<compile_context>
chip_gen: v5e
topology: v5e:2x2
jax: 0.10.0
libtpu: 0.0.40
codegen_flags: <defaults>
</compile_context>

<pallas_src>
import functools

import jax
import jax.numpy as jnp
from jax import lax
from jax.experimental import pallas as pl
from jax.experimental.pallas import tpu as pltpu


def _decom_fused_kernel(x_ref, w1_ref, b1_ref, w2_ref, b2_ref, w3_ref, b3_ref,
                        w4_ref, b4_ref, r_ref, l_ref, *, H, W, TH):
    """Fused 4-layer 3x3 conv stack for one (batch, H-tile) grid step.

    x_ref : (1, H+8, W+2, 3)   bf16, whole zero-padded image of this batch elem
    wX_ref: (9*Cin, Cout)      bf16, 3x3 taps flattened as (dy, dx, cin)
    bX_ref: (1, 1, Cout)       f32
    r_ref : (1, TH, W, 3)      f32
    l_ref : (1, TH, W, 1)      f32
    """
    i = pl.program_id(1)
    h0 = i * TH  # first output row of this tile

    def conv(inp, w_ref, b_ref, rows, leaky):
        # inp: (rows+2, W+2, cin) bf16 with correct (zero) halos already in place.
        # Single matmul with K = 9*cin: concat the 9 shifted taps on the channel
        # axis (im2col) and contract against the (9*cin, cout) weight matrix.
        taps = []
        for dy in range(3):
            for dx in range(3):
                taps.append(inp[dy:dy + rows, dx:dx + W, :])
        patches = jnp.concatenate(taps, axis=-1)               # (rows, W, 9*cin) bf16
        acc = jnp.einsum("rwk,kc->rwc", patches, w_ref[...],
                         preferred_element_type=jnp.float32)   # (rows, W, cout) f32
        acc = acc + b_ref[...]                                 # (1,1,cout) broadcast
        if leaky:
            acc = jnp.where(acc > 0, acc, 0.2 * acc)           # LeakyReLU(0.2)
        else:
            acc = jnp.maximum(acc, 0.0)                        # ReLU
        return acc

    def mask_rows(a, start):
        # Zero rows whose global index falls outside [0, H): this reproduces the
        # per-layer zero padding of the original network for the halo rows.
        rows, w = a.shape[0], a.shape[1]
        g = lax.broadcasted_iota(jnp.int32, (rows, w, 1), 0) + start
        ok = jnp.logical_and(g >= 0, g < H)
        return jnp.where(ok, a, 0.0)

    def pad_w(a):
        # Zero-pad 1 column on each side (the per-layer width padding).
        z = jnp.zeros((a.shape[0], 1, a.shape[2]), a.dtype)
        return jnp.concatenate([z, a, z], axis=1)

    # ---- layer 1: activations on global rows [h0-3, h0+TH+3) --------------
    # Needs padded-input rows [h0-4, h0+TH+4) -> padded indices [h0, h0+TH+8).
    xin = x_ref[0, pl.ds(h0, TH + 8), :, :]                    # (TH+8, W+2, 3) bf16
    a1 = conv(xin, w1_ref, b1_ref, TH + 6, leaky=True)         # (TH+6, W, 32) f32
    a1 = pad_w(mask_rows(a1, h0 - 3).astype(jnp.bfloat16))     # (TH+6, W+2, 32)

    # ---- layer 2: rows [h0-2, h0+TH+2) -------------------------------------
    a2 = conv(a1, w2_ref, b2_ref, TH + 4, leaky=True)
    a2 = pad_w(mask_rows(a2, h0 - 2).astype(jnp.bfloat16))     # (TH+4, W+2, 32)

    # ---- layer 3: rows [h0-1, h0+TH+1) -------------------------------------
    a3 = conv(a2, w3_ref, b3_ref, TH + 2, leaky=True)
    a3 = pad_w(mask_rows(a3, h0 - 1).astype(jnp.bfloat16))     # (TH+2, W+2, 32)

    # ---- layer 4 (+ ReLU) and the R/L split --------------------------------
    a4 = conv(a3, w4_ref, b4_ref, TH, leaky=False)             # (TH, W, 4) f32
    r_ref[0] = a4[:, :, 0:3].astype(r_ref.dtype)
    l_ref[0] = a4[:, :, 3:4].astype(l_ref.dtype)


def _pick_tile_rows(H, W, target_pixels=4096):
    """Largest divisor TH of H with TH * W <= target_pixels (bounds VMEM use)."""
    best = 1
    for th in range(1, H + 1):
        if H % th == 0 and th * W <= target_pixels:
            best = th
    return best


def _fused_decom(x_pad_nhwc, flat_params, *, N, H, W):
    (w1, b1), (w2, b2), (w3, b3), (w4, b4) = flat_params
    TH = _pick_tile_rows(H, W)
    n_tiles = H // TH

    kernel = functools.partial(_decom_fused_kernel, H=H, W=W, TH=TH)

    def zero2(n, i):
        return (0, 0)

    def zero3(n, i):
        return (0, 0, 0)

    r, l = pl.pallas_call(
        kernel,
        out_shape=(
            jax.ShapeDtypeStruct((N, H, W, 3), jnp.float32),
            jax.ShapeDtypeStruct((N, H, W, 1), jnp.float32),
        ),
        grid_spec=pltpu.PrefetchScalarGridSpec(
            num_scalar_prefetch=0,
            grid=(N, n_tiles),
            in_specs=[
                # Whole padded image per batch element; block index only depends
                # on n, so it is DMA'd once per batch element (inner h-tile axis
                # reuses the resident block).
                pl.BlockSpec((1, H + 8, W + 2, 3), lambda n, i: (n, 0, 0, 0)),
                pl.BlockSpec(w1.shape, zero2), pl.BlockSpec(b1.shape, zero3),
                pl.BlockSpec(w2.shape, zero2), pl.BlockSpec(b2.shape, zero3),
                pl.BlockSpec(w3.shape, zero2), pl.BlockSpec(b3.shape, zero3),
                pl.BlockSpec(w4.shape, zero2), pl.BlockSpec(b4.shape, zero3),
            ],
            out_specs=[
                pl.BlockSpec((1, TH, W, 3), lambda n, i: (n, i, 0, 0)),
                pl.BlockSpec((1, TH, W, 1), lambda n, i: (n, i, 0, 0)),
            ],
        ),
        compiler_params=pltpu.CompilerParams(
            dimension_semantics=("parallel", "parallel"),
            vmem_limit_bytes=64 * 1024 * 1024,
        ),
    )(x_pad_nhwc, w1, b1, w2, b2, w3, b3, w4, b4)
    return r, l


def init_decom_params(key):
    """Synthetic params matching nn.Conv2d(in, out, 3, 1, 1) shapes (HWIO + bias)."""
    layer_dims = [(3, 32), (32, 32), (32, 32), (32, 4)]
    params = []
    for i, (cin, cout) in enumerate(layer_dims):
        kw, kb = jax.random.split(jax.random.fold_in(key, i))
        fan_in = cin * 9
        bound = 1.0 / jnp.sqrt(fan_in)
        w = jax.random.uniform(kw, (3, 3, cin, cout), jnp.float32, -bound, bound)
        b = jax.random.uniform(kb, (cout,), jnp.float32, -bound, bound)
        params.append((w, b))
    return params


@jax.jit
def decom_forward(x_nchw, params):
    """Decom forward. Input (N,3,H,W) f32 -> (R:(N,3,H,W), L:(N,1,H,W)) f32."""
    N, _, H, W = x_nchw.shape

    # NCHW -> NHWC, cast matmul operand to bf16, pad ONCE:
    # 4 halo rows (one per fused conv layer) and 1 halo column (layer widths are
    # kept full inside the kernel; deeper layers' column halos are rebuilt there).
    x = jnp.transpose(x_nchw, (0, 2, 3, 1)).astype(jnp.bfloat16)
    x_pad = jnp.pad(x, ((0, 0), (4, 4), (1, 1), (0, 0)))

    # Flatten 3x3 taps to a (9*Cin, Cout) bf16 matmul weight; bias as f32 (1,1,Cout).
    flat_params = []
    for w, b in params:
        cin, cout = w.shape[2], w.shape[3]
        flat_params.append((
            w.reshape(9 * cin, cout).astype(jnp.bfloat16),
            b.reshape(1, 1, cout).astype(jnp.float32),
        ))

    r_nhwc, l_nhwc = _fused_decom(x_pad, flat_params, N=N, H=H, W=W)

    R = jnp.transpose(r_nhwc, (0, 3, 1, 2))   # (N, 3, H, W)
    L = jnp.transpose(l_nhwc, (0, 3, 1, 2))   # (N, 1, H, W)
    return R, L


if __name__ == "__main__":
    key = jax.random.PRNGKey(0)
    k_x, k_p = jax.random.split(key)

    # Small deterministic example input: batch=2, channels=3 (RGB), 16x16 spatial.
    x = jax.random.uniform(k_x, (2, 3, 16, 16), jnp.float32)
    params = init_decom_params(k_p)

    R, L = decom_forward(x, params)
    jax.block_until_ready((R, L))

    assert R.shape == (2, 3, 16, 16), R.shape
    assert L.shape == (2, 1, 16, 16), L.shape
    assert bool(jnp.all(jnp.isfinite(R))) and bool(jnp.all(jnp.isfinite(L)))
    assert bool(jnp.all(L >= 0.0))  # final ReLU
    print("KERNEL_OK")
</pallas_src>

<mosaic_0001>
module attributes {stable_mosaic.version = 11 : i64} {
  func.func @_decom_fused_kernel(%arg0: i32, %arg1: i32, %arg2: memref<1x24x18x3xbf16, #tpu.memory_space<vmem>>, %arg3: memref<27x32xbf16, #tpu.memory_space<vmem>>, %arg4: memref<1x1x32xf32, #tpu.memory_space<vmem>>, %arg5: memref<288x32xbf16, #tpu.memory_space<vmem>>, %arg6: memref<1x1x32xf32, #tpu.memory_space<vmem>>, %arg7: memref<288x32xbf16, #tpu.memory_space<vmem>>, %arg8: memref<1x1x32xf32, #tpu.memory_space<vmem>>, %arg9: memref<288x4xbf16, #tpu.memory_space<vmem>>, %arg10: memref<1x1x4xf32, #tpu.memory_space<vmem>>, %arg11: memref<1x16x16x3xf32, #tpu.memory_space<vmem>>, %arg12: memref<1x16x16x1xf32, #tpu.memory_space<vmem>>) attributes {dimension_semantics = [#tpu.dimension_semantics<parallel>, #tpu.dimension_semantics<parallel>], iteration_bounds = array<i64: 2, 1>, scalar_prefetch = 0 : i64, scratch_operands = 0 : i64, tpu.core_type = #tpu.core_type<tc>, window_params = [{transform_indices = @transform_0, window_bounds = array<i64: 1, 24, 18, 3>}, {pipeline_mode = #tpu.pipeline_mode<synchronous>, transform_indices = @transform_1, window_bounds = array<i64: 27, 32>}, {pipeline_mode = #tpu.pipeline_mode<synchronous>, transform_indices = @transform_2, window_bounds = array<i64: 1, 1, 32>}, {pipeline_mode = #tpu.pipeline_mode<synchronous>, transform_indices = @transform_3, window_bounds = array<i64: 288, 32>}, {pipeline_mode = #tpu.pipeline_mode<synchronous>, transform_indices = @transform_4, window_bounds = array<i64: 1, 1, 32>}, {pipeline_mode = #tpu.pipeline_mode<synchronous>, transform_indices = @transform_5, window_bounds = array<i64: 288, 32>}, {pipeline_mode = #tpu.pipeline_mode<synchronous>, transform_indices = @transform_6, window_bounds = array<i64: 1, 1, 32>}, {pipeline_mode = #tpu.pipeline_mode<synchronous>, transform_indices = @transform_7, window_bounds = array<i64: 288, 4>}, {pipeline_mode = #tpu.pipeline_mode<synchronous>, transform_indices = @transform_8, window_bounds = array<i64: 1, 1, 4>}, {transform_indices = @transform_9, window_bounds = array<i64: 1, 16, 16, 3>}, {transform_indices = @transform_10, window_bounds = array<i64: 1, 16, 16, 1>}]} {
    %c16_i32 = arith.constant 16 : i32
    %0 = arith.muli %arg1, %c16_i32 : i32
    %c0 = arith.constant 0 : index
    %1 = arith.index_cast %0 : i32 to index
    %c0_0 = arith.constant 0 : index
    %c0_1 = arith.constant 0 : index
    %2 = vector.load %arg2[%c0, %1, %c0_0, %c0_1] : memref<1x24x18x3xbf16, #tpu.memory_space<vmem>>, vector<1x24x18x3xbf16>
    %3 = vector.shape_cast %2 : vector<1x24x18x3xbf16> to vector<24x18x3xbf16>
    %4 = vector.extract_strided_slice %3 {offsets = [0, 0, 0], sizes = [22, 16, 3], strides = [1, 1, 1]} : vector<24x18x3xbf16> to vector<22x16x3xbf16>
    %5 = vector.extract_strided_slice %3 {offsets = [0, 1, 0], sizes = [22, 16, 3], strides = [1, 1, 1]} : vector<24x18x3xbf16> to vector<22x16x3xbf16>
    %6 = vector.extract_strided_slice %3 {offsets = [0, 2, 0], sizes = [22, 16, 3], strides = [1, 1, 1]} : vector<24x18x3xbf16> to vector<22x16x3xbf16>
    %7 = vector.extract_strided_slice %3 {offsets = [1, 0, 0], sizes = [22, 16, 3], strides = [1, 1, 1]} : vector<24x18x3xbf16> to vector<22x16x3xbf16>
    %8 = vector.extract_strided_slice %3 {offsets = [1, 1, 0], sizes = [22, 16, 3], strides = [1, 1, 1]} : vector<24x18x3xbf16> to vector<22x16x3xbf16>
    %9 = vector.extract_strided_slice %3 {offsets = [1, 2, 0], sizes = [22, 16, 3], strides = [1, 1, 1]} : vector<24x18x3xbf16> to vector<22x16x3xbf16>
    %10 = vector.extract_strided_slice %3 {offsets = [2, 0, 0], sizes = [22, 16, 3], strides = [1, 1, 1]} : vector<24x18x3xbf16> to vector<22x16x3xbf16>
    %11 = vector.extract_strided_slice %3 {offsets = [2, 1, 0], sizes = [22, 16, 3], strides = [1, 1, 1]} : vector<24x18x3xbf16> to vector<22x16x3xbf16>
    %12 = vector.extract_strided_slice %3 {offsets = [2, 2, 0], sizes = [22, 16, 3], strides = [1, 1, 1]} : vector<24x18x3xbf16> to vector<22x16x3xbf16>
    %13 = tpu.concatenate %4, %5, %6, %7, %8, %9, %10, %11, %12 in 2 : vector<22x16x3xbf16>, vector<22x16x3xbf16>, vector<22x16x3xbf16>, vector<22x16x3xbf16>, vector<22x16x3xbf16>, vector<22x16x3xbf16>, vector<22x16x3xbf16>, vector<22x16x3xbf16>, vector<22x16x3xbf16> -> vector<22x16x27xbf16>
    %c0_2 = arith.constant 0 : index
    %c0_3 = arith.constant 0 : index
    %14 = vector.load %arg3[%c0_2, %c0_3] : memref<27x32xbf16, #tpu.memory_space<vmem>>, vector<27x32xbf16>
    "tpu.trace_start"() <{level = 10 : i32, message = "rwk,kc->rwc"}> : () -> ()
    %cst = arith.constant dense<0.000000e+00> : vector<22x16x32xf32>
    %15 = tpu.matmul %13, %14, %cst {dimension_numbers = #tpu.dot_dimension_numbers<[2], [0], [0, 1], [1], [0, 0, 0, 1, 1, 1], [], []>} : vector<22x16x27xbf16>, vector<27x32xbf16>, vector<22x16x32xf32> -> vector<22x16x32xf32>
    "tpu.trace_stop"() : () -> ()
    %c0_4 = arith.constant 0 : index
    %c0_5 = arith.constant 0 : index
    %c0_6 = arith.constant 0 : index
    %16 = vector.load %arg4[%c0_4, %c0_5, %c0_6] : memref<1x1x32xf32, #tpu.memory_space<vmem>>, vector<1x1x32xf32>
    %17 = vector.broadcast %16 : vector<1x1x32xf32> to vector<22x16x32xf32>
    %18 = arith.addf %15, %17 : vector<22x16x32xf32>
    %cst_7 = arith.constant 0.000000e+00 : f32
    %19 = vector.broadcast %cst_7 : f32 to vector<22x16x32xf32>
    %20 = arith.cmpf ogt, %18, %19 : vector<22x16x32xf32>
    %cst_8 = arith.constant 2.000000e-01 : f32
    %21 = vector.broadcast %cst_8 : f32 to vector<22x16x32xf32>
    %22 = arith.mulf %21, %18 : vector<22x16x32xf32>
    %23 = arith.select %20, %18, %22 : vector<22x16x32xi1>, vector<22x16x32xf32>
    %c3_i32 = arith.constant 3 : i32
    %24 = arith.subi %0, %c3_i32 : i32
    %25 = tpu.iota {dimensions = array<i32: 0>} : vector<22x16x1xi32>
    %26 = vector.broadcast %24 : i32 to vector<22x16x1xi32>
    %27 = arith.addi %25, %26 : vector<22x16x1xi32>
    %c0_i32 = arith.constant 0 : i32
    %28 = vector.broadcast %c0_i32 : i32 to vector<22x16x1xi32>
    %29 = arith.cmpi sge, %27, %28 : vector<22x16x1xi32>
    %c16_i32_9 = arith.constant 16 : i32
    %30 = vector.broadcast %c16_i32_9 : i32 to vector<22x16x1xi32>
    %31 = arith.cmpi slt, %27, %30 : vector<22x16x1xi32>
    %32 = arith.andi %29, %31 : vector<22x16x1xi1>
    %cst_10 = arith.constant 0.000000e+00 : f32
    %33 = vector.shape_cast %32 : vector<22x16x1xi1> to vector<22x16x1xi1>
    %34 = vector.broadcast %33 : vector<22x16x1xi1> to vector<22x16x32xi1>
    %35 = vector.broadcast %cst_10 : f32 to vector<22x16x32xf32>
    %36 = arith.select %34, %23, %35 : vector<22x16x32xi1>, vector<22x16x32xf32>
    %37 = arith.truncf %36 : vector<22x16x32xf32> to vector<22x16x32xbf16>
    %cst_11 = arith.constant 0.000000e+00 : bf16
    %38 = vector.broadcast %cst_11 : bf16 to vector<22x1x32xbf16>
    %39 = tpu.concatenate %38, %37, %38 in 1 : vector<22x1x32xbf16>, vector<22x16x32xbf16>, vector<22x1x32xbf16> -> vector<22x18x32xbf16>
    %40 = vector.extract_strided_slice %39 {offsets = [0, 0, 0], sizes = [20, 16, 32], strides = [1, 1, 1]} : vector<22x18x32xbf16> to vector<20x16x32xbf16>
    %41 = vector.extract_strided_slice %39 {offsets = [0, 1, 0], sizes = [20, 16, 32], strides = [1, 1, 1]} : vector<22x18x32xbf16> to vector<20x16x32xbf16>
    %42 = vector.extract_strided_slice %39 {offsets = [0, 2, 0], sizes = [20, 16, 32], strides = [1, 1, 1]} : vector<22x18x32xbf16> to vector<20x16x32xbf16>
    %43 = vector.extract_strided_slice %39 {offsets = [1, 0, 0], sizes = [20, 16, 32], strides = [1, 1, 1]} : vector<22x18x32xbf16> to vector<20x16x32xbf16>
    %44 = vector.extract_strided_slice %39 {offsets = [1, 1, 0], sizes = [20, 16, 32], strides = [1, 1, 1]} : vector<22x18x32xbf16> to vector<20x16x32xbf16>
    %45 = vector.extract_strided_slice %39 {offsets = [1, 2, 0], sizes = [20, 16, 32], strides = [1, 1, 1]} : vector<22x18x32xbf16> to vector<20x16x32xbf16>
    %46 = vector.extract_strided_slice %39 {offsets = [2, 0, 0], sizes = [20, 16, 32], strides = [1, 1, 1]} : vector<22x18x32xbf16> to vector<20x16x32xbf16>
    %47 = vector.extract_strided_slice %39 {offsets = [2, 1, 0], sizes = [20, 16, 32], strides = [1, 1, 1]} : vector<22x18x32xbf16> to vector<20x16x32xbf16>
    %48 = vector.extract_strided_slice %39 {offsets = [2, 2, 0], sizes = [20, 16, 32], strides = [1, 1, 1]} : vector<22x18x32xbf16> to vector<20x16x32xbf16>
    %49 = tpu.concatenate %40, %41, %42, %43, %44, %45, %46, %47, %48 in 2 : vector<20x16x32xbf16>, vector<20x16x32xbf16>, vector<20x16x32xbf16>, vector<20x16x32xbf16>, vector<20x16x32xbf16>, vector<20x16x32xbf16>, vector<20x16x32xbf16>, vector<20x16x32xbf16>, vector<20x16x32xbf16> -> vector<20x16x288xbf16>
    %c0_12 = arith.constant 0 : index
    %c0_13 = arith.constant 0 : index
    %50 = vector.load %arg5[%c0_12, %c0_13] : memref<288x32xbf16, #tpu.memory_space<vmem>>, vector<288x32xbf16>
    "tpu.trace_start"() <{level = 10 : i32, message = "rwk,kc->rwc"}> : () -> ()
    %cst_14 = arith.constant dense<0.000000e+00> : vector<20x16x32xf32>
    %51 = tpu.matmul %49, %50, %cst_14 {dimension_numbers = #tpu.dot_dimension_numbers<[2], [0], [0, 1], [1], [0, 0, 0, 1, 1, 1], [], []>} : vector<20x16x288xbf16>, vector<288x32xbf16>, vector<20x16x32xf32> -> vector<20x16x32xf32>
    "tpu.trace_stop"() : () -> ()
    %c0_15 = arith.constant 0 : index
    %c0_16 = arith.constant 0 : index
    %c0_17 = arith.constant 0 : index
    %52 = vector.load %arg6[%c0_15, %c0_16, %c0_17] : memref<1x1x32xf32, #tpu.memory_space<vmem>>, vector<1x1x32xf32>
    %53 = vector.broadcast %52 : vector<1x1x32xf32> to vector<20x16x32xf32>
    %54 = arith.addf %51, %53 : vector<20x16x32xf32>
    %cst_18 = arith.constant 0.000000e+00 : f32
    %55 = vector.broadcast %cst_18 : f32 to vector<20x16x32xf32>
    %56 = arith.cmpf ogt, %54, %55 : vector<20x16x32xf32>
    %cst_19 = arith.constant 2.000000e-01 : f32
    %57 = vector.broadcast %cst_19 : f32 to vector<20x16x32xf32>
    %58 = arith.mulf %57, %54 : vector<20x16x32xf32>
    %59 = arith.select %56, %54, %58 : vector<20x16x32xi1>, vector<20x16x32xf32>
    %c2_i32 = arith.constant 2 : i32
    %60 = arith.subi %0, %c2_i32 : i32
    %61 = tpu.iota {dimensions = array<i32: 0>} : vector<20x16x1xi32>
    %62 = vector.broadcast %60 : i32 to vector<20x16x1xi32>
    %63 = arith.addi %61, %62 : vector<20x16x1xi32>
    %c0_i32_20 = arith.constant 0 : i32
    %64 = vector.broadcast %c0_i32_20 : i32 to vector<20x16x1xi32>
    %65 = arith.cmpi sge, %63, %64 : vector<20x16x1xi32>
    %c16_i32_21 = arith.constant 16 : i32
    %66 = vector.broadcast %c16_i32_21 : i32 to vector<20x16x1xi32>
    %67 = arith.cmpi slt, %63, %66 : vector<20x16x1xi32>
    %68 = arith.andi %65, %67 : vector<20x16x1xi1>
    %cst_22 = arith.constant 0.000000e+00 : f32
    %69 = vector.shape_cast %68 : vector<20x16x1xi1> to vector<20x16x1xi1>
    %70 = vector.broadcast %69 : vector<20x16x1xi1> to vector<20x16x32xi1>
    %71 = vector.broadcast %cst_22 : f32 to vector<20x16x32xf32>
    %72 = arith.select %70, %59, %71 : vector<20x16x32xi1>, vector<20x16x32xf32>
    %73 = arith.truncf %72 : vector<20x16x32xf32> to vector<20x16x32xbf16>
    %cst_23 = arith.constant 0.000000e+00 : bf16
    %74 = vector.broadcast %cst_23 : bf16 to vector<20x1x32xbf16>
    %75 = tpu.concatenate %74, %73, %74 in 1 : vector<20x1x32xbf16>, vector<20x16x32xbf16>, vector<20x1x32xbf16> -> vector<20x18x32xbf16>
    %76 = vector.extract_strided_slice %75 {offsets = [0, 0, 0], sizes = [18, 16, 32], strides = [1, 1, 1]} : vector<20x18x32xbf16> to vector<18x16x32xbf16>
    %77 = vector.extract_strided_slice %75 {offsets = [0, 1, 0], sizes = [18, 16, 32], strides = [1, 1, 1]} : vector<20x18x32xbf16> to vector<18x16x32xbf16>
    %78 = vector.extract_strided_slice %75 {offsets = [0, 2, 0], sizes = [18, 16, 32], strides = [1, 1, 1]} : vector<20x18x32xbf16> to vector<18x16x32xbf16>
    %79 = vector.extract_strided_slice %75 {offsets = [1, 0, 0], sizes = [18, 16, 32], strides = [1, 1, 1]} : vector<20x18x32xbf16> to vector<18x16x32xbf16>
    %80 = vector.extract_strided_slice %75 {offsets = [1, 1, 0], sizes = [18, 16, 32], strides = [1, 1, 1]} : vector<20x18x32xbf16> to vector<18x16x32xbf16>
    %81 = vector.extract_strided_slice %75 {offsets = [1, 2, 0], sizes = [18, 16, 32], strides = [1, 1, 1]} : vector<20x18x32xbf16> to vector<18x16x32xbf16>
    %82 = vector.extract_strided_slice %75 {offsets = [2, 0, 0], sizes = [18, 16, 32], strides = [1, 1, 1]} : vector<20x18x32xbf16> to vector<18x16x32xbf16>
    %83 = vector.extract_strided_slice %75 {offsets = [2, 1, 0], sizes = [18, 16, 32], strides = [1, 1, 1]} : vector<20x18x32xbf16> to vector<18x16x32xbf16>
    %84 = vector.extract_strided_slice %75 {offsets = [2, 2, 0], sizes = [18, 16, 32], strides = [1, 1, 1]} : vector<20x18x32xbf16> to vector<18x16x32xbf16>
    %85 = tpu.concatenate %76, %77, %78, %79, %80, %81, %82, %83, %84 in 2 : vector<18x16x32xbf16>, vector<18x16x32xbf16>, vector<18x16x32xbf16>, vector<18x16x32xbf16>, vector<18x16x32xbf16>, vector<18x16x32xbf16>, vector<18x16x32xbf16>, vector<18x16x32xbf16>, vector<18x16x32xbf16> -> vector<18x16x288xbf16>
    %c0_24 = arith.constant 0 : index
    %c0_25 = arith.constant 0 : index
    %86 = vector.load %arg7[%c0_24, %c0_25] : memref<288x32xbf16, #tpu.memory_space<vmem>>, vector<288x32xbf16>
    "tpu.trace_start"() <{level = 10 : i32, message = "rwk,kc->rwc"}> : () -> ()
    %cst_26 = arith.constant dense<0.000000e+00> : vector<18x16x32xf32>
    %87 = tpu.matmul %85, %86, %cst_26 {dimension_numbers = #tpu.dot_dimension_numbers<[2], [0], [0, 1], [1], [0, 0, 0, 1, 1, 1], [], []>} : vector<18x16x288xbf16>, vector<288x32xbf16>, vector<18x16x32xf32> -> vector<18x16x32xf32>
    "tpu.trace_stop"() : () -> ()
    %c0_27 = arith.constant 0 : index
    %c0_28 = arith.constant 0 : index
    %c0_29 = arith.constant 0 : index
    %88 = vector.load %arg8[%c0_27, %c0_28, %c0_29] : memref<1x1x32xf32, #tpu.memory_space<vmem>>, vector<1x1x32xf32>
    %89 = vector.broadcast %88 : vector<1x1x32xf32> to vector<18x16x32xf32>
    %90 = arith.addf %87, %89 : vector<18x16x32xf32>
    %cst_30 = arith.constant 0.000000e+00 : f32
    %91 = vector.broadcast %cst_30 : f32 to vector<18x16x32xf32>
    %92 = arith.cmpf ogt, %90, %91 : vector<18x16x32xf32>
    %cst_31 = arith.constant 2.000000e-01 : f32
    %93 = vector.broadcast %cst_31 : f32 to vector<18x16x32xf32>
    %94 = arith.mulf %93, %90 : vector<18x16x32xf32>
    %95 = arith.select %92, %90, %94 : vector<18x16x32xi1>, vector<18x16x32xf32>
    %c1_i32 = arith.constant 1 : i32
    %96 = arith.subi %0, %c1_i32 : i32
    %97 = tpu.iota {dimensions = array<i32: 0>} : vector<18x16x1xi32>
    %98 = vector.broadcast %96 : i32 to vector<18x16x1xi32>
    %99 = arith.addi %97, %98 : vector<18x16x1xi32>
    %c0_i32_32 = arith.constant 0 : i32
    %100 = vector.broadcast %c0_i32_32 : i32 to vector<18x16x1xi32>
    %101 = arith.cmpi sge, %99, %100 : vector<18x16x1xi32>
    %c16_i32_33 = arith.constant 16 : i32
    %102 = vector.broadcast %c16_i32_33 : i32 to vector<18x16x1xi32>
    %103 = arith.cmpi slt, %99, %102 : vector<18x16x1xi32>
    %104 = arith.andi %101, %103 : vector<18x16x1xi1>
    %cst_34 = arith.constant 0.000000e+00 : f32
    %105 = vector.shape_cast %104 : vector<18x16x1xi1> to vector<18x16x1xi1>
    %106 = vector.broadcast %105 : vector<18x16x1xi1> to vector<18x16x32xi1>
    %107 = vector.broadcast %cst_34 : f32 to vector<18x16x32xf32>
    %108 = arith.select %106, %95, %107 : vector<18x16x32xi1>, vector<18x16x32xf32>
    %109 = arith.truncf %108 : vector<18x16x32xf32> to vector<18x16x32xbf16>
    %cst_35 = arith.constant 0.000000e+00 : bf16
    %110 = vector.broadcast %cst_35 : bf16 to vector<18x1x32xbf16>
    %111 = tpu.concatenate %110, %109, %110 in 1 : vector<18x1x32xbf16>, vector<18x16x32xbf16>, vector<18x1x32xbf16> -> vector<18x18x32xbf16>
    %112 = vector.extract_strided_slice %111 {offsets = [0, 0, 0], sizes = [16, 16, 32], strides = [1, 1, 1]} : vector<18x18x32xbf16> to vector<16x16x32xbf16>
    %113 = vector.extract_strided_slice %111 {offsets = [0, 1, 0], sizes = [16, 16, 32], strides = [1, 1, 1]} : vector<18x18x32xbf16> to vector<16x16x32xbf16>
    %114 = vector.extract_strided_slice %111 {offsets = [0, 2, 0], sizes = [16, 16, 32], strides = [1, 1, 1]} : vector<18x18x32xbf16> to vector<16x16x32xbf16>
    %115 = vector.extract_strided_slice %111 {offsets = [1, 0, 0], sizes = [16, 16, 32], strides = [1, 1, 1]} : vector<18x18x32xbf16> to vector<16x16x32xbf16>
    %116 = vector.extract_strided_slice %111 {offsets = [1, 1, 0], sizes = [16, 16, 32], strides = [1, 1, 1]} : vector<18x18x32xbf16> to vector<16x16x32xbf16>
    %117 = vector.extract_strided_slice %111 {offsets = [1, 2, 0], sizes = [16, 16, 32], strides = [1, 1, 1]} : vector<18x18x32xbf16> to vector<16x16x32xbf16>
    %118 = vector.extract_strided_slice %111 {offsets = [2, 0, 0], sizes = [16, 16, 32], strides = [1, 1, 1]} : vector<18x18x32xbf16> to vector<16x16x32xbf16>
    %119 = vector.extract_strided_slice %111 {offsets = [2, 1, 0], sizes = [16, 16, 32], strides = [1, 1, 1]} : vector<18x18x32xbf16> to vector<16x16x32xbf16>
    %120 = vector.extract_strided_slice %111 {offsets = [2, 2, 0], sizes = [16, 16, 32], strides = [1, 1, 1]} : vector<18x18x32xbf16> to vector<16x16x32xbf16>
    %121 = tpu.concatenate %112, %113, %114, %115, %116, %117, %118, %119, %120 in 2 : vector<16x16x32xbf16>, vector<16x16x32xbf16>, vector<16x16x32xbf16>, vector<16x16x32xbf16>, vector<16x16x32xbf16>, vector<16x16x32xbf16>, vector<16x16x32xbf16>, vector<16x16x32xbf16>, vector<16x16x32xbf16> -> vector<16x16x288xbf16>
    %c0_36 = arith.constant 0 : index
    %c0_37 = arith.constant 0 : index
    %122 = vector.load %arg9[%c0_36, %c0_37] : memref<288x4xbf16, #tpu.memory_space<vmem>>, vector<288x4xbf16>
    "tpu.trace_start"() <{level = 10 : i32, message = "rwk,kc->rwc"}> : () -> ()
    %cst_38 = arith.constant dense<0.000000e+00> : vector<16x16x4xf32>
    %123 = tpu.matmul %121, %122, %cst_38 {dimension_numbers = #tpu.dot_dimension_numbers<[2], [0], [0, 1], [1], [0, 0, 0, 1, 1, 1], [], []>} : vector<16x16x288xbf16>, vector<288x4xbf16>, vector<16x16x4xf32> -> vector<16x16x4xf32>
    "tpu.trace_stop"() : () -> ()
    %c0_39 = arith.constant 0 : index
    %c0_40 = arith.constant 0 : index
    %c0_41 = arith.constant 0 : index
    %124 = vector.load %arg10[%c0_39, %c0_40, %c0_41] : memref<1x1x4xf32, #tpu.memory_space<vmem>>, vector<1x1x4xf32>
    %125 = vector.broadcast %124 : vector<1x1x4xf32> to vector<16x16x4xf32>
    %126 = arith.addf %123, %125 : vector<16x16x4xf32>
    %cst_42 = arith.constant 0.000000e+00 : f32
    %127 = vector.broadcast %cst_42 : f32 to vector<16x16x4xf32>
    %128 = arith.maximumf %126, %127 : vector<16x16x4xf32>
    %129 = vector.extract_strided_slice %128 {offsets = [0, 0, 0], sizes = [16, 16, 3], strides = [1, 1, 1]} : vector<16x16x4xf32> to vector<16x16x3xf32>
    %c0_43 = arith.constant 0 : index
    %c0_44 = arith.constant 0 : index
    %c0_45 = arith.constant 0 : index
    %c0_46 = arith.constant 0 : index
    %130 = vector.load %arg11[%c0_43, %c0_44, %c0_45, %c0_46] : memref<1x16x16x3xf32, #tpu.memory_space<vmem>>, vector<1x16x16x3xf32>
    %131 = vector.shape_cast %130 : vector<1x16x16x3xf32> to vector<16x16x3xf32>
    %132 = vector.shape_cast %129 : vector<16x16x3xf32> to vector<1x16x16x3xf32>
    tpu.vector_store %arg11[%c0_43, %c0_44, %c0_45, %c0_46], %132 {strides = array<i32>} : memref<1x16x16x3xf32, #tpu.memory_space<vmem>>, vector<1x16x16x3xf32>,
    %133 = vector.extract_strided_slice %128 {offsets = [0, 0, 3], sizes = [16, 16, 1], strides = [1, 1, 1]} : vector<16x16x4xf32> to vector<16x16x1xf32>
    %c0_47 = arith.constant 0 : index
    %c0_48 = arith.constant 0 : index
    %c0_49 = arith.constant 0 : index
    %c0_50 = arith.constant 0 : index
    %134 = vector.load %arg12[%c0_47, %c0_48, %c0_49, %c0_50] : memref<1x16x16x1xf32, #tpu.memory_space<vmem>>, vector<1x16x16x1xf32>
    %135 = vector.shape_cast %134 : vector<1x16x16x1xf32> to vector<16x16x1xf32>
    %136 = vector.shape_cast %133 : vector<16x16x1xf32> to vector<1x16x16x1xf32>
    tpu.vector_store %arg12[%c0_47, %c0_48, %c0_49, %c0_50], %136 {strides = array<i32>} : memref<1x16x16x1xf32, #tpu.memory_space<vmem>>, vector<1x16x16x1xf32>,
    return
  }
  func.func @transform_0(%arg0: i32, %arg1: i32) -> (i32, i32, i32, i32) {
    %c0_i32 = arith.constant 0 : i32
    %c0_i32_0 = arith.constant 0 : i32
    %c0_i32_1 = arith.constant 0 : i32
    %c0_i32_2 = arith.constant 0 : i32
    return %arg0, %c0_i32, %c0_i32_0, %c0_i32_1 : i32, i32, i32, i32
  }
  func.func @transform_1(%arg0: i32, %arg1: i32) -> (i32, i32) {
    %c0_i32 = arith.constant 0 : i32
    %c0_i32_0 = arith.constant 0 : i32
    %c0_i32_1 = arith.constant 0 : i32
    return %c0_i32, %c0_i32_0 : i32, i32
  }
  func.func @transform_2(%arg0: i32, %arg1: i32) -> (i32, i32, i32) {
    %c0_i32 = arith.constant 0 : i32
    %c0_i32_0 = arith.constant 0 : i32
    %c0_i32_1 = arith.constant 0 : i32
    %c0_i32_2 = arith.constant 0 : i32
    return %c0_i32, %c0_i32_0, %c0_i32_1 : i32, i32, i32
  }
  func.func @transform_3(%arg0: i32, %arg1: i32) -> (i32, i32) {
    %c0_i32 = arith.constant 0 : i32
    %c0_i32_0 = arith.constant 0 : i32
    %c0_i32_1 = arith.constant 0 : i32
    return %c0_i32, %c0_i32_0 : i32, i32
  }
  func.func @transform_4(%arg0: i32, %arg1: i32) -> (i32, i32, i32) {
    %c0_i32 = arith.constant 0 : i32
    %c0_i32_0 = arith.constant 0 : i32
    %c0_i32_1 = arith.constant 0 : i32
    %c0_i32_2 = arith.constant 0 : i32
    return %c0_i32, %c0_i32_0, %c0_i32_1 : i32, i32, i32
  }
  func.func @transform_5(%arg0: i32, %arg1: i32) -> (i32, i32) {
    %c0_i32 = arith.constant 0 : i32
    %c0_i32_0 = arith.constant 0 : i32
    %c0_i32_1 = arith.constant 0 : i32
    return %c0_i32, %c0_i32_0 : i32, i32
  }
  func.func @transform_6(%arg0: i32, %arg1: i32) -> (i32, i32, i32) {
    %c0_i32 = arith.constant 0 : i32
    %c0_i32_0 = arith.constant 0 : i32
    %c0_i32_1 = arith.constant 0 : i32
    %c0_i32_2 = arith.constant 0 : i32
    return %c0_i32, %c0_i32_0, %c0_i32_1 : i32, i32, i32
  }
  func.func @transform_7(%arg0: i32, %arg1: i32) -> (i32, i32) {
    %c0_i32 = arith.constant 0 : i32
    %c0_i32_0 = arith.constant 0 : i32
    %c0_i32_1 = arith.constant 0 : i32
    return %c0_i32, %c0_i32_0 : i32, i32
  }
  func.func @transform_8(%arg0: i32, %arg1: i32) -> (i32, i32, i32) {
    %c0_i32 = arith.constant 0 : i32
    %c0_i32_0 = arith.constant 0 : i32
    %c0_i32_1 = arith.constant 0 : i32
    %c0_i32_2 = arith.constant 0 : i32
    return %c0_i32, %c0_i32_0, %c0_i32_1 : i32, i32, i32
  }
  func.func @transform_9(%arg0: i32, %arg1: i32) -> (i32, i32, i32, i32) {
    %c0_i32 = arith.constant 0 : i32
    %c0_i32_0 = arith.constant 0 : i32
    %c0_i32_1 = arith.constant 0 : i32
    return %arg0, %arg1, %c0_i32, %c0_i32_0 : i32, i32, i32, i32
  }
  func.func @transform_10(%arg0: i32, %arg1: i32) -> (i32, i32, i32, i32) {
    %c0_i32 = arith.constant 0 : i32
    %c0_i32_0 = arith.constant 0 : i32
    %c0_i32_1 = arith.constant 0 : i32
    return %arg0, %arg1, %c0_i32, %c0_i32_0 : i32, i32, i32, i32
  }
}

</mosaic_0001>

<bundles_post_ra>
// kernel: decom_forward.1
= control target key start
LH: loop header
LB: loop body
LE: loop exit
PB: predicated region body
PF: predicated region fallthrough
CT: control target
= control target key end

     0   :  { %s8857_s13 = smov 0   ;;  %s8859_s14 = smov 0   ;;  %s12763_s0 = inlined_call_operand.vmem [shape: bf16[2,24,18,3], index: 0, kind: input, shape index: {}]   ;;  %s12764_s1 = inlined_call_operand.vmem [shape: bf16[27,32], index: 1, kind: input, shape index: {}]   ;;  %s12765_s2 = inlined_call_operand.vmem [shape: f32[1,1,32], index: 2, kind: input, shape index: {}]   ;;  %s12766_s3 = inlined_call_operand.vmem [shape: bf16[288,32], index: 3, kind: input, shape index: {}]   ;;  %s12767_s4 = inlined_call_operand.vmem [shape: f32[1,1,32], index: 4, kind: input, shape index: {}]   ;;  %s12768_s5 = inlined_call_operand.vmem [shape: bf16[288,32], index: 5, kind: input, shape index: {}]   ;;  %s12769_s6 = inlined_call_operand.vmem [shape: f32[1,1,32], index: 6, kind: input, shape index: {}]   ;;  %s12770_s7 = inlined_call_operand.vmem [shape: bf16[288,4], index: 7, kind: input, shape index: {}]   ;;  %s12771_s8 = inlined_call_operand.vmem [shape: f32[1,1,4], index: 8, kind: input, shape index: {}]   ;;  %s12772_s9 = inlined_call_operand.vmem [shape: f32[2,16,16,3], index: 9, kind: output, shape index: {0}]   ;;  %s12773_s10 = inlined_call_operand.vmem [shape: f32[2,16,16,1], index: 10, kind: output, shape index: {1}]  }
   0x1   :  { %s8861_s15 = smov 0  }
   0x2 LB: > { %s33_s16 = sadd.s32 1, %s8782_s14  ;;  %p8222_p0 = scmp.ge.s32.totalorder %s8786_s15, 1  ;;  %s8786_s15 = sphi %s8861_s15, %s21_s15   ;;  %s8782_s14 = sphi %s8859_s14, %s13026_s14   ;;  %s8778_s13 = sphi %s8857_s13, %s13025_s13  }
   0x3   : > { %p35_p1 = scmp.ge.s32.totalorder %s33_s16, 2  ;;  %p331_p2 = scmp.lt.s32.totalorder %s8786_s15, 3 }
   0x5   : > { %s13028_s16 = smov (%p35_p1, %s33_s16), 0  ;;  %p332_p3 = pnand %p8222_p0, %p331_p2 }
   0x7   : > { %335 = sbr.rel (%p332_p3) target bundleno = 2354 (0x932), region = 56 }
   0xc   : > { %p384_p4 = scmp.lt.s32.totalorder %s8778_s13, 1  ;;  %s8788_s21 = smov 9   ;;  %vm973_vm0 = vcmask 1046528   ;;  %vm664_vm1 = vsmask.f32 7424  ;;  %vm1818_vm2 = vcmask 1044480  }
   0xd   : > { %s8789_s22 = smov 18   ;;  %s8790_s23 = smov 6   ;;  %vm1819_vm3 = vcmask 1045504   ;;  %vm1394_vm4 = vcmask 23552   ;;  %vm12775_vm5 = vcmask 48128   ;;  %vm1484_vm6 = vcmask 72704  }
   0xe   : > { %s13030_s13 = smov (!%p384_p4, %s8778_s13), 1  ;;  %s8791_s24 = smov 24   ;;  %vm1529_vm7 = vcmask 97280   ;;  %vm1574_vm8 = vcmask 121856   ;;  %vm1619_vm9 = vcmask 146432   ;;  %vm1664_vm10 = vcmask 171008  }
   0xf   : > { %s8712_s17 = smul.u32 288, %s13030_s13  ;;  %s8792_s25 = smov 15   ;;  %vm1709_vm11 = vcmask 195584   ;;  %vm12776_vm12 = vcmask 220160   ;;  %vm2605_vm13 = vcmask 1040384  }
  0x10   : > { %s8793_s26 = smov 3   ;;  %s8794_s27 = smov 12   ;;  %vm2606_vm14 = vsmask.f32 256 }
  0x11   : > { %s8881_s20 = scalar_lea.vmem %s12763_s0, %s8712_s17  ;;  %s8795_s28 = smov 21   ;;  %vm9371_vm15 = vmand %vm2605_vm13, %vm2606_vm14 }
  0x12   : > { %v8884_v0 = vld [vmem:[%s8881_s20 + $0xc] sm:$0xff]  ;;  %v8887_v1 = vld [vmem:[%s8881_s20 + $0x18] sm:$0xff]  ;;  %v8890_v2 = vld [vmem:[%s8881_s20] sm:$0xff]  ;;  %s8798_s19 = smov 96   ;;  %s8799_s29 = smov 64  }
  0x13   : > { %v418_v3 = vld [vmem:[%s8881_s20 + $0x8] sm:$0x1]  ;;  %v424_v4 = vld [vmem:[%s8881_s20 + $0x20] sm:$0x1]  ;;  %v421_v5 = vld [vmem:[%s8881_s20 + $0x14] sm:$0x1]  ;;  %1089 = vrot.lane.b32.xlu1 %v8884_v0, %s8788_s21 }
  0x14   : > { %1244 = vrot.lane.b32.xlu2 %v8887_v1, %s8789_s22  ;;  %v620_v6 = vunpack.c.l.b16 %v418_v3  ;;  %v622_v7 = vunpack.c.l.b16 %v424_v4  ;;  %v974_v8 = vrot.slane %v8890_v2, 1  ;;  %v621_v9 = vunpack.c.l.b16 %v421_v5  ;;  %v427_v34 = vld [vmem:[%s8881_s20 + $0x2c] sm:$0x1]  ;;  %v8918_v40 = vld [vmem:[%s8881_s20 + $0x24] sm:$0xff]  ;;  %v430_v53 = vld [vmem:[%s8881_s20 + $0x38] sm:$0x1] }
  0x15   : > { %v668_v10 = vshll.u32 %v8890_v2, 16  ;;  %v980_v13 = vrot.slane %v8887_v1, 1  ;;  %v680_v14 = vshll.u32 %v8884_v0, 16  ;;  %v977_v16 = vrot.slane %v8884_v0, 1  ;;  %v8937_v54 = vld [vmem:[%s8881_s20 + $0x30] sm:$0xff]  ;;  %s8800_s12 = smov 32  }
  0x16   : > { %v642_v11 = vpack.c.b16 %v620_v6, %v620_v6  ;;  %v644_v12 = vpack.c.b16 %v622_v7, %v622_v7  ;;  %v643_v15 = vpack.c.b16 %v621_v9, %v621_v9  ;;  %v666_v17 = vshrl.u32 %v8890_v2, 16  ;;  %v433_v9 = vld [vmem:[%s8881_s20 + $0x44] sm:$0x1]  ;;  %s8801_s30 = smov 125  }
  0x17   : > { %v670_v20 = vrot.slane %v668_v10, 1  ;;  %v678_v23 = vshrl.u32 %v8884_v0, 16  ;;  %v682_v24 = vrot.slane %v680_v14, 1  ;;  %v692_v31 = vshll.u32 %v8887_v1, 16 }
  0x18   : > { %v975_v18 = vrot.slane %v642_v11, 1  ;;  %v981_v19 = vrot.slane %v644_v12, 1  ;;  %v673_v21 = vshll.u32 %v642_v11, 16  ;;  %v978_v22 = vrot.slane %v643_v15, 1  ;;  %v8963_v11 = vld [vmem:[%s8881_s20 + $0x3c] sm:$0xff] }
  0x19   : > { %v685_v25 = vshll.u32 %v643_v15, 16  ;;  %v671_v29 = vor.u32 %v670_v20, %v666_v17  ;;  %v683_v32 = vor.u32 %v682_v24, %v678_v23  ;;  %v690_v36 = vshrl.u32 %v8887_v1, 16 }
  0x1a   : > { %v976_v26 = vsel %vm973_vm0, %v974_v8, %v975_v18  ;;  %v982_v27 = vsel %vm973_vm0, %v980_v13, %v981_v19  ;;  %v979_v28 = vsel %vm973_vm0, %v977_v16, %v978_v22  ;;  %v675_v30 = vrot.slane %v673_v21, 1  ;;  %v436_v16 = vld [vmem:[%s8881_s20 + $0x50] sm:$0x1]  ;;  %v8975_v21 = vld [vmem:[%s8881_s20 + $0x48] sm:$0xff] }
  0x1b   : > { %1040 = vrot.lane.b32.xlu0 %v976_v26, %s8790_s23  ;;  %1350 = vrot.lane.b32.xlu1 %v982_v27, %s8791_s24  ;;  %v687_v33 = vrot.slane %v685_v25, 1  ;;  %v694_v37 = vrot.slane %v692_v31, 1  ;;  %v697_v38 = vshll.u32 %v644_v12, 16  ;;  %v623_v41 = vunpack.c.l.b16 %v427_v34 }
  0x1c   : > { %1195 = vrot.lane.b32.xlu2 %v979_v28, %s8792_s25  ;;  %v676_v35 = vsel %vm664_vm1, %v671_v29, %v675_v30  ;;  %v704_v45 = vshll.u32 %v8918_v40, 16  ;;  %v702_v47 = vshrl.u32 %v8918_v40, 16  ;;  %v624_v55 = vunpack.c.l.b16 %v430_v53 }
  0x1d   : > { %v688_v39 = vsel %vm664_vm1, %v683_v32, %v687_v33  ;;  %v695_v42 = vor.u32 %v694_v37, %v690_v36  ;;  %v699_v43 = vrot.slane %v697_v38, 1  ;;  %v645_v44 = vpack.c.b16 %v623_v41, %v623_v41  ;;  %v8653_v36 = vld [vmem:[%s12764_s1 + $0x8] sm:$0x30] }
  0x1e   : > { %v706_v48 = vrot.slane %v704_v45, 1  ;;  %v983_v56 = vrot.slane %v8918_v40, 1  ;;  %v716_v58 = vshll.u32 %v8937_v54, 16  ;;  %v646_v59 = vpack.c.b16 %v624_v55, %v624_v55  ;;  %v9005_v45 = vld [vmem:[%s8881_s20 + $0x54] sm:$0xff] }
  0x1f   : > { %v700_v46 = vsel %vm664_vm1, %v695_v42, %v699_v43  ;;  %v709_v49 = vshll.u32 %v645_v44, 16  ;;  %v984_v57 = vrot.slane %v645_v44, 1  ;;  %v714_v61 = vshrl.u32 %v8937_v54, 16  ;;  %v439_v44 = vld [vmem:[%s8881_s20 + $0x5c] sm:$0x1] }
  0x20   : > { %v707_v50 = vor.u32 %v706_v48, %v702_v47  ;;  %v718_v62 = vrot.slane %v716_v58, 1  ;;  %v721_v63 = vshll.u32 %v646_v59, 16  ;;  %v986_v3 = vrot.slane %v8937_v54, 1  ;;  %v8652_v47 = vld [vmem:[%s12764_s1] sm:$0xff] }
  0x21   : > { %v711_v51 = vrot.slane %v709_v49, 1  ;;  %v985_v60 = vsel %vm973_vm0, %v983_v56, %v984_v57  ;;  %v987_v4 = vrot.slane %v646_v59, 1  ;;  %v625_v10 = vunpack.c.l.b16 %v433_v9 }
  0x22   : > { %v719_v5 = vor.u32 %v718_v62, %v714_v61  ;;  %v723_v6 = vrot.slane %v721_v63, 1  ;;  %v728_v13 = vshll.u32 %v8963_v11, 16  ;;  %v989_v14 = vrot.slane %v8963_v11, 1 }
  0x23   : > { %929 = vrot.lane.b32.xlu0 %v676_v35, %s8793_s26  ;;  %1148 = vrot.lane.b32.xlu1 %v688_v39, %s8794_s27  ;;  %v712_v52 = vsel %vm664_vm1, %v707_v50, %v711_v51  ;;  %v988_v7 = vsel %vm973_vm0, %v986_v3, %v987_v4  ;;  %v647_v12 = vpack.c.b16 %v625_v10, %v625_v10  ;;  %v726_v17 = vshrl.u32 %v8963_v11, 16  ;;  %v8330_v35 = vld [vmem:[%s12764_s1 + $0x8] sm:$0xf] }
  0x24   : > { %931 = vrot.lane.b32.xlu2 %v688_v39, %s8793_s26  ;;  %v724_v8 = vsel %vm664_vm1, %v719_v5, %v723_v6  ;;  %v730_v18 = vrot.slane %v728_v13, 1  ;;  %v626_v22 = vunpack.c.l.b16 %v436_v16  ;;  %v740_v26 = vshll.u32 %v8975_v21, 16 }
  0x25   : > { %v990_v15 = vrot.slane %v647_v12, 1  ;;  %v733_v19 = vshll.u32 %v647_v12, 16  ;;  %v8331_v37 = vor.u32 %v8653_v36, %v8330_v35  ;;  %v8796_v38 = vmov 65535   ;;  %v9073_v35 = vld [vmem:[%s8881_s20 + $0x6c] sm:$0xff] }
  0x26   : > { %v731_v23 = vor.u32 %v730_v18, %v726_v17  ;;  %v648_v25 = vpack.c.b16 %v626_v22, %v626_v22  ;;  %v742_v29 = vrot.slane %v740_v26, 1  ;;  %v1820_v39 = vsel %vm1818_vm2, 4294967295, %v8796_v38  ;;  %v9050_v17 = vld [vmem:[%s8881_s20 + $0x60] sm:$0xff] }
  0x27   : > { %v991_v20 = vsel %vm973_vm0, %v989_v14, %v990_v15  ;;  %v735_v24 = vrot.slane %v733_v19, 1  ;;  %v1821_v42 = vsel %vm1819_vm3, %v1820_v39, 0  ;;  %v992_v48 = vrot.slane %v8975_v21, 1 }
  0x28   : > { %v745_v30 = vshll.u32 %v648_v25, 16  ;;  %v1823_v43 = vand.u32 %v8331_v37, %v1821_v42  ;;  %v993_v49 = vrot.slane %v648_v25, 1  ;;  %v752_v50 = vshll.u32 %v9005_v45, 16 }
  0x29   : > { %v750_v55 = vshrl.u32 %v9005_v45, 16  ;;  %v995_v58 = vrot.slane %v9005_v45, 1 }
  0x2a   : > { %v747_v32 = vrot.slane %v745_v30, 1  ;;  %1831 = vmatpush.bf16.msra.mxu0 %v1823_v43  ;;  %8708 = vmatpush.bf16.msra.mxu1 %v1823_v43  ;;  %v994_v53 = vsel %vm973_vm0, %v992_v48, %v993_v49  ;;  %v754_v56 = vrot.slane %v752_v50, 1  ;;  %v776_v43 = vshll.u32 %v9073_v35, 16 }
  0x2b   : > { %1303 = vrot.lane.b32.xlu0 %v700_v46, %s8795_s28  ;;  %1091 = vrot.lane.b32.xlu1 %v8887_v1, %s8788_s21  ;;  %v774_v49 = vshrl.u32 %v9073_v35, 16 }
  0x2c   : > { %1150 = vrot.lane.b32.xlu2 %v700_v46, %s8794_s27  ;;  %v778_v50 = vrot.slane %v776_v43, 1 }
  0x2e   : > { %1832 = vmatpush.bf16.msra.mxu0 %v8652_v47  ;;  %8709 = vmatpush.bf16.msra.mxu1 %v8652_v47 }
  0x33   : > { %1042 = vrot.lane.b32.xlu0 %v979_v28, %s8790_s23  ;;  %1246 = vrot.lane.b32.xlu1 %v8918_v40, %s8789_s22  ;;  %v738_v28 = vshrl.u32 %v8975_v21, 16 }
  0x34   : > { %1305 = vrot.lane.b32.xlu2 %v712_v52, %s8795_s28 }
  0x35   : > { %v743_v31 = vor.u32 %v742_v29, %v738_v28  ;;  %v445_v29 = vld [vmem:[%s8881_s20 + $0x74] sm:$0x1] }
  0x36   : > { %v629_v36 = vunpack.c.l.b16 %v445_v29 }
  0x37   : > { %v8990_v34 = vsel %vm664_vm1, %v743_v31, %v747_v32  ;;  %v762_v31 = vshrl.u32 %v9050_v17, 16 }
  0x38   : > { %v651_v42 = vpack.c.b16 %v629_v36, %v629_v36 }
  0x3b   : > { %1197 = vrot.lane.b32.xlu0 %v982_v27, %s8792_s25  ;;  %933 = vrot.lane.b32.xlu1 %v700_v46, %s8793_s26  ;;  %v627_v46 = vunpack.c.l.b16 %v439_v44 }
  0x3c   : > { %1044 = vrot.lane.b32.xlu2 %v982_v27, %s8790_s23  ;;  %v736_v27 = vsel %vm664_vm1, %v731_v23, %v735_v24  ;;  %v998_v24 = vrot.slane %v9050_v17, 1 }
  0x43   : > { %1352 = vrot.lane.b32.xlu0 %v985_v60, %s8791_s24  ;;  %1152 = vrot.lane.b32.xlu1 %v712_v52, %s8794_s27 }
  0x44   : > { %1199 = vrot.lane.b32.xlu2 %v985_v60, %s8792_s25 }
  0x4b   : > { %1093 = vrot.lane.b32.xlu0 %v8918_v40, %s8788_s21  ;;  %1307 = vrot.lane.b32.xlu1 %v724_v8, %s8795_s28 }
  0x4c   : > { %1354 = vrot.lane.b32.xlu2 %v988_v7, %s8791_s24 }
  0x53   : > { %1248 = vrot.lane.b32.xlu0 %v8937_v54, %s8789_s22  ;;  %1046 = vrot.lane.b32.xlu1 %v985_v60, %s8790_s23  ;;  %v755_v60 = vor.u32 %v754_v56, %v750_v55 }
  0x54   : > { %1095 = vrot.lane.b32.xlu2 %v8937_v54, %s8788_s21 }
  0x5b   : > { %935 = vrot.lane.b32.xlu0 %v712_v52, %s8793_s26  ;;  %1201 = vrot.lane.b32.xlu1 %v988_v7, %s8792_s25  ;;  %v649_v52 = vpack.c.b16 %v627_v46, %v627_v46 }
  0x5c   : > { %1250 = vrot.lane.b32.xlu2 %v8963_v11, %s8789_s22 }
  0x5d   : > { %v757_v57 = vshll.u32 %v649_v52, 16  ;;  %v996_v59 = vrot.slane %v649_v52, 1  ;;  %v781_v52 = vshll.u32 %v651_v42, 16 }
  0x5f   : > { %v759_v61 = vrot.slane %v757_v57, 1  ;;  %v9027_v3 = vsel %vm973_vm0, %v995_v58, %v996_v59  ;;  %v783_v55 = vrot.slane %v781_v52, 1 }
  0x61   : > { %v760_v4 = vsel %vm664_vm1, %v755_v60, %v759_v61 }
  0x63   : > { %1154 = vrot.lane.b32.xlu0 %v724_v8, %s8794_s27  ;;  %1356 = vrot.lane.b32.xlu1 %v991_v20, %s8791_s24 }
  0x64   : > { %937 = vrot.lane.b32.xlu2 %v724_v8, %s8793_s26  ;;  %v442_v8 = vld [vmem:[%s8881_s20 + $0x68] sm:$0x1] }
  0x65   : > { %v628_v15 = vunpack.c.l.b16 %v442_v8  ;;  %v448_v8 = vld [vmem:[%s8881_s20 + $0x80] sm:$0x1] }
  0x6b   : > { %1309 = vrot.lane.b32.xlu0 %v736_v27, %s8795_s28  ;;  %1097 = vrot.lane.b32.xlu1 %v8963_v11, %s8788_s21 }
  0x6c   : > { %1156 = vrot.lane.b32.xlu2 %v736_v27, %s8794_s27 }
  0x6e   : > { %v8987_v33 = vpop.permute.xlu2 %1244 }
  0x73   : > { %1048 = vrot.lane.b32.xlu0 %v988_v7, %s8790_s23  ;;  %1252 = vrot.lane.b32.xlu1 %v8975_v21, %s8789_s22 }
  0x74   : > { %1311 = vrot.lane.b32.xlu2 %v8990_v34, %s8795_s28 }
  0x76   : > { %v1196_v41 = vpop.permute.xlu2 %1195 }
  0x7b   : > { %1203 = vrot.lane.b32.xlu0 %v991_v20, %s8792_s25  ;;  %939 = vrot.lane.b32.xlu1 %v736_v27, %s8793_s26 }
  0x7c   : > { %1050 = vrot.lane.b32.xlu2 %v991_v20, %s8790_s23  ;;  %v764_v20 = vshll.u32 %v9050_v17, 16 }
  0x7e   : > { %v9015_v51 = vpop.permute.xlu2 %931  ;;  %v766_v32 = vrot.slane %v764_v20, 1 }
  0x7f   : > { %v1398_v39 = vsel %vm1394_vm4, %v8884_v0, %v9015_v51  ;;  %v779_v51 = vor.u32 %v778_v50, %v774_v49 }
  0x80   : > { %v767_v37 = vor.u32 %v766_v32, %v762_v31 }
  0x81   : > { %v9098_v60 = vsel %vm664_vm1, %v779_v51, %v783_v55 }
  0x83   : > { %1358 = vrot.lane.b32.xlu0 %v994_v53, %s8791_s24  ;;  %1158 = vrot.lane.b32.xlu1 %v8990_v34, %s8794_s27 }
  0x84   : > { %1205 = vrot.lane.b32.xlu2 %v994_v53, %s8792_s25 }
  0x85   : > { %v1090_v62 = vpop.permute.xlu1 %1089 }
  0x86   : > { %v9024_v63 = vpop.permute.xlu2 %1150 }
  0x8b   : > { %1099 = vrot.lane.b32.xlu0 %v8975_v21, %s8788_s21  ;;  %1313 = vrot.lane.b32.xlu1 %v760_v4, %s8795_s28 }
  0x8c   : > { %1360 = vrot.lane.b32.xlu2 %v9027_v3, %s8791_s24 }
  0x8d   : > { %v1041_v5 = vpop.permute.xlu0 %1040  ;;  %v1351_v6 = vpop.permute.xlu1 %1350 }
  0x8e   : > { %v9035_v7 = vpop.permute.xlu2 %1305 }
  0x93   : > { %1254 = vrot.lane.b32.xlu0 %v9005_v45, %s8789_s22  ;;  %1052 = vrot.lane.b32.xlu1 %v994_v53, %s8790_s23 }
  0x94   : > { %1101 = vrot.lane.b32.xlu2 %v9005_v45, %s8788_s21 }
  0x95   : > { %v930_v9 = vpop.permute.xlu0 %929  ;;  %v1149_v12 = vpop.permute.xlu1 %1148 }
  0x96   : > { %v1396_v10 = vsel %vm1394_vm4, %v8890_v2, %v930_v9  ;;  %v9045_v13 = vpop.permute.xlu2 %1044  ;;  %v650_v2 = vpack.c.b16 %v628_v15, %v628_v15  ;;  %v9115_v9 = vld [vmem:[%s8881_s20 + $0x78] sm:$0xff] }
  0x97   : > { %v1441_v14 = vsel %vm12775_vm5, %v1396_v10, %v1041_v5  ;;  %v630_v10 = vunpack.c.l.b16 %v448_v8  ;;  %v788_v15 = vshll.u32 %v9115_v9, 16 }
  0x98   : > { %v1486_v16 = vsel %vm1484_vm6, %v1441_v14, %v1090_v62  ;;  %v999_v25 = vrot.slane %v650_v2, 1 }
  0x99   : > { %v1531_v18 = vsel %vm1529_vm7, %v1486_v16, %v1149_v12  ;;  %v1002_v12 = vrot.slane %v651_v42, 1 }
  0x9a   : > { %v1576_v19 = vsel %vm1574_vm8, %v1531_v18, %v1196_v41 }
  0x9b   : > { %941 = vrot.lane.b32.xlu0 %v8990_v34, %s8793_s26  ;;  %1207 = vrot.lane.b32.xlu1 %v9027_v3, %s8792_s25  ;;  %v1621_v22 = vsel %vm1619_vm9, %v1576_v19, %v8987_v33  ;;  %v769_v34 = vshll.u32 %v650_v2, 16  ;;  %v1000_v33 = vsel %vm973_vm0, %v998_v24, %v999_v25  ;;  %v652_v2 = vpack.c.b16 %v630_v10, %v630_v10  ;;  %v9194_v10 = vld [vmem:[%s8881_s20 + $0x90] sm:$0xff] }
  0x9c   : > { %1256 = vrot.lane.b32.xlu2 %v9050_v17, %s8789_s22 }
  0x9d   : > { %v1304_v23 = vpop.permute.xlu0 %1303  ;;  %v1092_v28 = vpop.permute.xlu1 %1091  ;;  %v771_v38 = vrot.slane %v769_v34, 1  ;;  %v793_v24 = vshll.u32 %v652_v2, 16  ;;  %v1005_v29 = vrot.slane %v652_v2, 1 }
  0x9e   : > { %v1666_v26 = vsel %vm1664_vm10, %v1621_v22, %v1304_v23  ;;  %v9065_v27 = vpop.permute.xlu2 %1199  ;;  %v786_v22 = vshrl.u32 %v9115_v9, 16  ;;  %v790_v23 = vrot.slane %v788_v15, 1 }
  0x9f   : > { %v1711_v30 = vsel %vm1709_vm11, %v1666_v26, %v1351_v6  ;;  %v772_v48 = vsel %vm664_vm1, %v767_v37, %v771_v38  ;;  %v795_v31 = vrot.slane %v793_v24, 1  ;;  %v810_v24 = vshrl.u32 %v9194_v10, 16 }
  0xa0   : > { %8332 = vmatmul.msk.bf16.vlgmr.msra.gmra.mxu0 %vm12776_vm12, %v1711_v30  ;;  %v791_v30 = vor.u32 %v790_v23, %v786_v22 }
  0xa3   : > { %1160 = vrot.lane.b32.xlu0 %v760_v4, %s8794_s27  ;;  %1362 = vrot.lane.b32.xlu1 %v1000_v33, %s8791_s24 }
  0xa4   : > { %943 = vrot.lane.b32.xlu2 %v760_v4, %s8793_s26 }
  0xa5   : > { %v1043_v41 = vpop.permute.xlu0 %1042  ;;  %v1247_v46 = vpop.permute.xlu1 %1246 }
  0xa6   : > { %v9082_v44 = vpop.permute.xlu2 %1354  ;;  %v1443_v47 = vsel %vm12775_vm5, %v1398_v39, %v1043_v41 }
  0xa7   : > { %v1488_v53 = vsel %vm1484_vm6, %v1443_v47, %v1092_v28 }
  0xa8   : > { %v1533_v56 = vsel %vm1529_vm7, %v1488_v53, %v9024_v63  ;;  %v9172_v53 = vld [vmem:[%s8881_s20 + $0x84] sm:$0xff] }
  0xa9   : > { %v800_v55 = vshll.u32 %v9172_v53, 16 }
  0xab   : > { %1315 = vrot.lane.b32.xlu0 %v772_v48, %s8795_s28  ;;  %1103 = vrot.lane.b32.xlu1 %v9050_v17, %s8788_s21  ;;  %v802_v8 = vrot.slane %v800_v55, 1 }
  0xac   : > { %1162 = vrot.lane.b32.xlu2 %v772_v48, %s8794_s27 }
  0xad   : > { %v1198_v0 = vpop.permute.xlu0 %1197  ;;  %v934_v58 = vpop.permute.xlu1 %933 }
  0xae   : > { %v9094_v57 = vpop.permute.xlu2 %1095  ;;  %v1578_v59 = vsel %vm1574_vm8, %v1533_v56, %v1198_v0 }
  0xaf   : > { %v1623_v61 = vsel %vm1619_vm9, %v1578_v59, %v1247_v46  ;;  %v451_v46 = vld [vmem:[%s8881_s20 + $0x8c] sm:$0x1] }
  0xb0   : > { %v1668_v63 = vsel %vm1664_vm10, %v1623_v61, %v9035_v7  ;;  %v1001_v7 = vrot.slane %v9073_v35, 1  ;;  %v631_v52 = vunpack.c.l.b16 %v451_v46 }
  0xb2   : > { %v1003_v20 = vsel %vm973_vm0, %v1001_v7, %v1002_v12  ;;  %v653_v51 = vpack.c.b16 %v631_v52, %v631_v52 }
  0xb3   : > { %1054 = vrot.lane.b32.xlu0 %v9027_v3, %s8790_s23  ;;  %1258 = vrot.lane.b32.xlu1 %v9073_v35, %s8789_s22  ;;  %v1400_v3 = vsel %vm1394_vm4, %v8887_v1, %v934_v58  ;;  %v1007_v58 = vrot.slane %v9172_v53, 1 }
  0xb4   : > { %1317 = vrot.lane.b32.xlu2 %v9098_v60, %s8795_s28  ;;  %v1445_v16 = vsel %vm12775_vm5, %v1400_v3, %v9045_v13  ;;  %v1004_v13 = vrot.slane %v9115_v9, 1  ;;  %v1008_v59 = vrot.slane %v653_v51, 1  ;;  %v805_v3 = vshll.u32 %v653_v51, 16 }
  0xb5   : > { %v1353_v62 = vpop.permute.xlu0 %1352  ;;  %v1153_v6 = vpop.permute.xlu1 %1152 }
  0xb6   : > { %v1713_v4 = vsel %vm1709_vm11, %v1668_v63, %v1353_v62  ;;  %v9110_v5 = vpop.permute.xlu2 %1250  ;;  %v9147_v38 = vsel %vm973_vm0, %v1004_v13, %v1005_v29  ;;  %v454_v63 = vld [vmem:[%s8881_s20 + $0x98] sm:$0x1] }
  0xb7   : > { %8333 = vmatmul.msk.bf16.gmra.mxu0 %vm12776_vm12, %v1713_v4  ;;  %v632_v7 = vunpack.c.l.b16 %v454_v63 }
  0xbb   : > { %1209 = vrot.lane.b32.xlu0 %v1000_v33, %s8792_s25  ;;  %945 = vrot.lane.b32.xlu1 %v772_v48, %s8793_s26 }
  0xbc   : > { %1056 = vrot.lane.b32.xlu2 %v1000_v33, %s8790_s23 }
  0xbd   : > { %v1094_v14 = vpop.permute.xlu0 %1093  ;;  %v1308_v19 = vpop.permute.xlu1 %1307 }
  0xbe   : > { %v9126_v18 = vpop.permute.xlu2 %937  ;;  %v1490_v1 = vsel %vm1484_vm6, %v1445_v16, %v1094_v14  ;;  %v807_v14 = vrot.slane %v805_v3, 1 }
  0xbf   : > { %v1535_v25 = vsel %vm1529_vm7, %v1490_v1, %v1153_v6  ;;  %v798_v6 = vshrl.u32 %v9172_v53, 16  ;;  %v1404_v15 = vsel %vm1394_vm4, %v8937_v54, %v9126_v18  ;;  %v812_v1 = vshll.u32 %v9194_v10, 16 }
  0xc0   : > { %v1580_v26 = vsel %vm1574_vm8, %v1535_v25, %v9065_v27  ;;  %v796_v27 = vsel %vm664_vm1, %v791_v30, %v795_v31 }
  0xc1   : > { %v803_v12 = vor.u32 %v802_v8, %v798_v6  ;;  %v814_v25 = vrot.slane %v812_v1, 1 }
  0xc3   : > { %1364 = vrot.lane.b32.xlu0 %v1003_v20, %s8791_s24  ;;  %1164 = vrot.lane.b32.xlu1 %v9098_v60, %s8794_s27  ;;  %v808_v23 = vsel %vm664_vm1, %v803_v12, %v807_v14  ;;  %v815_v18 = vor.u32 %v814_v25, %v810_v24 }
  0xc4   : > { %1211 = vrot.lane.b32.xlu2 %v1003_v20, %s8792_s25 }
  0xc5   : > { %v1249_v28 = vpop.permute.xlu0 %1248  ;;  %v1047_v33 = vpop.permute.xlu1 %1046 }
  0xc6   : > { %v1625_v32 = vsel %vm1619_vm9, %v1580_v26, %v1249_v28  ;;  %v9140_v34 = vpop.permute.xlu2 %1156 }
  0xc7   : > { %v1670_v36 = vsel %vm1664_vm10, %v1625_v32, %v1308_v19  ;;  %v654_v19 = vpack.c.b16 %v632_v7, %v632_v7 }
  0xc8   : > { %v1715_v37 = vsel %vm1709_vm11, %v1670_v36, %v9082_v44 }
  0xc9   : > { %8334 = vmatmul.msk.bf16.gmra.mxu0 %vm12776_vm12, %v1715_v37  ;;  %v817_v13 = vshll.u32 %v654_v19, 16 }
  0xcb   : > { %1105 = vrot.lane.b32.xlu0 %v9073_v35, %s8788_s21  ;;  %1319 = vrot.lane.b32.xlu1 %v796_v27, %s8795_s28  ;;  %v819_v28 = vrot.slane %v817_v13, 1 }
  0xcc   : > { %1366 = vrot.lane.b32.xlu2 %v9147_v38, %s8791_s24 }
  0xcd   : > { %v936_v39 = vpop.permute.xlu0 %935  ;;  %v1202_v42 = vpop.permute.xlu1 %1201 }
  0xce   : > { %v9155_v41 = vpop.permute.xlu2 %1311  ;;  %v1402_v43 = vsel %vm1394_vm4, %v8918_v40, %v936_v39 }
  0xcf   : > { %v1447_v44 = vsel %vm12775_vm5, %v1402_v43, %v1047_v33  ;;  %v9219_v33 = vsel %vm664_vm1, %v815_v18, %v819_v28  ;;  %v457_v43 = vld [vmem:[%s8881_s20 + $0xa4] sm:$0x1] }
  0xd0   : > { %v1492_v48 = vsel %vm1484_vm6, %v1447_v44, %v9094_v57  ;;  %v9236_v44 = vld [vmem:[%s8881_s20 + $0x9c] sm:$0xff]  ;;  %v633_v46 = vunpack.c.l.b16 %v457_v43 }
  0xd2   : > { %v655_v51 = vpack.c.b16 %v633_v46, %v633_v46 }
  0xd3   : > { %1260 = vrot.lane.b32.xlu0 %v9115_v9, %s8789_s22  ;;  %1058 = vrot.lane.b32.xlu1 %v1003_v20, %s8790_s23 }
  0xd4   : > { %1107 = vrot.lane.b32.xlu2 %v9115_v9, %s8788_s21  ;;  %v1014_v63 = vrot.slane %v655_v51, 1 }
  0xd5   : > { %v1155_v47 = vpop.permute.xlu0 %1154  ;;  %v1357_v50 = vpop.permute.xlu1 %1356 }
  0xd6   : > { %v9168_v49 = vpop.permute.xlu2 %1050  ;;  %v1537_v40 = vsel %vm1529_vm7, %v1492_v48, %v1155_v47  ;;  %v1011_v47 = vrot.slane %v654_v19, 1 }
  0xd7   : > { %v1582_v0 = vsel %vm1574_vm8, %v1537_v40, %v1202_v42 }
  0xd8   : > { %v1627_v56 = vsel %vm1619_vm9, %v1582_v0, %v9110_v5  ;;  %v1009_v5 = vsel %vm973_vm0, %v1007_v58, %v1008_v59  ;;  %v829_v58 = vshll.u32 %v655_v51, 16 }
  0xda   : > { %v831_v6 = vrot.slane %v829_v58, 1 }
  0xdb   : > { %947 = vrot.lane.b32.xlu0 %v9098_v60, %s8793_s26  ;;  %1213 = vrot.lane.b32.xlu1 %v9147_v38, %s8792_s25 }
  0xdc   : > { %1262 = vrot.lane.b32.xlu2 %v9172_v53, %s8789_s22 }
  0xdd   : > { %v1310_v57 = vpop.permute.xlu0 %1309  ;;  %v1098_v62 = vpop.permute.xlu1 %1097 }
  0xde   : > { %v1672_v61 = vsel %vm1664_vm10, %v1627_v56, %v1310_v57  ;;  %v9186_v60 = vpop.permute.xlu2 %1205  ;;  %v822_v56 = vshrl.u32 %v9236_v44, 16 }
  0xdf   : > { %v1717_v4 = vsel %vm1709_vm11, %v1672_v61, %v1357_v50  ;;  %v824_v50 = vshll.u32 %v9236_v44, 16 }
  0xe0   : > { %8335 = vmatmul.msk.bf16.gmra.mxu0 %vm12776_vm12, %v1717_v4 }
  0xe1   : > { %v826_v57 = vrot.slane %v824_v50, 1 }
  0xe3   : > { %1166 = vrot.lane.b32.xlu0 %v796_v27, %s8794_s27  ;;  %1368 = vrot.lane.b32.xlu1 %v1009_v5, %s8791_s24  ;;  %v827_v4 = vor.u32 %v826_v57, %v822_v56 }
  0xe4   : > { %949 = vrot.lane.b32.xlu2 %v796_v27, %s8793_s26 }
  0xe5   : > { %v1049_v16 = vpop.permute.xlu0 %1048  ;;  %v1253_v20 = vpop.permute.xlu1 %1252 }
  0xe6   : > { %v9203_v2 = vpop.permute.xlu2 %1360  ;;  %v1449_v22 = vsel %vm12775_vm5, %v1404_v15, %v1049_v16 }
  0xe7   : > { %v1494_v26 = vsel %vm1484_vm6, %v1449_v22, %v1098_v62 }
  0xe8   : > { %v1539_v29 = vsel %vm1529_vm7, %v1494_v26, %v9140_v34  ;;  %v9293_v26 = vld [vmem:[%s8881_s20 + $0xa8] sm:$0xff] }
  0xe9   : > { %v836_v28 = vshll.u32 %v9293_v26, 16  ;;  %v834_v43 = vshrl.u32 %v9293_v26, 16 }
  0xeb   : > { %1321 = vrot.lane.b32.xlu0 %v808_v23, %s8795_s28  ;;  %1109 = vrot.lane.b32.xlu1 %v9172_v53, %s8788_s21 }
  0xec   : > { %1168 = vrot.lane.b32.xlu2 %v808_v23, %s8794_s27 }
  0xed   : > { %v1204_v54 = vpop.permute.xlu0 %1203  ;;  %v940_v31 = vpop.permute.xlu1 %939 }
  0xee   : > { %v9215_v30 = vpop.permute.xlu2 %1101  ;;  %v1584_v32 = vsel %vm1574_vm8, %v1539_v29, %v1204_v54 }
  0xef   : > { %v1629_v36 = vsel %vm1619_vm9, %v1584_v32, %v1253_v20  ;;  %v460_v20 = vld [vmem:[%s8881_s20 + $0xb0] sm:$0x1]  ;;  %v1016_v32 = vrot.slane %v9293_v26, 1 }
  0xf0   : > { %v1674_v37 = vsel %vm1664_vm10, %v1629_v36, %v9155_v41  ;;  %v1010_v41 = vrot.slane %v9194_v10, 1  ;;  %v634_v13 = vunpack.c.l.b16 %v460_v20 }
  0xf2   : > { %v1012_v55 = vsel %vm973_vm0, %v1010_v41, %v1011_v47  ;;  %v656_v18 = vpack.c.b16 %v634_v13, %v634_v13  ;;  %v9315_v41 = vld [vmem:[%s8881_s20 + $0xb4] sm:$0xff]  ;;  %v9357_v13 = vld [vmem:[%s8881_s20 + $0xc0] sm:$0xff] }
  0xf3   : > { %1060 = vrot.lane.b32.xlu0 %v9147_v38, %s8790_s23  ;;  %1264 = vrot.lane.b32.xlu1 %v9194_v10, %s8789_s22  ;;  %v1406_v38 = vsel %vm1394_vm4, %v8963_v11, %v940_v31 }
  0xf4   : > { %1323 = vrot.lane.b32.xlu2 %v9219_v33, %s8795_s28  ;;  %v1451_v40 = vsel %vm12775_vm5, %v1406_v38, %v9168_v49  ;;  %v1013_v49 = vrot.slane %v9236_v44, 1  ;;  %v1017_v36 = vrot.slane %v656_v18, 1  ;;  %v838_v38 = vrot.slane %v836_v28, 1 }
  0xf5   : > { %v1359_v34 = vpop.permute.xlu0 %1358  ;;  %v1159_v42 = vpop.permute.xlu1 %1158  ;;  %v841_v46 = vshll.u32 %v656_v18, 16 }
  0xf6   : > { %v1719_v27 = vsel %vm1709_vm11, %v1674_v37, %v1359_v34  ;;  %v9231_v39 = vpop.permute.xlu2 %1256  ;;  %v9268_v14 = vsel %vm973_vm0, %v1013_v49, %v1014_v63  ;;  %v846_v49 = vshrl.u32 %v9315_v41, 16 }
  0xf7   : > { %8336 = vmatmul.msk.bf16.gmra.mxu0 %vm12776_vm12, %v1719_v27  ;;  %v463_v27 = vld [vmem:[%s8881_s20 + $0xbc] sm:$0x1]  ;;  %v843_v50 = vrot.slane %v841_v46, 1 }
  0xf8   : > { %v635_v47 = vunpack.c.l.b16 %v463_v27 }
  0xfa   : > { %v657_v51 = vpack.c.b16 %v635_v47, %v635_v47 }
  0xfb   : > { %1215 = vrot.lane.b32.xlu0 %v1009_v5, %s8792_s25  ;;  %951 = vrot.lane.b32.xlu1 %v808_v23, %s8793_s26 }
  0xfc   : > { %1062 = vrot.lane.b32.xlu2 %v1009_v5, %s8790_s23 }
  0xfd   : > { %v1100_v48 = vpop.permute.xlu0 %1099  ;;  %v1314_v0 = vpop.permute.xlu1 %1313 }
  0xfe   : > { %v9247_v52 = vpop.permute.xlu2 %943  ;;  %v1496_v11 = vsel %vm1484_vm6, %v1451_v40, %v1100_v48  ;;  %v839_v48 = vor.u32 %v838_v38, %v834_v43 }
  0xff   : > { %v1541_v59 = vsel %vm1529_vm7, %v1496_v11, %v1159_v42  ;;  %v1410_v40 = vsel %vm1394_vm4, %v9005_v45, %v9247_v52 }
 0x100   : > { %v1586_v61 = vsel %vm1574_vm8, %v1541_v59, %v9186_v60  ;;  %v832_v60 = vsel %vm664_vm1, %v827_v4, %v831_v6  ;;  %v844_v59 = vsel %vm664_vm1, %v839_v48, %v843_v50 }
 0x103   : > { %1370 = vrot.lane.b32.xlu0 %v1012_v55, %s8791_s24  ;;  %1170 = vrot.lane.b32.xlu1 %v9219_v33, %s8794_s27 }
 0x104   : > { %1217 = vrot.lane.b32.xlu2 %v1012_v55, %s8792_s25 }
 0x105   : > { %v1255_v62 = vpop.permute.xlu0 %1254  ;;  %v1053_v5 = vpop.permute.xlu1 %1052 }
 0x106   : > { %v1631_v8 = vsel %vm1619_vm9, %v1586_v61, %v1255_v62  ;;  %v9261_v3 = vpop.permute.xlu2 %1162  ;;  %v853_v62 = vshll.u32 %v657_v51, 16 }
 0x107   : > { %v1676_v7 = vsel %vm1664_vm10, %v1631_v8, %v1314_v0 }
 0x108   : > { %v1721_v12 = vsel %vm1709_vm11, %v1676_v7, %v9203_v2  ;;  %v855_v4 = vrot.slane %v853_v62, 1  ;;  %v8797_v7 = vmov 0.0|0.0  }
 0x109   : > { %8337 = vmatmul.msk.bf16.gmra.mxu0 %vm12776_vm12, %v1721_v12  ;;  %v2341_v12 = vunpack.c.l.b16 %v8797_v7 }
 0x10b   : > { %1111 = vrot.lane.b32.xlu0 %v9194_v10, %s8788_s21  ;;  %1325 = vrot.lane.b32.xlu1 %v832_v60, %s8795_s28 }
 0x10c   : > { %1372 = vrot.lane.b32.xlu2 %v9268_v14, %s8791_s24 }
 0x10d   : > { %v942_v15 = vpop.permute.xlu0 %941  ;;  %v1208_v19 = vpop.permute.xlu1 %1207 }
 0x10e   : > { %v9276_v16 = vpop.permute.xlu2 %1317  ;;  %v1408_v1 = vsel %vm1394_vm4, %v8975_v21, %v942_v15 }
 0x10f   : > { %v1453_v2 = vsel %vm12775_vm5, %v1408_v1, %v1053_v5  ;;  %v2385_v1 = vpack.c.b16 %v2341_v12, %v2341_v12 }
 0x110   : > { %v1498_v23 = vsel %vm1484_vm6, %v1453_v2, %v9215_v30 }
 0x111   : > { %v2411_v18 = vshll.u32 %v2385_v1, 16 }
 0x113   : > { %1266 = vrot.lane.b32.xlu0 %v9236_v44, %s8789_s22  ;;  %1064 = vrot.lane.b32.xlu1 %v1012_v55, %s8790_s23  ;;  %v848_v55 = vshll.u32 %v9315_v41, 16 }
 0x114   : > { %1113 = vrot.lane.b32.xlu2 %v9236_v44, %s8788_s21 }
 0x115   : > { %v1161_v22 = vpop.permute.xlu0 %1160  ;;  %v1363_v25 = vpop.permute.xlu1 %1362  ;;  %v850_v61 = vrot.slane %v848_v55, 1 }
 0x116   : > { %v9289_v24 = vpop.permute.xlu2 %1056  ;;  %v1543_v21 = vsel %vm1529_vm7, %v1498_v23, %v1161_v22 }
 0x117   : > { %v1588_v54 = vsel %vm1574_vm8, %v1543_v21, %v1208_v19  ;;  %v851_v52 = vor.u32 %v850_v61, %v846_v49  ;;  %v2408_v21 = vshrl.u32 %v2385_v1, 16 }
 0x118   : > { %v1633_v30 = vsel %vm1619_vm9, %v1588_v54, %v9231_v39  ;;  %v1018_v39 = vsel %vm973_vm0, %v1016_v32, %v1017_v36  ;;  %v860_v36 = vshll.u32 %v9357_v13, 16 }
 0x119   : > { %v9340_v15 = vsel %vm664_vm1, %v851_v52, %v855_v4  ;;  %v2410_v54 = vrot.slane %v2408_v21, 7 }
 0x11a   : > { %v862_v47 = vrot.slane %v860_v36, 1 }
 0x11b   : > { %953 = vrot.lane.b32.xlu0 %v9219_v33, %s8793_s26  ;;  %1219 = vrot.lane.b32.xlu1 %v9268_v14, %s8792_s25  ;;  %v2413_v27 = vor.u32 %v2411_v18, %v2410_v54  ;;  %v2630_v62 = vsel %vm9371_vm15, %v2410_v54, 0 }
 0x11c   : > { %1268 = vrot.lane.b32.xlu2 %v9293_v26, %s8789_s22  ;;  %v2660_v7 = vshll.u32 %v2630_v62, 16 }
 0x11d   : > { %v1834_v29 = vpop.f32.mrf.mxu0  ;;  %v1316_v31 = vpop.permute.xlu0 %1315 }
 0x11e   : > { %v1678_v33 = vsel %vm1664_vm10, %v1633_v30, %v1316_v31  ;;  %v9307_v34 = vpop.permute.xlu2 %1211  ;;  %v1104_v37 = vpop.permute.xlu1 %1103  ;;  %v1019_v30 = vrot.slane %v9315_v41, 1  ;;  %v1020_v31 = vrot.slane %v657_v51, 1 }
 0x11f   : > { %v1723_v42 = vsel %vm1709_vm11, %v1678_v33, %v1363_v25 }
 0x120   : > { %8338 = vmatmul.msk.bf16.gmra.mxu0 %vm12776_vm12, %v1723_v42  ;;  %v1021_v46 = vsel %vm973_vm0, %v1019_v30, %v1020_v31 }
 0x123   : > { %1172 = vrot.lane.b32.xlu0 %v832_v60, %s8794_s27  ;;  %1374 = vrot.lane.b32.xlu1 %v1018_v39, %s8791_s24 }
 0x124   : > { %955 = vrot.lane.b32.xlu2 %v832_v60, %s8793_s26 }
 0x125   : > { %v1836_v0 = vpop.f32.mrf.mxu0  ;;  %v1055_v11 = vpop.permute.xlu0 %1054 }
 0x126   : > { %v9324_v56 = vpop.permute.xlu2 %1366  ;;  %v1259_v57 = vpop.permute.xlu1 %1258  ;;  %v1455_v58 = vsel %vm12775_vm5, %v1410_v40, %v1055_v11  ;;  %v1022_v40 = vrot.slane %v9357_v13, 1 }
 0x127   : > { %v1500_v63 = vsel %vm1484_vm6, %v1455_v58, %v1104_v37 }
 0x128   : > { %v1545_v6 = vsel %vm1529_vm7, %v1500_v63, %v9261_v3 }
 0x12b   : > { %1327 = vrot.lane.b32.xlu0 %v844_v59, %s8795_s28  ;;  %1115 = vrot.lane.b32.xlu1 %v9293_v26, %s8788_s21 }
 0x12c   : > { %1174 = vrot.lane.b32.xlu2 %v844_v59, %s8794_s27 }
 0x12d   : > { %v1210_v45 = vpop.permute.xlu0 %1209 }
 0x12e   : > { %v9336_v8 = vpop.permute.xlu2 %1107  ;;  %v946_v5 = vpop.permute.xlu1 %945  ;;  %v1590_v60 = vsel %vm1574_vm8, %v1545_v6, %v1210_v45 }
 0x12f   : > { %v1635_v19 = vsel %vm1619_vm9, %v1590_v60, %v1259_v57  ;;  %v1412_v28 = vsel %vm1394_vm4, %v9050_v17, %v946_v5  ;;  %v2662_v60 = vrot.slane %v2660_v7, 1 }
 0x130   : > { %v1680_v20 = vsel %vm1664_vm10, %v1635_v19, %v9276_v16  ;;  %v1457_v33 = vsel %vm12775_vm5, %v1412_v28, %v9289_v24  ;;  %v9380_v24 = vsel %vm9371_vm15, 0, %v2413_v27 }
 0x131   : > { %12811 = vst [vmem:[#allocation2_spill] sm:$0xff] %v9380_v24  ;;  %v2655_v58 = vshll.u32 %v9380_v24, 16  ;;  %v2653_v6 = vshrl.u32 %v9380_v24, 16 }
 0x133   : > { %1066 = vrot.lane.b32.xlu0 %v9268_v14, %s8790_s23  ;;  %1270 = vrot.lane.b32.xlu1 %v9315_v41, %s8789_s22  ;;  %v466_v14 = vld [vmem:[%s8881_s20 + $0xc8] sm:$0x1]  ;;  %v2657_v5 = vrot.slane %v2655_v58, 1 }
 0x134   : > { %v1839_v2 = vpop.f32.mrf.mxu0  ;;  %1329 = vrot.lane.b32.xlu2 %v9340_v15, %s8795_s28  ;;  %v636_v29 = vunpack.c.l.b16 %v466_v14 }
 0x135   : > { %v1365_v3 = vpop.permute.xlu0 %1364  ;;  %v2658_v12 = vor.u32 %v2657_v5, %v2653_v6 }
 0x136   : > { %v1725_v22 = vsel %vm1709_vm11, %v1680_v20, %v1365_v3  ;;  %v9352_v23 = vpop.permute.xlu2 %1262  ;;  %v1165_v25 = vpop.permute.xlu1 %1164  ;;  %v658_v43 = vpack.c.b16 %v636_v29, %v636_v29 }
 0x137   : > { %8339 = vmatmul.msk.bf16.gmra.mxu0 %vm12776_vm12, %v1725_v22  ;;  %v9417_v20 = vsel %vm664_vm1, %v2658_v12, %v2662_v60  ;;  %v2972_v22 = vrot.slane %v9380_v24, 1  ;;  %v472_v60 = vld [vmem:[%s8881_s20 + $0xe0] sm:$0x1] }
 0x138   : > { %v865_v48 = vshll.u32 %v658_v43, 16  ;;  %v1023_v0 = vrot.slane %v658_v43, 1  ;;  %12812 = vst [vmem:[#allocation3_spill] sm:$0xff] %v9417_v20 }
 0x13a   : > { %v867_v57 = vrot.slane %v865_v48, 1 }
 0x13b   : > { %1221 = vrot.lane.b32.xlu0 %v1018_v39, %s8792_s25  ;;  %957 = vrot.lane.b32.xlu1 %v844_v59, %s8793_s26 }
 0x13c   : > { %v1841_v16 = vpop.f32.mrf.mxu0  ;;  %1068 = vrot.lane.b32.xlu2 %v1018_v39, %s8790_s23  ;;  %v858_v39 = vshrl.u32 %v9357_v13, 16 }
 0x13d   : > { %v1106_v32 = vpop.permute.xlu0 %1105  ;;  %v9439_v16 = vld [vmem:[%s12765_s2] ss:$0 sm:$0xff] }
 0x13e   : > { %v9368_v17 = vpop.permute.xlu2 %949  ;;  %v1320_v37 = vpop.permute.xlu1 %1319  ;;  %v1502_v42 = vsel %vm1484_vm6, %v1457_v33, %v1106_v32  ;;  %v863_v55 = vor.u32 %v862_v47, %v858_v39 }
 0x13f   : > { %v1547_v50 = vsel %vm1529_vm7, %v1502_v42, %v1165_v25  ;;  %v2973_v25 = vrot.slane %v2630_v62, 1  ;;  %v1416_v47 = vsel %vm1394_vm4, %v9115_v9, %v9368_v17 }
 0x140   : > { %v1592_v11 = vsel %vm1574_vm8, %v1547_v50, %v9307_v34  ;;  %v9399_v34 = vsel %vm973_vm0, %v1022_v40, %v1023_v0  ;;  %v9403_v4 = vsel %vm664_vm1, %v863_v55, %v867_v57 }
 0x141   : > { %v9433_v28 = vsel %vm973_vm0, %v2972_v22, %v2973_v25 }
 0x142   : > { %12813 = vst [vmem:[#allocation4_spill] sm:$0xff] %v9433_v28 }
 0x143   : > { %1376 = vrot.lane.b32.xlu0 %v1021_v46, %s8791_s24  ;;  %1176 = vrot.lane.b32.xlu1 %v9340_v15, %s8794_s27 }
 0x144   : > { %1223 = vrot.lane.b32.xlu2 %v1021_v46, %s8792_s25 }
 0x145   : > { %v1261_v51 = vpop.permute.xlu0 %1260 }
 0x146   : > { %v1637_v59 = vsel %vm1619_vm9, %v1592_v11, %v1261_v51  ;;  %v1844_v49 = vpop.f32.mrf.mxu0  ;;  %v9391_v61 = vpop.permute.xlu2 %1168 }
 0x147   : > { %v1682_v63 = vsel %vm1664_vm10, %v1637_v59, %v1320_v37  ;;  %v1059_v45 = vpop.permute.xlu1 %1058 }
 0x148   : > { %v1727_v52 = vsel %vm1709_vm11, %v1682_v63, %v9324_v56 }
 0x149   : > { %8340 = vmatmul.msk.bf16.gmra.mxu0 %vm12776_vm12, %v1727_v52 }
 0x14b   : > { %1117 = vrot.lane.b32.xlu0 %v9315_v41, %s8788_s21  ;;  %1331 = vrot.lane.b32.xlu1 %v9403_v4, %s8795_s28 }
 0x14c   : > { %1378 = vrot.lane.b32.xlu2 %v9399_v34, %s8791_s24 }
 0x14d   : > { %v948_v56 = vpop.permute.xlu0 %947 }
 0x14e   : > { %v1846_v19 = vpop.f32.mrf.mxu0  ;;  %v9412_v1 = vpop.permute.xlu2 %1323  ;;  %v1414_v3 = vsel %vm1394_vm4, %v9073_v35, %v948_v56 }
 0x14f   : > { %v1214_v2 = vpop.permute.xlu1 %1213  ;;  %v1459_v41 = vsel %vm12775_vm5, %v1414_v3, %v1059_v45 }
 0x150   : > { %v1504_v21 = vsel %vm1484_vm6, %v1459_v41, %v9336_v8  ;;  %v469_v8 = vld [vmem:[%s8881_s20 + $0xd4] sm:$0x1] }
 0x151   : > { %v637_v43 = vunpack.c.l.b16 %v469_v8 }
 0x153   : > { %1272 = vrot.lane.b32.xlu0 %v9357_v13, %s8789_s22  ;;  %3170 = vrot.lane.b32.xlu1 %v9380_v24, %s8799_s29 }
 0x154   : > { %3222 = vrot.lane.b32.xlu2 %v9417_v20, %s8798_s19 }
 0x155   : > { %v1167_v35 = vpop.permute.xlu0 %1166 }
 0x156   : > { %v9429_v14 = vpop.permute.xlu2 %1062  ;;  %v1549_v54 = vsel %vm1529_vm7, %v1504_v21, %v1167_v35  ;;  %v9494_v35 = vld [vmem:[%s8881_s20 + $0xd8] sm:$0xff]  ;;  %v638_v21 = vunpack.c.l.b16 %v472_v60 }
 0x157   : > { %v1369_v18 = vpop.permute.xlu1 %1368  ;;  %v1594_v29 = vsel %vm1574_vm8, %v1549_v54, %v1214_v2 }
 0x158   : > { %v1639_v31 = vsel %vm1619_vm9, %v1594_v29, %v9352_v23  ;;  %v659_v23 = vpack.c.b16 %v637_v43, %v637_v43 }
 0x15a   : > { %v1026_v0 = vrot.slane %v659_v23, 1  ;;  %v877_v9 = vshll.u32 %v659_v23, 16 }
 0x15b   : > { %3129 = vrot.lane.b32.xlu0 %v9433_v28, %s8800_s12  ;;  %1070 = vrot.lane.b32.xlu1 %v1021_v46, %s8790_s23 }
 0x15c   : > { %1119 = vrot.lane.b32.xlu2 %v9357_v13, %s8788_s21  ;;  %v9456_v13 = vld [vmem:[%s8881_s20 + $0xcc] sm:$0xff]  ;;  %v879_v5 = vrot.slane %v877_v9, 1 }
 0x15d   : > { %v1849_v30 = vpop.f32.mrf.mxu0  ;;  %v1322_v32 = vpop.permute.xlu0 %1321  ;;  %v872_v39 = vshll.u32 %v9456_v13, 16  ;;  %v1025_v40 = vrot.slane %v9456_v13, 1  ;;  %v870_v57 = vshrl.u32 %v9456_v13, 16 }
 0x15e   : > { %v1850_v36 = vadd.f32 %v9439_v16, %v1849_v30  ;;  %v1684_v33 = vsel %vm1664_vm10, %v1639_v31, %v1322_v32  ;;  %v9451_v37 = vpop.permute.xlu2 %1217  ;;  %v9501_v30 = vpack.c.b16 %v638_v21, %v638_v21  ;;  %v884_v31 = vshll.u32 %v9494_v35, 16 }
 0x15f   : > { %v1729_v27 = vsel %vm1709_vm11, %v1684_v33, %v1369_v18  ;;  %v1110_v42 = vpop.permute.xlu1 %1109  ;;  %v874_v58 = vrot.slane %v872_v39, 1  ;;  %v9475_v62 = vsel %vm973_vm0, %v1025_v40, %v1026_v0 }
 0x160   : > { %8341 = vmatmul.msk.bf16.gmra.mxu0 %vm12776_vm12, %v1729_v27  ;;  %v1994_v46 = vmul.f32 0.2, %v1850_v36  ;;  %vm1950_vm2 = vcmp.gt.f32.partialorder %v1850_v36, 0.0  ;;  %v889_v40 = vshll.u32 %v9501_v30, 16 }
 0x161   : > { %v875_v6 = vor.u32 %v874_v58, %v870_v57 }
 0x162   : > { %v2038_v11 = vsel %vm1950_vm2, %v1850_v36, %v1994_v46 }
 0x163   : > { %959 = vrot.lane.b32.xlu0 %v9340_v15, %s8793_s26  ;;  %1225 = vrot.lane.b32.xlu1 %v9399_v34, %s8792_s25  ;;  %v2259_v17 = vpack.c.bf16 %v2038_v11, %v2038_v11  ;;  %v9491_v25 = vsel %vm664_vm1, %v875_v6, %v879_v5 }
 0x164   : > { %1274 = vrot.lane.b32.xlu2 %v9456_v13, %s8789_s22 }
 0x165   : > { %v1851_v48 = vpop.f32.mrf.mxu0  ;;  %v1061_v50 = vpop.permute.xlu0 %1060  ;;  %v2347_v7 = vunpack.c.l.b16 %v2259_v17 }
 0x166   : > { %v1852_v15 = vadd.f32 %v9439_v16, %v1851_v48  ;;  %v9470_v51 = vpop.permute.xlu2 %1372  ;;  %v1461_v49 = vsel %vm12775_vm5, %v1416_v47, %v1061_v50  ;;  %v882_v48 = vshrl.u32 %v9494_v35, 16  ;;  %v886_v50 = vrot.slane %v884_v31, 1 }
 0x167   : > { %v1265_v55 = vpop.permute.xlu1 %1264  ;;  %v1506_v52 = vsel %vm1484_vm6, %v1461_v49, %v1110_v42 }
 0x168   : > { %vm1951_vm3 = vcmp.gt.f32.partialorder %v1852_v15, 0.0  ;;  %v1995_v59 = vmul.f32 0.2, %v1852_v15  ;;  %v1551_v19 = vsel %vm1529_vm7, %v1506_v52, %v9391_v61  ;;  %v887_v17 = vor.u32 %v886_v50, %v882_v48 }
 0x16a   : > { %v2039_v63 = vsel %vm1951_vm3, %v1852_v15, %v1995_v59 }
 0x16b   : > { %v2260_v45 = vpack.c.bf16 %v2039_v63, %v2039_v63  ;;  %1178 = vrot.lane.b32.xlu0 %v9403_v4, %s8794_s27  ;;  %1380 = vrot.lane.b32.xlu1 %v9475_v62, %s8791_s24  ;;  %v891_v63 = vrot.slane %v889_v40, 1 }
 0x16c   : > { %3131 = vrot.lane.b32.xlu2 %v9433_v28, %s8800_s12 }
 0x16d   : > { %v2348_v56 = vunpack.c.l.b16 %v2260_v45  ;;  %v1216_v12 = vpop.permute.xlu0 %1215  ;;  %v9542_v60 = vsel %vm664_vm1, %v887_v17, %v891_v63 }
 0x16e   : > { %v9487_v2 = vpop.permute.xlu2 %1113  ;;  %v1596_v41 = vsel %vm1574_vm8, %v1551_v19, %v1216_v12 }
 0x16f   : > { %v2388_v3 = vpack.c.b16 %v2348_v56, %v2347_v7  ;;  %v952_v22 = vpop.permute.xlu1 %951  ;;  %v1641_v18 = vsel %vm1619_vm9, %v1596_v41, %v1265_v55 }
 0x170   : > { %v1686_v33 = vsel %vm1664_vm10, %v1641_v18, %v9412_v1  ;;  %v1418_v15 = vsel %vm1394_vm4, %v9172_v53, %v952_v22 }
 0x171   : > { %v2429_v54 = vshrl.u32 %v2388_v3, 16  ;;  %v2432_v8 = vshll.u32 %v2388_v3, 16  ;;  %v1463_v45 = vsel %vm12775_vm5, %v1418_v15, %v9429_v14 }
 0x173   : > { %v2431_v29 = vrot.slane %v2429_v54, 7  ;;  %1333 = vrot.lane.b32.xlu0 %v9491_v25, %s8795_s28 }
 0x174   : > { %v1854_v61 = vpop.f32.mrf.mxu0  ;;  %961 = vrot.lane.b32.xlu2 %v9403_v4, %s8793_s26 }
 0x175   : > { %v1855_v32 = vadd.f32 %v9439_v16, %v1854_v61  ;;  %v1371_v36 = vpop.permute.xlu0 %1370  ;;  %v2434_v27 = vor.u32 %v2432_v8, %v2431_v29  ;;  %v9509_v42 = vsel %vm9371_vm15, %v2431_v29, 0 }
 0x176   : > { %v1731_v43 = vsel %vm1709_vm11, %v1686_v33, %v1371_v36  ;;  %v9512_v46 = vpop.permute.xlu2 %1268  ;;  %v2696_v1 = vshll.u32 %v9509_v42, 16  ;;  %v2982_v17 = vrot.slane %v9509_v42, 1 }
 0x177   : > { %8342 = vmatmul.msk.bf16.gmra.mxu0 %vm12776_vm12, %v1731_v43  ;;  %v9517_v4 = vsel %vm9371_vm15, 0, %v2434_v27  ;;  %v1171_v23 = vpop.permute.xlu1 %1170  ;;  %v1996_v47 = vmul.f32 0.2, %v1855_v32  ;;  %vm1952_vm13 = vcmp.gt.f32.partialorder %v1855_v32, 0.0 }
 0x178   : > { %v2691_v39 = vshll.u32 %v9517_v4, 16  ;;  %v2689_v0 = vshrl.u32 %v9517_v4, 16  ;;  %v2698_v58 = vrot.slane %v2696_v1, 1 }
 0x179   : > { %v2040_v59 = vsel %vm1952_vm13, %v1855_v32, %v1996_v47 }
 0x17a   : > { %v2693_v11 = vrot.slane %v2691_v39, 1  ;;  %v2261_v56 = vpack.c.bf16 %v2040_v59, %v2040_v59  ;;  %v1029_v39 = vrot.slane %v9501_v30, 1 }
 0x17b   : > { %3172 = vrot.lane.b32.xlu0 %v9517_v4, %s8799_s29 }
 0x17c   : > { %v1856_v55 = vpop.f32.mrf.mxu0  ;;  %1180 = vrot.lane.b32.xlu2 %v9491_v25, %s8794_s27  ;;  %v2694_v57 = vor.u32 %v2693_v11, %v2689_v0  ;;  %v2349_v3 = vunpack.c.l.b16 %v2261_v56  ;;  %v475_v56 = vld [vmem:[%s8881_s20 + $0xec] sm:$0x1] }
 0x17d   : > { %v1857_v49 = vadd.f32 %v9439_v16, %v1856_v55  ;;  %v1112_v9 = vpop.permute.xlu0 %1111  ;;  %v2981_v55 = vrot.slane %v9517_v4, 1 }
 0x17e   : > { %v9534_v53 = vsel %vm664_vm1, %v2694_v57, %v2698_v58  ;;  %v9536_v52 = vpop.permute.xlu2 %955  ;;  %v1508_v5 = vsel %vm1484_vm6, %v1463_v45, %v1112_v9  ;;  %v8669_v58 = vld [vmem:[%s12766_s3 + $0x78] sm:$0xff] }
 0x17f   : > { %vm1953_vm14 = vcmp.gt.f32.partialorder %v1857_v49, 0.0  ;;  %v1997_v6 = vmul.f32 0.2, %v1857_v49  ;;  %3224 = vrot.lane.b32.xlu1 %v9534_v53, %s8798_s19  ;;  %v1326_v7 = vpop.permute.xlu1 %1325  ;;  %v1553_v14 = vsel %vm1529_vm7, %v1508_v5, %v1171_v23  ;;  %v1028_v23 = vrot.slane %v9494_v35, 1  ;;  %3886 = vmatpush.bf16.msra.mxu2 %v8669_v58 }
 0x180   : > { %v1598_v22 = vsel %vm1574_vm8, %v1553_v14, %v9451_v37 }
 0x181   : > { %v2041_v12 = vsel %vm1953_vm14, %v1857_v49, %v1997_v6  ;;  %v9580_v11 = vsel %vm973_vm0, %v1028_v23, %v1029_v39  ;;  %v8666_v23 = vld [vmem:[%s12766_s3 + $0x60] sm:$0xff] }
 0x182   : > { %v2262_v19 = vpack.c.bf16 %v2041_v12, %v2041_v12  ;;  %v8668_v12 = vld [vmem:[%s12766_s3 + $0x70] sm:$0xff] }
 0x183   : > { %1072 = vrot.lane.b32.xlu0 %v9399_v34, %s8790_s23  ;;  %3887 = vmatpush.bf16.msra.mxu2 %v8668_v12 }
 0x184   : > { %v2350_v41 = vunpack.c.l.b16 %v2262_v19  ;;  %1335 = vrot.lane.b32.xlu2 %v9542_v60, %s8795_s28 }
 0x185   : > { %v1267_v21 = vpop.permute.xlu0 %1266 }
 0x186   : > { %v2389_v54 = vpack.c.b16 %v2350_v41, %v2349_v3  ;;  %v1643_v18 = vsel %vm1619_vm9, %v1598_v22, %v1267_v21  ;;  %v1859_v29 = vpop.f32.mrf.mxu0  ;;  %v9552_v8 = vpop.permute.xlu2 %1174 }
 0x187   : > { %v1688_v61 = vsel %vm1664_vm10, %v1643_v18, %v1326_v7  ;;  %v1860_v31 = vadd.f32 %v9439_v16, %v1859_v29  ;;  %1121 = vrot.lane.b32.xlu1 %v9456_v13, %s8788_s21  ;;  %v1065_v34 = vpop.permute.xlu1 %1064  ;;  %v9597_v7 = vsel %vm973_vm0, %v2981_v55, %v2982_v17  ;;  %v639_v18 = vunpack.c.l.b16 %v475_v56  ;;  %v8667_v29 = vld [vmem:[%s12766_s3 + $0x68] sm:$0xff] }
 0x188   : > { %v2436_v32 = vshrl.u32 %v2389_v54, 16  ;;  %v1733_v36 = vsel %vm1709_vm11, %v1688_v61, %v9470_v51  ;;  %v2439_v33 = vshll.u32 %v2389_v54, 16  ;;  %3888 = vmatpush.bf16.msra.mxu2 %v8667_v29 }
 0x189   : > { %8343 = vmatmul.msk.bf16.gmra.mxu0 %vm12776_vm12, %v1733_v36  ;;  %v1998_v27 = vmul.f32 0.2, %v1860_v31  ;;  %vm1954_vm2 = vcmp.gt.f32.partialorder %v1860_v31, 0.0  ;;  %v661_v36 = vpack.c.b16 %v639_v18, %v639_v18 }
 0x18a   : > { %v2438_v37 = vrot.slane %v2436_v32, 7  ;;  %v9622_v32 = vld [vmem:[%s8881_s20 + $0xe4] sm:$0xff] }
 0x18b   : > { %1227 = vrot.lane.b32.xlu0 %v9475_v62, %s8792_s25  ;;  %v2042_v51 = vsel %vm1954_vm2, %v1860_v31, %v1998_v27  ;;  %v901_v58 = vshll.u32 %v661_v36, 16 }
 0x18c   : > { %v2441_v43 = vor.u32 %v2439_v33, %v2438_v37  ;;  %v9585_v57 = vsel %vm9371_vm15, %v2438_v37, 0  ;;  %v2263_v59 = vpack.c.bf16 %v2042_v51, %v2042_v51  ;;  %3889 = vmatpush.bf16.msra.mxu2 %v8666_v23 }
 0x18d   : > { %v954_v13 = vpop.permute.xlu0 %953  ;;  %v2708_v6 = vshll.u32 %v9585_v57, 16  ;;  %v903_v56 = vrot.slane %v901_v58, 1 }
 0x18e   : > { %v1861_v1 = vpop.f32.mrf.mxu0  ;;  %v9567_v47 = vsel %vm9371_vm15, 0, %v2441_v43  ;;  %v1420_v30 = vsel %vm1394_vm4, %v9194_v10, %v954_v13  ;;  %v9577_v0 = vpop.permute.xlu2 %1329  ;;  %v2351_v19 = vunpack.c.l.b16 %v2263_v59 }
 0x18f   : > { %v1862_v48 = vadd.f32 %v9439_v16, %v1861_v1  ;;  %1276 = vrot.lane.b32.xlu1 %v9494_v35, %s8789_s22  ;;  %3174 = vrot.lane.b32.xlu2 %v9567_v47, %s8799_s29  ;;  %v1220_v50 = vpop.permute.xlu1 %1219  ;;  %v2703_v40 = vshll.u32 %v9567_v47, 16  ;;  %v1465_v49 = vsel %vm12775_vm5, %v1420_v30, %v1065_v34  ;;  %v2701_v45 = vshrl.u32 %v9567_v47, 16 }
 0x190   : > { %v1510_v42 = vsel %vm1484_vm6, %v1465_v49, %v9487_v2  ;;  %v2710_v54 = vrot.slane %v2708_v6, 1  ;;  %v1422_v49 = vsel %vm1394_vm4, %v9236_v44, %v9536_v52 }
 0x191   : > { %vm1955_vm3 = vcmp.gt.f32.partialorder %v1862_v48, 0.0  ;;  %v1999_v15 = vmul.f32 0.2, %v1862_v48  ;;  %v2705_v10 = vrot.slane %v2703_v40, 1 }
 0x193   : > { %v2043_v9 = vsel %vm1955_vm3, %v1862_v48, %v1999_v15  ;;  %1382 = vrot.lane.b32.xlu0 %v9580_v11, %s8791_s24  ;;  %v2706_v3 = vor.u32 %v2705_v10, %v2701_v45  ;;  %v896_v48 = vshll.u32 %v9622_v32, 16  ;;  %v894_v15 = vshrl.u32 %v9622_v32, 16 }
 0x194   : > { %v2264_v63 = vpack.c.bf16 %v2043_v9, %v2043_v9 }
 0x195   : > { %v1173_v5 = vpop.permute.xlu0 %1172  ;;  %v9617_v34 = vsel %vm664_vm1, %v2706_v3, %v2710_v54  ;;  %v898_v55 = vrot.slane %v896_v48, 1  ;;  %v8663_v3 = vld [vmem:[%s12766_s3 + $0x48] sm:$0xff] }
 0x196   : > { %v2352_v14 = vunpack.c.l.b16 %v2264_v63  ;;  %v1555_v41 = vsel %vm1529_vm7, %v1510_v42, %v1173_v5  ;;  %v9614_v31 = vpop.permute.xlu2 %1068 }
 0x197   : > { %3133 = vrot.lane.b32.xlu1 %v9597_v7, %s8800_s12  ;;  %1074 = vrot.lane.b32.xlu2 %v9475_v62, %s8790_s23  ;;  %v1375_v22 = vpop.permute.xlu1 %1374  ;;  %v1600_v61 = vsel %vm1574_vm8, %v1555_v41, %v1220_v50  ;;  %v1032_v50 = vrot.slane %v661_v36, 1  ;;  %v899_v52 = vor.u32 %v898_v55, %v894_v15 }
 0x198   : > { %v2390_v21 = vpack.c.b16 %v2352_v14, %v2351_v19  ;;  %v1645_v27 = vsel %vm1619_vm9, %v1600_v61, %v9512_v46  ;;  %v1031_v46 = vrot.slane %v9622_v32, 1  ;;  %v8662_v61 = vld [vmem:[%s12766_s3 + $0x40] sm:$0xff] }
 0x199   : > { %v9680_v18 = vsel %vm664_vm1, %v899_v52, %v903_v56 }
 0x19a   : > { %v2443_v2 = vshrl.u32 %v2390_v21, 16  ;;  %v2446_v62 = vshll.u32 %v2390_v21, 16  ;;  %v9652_v10 = vsel %vm973_vm0, %v1031_v46, %v1032_v50  ;;  %v478_v46 = vld [vmem:[%s8881_s20 + $0xf8] sm:$0x1] }
 0x19b   : > { %3226 = vrot.lane.b32.xlu0 %v9617_v34, %s8798_s19  ;;  %v640_v58 = vunpack.c.l.b16 %v478_v46 }
 0x19c   : > { %v2445_v37 = vrot.slane %v2443_v2, 7 }
 0x19d   : > { %v1864_v33 = vpop.f32.mrf.mxu0  ;;  %v1328_v43 = vpop.permute.xlu0 %1327 }
 0x19e   : > { %v1690_v39 = vsel %vm1664_vm10, %v1645_v27, %v1328_v43  ;;  %v2448_v13 = vor.u32 %v2446_v62, %v2445_v37  ;;  %v9649_v59 = vpop.permute.xlu2 %1223  ;;  %v9659_v63 = vsel %vm9371_vm15, %v2445_v37, 0  ;;  %v1865_v45 = vadd.f32 %v9439_v16, %v1864_v33 }
 0x19f   : > { %v1735_v1 = vsel %vm1709_vm11, %v1690_v39, %v1375_v22  ;;  %963 = vrot.lane.b32.xlu1 %v9491_v25, %s8793_s26  ;;  %1229 = vrot.lane.b32.xlu2 %v9580_v11, %s8792_s25  ;;  %v1116_v51 = vpop.permute.xlu1 %1115  ;;  %v8665_v25 = vld [vmem:[%s12766_s3 + $0x58] sm:$0xff]  ;;  %v2720_v42 = vshll.u32 %v9659_v63, 16  ;;  %v2984_v27 = vrot.slane %v9567_v47, 1 }
 0x1a0   : > { %8344 = vmatmul.msk.bf16.gmra.mxu0 %vm12776_vm12, %v1735_v1  ;;  %v9640_v40 = vsel %vm9371_vm15, 0, %v2448_v13  ;;  %3890 = vmatpush.bf16.msra.mxu2 %v8665_v25  ;;  %v2000_v41 = vmul.f32 0.2, %v1865_v45  ;;  %vm1956_vm14 = vcmp.gt.f32.partialorder %v1865_v45, 0.0  ;;  %v2985_v13 = vrot.slane %v9585_v57, 1 }
 0x1a1   : > { %v2715_v30 = vshll.u32 %v9640_v40, 16  ;;  %v2713_v14 = vshrl.u32 %v9640_v40, 16  ;;  %v2722_v29 = vrot.slane %v2720_v42, 1 }
 0x1a2   : > { %v2044_v62 = vsel %vm1956_vm14, %v1865_v45, %v2000_v41  ;;  %vm3307_vm14 = vcmask 523264  }
 0x1a3   : > { %1123 = vrot.lane.b32.xlu0 %v9494_v35, %s8788_s21  ;;  %v8664_v35 = vld [vmem:[%s12766_s3 + $0x50] sm:$0xff]  ;;  %v2717_v5 = vrot.slane %v2715_v30, 1  ;;  %v2265_v1 = vpack.c.bf16 %v2044_v62, %v2044_v62  ;;  %v2987_v62 = vrot.slane %v9640_v40, 1 }
 0x1a4   : > { %3891 = vmatpush.bf16.msra.mxu2 %v8664_v35  ;;  %v9718_v35 = vld [vmem:[%s8881_s20 + $0xf0] sm:$0xff] }
 0x1a5   : > { %v1866_v9 = vpop.f32.mrf.mxu0  ;;  %v1067_v17 = vpop.permute.xlu0 %1066  ;;  %v2718_v22 = vor.u32 %v2717_v5, %v2713_v14  ;;  %v2353_v25 = vunpack.c.l.b16 %v2265_v1  ;;  %v906_v14 = vshrl.u32 %v9718_v35, 16 }
 0x1a6   : > { %v1867_v6 = vadd.f32 %v9439_v16, %v1866_v9  ;;  %v1467_v19 = vsel %vm12775_vm5, %v1422_v49, %v1067_v17  ;;  %v9685_v36 = vpop.permute.xlu2 %1378 }
 0x1a7   : > { %1182 = vrot.lane.b32.xlu1 %v9542_v60, %s8794_s27  ;;  %1384 = vrot.lane.b32.xlu2 %v9652_v10, %s8791_s24  ;;  %v1271_v44 = vpop.permute.xlu1 %1270  ;;  %v1512_v21 = vsel %vm1484_vm6, %v1467_v19, %v1116_v51  ;;  %v9690_v33 = vsel %vm664_vm1, %v2718_v22, %v2722_v29  ;;  %v9701_v51 = vsel %vm973_vm0, %v2984_v27, %v2985_v13 }
 0x1a8   : > { %v2001_v12 = vmul.f32 0.2, %v1867_v6  ;;  %vm1957_vm13 = vcmp.gt.f32.partialorder %v1867_v6, 0.0  ;;  %3892 = vmatpush.bf16.msra.mxu2 %v8663_v3  ;;  %v1557_v37 = vsel %vm1529_vm7, %v1512_v21, %v9552_v8 }
 0x1aa   : > { %v2045_v54 = vsel %vm1957_vm13, %v1867_v6, %v2001_v12  ;;  %v908_v6 = vshll.u32 %v9718_v35, 16  ;;  %vm12774_vm13 = vcmask 261120  }
 0x1ab   : > { %1278 = vrot.lane.b32.xlu0 %v9622_v32, %s8789_s22  ;;  %v2266_v43 = vpack.c.bf16 %v2045_v54, %v2045_v54 }
 0x1ac   : > { %3893 = vmatpush.bf16.msra.mxu2 %v8662_v61  ;;  %v910_v42 = vrot.slane %v908_v6, 1 }
 0x1ad   : > { %v1222_v2 = vpop.permute.xlu0 %1221  ;;  %v2354_v48 = vunpack.c.l.b16 %v2266_v43 }
 0x1ae   : > { %v1602_v23 = vsel %vm1574_vm8, %v1557_v37, %v1222_v2  ;;  %v9714_v17 = vpop.permute.xlu2 %3222  ;;  %v911_v37 = vor.u32 %v910_v42, %v906_v14 }
 0x1af   : > { %1337 = vrot.lane.b32.xlu1 %v9680_v18, %s8795_s28  ;;  %3228 = vrot.lane.b32.xlu2 %v9690_v33, %s8798_s19  ;;  %v958_v39 = vpop.permute.xlu1 %957  ;;  %v1647_v8 = vsel %vm1619_vm9, %v1602_v23, %v1271_v44  ;;  %v2391_v49 = vpack.c.b16 %v2354_v48, %v2353_v25 }
 0x1b0   : > { %v1692_v57 = vsel %vm1664_vm10, %v1647_v8, %v9577_v0  ;;  %v9720_v0 = vpack.c.b16 %v640_v58, %v640_v58  ;;  %v1424_v44 = vsel %vm1394_vm4, %v9293_v26, %v958_v39  ;;  %v2988_v39 = vrot.slane %v9659_v63, 1 }
 0x1b1   : > { %v2450_v5 = vshrl.u32 %v2391_v49, 16  ;;  %v1469_v19 = vsel %vm12775_vm5, %v1424_v44, %v9614_v31  ;;  %v2453_v54 = vshll.u32 %v2391_v49, 16  ;;  %v1034_v58 = vrot.slane %v9718_v35, 1 }
 0x1b2   : > { %v913_v3 = vshll.u32 %v9720_v0, 16  ;;  %v1035_v49 = vrot.slane %v9720_v0, 1 }
 0x1b3   : > { %3135 = vrot.lane.b32.xlu0 %v9701_v51, %s8800_s12  ;;  %v2452_v22 = vrot.slane %v2450_v5, 7 }
 0x1b4   : > { %v1869_v50 = vpop.f32.mrf.mxu0  ;;  %v9777_v0 = vsel %vm973_vm0, %v1034_v58, %v1035_v49  ;;  %v8670_v49 = vld [vmem:[%s12766_s3 + $0x80] sm:$0xff] }
 0x1b5   : > { %v1870_v30 = vadd.f32 %v9439_v16, %v1869_v50  ;;  %v1377_v15 = vpop.permute.xlu0 %1376  ;;  %v2455_v27 = vor.u32 %v2453_v54, %v2452_v22  ;;  %v9748_v50 = vsel %vm973_vm0, %v2987_v62, %v2988_v39 }
 0x1b6   : > { %v1737_v55 = vsel %vm1709_vm11, %v1692_v57, %v1377_v15  ;;  %v9737_v29 = vpop.permute.xlu2 %1119 }
 0x1b7   : > { %3176 = vrot.lane.b32.xlu1 %v9640_v40, %s8799_s29  ;;  %1125 = vrot.lane.b32.xlu2 %v9622_v32, %s8788_s21  ;;  %v1177_v9 = vpop.permute.xlu1 %1176  ;;  %v2002_v45 = vmul.f32 0.2, %v1870_v30  ;;  %vm1958_vm2 = vcmp.gt.f32.partialorder %v1870_v30, 0.0  ;;  %v9761_v57 = vsel %vm9371_vm15, 0, %v2455_v27 }
 0x1b8   : > { %8345 = vmatmul.msk.bf16.gmra.mxu0 %vm12776_vm12, %v1737_v55  ;;  %v2990_v6 = vrot.slane %v9761_v57, 1  ;;  %v2727_v5 = vshll.u32 %v9761_v57, 16 }
 0x1b9   : > { %v2046_v52 = vsel %vm1958_vm2, %v1870_v30, %v2002_v45 }
 0x1ba   : > { %v2267_v21 = vpack.c.bf16 %v2046_v52, %v2046_v52 }
 0x1bb   : > { %965 = vrot.lane.b32.xlu0 %v9542_v60, %s8793_s26 }
 0x1bc   : > { %v1871_v32 = vpop.f32.mrf.mxu0  ;;  %v2355_v43 = vunpack.c.l.b16 %v2267_v21 }
 0x1bd   : > { %v1872_v56 = vadd.f32 %v9439_v16, %v1871_v32  ;;  %v1118_v12 = vpop.permute.xlu0 %1117 }
 0x1be   : > { %v1514_v26 = vsel %vm1484_vm6, %v1469_v19, %v1118_v12 }
 0x1bf   : > { %vm1959_vm3 = vcmp.gt.f32.partialorder %v1872_v56, 0.0  ;;  %v2003_v41 = vmul.f32 0.2, %v1872_v56  ;;  %1076 = vrot.lane.b32.xlu1 %v9580_v11, %s8790_s23  ;;  %1280 = vrot.lane.b32.xlu2 %v9718_v35, %s8789_s22  ;;  %v1332_v60 = vpop.permute.xlu1 %1331  ;;  %v1559_v61 = vsel %vm1529_vm7, %v1514_v26, %v1177_v9  ;;  %v915_v11 = vrot.slane %v913_v3, 1 }
 0x1c0   : > { %v1604_v13 = vsel %vm1574_vm8, %v1559_v61, %v9649_v59  ;;  %v2636_v9 = vsel %vm9371_vm15, %v2452_v22, 0  ;;  %v2729_v3 = vrot.slane %v2727_v5, 1 }
 0x1c1   : > { %v2047_v31 = vsel %vm1959_vm3, %v1872_v56, %v2003_v41  ;;  %v9757_v59 = vsel %vm664_vm1, %v911_v37, %v915_v11  ;;  %v2991_v52 = vrot.slane %v2636_v9, 1  ;;  %vm3348_vm3 = vcmask 785408  }
 0x1c2   : > { %v2268_v2 = vpack.c.bf16 %v2047_v31, %v2047_v31  ;;  %v2725_v31 = vshrl.u32 %v9761_v57, 16 }
 0x1c3   : > { %1184 = vrot.lane.b32.xlu0 %v9680_v18, %s8794_s27  ;;  %v9782_v42 = vsel %vm973_vm0, %v2990_v6, %v2991_v52 }
 0x1c4   : > { %v2356_v23 = vunpack.c.l.b16 %v2268_v2  ;;  %v2732_v2 = vshll.u32 %v2636_v9, 16  ;;  %v2730_v27 = vor.u32 %v2729_v3, %v2725_v31 }
 0x1c5   : > { %v1273_v1 = vpop.permute.xlu0 %1272 }
 0x1c6   : > { %v2392_v8 = vpack.c.b16 %v2356_v23, %v2355_v43  ;;  %v1649_v48 = vsel %vm1619_vm9, %v1604_v13, %v1273_v1  ;;  %v1874_v46 = vpop.f32.mrf.mxu0  ;;  %v2734_v13 = vrot.slane %v2732_v2, 1 }
 0x1c7   : > { %v1694_v25 = vsel %vm1664_vm10, %v1649_v48, %v1332_v60  ;;  %v1875_v30 = vadd.f32 %v9439_v16, %v1874_v46  ;;  %1231 = vrot.lane.b32.xlu1 %v9652_v10, %s8792_s25  ;;  %3137 = vrot.lane.b32.xlu2 %v9748_v50, %s8800_s12  ;;  %v3171_v63 = vpop.permute.xlu1 %3170 }
 0x1c8   : > { %v2457_v15 = vshrl.u32 %v2392_v8, 16  ;;  %v1739_v55 = vsel %vm1709_vm11, %v1694_v25, %v9685_v36  ;;  %v2460_v45 = vshll.u32 %v2392_v8, 16  ;;  %v9774_v36 = vpop.permute.xlu2 %1274 }
 0x1c9   : > { %8346 = vmatmul.msk.bf16.gmra.mxu0 %vm12776_vm12, %v1739_v55  ;;  %v2004_v32 = vmul.f32 0.2, %v1875_v30  ;;  %vm1960_vm2 = vcmp.gt.f32.partialorder %v1875_v30, 0.0 }
 0x1ca   : > { %v2459_v44 = vrot.slane %v2457_v15, 7 }
 0x1cb   : > { %1339 = vrot.lane.b32.xlu0 %v9757_v59, %s8795_s28  ;;  %v2048_v26 = vsel %vm1960_vm2, %v1875_v30, %v2004_v32 }
 0x1cc   : > { %v2462_v56 = vor.u32 %v2460_v45, %v2459_v44  ;;  %v2637_v62 = vsel %vm9371_vm15, %v2459_v44, 0  ;;  %v2269_v11 = vpack.c.bf16 %v2048_v26, %v2048_v26  ;;  %v8755_v45 = vld [vmem:[%s8881_s20 + $0xb4] sm:$0xff] }
 0x1cd   : > { %v3130_v12 = vpop.permute.xlu0 %3129  ;;  %v2994_v1 = vrot.slane %v2637_v62, 1  ;;  %v2744_v58 = vshll.u32 %v2637_v62, 16 }
 0x1ce   : > { %v3411_v19 = vsel %vm12774_vm13, %v9417_v20, %v3130_v12  ;;  %v1876_v14 = vpop.f32.mrf.mxu0  ;;  %v9786_v41 = vsel %vm9371_vm15, 0, %v2462_v56  ;;  %v2357_v46 = vunpack.c.l.b16 %v2269_v11 }
 0x1cf   : > { %v3470_v60 = vsel %vm3307_vm14, %v3411_v19, %v3171_v63  ;;  %v1877_v22 = vadd.f32 %v9439_v16, %v1876_v14  ;;  %1386 = vrot.lane.b32.xlu1 %v9777_v0, %s8791_s24  ;;  %3139 = vrot.lane.b32.xlu2 %v9782_v42, %s8800_s12  ;;  %v1071_v54 = vpop.permute.xlu1 %1070  ;;  %v2739_v37 = vshll.u32 %v9786_v41, 16  ;;  %v2993_v43 = vrot.slane %v9786_v41, 1 }
 0x1d0   : > { %v3510_v21 = vsel %vm3348_vm3, %v3470_v60, %v9714_v17  ;;  %v8671_v17 = vld [vmem:[%s12766_s3 + $0x88] sm:$0xff]  ;;  %v9806_v25 = vpop.permute.xlu2 %3131  ;;  %v9809_v63 = vsel %vm664_vm1, %v2730_v27, %v2734_v13  ;;  %v2737_v55 = vshrl.u32 %v9786_v41, 16  ;;  %v2746_v56 = vrot.slane %v2744_v58, 1 }
 0x1d1   : > { %vm1961_vm13 = vcmp.gt.f32.partialorder %v1877_v22, 0.0  ;;  %v2005_v61 = vmul.f32 0.2, %v1877_v22  ;;  %3894 = vmatmul.bf16.vlgmr.msra.gmra.mxu2 %v3510_v21  ;;  %v2741_v48 = vrot.slane %v2739_v37, 1  ;;  %8710 = vmatpush.bf16.msra.mxu3 %v8671_v17  ;;  %v9812_v15 = vsel %vm973_vm0, %v2993_v43, %v2994_v1 }
 0x1d2   : > { %4001 = vmatpush.bf16.msrb.mxu2 %v8671_v17 }
 0x1d3   : > { %v2049_v23 = vsel %vm1961_vm13, %v1877_v22, %v2005_v61  ;;  %3178 = vrot.lane.b32.xlu0 %v9761_v57, %s8799_s29  ;;  %v2742_v5 = vor.u32 %v2741_v48, %v2737_v55 }
 0x1d4   : > { %v2270_v39 = vpack.c.bf16 %v2049_v23, %v2049_v23 }
 0x1d5   : > { %v960_v8 = vpop.permute.xlu0 %959  ;;  %8711 = vmatpush.bf16.msra.mxu3 %v8670_v49  ;;  %v9828_v26 = vsel %vm664_vm1, %v2742_v5, %v2746_v56 }
 0x1d6   : > { %v2358_v30 = vunpack.c.l.b16 %v2270_v39  ;;  %v1426_v6 = vsel %vm1394_vm4, %v8755_v45, %v960_v8  ;;  %4002 = vmatpush.bf16.msrb.mxu2 %v8670_v49 }
 0x1d7   : > { %3230 = vrot.lane.b32.xlu1 %v9809_v63, %s8798_s19  ;;  %3141 = vrot.lane.b32.xlu2 %v9812_v15, %s8800_s12  ;;  %v1226_v32 = vpop.permute.xlu1 %1225  ;;  %v1471_v52 = vsel %vm12775_vm5, %v1426_v6, %v1071_v54 }
 0x1d8   : > { %v2393_v9 = vpack.c.b16 %v2358_v30, %v2357_v46  ;;  %v1516_v22 = vsel %vm1484_vm6, %v1471_v52, %v9737_v29  ;;  %v962_v2 = vpop.permute.xlu2 %961 }
 0x1da   : > { %v2464_v44 = vshrl.u32 %v2393_v9, 16  ;;  %v2467_v19 = vshll.u32 %v2393_v9, 16 }
 0x1db   : > { %3180 = vrot.lane.b32.xlu0 %v9786_v41, %s8799_s29 }
 0x1dc   : > { %v2466_v12 = vrot.slane %v2464_v44, 7 }
 0x1dd   : > { %v1879_v14 = vpop.f32.mrf.mxu0  ;;  %v1179_v3 = vpop.permute.xlu0 %1178 }
 0x1de   : > { %v1880_v60 = vadd.f32 %v9439_v16, %v1879_v14  ;;  %v2469_v21 = vor.u32 %v2467_v19, %v2466_v12  ;;  %v2638_v54 = vsel %vm9371_vm15, %v2466_v12, 0  ;;  %v1561_v31 = vsel %vm1529_vm7, %v1516_v22, %v1179_v3 }
 0x1df   : > { %3232 = vrot.lane.b32.xlu1 %v9828_v26, %s8798_s19  ;;  %v2997_v37 = vrot.slane %v2638_v54, 1  ;;  %v2756_v29 = vshll.u32 %v2638_v54, 16  ;;  %v1606_v43 = vsel %vm1574_vm8, %v1561_v31, %v1226_v32  ;;  %v1381_v13 = vpop.permute.xlu1 %1380 }
 0x1e0   : > { %v9840_v61 = vsel %vm9371_vm15, 0, %v2469_v21  ;;  %v2006_v27 = vmul.f32 0.2, %v1880_v60  ;;  %vm1962_vm13 = vcmp.gt.f32.partialorder %v1880_v60, 0.0  ;;  %v1651_v8 = vsel %vm1619_vm9, %v1606_v43, %v9774_v36  ;;  %v1181_v5 = vpop.permute.xlu2 %1180 }
 0x1e1   : > { %v2996_v62 = vrot.slane %v9840_v61, 1  ;;  %v2751_v11 = vshll.u32 %v9840_v61, 16  ;;  %v2749_v17 = vshrl.u32 %v9840_v61, 16  ;;  %v2758_v30 = vrot.slane %v2756_v29, 1 }
 0x1e2   : > { %v2050_v55 = vsel %vm1962_vm13, %v1880_v60, %v2006_v27  ;;  %vm12814_vm13 = vcmask 261120  }
 0x1e3   : > { %3182 = vrot.lane.b32.xlu0 %v9840_v61, %s8799_s29  ;;  %v9848_v23 = vsel %vm973_vm0, %v2996_v62, %v2997_v37  ;;  %v2753_v39 = vrot.slane %v2751_v11, 1  ;;  %v2271_v36 = vpack.c.bf16 %v2050_v55, %v2050_v55  ;;  %v3414_v19 = vsel %vm12814_vm13, %v9417_v20, %v9806_v25  ;;  %v8756_v25 = vld [vmem:[%s8881_s20 + $0xc0] sm:$0xff] }
 0x1e4   : > { %3143 = vrot.lane.b32.xlu2 %v9848_v23, %s8800_s12 }
 0x1e5   : > { %v1881_v1 = vpop.f32.mrf.mxu0  ;;  %v1334_v48 = vpop.permute.xlu0 %1333  ;;  %v2754_v46 = vor.u32 %v2753_v39, %v2749_v17  ;;  %v2359_v52 = vunpack.c.l.b16 %v2271_v36  ;;  %v1428_v17 = vsel %vm1394_vm4, %v8756_v25, %v962_v2 }
 0x1e6   : > { %v1882_v58 = vadd.f32 %v9439_v16, %v1881_v1  ;;  %v1696_v49 = vsel %vm1664_vm10, %v1651_v8, %v1334_v48 }
 0x1e7   : > { %v9858_v9 = vsel %vm664_vm1, %v2754_v46, %v2758_v30  ;;  %v1741_v45 = vsel %vm1709_vm11, %v1696_v49, %v1381_v13 }
 0x1e8   : > { %vm1963_vm2 = vcmp.gt.f32.partialorder %v1882_v58, 0.0  ;;  %v2007_v6 = vmul.f32 0.2, %v1882_v58  ;;  %3234 = vrot.lane.b32.xlu1 %v9858_v9, %s8798_s19  ;;  %8347 = vmatmul.msk.bf16.vlgmr.msra.gmra.mxu1 %vm12776_vm12, %v1741_v45  ;;  %v1336_v62 = vpop.permute.xlu2 %1335 }
 0x1ea   : > { %v2051_v44 = vsel %vm1963_vm2, %v1882_v58, %v2007_v6 }
 0x1eb   : > { %v2272_v32 = vpack.c.bf16 %v2051_v44, %v2051_v44 }
 0x1ed   : > { %v2360_v56 = vunpack.c.l.b16 %v2272_v32  ;;  %v3173_v12 = vpop.permute.xlu0 %3172 }
 0x1ee   : > { %v3472_v60 = vsel %vm3307_vm14, %v3414_v19, %v3173_v12 }
 0x1ef   : > { %v2394_v14 = vpack.c.b16 %v2360_v56, %v2359_v52 }
 0x1f0   : > { %v3175_v12 = vpop.permute.xlu2 %3174 }
 0x1f1   : > { %v2471_v3 = vshrl.u32 %v2394_v14, 16  ;;  %v3225_v22 = vpop.permute.xlu1 %3224  ;;  %v2474_v31 = vshll.u32 %v2394_v14, 16 }
 0x1f2   : > { %v3513_v21 = vsel %vm3348_vm3, %v3472_v60, %v3225_v22 }
 0x1f3   : > { %v2473_v54 = vrot.slane %v2471_v3, 7  ;;  %3899 = vmatmul.bf16.gmra.mxu2 %v3513_v21 }
 0x1f4   : > { %v1884_v37 = vpop.f32.mrf.mxu0 }
 0x1f5   : > { %v1885_v11 = vadd.f32 %v9439_v16, %v1884_v37  ;;  %v1073_v29 = vpop.permute.xlu0 %1072  ;;  %v2476_v27 = vor.u32 %v2474_v31, %v2473_v54  ;;  %v2639_v43 = vsel %vm9371_vm15, %v2473_v54, 0 }
 0x1f6   : > { %v3000_v1 = vrot.slane %v2639_v43, 1  ;;  %v2768_v48 = vshll.u32 %v2639_v43, 16  ;;  %v1473_v30 = vsel %vm12775_vm5, %v1428_v17, %v1073_v29 }
 0x1f7   : > { %v9876_v39 = vsel %vm9371_vm15, 0, %v2476_v27  ;;  %v2008_v46 = vmul.f32 0.2, %v1885_v11  ;;  %vm1964_vm2 = vcmp.gt.f32.partialorder %v1885_v11, 0.0 }
 0x1f8   : > { %3184 = vrot.lane.b32.xlu0 %v9876_v39, %s8799_s29  ;;  %v2999_v13 = vrot.slane %v9876_v39, 1  ;;  %v2763_v8 = vshll.u32 %v9876_v39, 16  ;;  %v2761_v58 = vshrl.u32 %v9876_v39, 16  ;;  %v2770_v36 = vrot.slane %v2768_v48, 1 }
 0x1f9   : > { %v1122_v55 = vpop.permute.xlu1 %1121  ;;  %v2052_v44 = vsel %vm1964_vm2, %v1885_v11, %v2008_v46 }
 0x1fa   : > { %v9884_v2 = vsel %vm973_vm0, %v2999_v13, %v3000_v1  ;;  %v2765_v49 = vrot.slane %v2763_v8, 1  ;;  %v1518_v32 = vsel %vm1484_vm6, %v1473_v30, %v1122_v55  ;;  %v2273_v3 = vpack.c.bf16 %v2052_v44, %v2052_v44 }
 0x1fb   : > { %3145 = vrot.lane.b32.xlu2 %v9884_v2, %s8800_s12  ;;  %8433 = vmatmul.msk.bf16.vlgmr.msra.gmra.mxu3 %vm12814_vm13, %v9884_v2  ;;  %v1563_v60 = vsel %vm1529_vm7, %v1518_v32, %v1181_v5  ;;  %v1075_v5 = vpop.permute.xlu2 %1074 }
 0x1fc   : > { %v1886_v45 = vpop.f32.mrf.mxu0  ;;  %v2766_v6 = vor.u32 %v2765_v49, %v2761_v58  ;;  %v2361_v11 = vunpack.c.l.b16 %v2273_v3 }
 0x1fd   : > { %v1887_v52 = vadd.f32 %v9439_v16, %v1886_v45  ;;  %v1228_v56 = vpop.permute.xlu0 %1227 }
 0x1fe   : > { %v9894_v19 = vsel %vm664_vm1, %v2766_v6, %v2770_v36  ;;  %v1608_v21 = vsel %vm1574_vm8, %v1563_v60, %v1228_v56  ;;  %v9918_v56 = vld [vmem:[%s12765_s2] ss:$0 sm:$0xff] }
 0x1ff   : > { %vm1965_vm5 = vcmp.gt.f32.partialorder %v1887_v52, 0.0  ;;  %v2009_v14 = vmul.f32 0.2, %v1887_v52  ;;  %3236 = vrot.lane.b32.xlu1 %v9894_v19, %s8798_s19 }
 0x201   : > { %v2053_v22 = vsel %vm1965_vm5, %v1887_v52, %v2009_v14  ;;  %v1277_v54 = vpop.permute.xlu1 %1276  ;;  %vm12815_vm5 = vmmov %vm12814_vm13 }
 0x202   : > { %v2274_v31 = vpack.c.bf16 %v2053_v22, %v2053_v22  ;;  %v1653_v37 = vsel %vm1619_vm9, %v1608_v21, %v1277_v54 }
 0x203   : > { %v1698_v43 = vsel %vm1664_vm10, %v1653_v37, %v1336_v62 }
 0x204   : > { %v2362_v29 = vunpack.c.l.b16 %v2274_v31 }
 0x205   : > { %v1383_v27 = vpop.permute.xlu0 %1382 }
 0x206   : > { %v2395_v25 = vpack.c.b16 %v2362_v29, %v2361_v11  ;;  %v1889_v17 = vpop.f32.mrf.mxu0  ;;  %v1743_v13 = vsel %vm1709_vm11, %v1698_v43, %v1383_v27  ;;  %v1230_v11 = vpop.permute.xlu2 %1229 }
 0x207   : > { %v1890_v1 = vadd.f32 %v9439_v16, %v1889_v17  ;;  %8348 = vmatmul.msk.bf16.gmra.mxu1 %vm12776_vm12, %v1743_v13 }
 0x208   : > { %v2478_v8 = vshrl.u32 %v2395_v25, 16  ;;  %v2481_v30 = vshll.u32 %v2395_v25, 16 }
 0x209   : > { %v3134_v48 = vpop.permute.xlu1 %3133  ;;  %v2010_v55 = vmul.f32 0.2, %v1890_v1  ;;  %vm1966_vm2 = vcmp.gt.f32.partialorder %v1890_v1, 0.0 }
 0x20a   : > { %v2480_v46 = vrot.slane %v2478_v8, 7  ;;  %v3417_v58 = vsel %vm12815_vm5, %v9534_v53, %v3134_v48 }
 0x20b   : > { %v3474_v6 = vsel %vm3307_vm14, %v3417_v58, %v3175_v12  ;;  %v2054_v16 = vsel %vm1966_vm2, %v1890_v1, %v2010_v55  ;;  %vm12816_vm2 = vcmask 48128  }
 0x20c   : > { %v2483_v49 = vor.u32 %v2481_v30, %v2480_v46  ;;  %v2640_v62 = vsel %vm9371_vm15, %v2480_v46, 0  ;;  %v2275_v29 = vpack.c.bf16 %v2054_v16, %v2054_v16  ;;  %v8758_v46 = vld [vmem:[%s8881_s20 + $0xcc] sm:$0xff] }
 0x20d   : > { %v3227_v45 = vpop.permute.xlu0 %3226  ;;  %v3003_v52 = vrot.slane %v2640_v62, 1  ;;  %v2780_v60 = vshll.u32 %v2640_v62, 16 }
 0x20e   : > { %v1891_v36 = vpop.f32.mrf.mxu0  ;;  %v9912_v44 = vsel %vm9371_vm15, 0, %v2483_v49  ;;  %v3516_v32 = vsel %vm3348_vm3, %v3474_v6, %v3227_v45  ;;  %v2363_v8 = vunpack.c.l.b16 %v2275_v29  ;;  %v1385_v6 = vpop.permute.xlu2 %1384 }
 0x20f   : > { %v1892_v14 = vadd.f32 %v9918_v56, %v1891_v36  ;;  %3186 = vrot.lane.b32.xlu0 %v9912_v44, %s8799_s29  ;;  %3904 = vmatmul.bf16.gmra.mxu2 %v3516_v32  ;;  %v3002_v12 = vrot.slane %v9912_v44, 1  ;;  %v2775_v3 = vshll.u32 %v9912_v44, 16  ;;  %v2773_v22 = vshrl.u32 %v9912_v44, 16 }
 0x210   : > { %v2782_v25 = vrot.slane %v2780_v60, 1 }
 0x211   : > { %vm1967_vm13 = vcmp.gt.f32.partialorder %v1892_v14, 0.0  ;;  %v2011_v21 = vmul.f32 0.2, %v1892_v14  ;;  %v964_v54 = vpop.permute.xlu1 %963  ;;  %v9927_v31 = vsel %vm973_vm0, %v3002_v12, %v3003_v52  ;;  %v2777_v37 = vrot.slane %v2775_v3, 1 }
 0x212   : > { %3147 = vrot.lane.b32.xlu2 %v9927_v31, %s8800_s12  ;;  %8434 = vmatmul.msk.bf16.gmra.mxu3 %vm12815_vm5, %v9927_v31  ;;  %v1430_v30 = vsel %vm1394_vm4, %v8758_v46, %v964_v54 }
 0x213   : > { %v2055_v27 = vsel %vm1967_vm13, %v1892_v14, %v2011_v21  ;;  %v2778_v43 = vor.u32 %v2777_v37, %v2773_v22  ;;  %v1475_v62 = vsel %vm12816_vm2, %v1430_v30, %v1075_v5 }
 0x214   : > { %v2276_v17 = vpack.c.bf16 %v2055_v27, %v2055_v27 }
 0x215   : > { %v1124_v13 = vpop.permute.xlu0 %1123  ;;  %v9934_v1 = vsel %vm664_vm1, %v2778_v43, %v2782_v25 }
 0x216   : > { %v2364_v48 = vunpack.c.l.b16 %v2276_v17  ;;  %3238 = vrot.lane.b32.xlu1 %v9934_v1, %s8798_s19  ;;  %v1520_v45 = vsel %vm1484_vm6, %v1475_v62, %v1124_v13 }
 0x218   : > { %v2396_v55 = vpack.c.b16 %v2364_v48, %v2363_v8 }
 0x219   : > { %v1183_v58 = vpop.permute.xlu1 %1182 }
 0x21a   : > { %v2485_v49 = vshrl.u32 %v2396_v55, 16  ;;  %v2488_v36 = vshll.u32 %v2396_v55, 16  ;;  %v1565_v32 = vsel %vm1529_vm7, %v1520_v45, %v1183_v58  ;;  %v3229_v45 = vpop.permute.xlu2 %3228 }
 0x21b   : > { %v1610_v22 = vsel %vm1574_vm8, %v1565_v32, %v1230_v11 }
 0x21c   : > { %v2487_v16 = vrot.slane %v2485_v49, 7 }
 0x21d   : > { %v1894_v52 = vpop.f32.mrf.mxu0  ;;  %v1279_v14 = vpop.permute.xlu0 %1278 }
 0x21e   : > { %v1895_v12 = vadd.f32 %v9918_v56, %v1894_v52  ;;  %v2490_v3 = vor.u32 %v2488_v36, %v2487_v16  ;;  %v2641_v60 = vsel %vm9371_vm15, %v2487_v16, 0  ;;  %v1655_v21 = vsel %vm1619_vm9, %v1610_v22, %v1279_v14 }
 0x21f   : > { %v3006_v29 = vrot.slane %v2641_v60, 1  ;;  %v2792_v43 = vshll.u32 %v2641_v60, 16 }
 0x220   : > { %v9950_v5 = vsel %vm9371_vm15, 0, %v2490_v3  ;;  %vm1968_vm13 = vcmp.gt.f32.partialorder %v1895_v12, 0.0  ;;  %v2012_v25 = vmul.f32 0.2, %v1895_v12 }
 0x221   : > { %v1338_v54 = vpop.permute.xlu1 %1337  ;;  %3188 = vrot.lane.b32.xlu0 %v9950_v5, %s8799_s29  ;;  %v3005_v37 = vrot.slane %v9950_v5, 1  ;;  %v2787_v27 = vshll.u32 %v9950_v5, 16  ;;  %v2785_v8 = vshrl.u32 %v9950_v5, 16  ;;  %v2794_v58 = vrot.slane %v2792_v43, 1 }
 0x222   : > { %v1700_v11 = vsel %vm1664_vm10, %v1655_v21, %v1338_v54  ;;  %v2056_v49 = vsel %vm1968_vm13, %v1895_v12, %v2012_v25 }
 0x223   : > { %v9958_v17 = vsel %vm973_vm0, %v3005_v37, %v3006_v29  ;;  %v1745_v13 = vsel %vm1709_vm11, %v1700_v11, %v1385_v6  ;;  %v2789_v48 = vrot.slane %v2787_v27, 1  ;;  %v2277_v36 = vpack.c.bf16 %v2056_v49, %v2056_v49  ;;  %v1126_v29 = vpop.permute.xlu2 %1125 }
 0x224   : > { %3149 = vrot.lane.b32.xlu2 %v9958_v17, %s8800_s12  ;;  %8349 = vmatmul.msk.bf16.gmra.mxu1 %vm12776_vm12, %v1745_v13  ;;  %vm12817_vm12 = vmmov %vm12815_vm5  ;;  %v8759_v13 = vld [vmem:[%s8881_s20 + $0xd8] sm:$0xff] }
 0x225   : > { %8435 = vmatmul.msk.bf16.gmra.mxu3 %vm12815_vm5, %v9958_v17  ;;  %v1896_v46 = vpop.f32.mrf.mxu0  ;;  %v3136_v30 = vpop.permute.xlu0 %3135  ;;  %v2790_v55 = vor.u32 %v2789_v48, %v2785_v8  ;;  %v2365_v22 = vunpack.c.l.b16 %v2277_v36 }
 0x226   : > { %v1897_v62 = vadd.f32 %v9918_v56, %v1896_v46  ;;  %v3420_v32 = vsel %vm12817_vm12, %v9617_v34, %v3136_v30  ;;  %vm12818_vm12 = vcmask 48128  }
 0x227   : > { %v9969_v6 = vsel %vm664_vm1, %v2790_v55, %v2794_v58 }
 0x228   : > { %vm1969_vm2 = vcmp.gt.f32.partialorder %v1897_v62, 0.0  ;;  %v2013_v16 = vmul.f32 0.2, %v1897_v62  ;;  %3240 = vrot.lane.b32.xlu1 %v9969_v6, %s8798_s19 }
 0x229   : > { %v3177_v52 = vpop.permute.xlu1 %3176 }
 0x22a   : > { %v2057_v14 = vsel %vm1969_vm2, %v1897_v62, %v2013_v16  ;;  %v3476_v12 = vsel %vm3307_vm14, %v3420_v32, %v3177_v52 }
 0x22b   : > { %v2278_v3 = vpack.c.bf16 %v2057_v14, %v2057_v14  ;;  %v3519_v60 = vsel %vm3348_vm3, %v3476_v12, %v3229_v45 }
 0x22c   : > { %3909 = vmatmul.bf16.gmra.mxu2 %v3519_v60 }
 0x22d   : > { %v2366_v21 = vunpack.c.l.b16 %v2278_v3  ;;  %v966_v54 = vpop.permute.xlu0 %965  ;;  %v1281_v3 = vpop.permute.xlu2 %1280 }
 0x22e   : > { %v1432_v8 = vsel %vm1394_vm4, %v8759_v13, %v966_v54 }
 0x22f   : > { %v2397_v37 = vpack.c.b16 %v2366_v21, %v2365_v22 }
 0x231   : > { %v2492_v27 = vshrl.u32 %v2397_v37, 16  ;;  %v1077_v43 = vpop.permute.xlu1 %1076  ;;  %v2495_v11 = vshll.u32 %v2397_v37, 16  ;;  %v481_v37 = vld [vmem:[%s8881_s20 + $0x104] sm:$0x1] }
 0x232   : > { %v1477_v62 = vsel %vm12818_vm12, %v1432_v8, %v1077_v43  ;;  %vm12819_vm12 = vcmask 220160  }
 0x233   : > { %v2494_v25 = vrot.slane %v2492_v27, 7  ;;  %v1522_v60 = vsel %vm1484_vm6, %v1477_v62, %v1126_v29 }
 0x235   : > { %v1899_v48 = vpop.f32.mrf.mxu0  ;;  %v1185_v46 = vpop.permute.xlu0 %1184  ;;  %v2497_v30 = vor.u32 %v2495_v11, %v2494_v25  ;;  %v2642_v55 = vsel %vm9371_vm15, %v2494_v25, 0 }
 0x236   : > { %v1900_v58 = vadd.f32 %v9918_v56, %v1899_v48  ;;  %v3009_v16 = vrot.slane %v2642_v55, 1  ;;  %v2804_v52 = vshll.u32 %v2642_v55, 16  ;;  %v1567_v54 = vsel %vm1529_vm7, %v1522_v60, %v1185_v46  ;;  %v10005_v48 = vld [vmem:[%s8881_s20 + $0xfc] sm:$0xff] }
 0x237   : > { %v9984_v49 = vsel %vm9371_vm15, 0, %v2497_v30  ;;  %v641_v55 = vunpack.c.l.b16 %v481_v37 }
 0x238   : > { %3190 = vrot.lane.b32.xlu0 %v9984_v49, %s8799_s29  ;;  %v3008_v45 = vrot.slane %v9984_v49, 1  ;;  %v2799_v32 = vshll.u32 %v9984_v49, 16  ;;  %v2014_v14 = vmul.f32 0.2, %v1900_v58  ;;  %vm1970_vm13 = vcmp.gt.f32.partialorder %v1900_v58, 0.0 }
 0x239   : > { %v1232_v36 = vpop.permute.xlu1 %1231  ;;  %v2797_v22 = vshrl.u32 %v9984_v49, 16  ;;  %v2806_v13 = vrot.slane %v2804_v52, 1  ;;  %v920_v52 = vshll.u32 %v10005_v48, 16  ;;  %v10019_v60 = vpack.c.b16 %v641_v55, %v641_v55 }
 0x23a   : > { %v9992_v12 = vsel %vm973_vm0, %v3008_v45, %v3009_v16  ;;  %v2801_v21 = vrot.slane %v2799_v32, 1  ;;  %v1612_v27 = vsel %vm1574_vm8, %v1567_v54, %v1232_v36  ;;  %v2058_v8 = vsel %vm1970_vm13, %v1900_v58, %v2014_v14  ;;  %vm12820_vm13 = vmmov %vm12815_vm5 }
 0x23b   : > { %3151 = vrot.lane.b32.xlu2 %v9992_v12, %s8800_s12  ;;  %8436 = vmatmul.msk.bf16.gmra.mxu3 %vm12815_vm5, %v9992_v12  ;;  %v1657_v46 = vsel %vm1619_vm9, %v1612_v27, %v1281_v3  ;;  %v2279_v45 = vpack.c.bf16 %v2058_v8, %v2058_v8  ;;  %v3138_v3 = vpop.permute.xlu2 %3137  ;;  %v918_v27 = vshrl.u32 %v10005_v48, 16 }
 0x23c   : > { %v2802_v11 = vor.u32 %v2801_v21, %v2797_v22  ;;  %v3423_v8 = vsel %vm12820_vm13, %v9690_v33, %v3138_v3 }
 0x23d   : > { %v1901_v43 = vpop.f32.mrf.mxu0  ;;  %v1340_v25 = vpop.permute.xlu0 %1339  ;;  %v2367_v22 = vunpack.c.l.b16 %v2279_v45 }
 0x23e   : > { %v1902_v29 = vadd.f32 %v9918_v56, %v1901_v43  ;;  %v10008_v30 = vsel %vm664_vm1, %v2802_v11, %v2806_v13  ;;  %v1702_v16 = vsel %vm1664_vm10, %v1657_v46, %v1340_v25  ;;  %v922_v43 = vrot.slane %v920_v52, 1 }
 0x23f   : > { %3242 = vrot.lane.b32.xlu1 %v10008_v30, %s8798_s19  ;;  %v925_v13 = vshll.u32 %v10019_v60, 16 }
 0x240   : > { %vm1971_vm2 = vcmp.gt.f32.partialorder %v1902_v29, 0.0  ;;  %v2015_v62 = vmul.f32 0.2, %v1902_v29  ;;  %v923_v46 = vor.u32 %v922_v43, %v918_v27 }
 0x241   : > { %v1387_v36 = vpop.permute.xlu1 %1386 }
 0x242   : > { %v2059_v58 = vsel %vm1971_vm2, %v1902_v29, %v2015_v62  ;;  %v1747_v32 = vsel %vm1709_vm11, %v1702_v16, %v1387_v36 }
 0x243   : > { %v2280_v14 = vpack.c.bf16 %v2059_v58, %v2059_v58  ;;  %8350 = vmatmul.msk.bf16.gmra.mxu1 %vm12819_vm12, %v1747_v32  ;;  %967 = vrot.lane.b32.xlu2 %v9680_v18, %s8793_s26  ;;  %v927_v58 = vrot.slane %v925_v13, 1  ;;  %vm12822_vm12 = vmmov %vm12820_vm13 }
 0x244   : > { %vm12823_vm13 = vmmov %vm12822_vm12 }
 0x245   : > { %v2368_v21 = vunpack.c.l.b16 %v2280_v14  ;;  %v3179_v54 = vpop.permute.xlu0 %3178 }
 0x246   : > { %v1904_v37 = vpop.f32.mrf.mxu0  ;;  %v3478_v29 = vsel %vm3307_vm14, %v3423_v8, %v3179_v54 }
 0x247   : > { %v2398_v25 = vpack.c.b16 %v2368_v21, %v2367_v22  ;;  %v1905_v11 = vadd.f32 %v9918_v56, %v1904_v37  ;;  %1127 = vrot.lane.b32.xlu1 %v9718_v35, %s8788_s21  ;;  %v10040_v21 = vsel %vm664_vm1, %v923_v46, %v927_v58 }
 0x249   : > { %v2499_v18 = vshrl.u32 %v2398_v25, 16  ;;  %v3231_v55 = vpop.permute.xlu1 %3230  ;;  %v2502_v16 = vshll.u32 %v2398_v25, 16  ;;  %v2016_v36 = vmul.f32 0.2, %v1905_v11  ;;  %vm1972_vm5 = vcmp.gt.f32.partialorder %v1905_v11, 0.0 }
 0x24a   : > { %v3522_v62 = vsel %vm3348_vm3, %v3478_v29, %v3231_v55 }
 0x24b   : > { %v2501_v45 = vrot.slane %v2499_v18, 7  ;;  %3914 = vmatmul.bf16.gmra.mxu2 %v3522_v62  ;;  %1186 = vrot.lane.b32.xlu2 %v9757_v59, %s8794_s27  ;;  %v2060_v14 = vsel %vm1972_vm5, %v1905_v11, %v2016_v36  ;;  %vm12826_vm5 = vmmov %vm12822_vm12 }
 0x24c   : > { %v2281_v11 = vpack.c.bf16 %v2060_v14, %v2060_v14 }
 0x24d   : > { %v2504_v32 = vor.u32 %v2502_v16, %v2501_v45  ;;  %v2643_v35 = vsel %vm9371_vm15, %v2501_v45, 0  ;;  %v3140_v16 = vpop.permute.xlu2 %3139  ;;  %v3181_v58 = vpop.permute.xlu0 %3180 }
 0x24e   : > { %v1906_v52 = vpop.f32.mrf.mxu0  ;;  %v2816_v54 = vshll.u32 %v2643_v35, 16  ;;  %v3012_v27 = vrot.slane %v2643_v35, 1  ;;  %v2369_v36 = vunpack.c.l.b16 %v2281_v11  ;;  %v3426_v14 = vsel %vm12823_vm13, %v9809_v63, %v3140_v16 }
 0x24f   : > { %v1907_v3 = vadd.f32 %v9918_v56, %v1906_v52  ;;  %v10037_v22 = vsel %vm9371_vm15, 0, %v2504_v32 }
 0x250   : > { %3192 = vrot.lane.b32.xlu0 %v10037_v22, %s8799_s29  ;;  %v3011_v37 = vrot.slane %v10037_v22, 1  ;;  %v2811_v43 = vshll.u32 %v10037_v22, 16  ;;  %v2809_v8 = vshrl.u32 %v10037_v22, 16  ;;  %v2818_v45 = vrot.slane %v2816_v54, 1 }
 0x251   : > { %vm1973_vm2 = vcmp.gt.f32.partialorder %v1907_v3, 0.0  ;;  %v2017_v25 = vmul.f32 0.2, %v1907_v3  ;;  %v3233_v52 = vpop.permute.xlu1 %3232  ;;  %v3480_v54 = vsel %vm3307_vm14, %v3426_v14, %v3181_v58 }
 0x252   : > { %v10047_v13 = vsel %vm973_vm0, %v3011_v37, %v3012_v27  ;;  %v2813_v18 = vrot.slane %v2811_v43, 1  ;;  %v3525_v27 = vsel %vm3348_vm3, %v3480_v54, %v3233_v52 }
 0x253   : > { %12821 = vst [vmem:[#allocation5_spill] sm:$0xff] %v10047_v13  ;;  %v2061_v29 = vsel %vm1973_vm2, %v1907_v3, %v2017_v25  ;;  %8437 = vmatmul.msk.bf16.gmra.mxu3 %vm12822_vm12, %v10047_v13  ;;  %1341 = vrot.lane.b32.xlu2 %v10040_v21, %s8795_s28  ;;  %vm12827_vm2 = vmmov %vm12826_vm5 }
 0x254   : > { %v2282_v55 = vpack.c.bf16 %v2061_v29, %v2061_v29  ;;  %v3895_v62 = vpop.f32.mrf.mxu2  ;;  %v2814_v46 = vor.u32 %v2813_v18, %v2809_v8 }
 0x255   : > { %v1037_v62 = vrot.slane %v10005_v48, 1  ;;  %v3183_v52 = vpop.permute.xlu0 %3182 }
 0x256   : > { %v2370_v32 = vunpack.c.l.b16 %v2282_v55  ;;  %v10055_v35 = vsel %vm664_vm1, %v2814_v46, %v2818_v45  ;;  %v1038_v46 = vrot.slane %v10019_v60, 1 }
 0x257   : > { %3244 = vrot.lane.b32.xlu1 %v10055_v35, %s8798_s19 }
 0x258   : > { %v2399_v3 = vpack.c.b16 %v2370_v32, %v2369_v36  ;;  %1078 = vrot.lane.b32.xlu0 %v9652_v10, %s8790_s23  ;;  %v3142_v36 = vpop.permute.xlu2 %3141  ;;  %v10087_v32 = vsel %vm973_vm0, %v1037_v62, %v1038_v46 }
 0x259   : > { %v3429_v54 = vsel %vm12827_vm2, %v9828_v26, %v3142_v36 }
 0x25a   : > { %v2506_v37 = vshrl.u32 %v2399_v3, 16  ;;  %v2509_v25 = vshll.u32 %v2399_v3, 16  ;;  %v3235_v3 = vpop.permute.xlu1 %3234 }
 0x25b   : > { %3919 = vmatmul.bf16.gmra.mxu2 %v3525_v27 }
 0x25c   : > { %v2508_v43 = vrot.slane %v2506_v37, 7  ;;  %v3897_v11 = vpop.f32.mrf.mxu2  ;;  %v3482_v37 = vsel %vm3307_vm14, %v3429_v54, %v3183_v52 }
 0x25e   : > { %v2511_v8 = vor.u32 %v2509_v25, %v2508_v43  ;;  %v2644_v18 = vsel %vm9371_vm15, %v2508_v43, 0  ;;  %v484_v25 = vld [vmem:[%s8881_s20 + $0x110] sm:$0x1] }
 0x25f   : > { %1282 = vrot.lane.b32.xlu1 %v10005_v48, %s8789_s22  ;;  %v3015_v55 = vrot.slane %v2644_v18, 1  ;;  %v2828_v27 = vshll.u32 %v2644_v18, 16  ;;  %v1134_v62 = vunpack.c.l.b16 %v484_v25 }
 0x260   : > { %1233 = vrot.lane.b32.xlu0 %v9777_v0, %s8792_s25  ;;  %v10073_v10 = vsel %vm9371_vm15, 0, %v2511_v8  ;;  %v3528_v8 = vsel %vm3348_vm3, %v3482_v37, %v3235_v3 }
 0x261   : > { %12824 = vst [vmem:[#allocation6_spill] sm:$0xff] %v10073_v10  ;;  %3194 = vrot.lane.b32.xlu2 %v10073_v10, %s8799_s29  ;;  %v3014_v29 = vrot.slane %v10073_v10, 1  ;;  %v2823_v16 = vshll.u32 %v10073_v10, 16  ;;  %v2821_v43 = vshrl.u32 %v10073_v10, 16  ;;  %v1135_v52 = vpack.c.b16 %v1134_v62, %v1134_v62 }
 0x263   : > { %v10081_v45 = vsel %vm973_vm0, %v3014_v29, %v3015_v55  ;;  %v2825_v60 = vrot.slane %v2823_v16, 1  ;;  %v10103_v55 = vld [vmem:[%s8881_s20 + $0x108] sm:$0xff]  ;;  %v2830_v16 = vrot.slane %v2828_v27, 1  ;;  %v1193_v37 = vrot.slane %v1135_v52, 1 }
 0x264   : > { %12825 = vst [vmem:[#allocation7_spill] sm:$0xff] %v10081_v45  ;;  %8438 = vmatmul.msk.bf16.gmra.mxu3 %vm12826_vm5, %v10081_v45  ;;  %v1139_v3 = vshll.u32 %v10103_v55, 16  ;;  %v1192_v54 = vrot.slane %v10103_v55, 1  ;;  %v1137_v27 = vshrl.u32 %v10103_v55, 16  ;;  %v1144_v25 = vshll.u32 %v1135_v52, 16  ;;  %vm12828_vm5 = vmmov %vm12827_vm2 }
 0x265   : > { %v1909_v58 = vpop.f32.mrf.mxu1  ;;  %v2826_v29 = vor.u32 %v2825_v60, %v2821_v43 }
 0x266   : > { %v1910_v14 = vadd.f32 %v9918_v56, %v1909_v58  ;;  %v1141_v43 = vrot.slane %v1139_v3, 1  ;;  %v1146_v52 = vrot.slane %v1144_v25, 1 }
 0x267   : > { %3153 = vrot.lane.b32.xlu1 %v10047_v13, %s8800_s12 }
 0x268   : > { %1388 = vrot.lane.b32.xlu0 %v10087_v32, %s8791_s24  ;;  %v2018_v11 = vmul.f32 0.2, %v1910_v14  ;;  %vm1974_vm12 = vcmp.gt.f32.partialorder %v1910_v14, 0.0 }
 0x269   : > { %1080 = vrot.lane.b32.xlu2 %v9777_v0, %s8790_s23  ;;  %v10109_v0 = vsel %vm664_vm1, %v2826_v29, %v2830_v16  ;;  %v10119_v16 = vsel %vm973_vm0, %v1192_v54, %v1193_v37 }
 0x26a   : > { %v2062_v36 = vsel %vm1974_vm12, %v1910_v14, %v2018_v11  ;;  %v3144_v11 = vpop.permute.xlu2 %3143  ;;  %vm12830_vm12 = vmmov %vm12827_vm2 }
 0x26b   : > { %3924 = vmatmul.bf16.gmra.mxu2 %v3528_v8  ;;  %v2283_v60 = vpack.c.bf16 %v2062_v36, %v2062_v36 }
 0x26d   : > { %v1911_v46 = vpop.f32.mrf.mxu1  ;;  %v2371_v8 = vunpack.c.l.b16 %v2283_v60 }
 0x26e   : > { %v1912_v18 = vadd.f32 %v9918_v56, %v1911_v46  ;;  %v3185_v46 = vpop.permute.xlu0 %3184 }
 0x26f   : > { %969 = vrot.lane.b32.xlu1 %v9757_v59, %s8793_s26 }
 0x270   : > { %vm1975_vm13 = vcmp.gt.f32.partialorder %v1912_v18, 0.0  ;;  %v2019_v58 = vmul.f32 0.2, %v1912_v18  ;;  %3246 = vrot.lane.b32.xlu0 %v10109_v0, %s8798_s19 }
 0x271   : > { %1235 = vrot.lane.b32.xlu2 %v10087_v32, %s8792_s25  ;;  %v3237_v10 = vpop.permute.xlu1 %3236 }
 0x272   : > { %v2063_v14 = vsel %vm1975_vm13, %v1912_v18, %v2019_v58  ;;  %v3432_v18 = vsel %vm12828_vm5, %v9858_v9, %v3144_v11  ;;  %v1142_v58 = vor.u32 %v1141_v43, %v1137_v27 }
 0x273   : > { %v2284_v59 = vpack.c.bf16 %v2063_v14, %v2063_v14  ;;  %v3484_v3 = vsel %vm3307_vm14, %v3432_v18, %v3185_v46 }
 0x274   : > { %v3531_v14 = vsel %vm3348_vm3, %v3484_v3, %v3237_v10 }
 0x275   : > { %v2372_v29 = vunpack.c.l.b16 %v2284_v59  ;;  %v1147_v59 = vsel %vm664_vm1, %v1142_v58, %v1146_v52  ;;  %v3146_v58 = vpop.permute.xlu2 %3145 }
 0x276   : > { %v3900_v62 = vpop.f32.mrf.mxu2 }
 0x277   : > { %v2400_v36 = vpack.c.b16 %v2372_v29, %v2371_v8  ;;  %1188 = vrot.lane.b32.xlu1 %v10040_v21, %s8794_s27 }
 0x278   : > { %1129 = vrot.lane.b32.xlu0 %v10005_v48, %s8788_s21 }
 0x279   : > { %1390 = vrot.lane.b32.xlu2 %v10119_v16, %s8791_s24  ;;  %v2513_v60 = vshrl.u32 %v2400_v36, 16  ;;  %v2516_v54 = vshll.u32 %v2400_v36, 16 }
 0x27b   : > { %3929 = vmatmul.bf16.gmra.mxu2 %v3531_v14  ;;  %v2515_v37 = vrot.slane %v2513_v60, 7 }
 0x27d   : > { %v2518_v8 = vor.u32 %v2516_v54, %v2515_v37  ;;  %v2645_v11 = vsel %vm9371_vm15, %v2515_v37, 0 }
 0x27e   : > { %v3902_v27 = vpop.f32.mrf.mxu2  ;;  %v2840_v10 = vshll.u32 %v2645_v11, 16  ;;  %v3018_v29 = vrot.slane %v2645_v11, 1 }
 0x27f   : > { %1343 = vrot.lane.b32.xlu1 %v1147_v59, %s8795_s28  ;;  %v10137_v43 = vsel %vm9371_vm15, 0, %v2518_v8  ;;  %v3435_v8 = vsel %vm12830_vm12, %v9894_v19, %v3146_v58  ;;  %v8651_v58 = vld [vmem:[%s8881_s20 + $0x114] sm:$0xff]  ;;  %vm12833_vm12 = vmmov %vm12827_vm2 }
 0x280   : > { %12829 = vst [vmem:[#allocation8_spill] sm:$0xff] %v10137_v43  ;;  %1284 = vrot.lane.b32.xlu0 %v10103_v55, %s8789_s22  ;;  %v3017_v25 = vrot.slane %v10137_v43, 1  ;;  %v2835_v46 = vshll.u32 %v10137_v43, 16  ;;  %v2833_v36 = vshrl.u32 %v10137_v43, 16  ;;  %v2842_v60 = vrot.slane %v2840_v10, 1 }
 0x281   : > { %v3187_v14 = vpop.permute.xlu0 %3186 }
 0x282   : > { %v10144_v62 = vsel %vm973_vm0, %v3017_v25, %v3018_v29  ;;  %v2837_v18 = vrot.slane %v2835_v46, 1  ;;  %v3486_v11 = vsel %vm3307_vm14, %v3435_v8, %v3187_v14  ;;  %v487_v29 = vld [vmem:[%s8881_s20 + $0x11c] sm:$0x1] }
 0x283   : > { %8439 = vmatmul.msk.bf16.gmra.mxu3 %vm12827_vm2, %v10144_v62 }
 0x284   : > { %v1914_v52 = vpop.f32.mrf.mxu1  ;;  %v2838_v3 = vor.u32 %v2837_v18, %v2833_v36 }
 0x285   : > { %v1915_v54 = vadd.f32 %v9918_v56, %v1914_v52  ;;  %v1289_v52 = vunpack.c.l.b16 %v487_v29 }
 0x286   : > { %v10151_v37 = vsel %vm664_vm1, %v2838_v3, %v2842_v60 }
 0x287   : > { %3196 = vrot.lane.b32.xlu1 %v10137_v43, %s8799_s29  ;;  %3248 = vrot.lane.b32.xlu2 %v10151_v37, %s8798_s19  ;;  %v2020_v10 = vmul.f32 0.2, %v1915_v54  ;;  %vm1976_vm13 = vcmp.gt.f32.partialorder %v1915_v54, 0.0  ;;  %v1290_v8 = vpack.c.b16 %v1289_v52, %v1289_v52  ;;  %v3148_v43 = vpop.permute.xlu2 %3147 }
 0x288   : > { %3155 = vrot.lane.b32.xlu0 %v10081_v45, %s8800_s12  ;;  %v3239_v27 = vpop.permute.xlu1 %3238 }
 0x289   : > { %v3534_v25 = vsel %vm3348_vm3, %v3486_v11, %v3239_v27  ;;  %v2064_v36 = vsel %vm1976_vm13, %v1915_v54, %v2020_v10  ;;  %v1294_v11 = vshll.u32 %v8651_v58, 16 }
 0x28a   : > { %v2285_v60 = vpack.c.bf16 %v2064_v36, %v2064_v36  ;;  %v3438_v36 = vsel %vm12827_vm2, %v9934_v1, %v3148_v43 }
 0x28b   : > { %3934 = vmatmul.bf16.gmra.mxu2 %v3534_v25  ;;  %v1292_v25 = vshrl.u32 %v8651_v58, 16  ;;  %v1296_v29 = vrot.slane %v1294_v11, 1 }
 0x28c   : > { %v1916_v46 = vpop.f32.mrf.mxu1  ;;  %v2373_v27 = vunpack.c.l.b16 %v2285_v60 }
 0x28d   : > { %v1917_v18 = vadd.f32 %v9918_v56, %v1916_v46  ;;  %v1299_v46 = vshll.u32 %v1290_v8, 16 }
 0x28f   : > { %vm1977_vm5 = vcmp.gt.f32.partialorder %v1917_v18, 0.0  ;;  %v2021_v3 = vmul.f32 0.2, %v1917_v18  ;;  %1082 = vrot.lane.b32.xlu1 %v10087_v32, %s8790_s23  ;;  %1131 = vrot.lane.b32.xlu2 %v10103_v55, %s8788_s21  ;;  %v1348_v32 = vrot.slane %v1290_v8, 1  ;;  %v1301_v52 = vrot.slane %v1299_v46, 1 }
 0x290   : > { %971 = vrot.lane.b32.xlu0 %v10040_v21, %s8793_s26  ;;  %v1347_v21 = vrot.slane %v8651_v58, 1 }
 0x291   : > { %v2065_v14 = vsel %vm1977_vm5, %v1917_v18, %v2021_v3  ;;  %v1297_v18 = vor.u32 %v1296_v29, %v1292_v25 }
 0x292   : > { %v2286_v54 = vpack.c.bf16 %v2065_v14, %v2065_v14 }
 0x293   : > { %v3189_v13 = vpop.permute.xlu0 %3188 }
 0x294   : > { %v2374_v10 = vunpack.c.l.b16 %v2286_v54  ;;  %v3488_v60 = vsel %vm3307_vm14, %v3438_v36, %v3189_v13 }
 0x296   : > { %v2401_v45 = vpack.c.b16 %v2374_v10, %v2373_v27 }
 0x297   : > { %1237 = vrot.lane.b32.xlu1 %v10119_v16, %s8792_s25  ;;  %1286 = vrot.lane.b32.xlu2 %v8651_v58, %s8789_s22  ;;  %v1349_v16 = vsel %vm973_vm0, %v1347_v21, %v1348_v32  ;;  %v1302_v58 = vsel %vm664_vm1, %v1297_v18, %v1301_v52 }
 0x298   : > { %1190 = vrot.lane.b32.xlu0 %v1147_v59, %s8794_s27  ;;  %v2520_v55 = vshrl.u32 %v2401_v45, 16  ;;  %v2523_v3 = vshll.u32 %v2401_v45, 16 }
 0x29a   : > { %v3241_v14 = vpop.permute.xlu1 %3240  ;;  %v2522_v11 = vrot.slane %v2520_v55, 7  ;;  %v3150_v55 = vpop.permute.xlu2 %3149 }
 0x29b   : > { %v3537_v54 = vsel %vm3348_vm3, %v3488_v60, %v3241_v14 }
 0x29c   : > { %3939 = vmatmul.bf16.gmra.mxu2 %v3537_v54  ;;  %v2525_v27 = vor.u32 %v2523_v3, %v2522_v11  ;;  %v2646_v59 = vsel %vm9371_vm15, %v2522_v11, 0 }
 0x29d   : > { %v2852_v13 = vshll.u32 %v2646_v59, 16  ;;  %v3021_v8 = vrot.slane %v2646_v59, 1 }
 0x29e   : > { %v10186_v43 = vsel %vm9371_vm15, 0, %v2525_v27 }
 0x29f   : > { %12831 = vst [vmem:[#allocation9_spill] sm:$0xff] %v10186_v43  ;;  %1392 = vrot.lane.b32.xlu1 %v1349_v16, %s8791_s24  ;;  %3157 = vrot.lane.b32.xlu2 %v10144_v62, %s8800_s12  ;;  %v3020_v45 = vrot.slane %v10186_v43, 1  ;;  %v2847_v10 = vshll.u32 %v10186_v43, 16  ;;  %v2845_v46 = vshrl.u32 %v10186_v43, 16  ;;  %v2854_v18 = vrot.slane %v2852_v13, 1 }
 0x2a0   : > { %1345 = vrot.lane.b32.xlu0 %v1302_v58, %s8795_s28 }
 0x2a1   : > { %v1919_v25 = vpop.f32.mrf.mxu1  ;;  %v10195_v29 = vsel %vm973_vm0, %v3020_v45, %v3021_v8  ;;  %v2849_v21 = vrot.slane %v2847_v10, 1  ;;  %v3441_v45 = vsel %vm12827_vm2, %v9969_v6, %v3150_v55 }
 0x2a2   : > { %12832 = vst [vmem:[#allocation10_spill] sm:$0xff] %v10195_v29  ;;  %v1920_v32 = vadd.f32 %v9918_v56, %v1919_v25  ;;  %8440 = vmatmul.msk.bf16.gmra.mxu3 %vm12833_vm12, %v10195_v29  ;;  %v3152_v54 = vpop.permute.xlu2 %3151  ;;  %vm12836_vm12 = vmmov %vm12827_vm2 }
 0x2a3   : > { %v2850_v36 = vor.u32 %v2849_v21, %v2845_v46 }
 0x2a4   : > { %v2022_v3 = vmul.f32 0.2, %v1920_v32  ;;  %vm1978_vm13 = vcmp.gt.f32.partialorder %v1920_v32, 0.0 }
 0x2a5   : > { %v10202_v52 = vsel %vm664_vm1, %v2850_v36, %v2854_v18 }
 0x2a6   : > { %v2066_v14 = vsel %vm1978_vm13, %v1920_v32, %v2022_v3  ;;  %v8661_v3 = vld [vmem:[%s12766_s3 + $0x38] sm:$0xff] }
 0x2a7   : > { %3250 = vrot.lane.b32.xlu1 %v10202_v52, %s8798_s19  ;;  %2892 = vrot.lane.b32.xlu2 %v9417_v20, %s8800_s12  ;;  %v2287_v27 = vpack.c.bf16 %v2066_v14, %v2066_v14 }
 0x2a8   : > { %3198 = vrot.lane.b32.xlu0 %v10186_v43, %s8799_s29  ;;  %3777 = vmatpush.bf16.msrb.mxu1 %v8661_v3 }
 0x2a9   : > { %v1921_v60 = vpop.f32.mrf.mxu1  ;;  %v2375_v8 = vunpack.c.l.b16 %v2287_v27 }
 0x2aa   : > { %v1922_v11 = vadd.f32 %v9918_v56, %v1921_v60  ;;  %v3191_v13 = vpop.permute.xlu0 %3190  ;;  %v968_v21 = vpop.permute.xlu2 %967 }
 0x2ab   : > { %v3490_v25 = vsel %vm3307_vm14, %v3441_v45, %v3191_v13  ;;  %v8660_v45 = vld [vmem:[%s12766_s3 + $0x30] sm:$0xff] }
 0x2ac   : > { %vm1979_vm5 = vcmp.gt.f32.partialorder %v1922_v11, 0.0  ;;  %v2023_v16 = vmul.f32 0.2, %v1922_v11  ;;  %3778 = vmatpush.bf16.msrb.mxu1 %v8660_v45 }
 0x2ae   : > { %v2067_v59 = vsel %vm1979_vm5, %v1922_v11, %v2023_v16  ;;  %vm12837_vm5 = vmmov %vm12827_vm2 }
 0x2af   : > { %v2288_v58 = vpack.c.bf16 %v2067_v59, %v2067_v59  ;;  %3159 = vrot.lane.b32.xlu2 %v10195_v29, %s8800_s12  ;;  %3073 = vrot.lane.b32.xlu1 %v9380_v24, %s8798_s19 }
 0x2b0   : > { %3032 = vrot.lane.b32.xlu0 %v9433_v28, %s8799_s29 }
 0x2b1   : > { %v2376_v10 = vunpack.c.l.b16 %v2288_v58  ;;  %v3243_v46 = vpop.permute.xlu1 %3242 }
 0x2b2   : > { %v3540_v36 = vsel %vm3348_vm3, %v3490_v25, %v3243_v46 }
 0x2b3   : > { %v2402_v32 = vpack.c.b16 %v2376_v10, %v2375_v8  ;;  %3944 = vmatmul.bf16.gmra.mxu2 %v3540_v36  ;;  %v1187_v8 = vpop.permute.xlu2 %1186 }
 0x2b5   : > { %v2527_v18 = vshrl.u32 %v2402_v32, 16  ;;  %v2530_v14 = vshll.u32 %v2402_v32, 16 }
 0x2b7   : > { %v2529_v60 = vrot.slane %v2527_v18, 7  ;;  %2894 = vrot.lane.b32.xlu2 %v9417_v20, %s8800_s12 }
 0x2b9   : > { %v2532_v55 = vor.u32 %v2530_v14, %v2529_v60  ;;  %v2647_v11 = vsel %vm9371_vm15, %v2529_v60, 0  ;;  %v1128_v32 = vpop.permute.xlu1 %1127 }
 0x2ba   : > { %v3024_v59 = vrot.slane %v2647_v11, 1  ;;  %v2864_v13 = vshll.u32 %v2647_v11, 16 }
 0x2bb   : > { %v10230_v16 = vsel %vm9371_vm15, 0, %v2532_v55 }
 0x2bc   : > { %12834 = vst [vmem:[#allocation11_spill] sm:$0xff] %v10230_v16  ;;  %3200 = vrot.lane.b32.xlu0 %v10230_v16, %s8799_s29  ;;  %v3023_v27 = vrot.slane %v10230_v16, 1  ;;  %v2859_v58 = vshll.u32 %v10230_v16, 16  ;;  %v2857_v25 = vshrl.u32 %v10230_v16, 16  ;;  %v2866_v3 = vrot.slane %v2864_v13, 1 }
 0x2be   : > { %v10240_v10 = vsel %vm973_vm0, %v3023_v27, %v3024_v59  ;;  %v2861_v46 = vrot.slane %v2859_v58, 1  ;;  %v1342_v27 = vpop.permute.xlu2 %1341  ;;  %v3444_v59 = vsel %vm12837_vm5, %v10008_v30, %v3152_v54  ;;  %v8760_v58 = vld [vmem:[%s8881_s20 + $0xe4] sm:$0xff] }
 0x2bf   : > { %12835 = vst [vmem:[#allocation12_spill] sm:$0xff] %v10240_v10  ;;  %3161 = vrot.lane.b32.xlu2 %v10240_v10, %s8800_s12  ;;  %8441 = vmatmul.msk.bf16.gmra.mxu3 %vm12836_vm12, %v10240_v10  ;;  %v1434_v13 = vsel %vm1394_vm4, %v8760_v58, %v968_v21  ;;  %vm12838_vm12 = vcmask 48128   ;;  %v8659_v21 = vld [vmem:[%s12766_s3 + $0x28] sm:$0xff] }
 0x2c0   : > { %v1924_v36 = vpop.f32.mrf.mxu1  ;;  %v2862_v18 = vor.u32 %v2861_v46, %v2857_v25  ;;  %3779 = vmatpush.bf16.msrb.mxu1 %v8659_v21 }
 0x2c1   : > { %v1925_v60 = vadd.f32 %v9918_v56, %v1924_v36 }
 0x2c2   : > { %v3193_v14 = vpop.permute.xlu0 %3192  ;;  %v10249_v55 = vsel %vm664_vm1, %v2862_v18, %v2866_v3 }
 0x2c3   : > { %3252 = vrot.lane.b32.xlu1 %v10249_v55, %s8798_s19  ;;  %v2024_v11 = vmul.f32 0.2, %v1925_v60  ;;  %vm1980_vm13 = vcmp.gt.f32.partialorder %v1925_v60, 0.0  ;;  %v3492_v46 = vsel %vm3307_vm14, %v3444_v59, %v3193_v14 }
 0x2c4   : > { %3034 = vrot.lane.b32.xlu0 %v9433_v28, %s8799_s29 }
 0x2c5   : > { %v2068_v25 = vsel %vm1980_vm13, %v1925_v60, %v2024_v11  ;;  %vm12839_vm13 = vcmask 220160  }
 0x2c6   : > { %v2289_v54 = vpack.c.bf16 %v2068_v25, %v2068_v25 }
 0x2c7   : > { %2896 = vrot.lane.b32.xlu2 %v9417_v20, %s8800_s12 }
 0x2c8   : > { %v1926_v45 = vpop.f32.mrf.mxu1  ;;  %v2377_v11 = vunpack.c.l.b16 %v2289_v54 }
 0x2c9   : > { %v3245_v36 = vpop.permute.xlu1 %3244  ;;  %v1927_v18 = vadd.f32 %v9918_v56, %v1926_v45  ;;  %v3195_v45 = vpop.permute.xlu2 %3194 }
 0x2ca   : > { %v1079_v3 = vpop.permute.xlu0 %1078  ;;  %v3543_v10 = vsel %vm3348_vm3, %v3492_v46, %v3245_v36 }
 0x2cb   : > { %vm1981_vm2 = vcmp.gt.f32.partialorder %v1927_v18, 0.0  ;;  %v2025_v16 = vmul.f32 0.2, %v1927_v18  ;;  %v1479_v29 = vsel %vm12838_vm12, %v1434_v13, %v1079_v3  ;;  %3949 = vmatmul.bf16.gmra.mxu2 %v3543_v10  ;;  %3075 = vrot.lane.b32.xlu1 %v9380_v24, %s8798_s19  ;;  %v10272_v10 = vpop.f32.mrf.mxu2 }
 0x2cc   : > { %v1524_v14 = vsel %vm1484_vm6, %v1479_v29, %v1128_v32  ;;  %v8658_v29 = vld [vmem:[%s12766_s3 + $0x20] sm:$0xff] }
 0x2cd   : > { %v2069_v60 = vsel %vm1981_vm2, %v1927_v18, %v2025_v16  ;;  %v1569_v58 = vsel %vm1529_vm7, %v1524_v14, %v1187_v8  ;;  %3780 = vmatpush.bf16.msrb.mxu1 %v8658_v29  ;;  %vm12840_vm2 = vmmov %vm12837_vm5 }
 0x2ce   : > { %v2290_v56 = vpack.c.bf16 %v2069_v60, %v2069_v60 }
 0x2d0   : > { %v2378_v59 = vunpack.c.l.b16 %v2290_v56 }
 0x2d1   : > { %v1283_v13 = vpop.permute.xlu1 %1282  ;;  %v1081_v21 = vpop.permute.xlu2 %1080 }
 0x2d2   : > { %v2403_v46 = vpack.c.b16 %v2378_v59, %v2377_v11  ;;  %v1234_v36 = vpop.permute.xlu0 %1233 }
 0x2d3   : > { %v1614_v25 = vsel %vm1574_vm8, %v1569_v58, %v1234_v36 }
 0x2d4   : > { %v2534_v3 = vshrl.u32 %v2403_v46, 16  ;;  %v1659_v43 = vsel %vm1619_vm9, %v1614_v25, %v1283_v13  ;;  %v2537_v18 = vshll.u32 %v2403_v46, 16  ;;  %v10291_v13 = vpop.f32.mrf.mxu2 }
 0x2d5   : > { %v1704_v8 = vsel %vm1664_vm10, %v1659_v43, %v1342_v27 }
 0x2d6   : > { %v2536_v16 = vrot.slane %v2534_v3, 7 }
 0x2d8   : > { %v2539_v32 = vor.u32 %v2537_v18, %v2536_v16  ;;  %v2648_v54 = vsel %vm9371_vm15, %v2536_v16, 0 }
 0x2d9   : > { %v3154_v60 = vpop.permute.xlu1 %3153  ;;  %v3027_v11 = vrot.slane %v2648_v54, 1  ;;  %v2876_v27 = vshll.u32 %v2648_v54, 16 }
 0x2da   : > { %v1389_v14 = vpop.permute.xlu0 %1388  ;;  %v10284_v56 = vsel %vm9371_vm15, 0, %v2539_v32  ;;  %v3447_v3 = vsel %vm12840_vm2, %v10055_v35, %v3154_v60  ;;  %v8657_v60 = vld [vmem:[%s12766_s3 + $0x18] sm:$0xff] }
 0x2db   : > { %3202 = vrot.lane.b32.xlu0 %v10284_v56, %s8799_s29  ;;  %v1749_v59 = vsel %vm1709_vm11, %v1704_v8, %v1389_v14  ;;  %v3026_v58 = vrot.slane %v10284_v56, 1  ;;  %v2871_v43 = vshll.u32 %v10284_v56, 16  ;;  %v2869_v36 = vshrl.u32 %v10284_v56, 16  ;;  %v1236_v14 = vpop.permute.xlu2 %1235  ;;  %3781 = vmatpush.bf16.msrb.mxu1 %v8657_v60 }
 0x2dc   : > { %8351 = vmatmul.msk.bf16.gmra.mxu1 %vm12839_vm13, %v1749_v59  ;;  %v2878_v18 = vrot.slane %v2876_v27, 1  ;;  %v3494_v54 = vsel %vm3307_vm14, %v3447_v3, %v3195_v45  ;;  %v10313_v59 = vpop.f32.mrf.mxu2  ;;  %vm12841_vm13 = vmmov %vm12840_vm2 }
 0x2dd   : > { %v10295_v46 = vsel %vm973_vm0, %v3026_v58, %v3027_v11  ;;  %v2873_v25 = vrot.slane %v2871_v43, 1  ;;  %v8761_v58 = vld [vmem:[%s8881_s20 + $0xf0] sm:$0xff] }
 0x2de   : > { %3163 = vrot.lane.b32.xlu2 %v10295_v46, %s8800_s12  ;;  %8442 = vmatmul.msk.bf16.gmra.mxu3 %vm12837_vm5, %v10295_v46  ;;  %vm12842_vm5 = vcmask 220160  }
 0x2df   : > { %v2874_v16 = vor.u32 %v2873_v25, %v2869_v36 }
 0x2e1   : > { %v970_v29 = vpop.permute.xlu1 %969  ;;  %v10305_v32 = vsel %vm664_vm1, %v2874_v16, %v2878_v18 }
 0x2e2   : > { %v3247_v8 = vpop.permute.xlu0 %3246  ;;  %3254 = vrot.lane.b32.xlu1 %v10305_v32, %s8798_s19  ;;  %v1436_v43 = vsel %vm1394_vm4, %v8761_v58, %v970_v29 }
 0x2e3   : > { %3036 = vrot.lane.b32.xlu0 %v9433_v28, %s8799_s29  ;;  %v3546_v11 = vsel %vm3348_vm3, %v3494_v54, %v3247_v8  ;;  %v1481_v45 = vsel %vm12838_vm12, %v1436_v43, %v1081_v21  ;;  %v1391_v3 = vpop.permute.xlu2 %1390  ;;  %v8656_v54 = vld [vmem:[%s12766_s3 + $0x10] sm:$0xff]  ;;  %vm12843_vm12 = vmmov %vm12840_vm2 }
 0x2e4   : > { %3954 = vmatmul.bf16.gmra.mxu2 %v3546_v11  ;;  %v10329_v18 = vpop.f32.mrf.mxu2  ;;  %3782 = vmatpush.bf16.msrb.mxu1 %v8656_v54 }
 0x2e6   : > { %2898 = vrot.lane.b32.xlu2 %v9534_v53, %s8800_s12 }
 0x2e9   : > { %v1189_v27 = vpop.permute.xlu1 %1188 }
 0x2ea   : > { %v1130_v36 = vpop.permute.xlu0 %1129  ;;  %3077 = vrot.lane.b32.xlu1 %v9517_v4, %s8798_s19 }
 0x2eb   : > { %v1526_v25 = vsel %vm1484_vm6, %v1481_v45, %v1130_v36  ;;  %3204 = vrot.lane.b32.xlu0 %v9380_v24, %s8799_s29  ;;  %v3249_v58 = vpop.permute.xlu2 %3248 }
 0x2ec   : > { %v1571_v16 = vsel %vm1529_vm7, %v1526_v25, %v1189_v27 }
 0x2ed   : > { %v1616_v53 = vsel %vm1574_vm8, %v1571_v16, %v1236_v14  ;;  %v10346_v14 = vpop.f32.mrf.mxu2 }
 0x2ee   : > { %3165 = vrot.lane.b32.xlu2 %v9433_v28, %s8800_s12  ;;  %8443 = vmatmul.msk.bf16.gmra.mxu3 %vm12841_vm13, %v9433_v28  ;;  %vm12844_vm13 = vcmask 48128  }
 0x2f1   : > { %v1344_v21 = vpop.permute.xlu1 %1343 }
 0x2f2   : > { %v1285_v29 = vpop.permute.xlu0 %1284  ;;  %3256 = vrot.lane.b32.xlu1 %v9417_v20, %s8798_s19 }
 0x2f3   : > { %v1661_v8 = vsel %vm1619_vm9, %v1616_v53, %v1285_v29  ;;  %3038 = vrot.lane.b32.xlu0 %v9597_v7, %s8799_s29  ;;  %v1132_v16 = vpop.permute.xlu2 %1131 }
 0x2f4   : > { %v1706_v11 = vsel %vm1664_vm10, %v1661_v8, %v1344_v21  ;;  %v10374_v8 = vpop.f32.mrf.mxu3 }
 0x2f5   : > { %v1751_v60 = vsel %vm1709_vm11, %v1706_v11, %v1391_v3  ;;  %v10366_v3 = vpop.f32.mrf.mxu2 }
 0x2f6   : > { %2900 = vrot.lane.b32.xlu2 %v9617_v34, %s8800_s12  ;;  %8352 = vmatmul.msk.bf16.gmra.mxu1 %vm12842_vm5, %v1751_v60  ;;  %v8655_v34 = vld [vmem:[%s12766_s3 + $0x8] sm:$0xff] }
 0x2f7   : > { %3783 = vmatpush.bf16.msrb.mxu1 %v8655_v34 }
 0x2f9   : > { %v3197_v43 = vpop.permute.xlu1 %3196 }
 0x2fa   : > { %v3156_v45 = vpop.permute.xlu0 %3155  ;;  %3079 = vrot.lane.b32.xlu1 %v9567_v47, %s8798_s19 }
 0x2fb   : > { %v3450_v27 = vsel %vm12840_vm2, %v10109_v0, %v3156_v45  ;;  %3206 = vrot.lane.b32.xlu0 %v9380_v24, %s8799_s29 }
 0x2fc   : > { %v3496_v36 = vsel %vm3307_vm14, %v3450_v27, %v3197_v43 }
 0x2fd   : > { %v3549_v25 = vsel %vm3348_vm3, %v3496_v36, %v3249_v58  ;;  %v10382_v43 = vpop.f32.mrf.mxu2  ;;  %v8654_v36 = vld [vmem:[%s12766_s3] sm:$0xff] }
 0x2fe   : > { %3959 = vmatmul.bf16.gmra.mxu2 %v3549_v25  ;;  %3167 = vrot.lane.b32.xlu2 %v9433_v28, %s8800_s12 }
 0x2ff   : > { %8444 = vmatmul.msk.bf16.gmra.mxu3 %vm12843_vm12, %v9433_v28  ;;  %3784 = vmatpush.bf16.msrb.mxu1 %v8654_v36  ;;  %vm12856_vm12 = vmmov %vm12840_vm2 }
 0x301   : > { %v1083_v53 = vpop.permute.xlu1 %1082 }
 0x302   : > { %v972_v21 = vpop.permute.xlu0 %971  ;;  %3258 = vrot.lane.b32.xlu1 %v9417_v20, %s8798_s19 }
 0x303   : > { %v1438_v29 = vsel %vm1394_vm4, %v10005_v48, %v972_v21  ;;  %3040 = vrot.lane.b32.xlu0 %v9701_v51, %s8799_s29  ;;  %v1287_v48 = vpop.permute.xlu2 %1286 }
 0x304   : > { %v1483_v54 = vsel %vm12844_vm13, %v1438_v29, %v1083_v53  ;;  %vm12858_vm13 = vmmov %vm12840_vm2 }
 0x305   : > { %v1528_v11 = vsel %vm1484_vm6, %v1483_v54, %v1132_v16  ;;  %vm12845_vm6 = vmmov %vm12840_vm2  ;;  %v10404_v21 = vpop.f32.mrf.mxu2 }
 0x306   : > { %2902 = vrot.lane.b32.xlu2 %v9690_v33, %s8800_s12  ;;  %v10390_v33 = vpop.f32.mrf.mxu3 }
 0x309   : > { %v1238_v60 = vpop.permute.xlu1 %1237 }
 0x30a   : > { %v1191_v58 = vpop.permute.xlu0 %1190  ;;  %3081 = vrot.lane.b32.xlu1 %v9640_v40, %s8798_s19 }
 0x30b   : > { %v1573_v45 = vsel %vm1529_vm7, %v1528_v11, %v1191_v58  ;;  %3208 = vrot.lane.b32.xlu0 %v9380_v24, %s8799_s29  ;;  %v3158_v29 = vpop.permute.xlu2 %3157  ;;  %vm12846_vm7 = vmmov %vm12842_vm5 }
 0x30c   : > { %v1618_v27 = vsel %vm1574_vm8, %v1573_v45, %v1238_v60  ;;  %vm12847_vm8 = vmmov %vm12840_vm2 }
 0x30d   : > { %v1663_v25 = vsel %vm1619_vm9, %v1618_v27, %v1287_v48  ;;  %v3453_v54 = vsel %vm12847_vm8, %v10151_v37, %v3158_v29  ;;  %vm12848_vm9 = vmmov %vm12840_vm2 }
 0x30e   : > { %2904 = vrot.lane.b32.xlu2 %v9809_v63, %s8800_s12  ;;  %vm12851_vm5 = vmmov %vm12840_vm2 }
 0x30f   : > { %8445 = vmatmul.msk.bf16.gmra.mxu3 %vm12845_vm6, %v9433_v28  ;;  %vm12860_vm6 = vmmov %vm12840_vm2 }
 0x310   : > { %vm12864_vm8 = vmmov %vm12840_vm2 }
 0x311   : > { %v1393_v34 = vpop.permute.xlu1 %1392 }
 0x312   : > { %v1346_v16 = vpop.permute.xlu0 %1345  ;;  %3260 = vrot.lane.b32.xlu1 %v9417_v20, %s8798_s19 }
 0x313   : > { %v1708_v53 = vsel %vm1664_vm10, %v1663_v25, %v1346_v16  ;;  %3042 = vrot.lane.b32.xlu0 %v9748_v50, %s8799_s29  ;;  %v2893_v45 = vpop.permute.xlu2 %2892  ;;  %vm12849_vm10 = vmmov %vm12840_vm2 }
 0x314   : > { %v1753_v63 = vsel %vm1709_vm11, %v1708_v53, %v1393_v34  ;;  %v3268_v27 = vsel %vm12848_vm9, %v9380_v24, %v2893_v45  ;;  %vm12850_vm11 = vmmov %vm12840_vm2 }
 0x315   : > { %8353 = vmatmul.msk.bf16.gmra.mxu1 %vm12846_vm7, %v1753_v63  ;;  %vm12863_vm7 = vmmov %vm12840_vm2 }
 0x316   : > { %2906 = vrot.lane.b32.xlu2 %v9828_v26, %s8800_s12  ;;  %v10419_v26 = vpop.f32.mrf.mxu2  ;;  %vm12865_vm9 = vmmov %vm12840_vm2 }
 0x319   : > { %v3251_v60 = vpop.permute.xlu1 %3250 }
 0x31a   : > { %v3199_v11 = vpop.permute.xlu0 %3198  ;;  %3083 = vrot.lane.b32.xlu1 %v9761_v57, %s8798_s19 }
 0x31b   : > { %v3498_v58 = vsel %vm3307_vm14, %v3453_v54, %v3199_v11  ;;  %3044 = vrot.lane.b32.xlu0 %v9782_v42, %s8799_s29  ;;  %v3160_v53 = vpop.permute.xlu2 %3159 }
 0x31c   : > { %v3552_v48 = vsel %vm3348_vm3, %v3498_v58, %v3251_v60 }
 0x31d   : > { %3964 = vmatmul.bf16.gmra.mxu2 %v3552_v48 }
 0x31e   : > { %2908 = vrot.lane.b32.xlu2 %v9858_v9, %s8800_s12  ;;  %v10431_v9 = vpop.f32.mrf.mxu2 }
 0x321   : > { %v3074_v34 = vpop.permute.xlu1 %3073 }
 0x322   : > { %3085 = vrot.lane.b32.xlu1 %v9786_v41, %s8798_s19  ;;  %v3033_v36 = vpop.permute.xlu0 %3032 }
 0x323   : > { %3046 = vrot.lane.b32.xlu0 %v9812_v15, %s8799_s29  ;;  %v3309_v25 = vsel %vm3307_vm14, %v3268_v27, %v3033_v36  ;;  %v2895_v60 = vpop.permute.xlu2 %2894 }
 0x324   : > { %v3350_v16 = vsel %vm3348_vm3, %v3309_v25, %v3074_v34  ;;  %v3270_v58 = vsel %vm12850_vm11, %v9380_v24, %v2895_v60  ;;  %vm12867_vm11 = vmmov %vm12840_vm2 }
 0x325   : > { %3785 = vmatmul.bf16.vlgmr.msrb.gmra.mxu1 %v3350_v16 }
 0x326   : > { %2910 = vrot.lane.b32.xlu2 %v9894_v19, %s8800_s12  ;;  %v10441_v29 = vpop.f32.mrf.mxu2  ;;  %v3456_v19 = vsel %vm12849_vm10, %v10202_v52, %v3160_v53  ;;  %vm12866_vm10 = vmmov %vm12840_vm2 }
 0x32a   : > { %3087 = vrot.lane.b32.xlu1 %v9840_v61, %s8798_s19 }
 0x32b   : > { %3048 = vrot.lane.b32.xlu0 %v9848_v23, %s8799_s29  ;;  %v3162_v36 = vpop.permute.xlu2 %3161 }
 0x32e   : > { %2912 = vrot.lane.b32.xlu2 %v9934_v1, %s8800_s12  ;;  %v3201_v63 = vpop.permute.xlu0 %3200  ;;  %v10458_v45 = vpop.f32.mrf.mxu2 }
 0x32f   : > { %v3500_v54 = vsel %vm3307_vm14, %v3456_v19, %v3201_v63 }
 0x332   : > { %3089 = vrot.lane.b32.xlu1 %v9876_v39, %s8798_s19 }
 0x333   : > { %3050 = vrot.lane.b32.xlu0 %v9884_v2, %s8799_s29 }
 0x335   : > { %v3253_v11 = vpop.permute.xlu1 %3252 }
 0x336   : > { %2914 = vrot.lane.b32.xlu2 %v9969_v6, %s8800_s12  ;;  %v3555_v1 = vsel %vm3348_vm3, %v3500_v54, %v3253_v11  ;;  %v3035_v48 = vpop.permute.xlu0 %3034 }
 0x337   : > { %3969 = vmatmul.bf16.gmra.mxu2 %v3555_v1  ;;  %v3311_v2 = vsel %vm3307_vm14, %v3270_v58, %v3035_v48  ;;  %v12853_v1 = vld [vmem:[#allocation6_spill] sm:$0xff]  ;;  %v12854_v58 = vld [vmem:[#allocation7_spill] sm:$0xff] }
 0x33a   : > { %3091 = vrot.lane.b32.xlu1 %v9912_v44, %s8798_s19 }
 0x33b   : > { %3052 = vrot.lane.b32.xlu0 %v9927_v31, %s8799_s29  ;;  %v10469_v31 = vpop.f32.mrf.mxu2 }
 0x33d   : > { %v3076_v27 = vpop.permute.xlu1 %3075 }
 0x33e   : > { %2916 = vrot.lane.b32.xlu2 %v10008_v30, %s8800_s12  ;;  %v3353_v6 = vsel %vm3348_vm3, %v3311_v2, %v3076_v27  ;;  %v2897_v30 = vpop.permute.xlu2 %2896 }
 0x33f   : > { %3790 = vmatmul.bf16.gmra.mxu1 %v3353_v6 }
 0x342   : > { %3093 = vrot.lane.b32.xlu1 %v9950_v5, %s8798_s19 }
 0x343   : > { %3054 = vrot.lane.b32.xlu0 %v9958_v17, %s8799_s29  ;;  %v10477_v34 = vpop.f32.mrf.mxu2  ;;  %v3459_v17 = vsel %vm12851_vm5, %v10249_v55, %v3162_v36  ;;  %v12855_v36 = vld [vmem:[#allocation8_spill] sm:$0xff]  ;;  %vm12868_vm5 = vmmov %vm12840_vm2 }
 0x346   : > { %2918 = vrot.lane.b32.xlu2 %v10055_v35, %s8800_s12  ;;  %v12852_v35 = vld [vmem:[#allocation5_spill] sm:$0xff]  ;;  %v3164_v19 = vpop.permute.xlu2 %3163 }
 0x34a   : > { %3095 = vrot.lane.b32.xlu1 %v9984_v49, %s8798_s19 }
 0x34b   : > { %3056 = vrot.lane.b32.xlu0 %v9992_v12, %s8799_s29  ;;  %v10494_v60 = vpop.f32.mrf.mxu2 }
 0x34d   : > { %v3203_v25 = vpop.permute.xlu0 %3202 }
 0x34e   : > { %2920 = vrot.lane.b32.xlu2 %v10109_v0, %s8800_s12  ;;  %v3502_v16 = vsel %vm3307_vm14, %v3459_v17, %v3203_v25  ;;  %v3272_v0 = vsel %vm12840_vm2, %v9380_v24, %v2897_v30  ;;  %v3462_v30 = vsel %vm12856_vm12, %v10305_v32, %v3164_v19  ;;  %vm12870_vm12 = vmmov %vm12840_vm2 }
 0x352   : > { %3097 = vrot.lane.b32.xlu1 %v10037_v22, %s8798_s19 }
 0x353   : > { %3058 = vrot.lane.b32.xlu0 %v12852_v35, %s8799_s29  ;;  %v10508_v35 = vpop.f32.mrf.mxu2 }
 0x354   : > { %v3255_v53 = vpop.permute.xlu1 %3254 }
 0x355   : > { %v3037_v12 = vpop.permute.xlu0 %3036  ;;  %v3558_v63 = vsel %vm3348_vm3, %v3502_v16, %v3255_v53 }
 0x356   : > { %2922 = vrot.lane.b32.xlu2 %v10151_v37, %s8800_s12  ;;  %3974 = vmatmul.bf16.gmra.mxu2 %v3558_v63  ;;  %v3313_v11 = vsel %vm3307_vm14, %v3272_v0, %v3037_v12  ;;  %v2899_v37 = vpop.permute.xlu2 %2898  ;;  %v12857_v12 = vld [vmem:[#allocation9_spill] sm:$0xff] }
 0x357   : > { %v3274_v63 = vsel %vm12858_vm13, %v9517_v4, %v2899_v37  ;;  %vm12871_vm13 = vmmov %vm12840_vm2 }
 0x359   : > { %v1929_v54 = vpop.f32.mrf.mxu1 }
 0x35a   : > { %3099 = vrot.lane.b32.xlu1 %v12853_v1, %s8798_s19 }
 0x35b   : > { %3060 = vrot.lane.b32.xlu0 %v12854_v58, %s8799_s29  ;;  %v10520_v54 = vpop.f32.mrf.mxu2 }
 0x35c   : > { %v3078_v48 = vpop.permute.xlu1 %3077 }
 0x35d   : > { %v3205_v2 = vpop.permute.xlu0 %3204  ;;  %v3356_v27 = vsel %vm3348_vm3, %v3313_v11, %v3078_v48  ;;  %v12861_v48 = vld [vmem:[#allocation11_spill] sm:$0xff] }
 0x35e   : > { %2924 = vrot.lane.b32.xlu2 %v10202_v52, %s8800_s12  ;;  %3795 = vmatmul.bf16.gmra.mxu1 %v3356_v27  ;;  %v3504_v25 = vsel %vm3307_vm14, %v3462_v30, %v3205_v2  ;;  %v3166_v53 = vpop.permute.xlu2 %3165  ;;  %v12862_v2 = vld [vmem:[#allocation12_spill] sm:$0xff] }
 0x361   : > { %v1931_v6 = vpop.f32.mrf.mxu1 }
 0x362   : > { %3101 = vrot.lane.b32.xlu1 %v12855_v36, %s8798_s19 }
 0x363   : > { %3062 = vrot.lane.b32.xlu0 %v10144_v62, %s8799_s29  ;;  %v12859_v62 = vld [vmem:[#allocation10_spill] sm:$0xff] }
 0x364   : > { %v3257_v17 = vpop.permute.xlu1 %3256 }
 0x365   : > { %v3039_v16 = vpop.permute.xlu0 %3038  ;;  %v3561_v52 = vsel %vm3348_vm3, %v3504_v25, %v3257_v17 }
 0x366   : > { %2926 = vrot.lane.b32.xlu2 %v10249_v55, %s8800_s12  ;;  %3979 = vmatmul.bf16.gmra.mxu2 %v3561_v52  ;;  %v3315_v19 = vsel %vm3307_vm14, %v3274_v63, %v3039_v16  ;;  %v3465_v55 = vsel %vm12860_vm6, %v9417_v20, %v3166_v53  ;;  %v2901_v37 = vpop.permute.xlu2 %2900  ;;  %v8687_v63 = vld [vmem:[%s12768_s5 + $0x78] sm:$0xff]  ;;  %vm12873_vm6 = vmmov %vm12840_vm2 }
 0x367   : > { %v3276_v17 = vsel %vm12863_vm7, %v9567_v47, %v2901_v37  ;;  %5872 = vmatpush.bf16.msra.mxu1 %v8687_v63  ;;  %vm12875_vm7 = vmmov %vm12840_vm2 }
 0x36a   : > { %3103 = vrot.lane.b32.xlu1 %v12857_v12, %s8798_s19 }
 0x36b   : > { %3064 = vrot.lane.b32.xlu0 %v12859_v62, %s8799_s29 }
 0x36c   : > { %v3080_v0 = vpop.permute.xlu1 %3079 }
 0x36d   : > { %v3207_v11 = vpop.permute.xlu0 %3206  ;;  %v3359_v58 = vsel %vm3348_vm3, %v3315_v19, %v3080_v0 }
 0x36e   : > { %2928 = vrot.lane.b32.xlu2 %v10305_v32, %s8800_s12  ;;  %3800 = vmatmul.bf16.gmra.mxu1 %v3359_v58  ;;  %v3506_v4 = vsel %vm3307_vm14, %v3465_v55, %v3207_v11  ;;  %v10535_v32 = vpop.f32.mrf.mxu2  ;;  %v3168_v19 = vpop.permute.xlu2 %3167 }
 0x36f   : > { %v3468_v47 = vsel %vm12864_vm8, %v9417_v20, %v3168_v19  ;;  %vm12877_vm8 = vmmov %vm12840_vm2 }
 0x372   : > { %3105 = vrot.lane.b32.xlu1 %v12861_v48, %s8798_s19 }
 0x373   : > { %3066 = vrot.lane.b32.xlu0 %v12862_v2, %s8799_s29  ;;  %v1934_v27 = vpop.f32.mrf.mxu1 }
 0x374   : > { %v3259_v6 = vpop.permute.xlu1 %3258 }
 0x375   : > { %v3041_v30 = vpop.permute.xlu0 %3040  ;;  %v3564_v25 = vsel %vm3348_vm3, %v3506_v4, %v3259_v6 }
 0x376   : > { %3984 = vmatmul.bf16.gmra.mxu2 %v3564_v25  ;;  %2930 = vrot.lane.b32.xlu2 %v9417_v20, %s8800_s12  ;;  %v3317_v52 = vsel %vm3307_vm14, %v3276_v17, %v3041_v30  ;;  %v10550_v0 = vpop.f32.mrf.mxu2  ;;  %v2903_v4 = vpop.permute.xlu2 %2902 }
 0x377   : > { %v3278_v37 = vsel %vm12865_vm9, %v9640_v40, %v2903_v4  ;;  %vm12879_vm9 = vmmov %vm12840_vm2 }
 0x37a   : > { %3107 = vrot.lane.b32.xlu1 %v10284_v56, %s8798_s19 }
 0x37b   : > { %3068 = vrot.lane.b32.xlu0 %v10295_v46, %s8799_s29  ;;  %v1936_v16 = vpop.f32.mrf.mxu1 }
 0x37c   : > { %v3082_v53 = vpop.permute.xlu1 %3081 }
 0x37d   : > { %v3362_v62 = vsel %vm3348_vm3, %v3317_v52, %v3082_v53  ;;  %v3209_v46 = vpop.permute.xlu0 %3208 }
 0x37e   : > { %3805 = vmatmul.bf16.gmra.mxu1 %v3362_v62  ;;  %4961 = vrot.lane.b32.xlu2 %v9417_v20, %s8800_s12  ;;  %v3508_v11 = vsel %vm3307_vm14, %v3468_v47, %v3209_v46  ;;  %v10562_v2 = vpop.f32.mrf.mxu2  ;;  %v2905_v40 = vpop.permute.xlu2 %2904 }
 0x37f   : > { %v3280_v62 = vsel %vm12867_vm11, %v9761_v57, %v2905_v40  ;;  %vm12882_vm11 = vmmov %vm12840_vm2 }
 0x382   : > { %3109 = vrot.lane.b32.xlu1 %v9380_v24, %s8798_s19 }
 0x383   : > { %3070 = vrot.lane.b32.xlu0 %v9433_v28, %s8799_s29 }
 0x384   : > { %v3261_v58 = vpop.permute.xlu1 %3260 }
 0x385   : > { %v3567_v55 = vsel %vm3348_vm3, %v3508_v11, %v3261_v58  ;;  %v3043_v27 = vpop.permute.xlu0 %3042 }
 0x386   : > { %3989 = vmatmul.bf16.gmra.mxu2 %v3567_v55  ;;  %5176 = vrot.lane.b32.xlu2 %v9433_v28, %s8800_s12  ;;  %v3319_v6 = vsel %vm3307_vm14, %v3278_v37, %v3043_v27  ;;  %v10574_v17 = vpop.f32.mrf.mxu2  ;;  %v8686_v55 = vld [vmem:[%s12768_s5 + $0x70] sm:$0xff]  ;;  %v2907_v4 = vpop.permute.xlu2 %2906 }
 0x387   : > { %5873 = vmatpush.bf16.msra.mxu1 %v8686_v55 }
 0x38a   : > { %3111 = vrot.lane.b32.xlu1 %v9380_v24, %s8798_s19 }
 0x38b   : > { %5087 = vrot.lane.b32.xlu0 %v9433_v28, %s8799_s29 }
 0x38c   : > { %v3084_v30 = vpop.permute.xlu1 %3083 }
 0x38d   : > { %v3365_v25 = vsel %vm3348_vm3, %v3319_v6, %v3084_v30  ;;  %v3045_v52 = vpop.permute.xlu0 %3044  ;;  %v3282_v6 = vsel %vm12840_vm2, %v9786_v41, %v2907_v4 }
 0x38e   : > { %3810 = vmatmul.bf16.gmra.mxu1 %v3365_v25  ;;  %4963 = vrot.lane.b32.xlu2 %v9417_v20, %s8800_s12  ;;  %v10584_v19 = vpop.f32.mrf.mxu2  ;;  %v3321_v47 = vsel %vm3307_vm14, %v3280_v62, %v3045_v52 }
 0x392   : > { %v1939_v16 = vpop.f32.mrf.mxu1  ;;  %5124 = vrot.lane.b32.xlu1 %v9380_v24, %s8798_s19 }
 0x393   : > { %5089 = vrot.lane.b32.xlu0 %v9433_v28, %s8799_s29 }
 0x394   : > { %v3086_v53 = vpop.permute.xlu1 %3085 }
 0x395   : > { %v3368_v46 = vsel %vm3348_vm3, %v3321_v47, %v3086_v53  ;;  %v3047_v57 = vpop.permute.xlu0 %3046 }
 0x396   : > { %8426 = vmatmul.msk.bf16.vlgmr.msrb.gmra.mxu2 %vm12866_vm10, %v9433_v28  ;;  %v10588_v58 = vpop.f32.mrf.mxu2  ;;  %v3323_v30 = vsel %vm3307_vm14, %v3282_v6, %v3047_v57  ;;  %vm12881_vm10 = vmmov %vm12840_vm2 }
 0x39a   : > { %v1941_v63 = vpop.f32.mrf.mxu1 }
 0x39c   : > { %v3088_v27 = vpop.permute.xlu1 %3087 }
 0x39d   : > { %v3371_v16 = vsel %vm3348_vm3, %v3323_v30, %v3088_v27  ;;  %v3049_v52 = vpop.permute.xlu0 %3048 }
 0x39e   : > { %3815 = vmatmul.bf16.gmra.mxu1 %v3368_v46  ;;  %v10598_v25 = vpop.f32.mrf.mxu2 }
 0x3a2   : > { %v3786_v11 = vpop.f32.mrf.mxu1 }
 0x3a4   : > { %v3090_v53 = vpop.permute.xlu1 %3089 }
 0x3a5   : > { %v3051_v4 = vpop.permute.xlu0 %3050 }
 0x3a6   : > { %8427 = vmatmul.msk.bf16.gmra.mxu2 %vm12868_vm5, %v9597_v7  ;;  %v10601_v40 = vpop.f32.mrf.mxu2  ;;  %v2909_v7 = vpop.permute.xlu2 %2908  ;;  %vm12884_vm5 = vmmov %vm12840_vm2 }
 0x3a7   : > { %12869 = vst [vmem:[#allocation5_spill] sm:$0xff] %v10601_v40  ;;  %v3284_v63 = vsel %vm12871_vm13, %v9840_v61, %v2909_v7  ;;  %vm12886_vm13 = vmmov %vm12840_vm2 }
 0x3a8   : > { %v3325_v41 = vsel %vm3307_vm14, %v3284_v63, %v3049_v52 }
 0x3a9   : > { %v3374_v47 = vsel %vm3348_vm3, %v3325_v41, %v3090_v53 }
 0x3aa   : > { %v3788_v37 = vpop.f32.mrf.mxu1 }
 0x3ab   : > { %v8685_v37 = vld [vmem:[%s12768_s5 + $0x68] sm:$0xff] }
 0x3ac   : > { %v3092_v57 = vpop.permute.xlu1 %3091  ;;  %5874 = vmatpush.bf16.msra.mxu1 %v8685_v37 }
 0x3ae   : > { %3820 = vmatmul.bf16.gmra.mxu1 %v3371_v16  ;;  %v10609_v46 = vpop.f32.mrf.mxu2  ;;  %v3053_v16 = vpop.permute.xlu0 %3052 }
 0x3af   : > { %12872 = vst [vmem:[#allocation6_spill] sm:$0xff] %v10609_v46 }
 0x3b6   : > { %8428 = vmatmul.msk.bf16.gmra.mxu2 %vm12870_vm12, %v9701_v51  ;;  %v2911_v51 = vpop.permute.xlu2 %2910  ;;  %vm12885_vm12 = vmmov %vm12840_vm2 }
 0x3b7   : > { %v3286_v61 = vsel %vm12875_vm7, %v9876_v39, %v2911_v51  ;;  %v3094_v39 = vpop.permute.xlu1 %3093 }
 0x3b8   : > { %v3327_v27 = vsel %vm3307_vm14, %v3286_v61, %v3051_v4 }
 0x3b9   : > { %v3377_v6 = vsel %vm3348_vm3, %v3327_v27, %v3092_v57 }
 0x3ba   : > { %v10613_v55 = vpop.f32.mrf.mxu2 }
 0x3bb   : > { %12874 = vst [vmem:[#allocation7_spill] sm:$0xff] %v10613_v55 }
 0x3bc   : > { %v3791_v62 = vpop.f32.mrf.mxu1 }
 0x3be   : > { %3825 = vmatmul.bf16.gmra.mxu1 %v3374_v47 }
 0x3bf   : > { %v3096_v4 = vpop.permute.xlu1 %3095 }
 0x3c2   : > { %v10622_v30 = vpop.f32.mrf.mxu2 }
 0x3c3   : > { %12876 = vst [vmem:[#allocation8_spill] sm:$0xff] %v10622_v30 }
 0x3c4   : > { %v3793_v11 = vpop.f32.mrf.mxu1 }
 0x3c5   : > { %v3055_v11 = vpop.permute.xlu0 %3054 }
 0x3c6   : > { %8429 = vmatmul.msk.bf16.gmra.mxu2 %vm12873_vm6, %v9748_v50  ;;  %v2913_v50 = vpop.permute.xlu2 %2912  ;;  %vm12887_vm6 = vmmov %vm12840_vm2 }
 0x3c7   : > { %v3288_v52 = vsel %vm12879_vm9, %v9912_v44, %v2913_v50  ;;  %vm12888_vm9 = vmmov %vm12840_vm2 }
 0x3c8   : > { %v3329_v63 = vsel %vm3307_vm14, %v3288_v52, %v3053_v16  ;;  %v3098_v52 = vpop.permute.xlu1 %3097 }
 0x3c9   : > { %v3380_v41 = vsel %vm3348_vm3, %v3329_v63, %v3094_v39 }
 0x3cd   : > { %v3057_v16 = vpop.permute.xlu0 %3056 }
 0x3ce   : > { %3830 = vmatmul.bf16.gmra.mxu1 %v3377_v6  ;;  %v2915_v44 = vpop.permute.xlu2 %2914 }
 0x3cf   : > { %v3290_v57 = vsel %vm12882_vm11, %v9950_v5, %v2915_v44 }
 0x3d0   : > { %v3331_v27 = vsel %vm3307_vm14, %v3290_v57, %v3055_v11  ;;  %v8678_v11 = vld [vmem:[%s12768_s5 + $0x30] sm:$0xff] }
 0x3d1   : > { %v3383_v37 = vsel %vm3348_vm3, %v3331_v27, %v3096_v4 }
 0x3d5   : > { %v3059_v27 = vpop.permute.xlu0 %3058 }
 0x3d6   : > { %8430 = vmatmul.msk.bf16.gmra.mxu2 %vm12877_vm8, %v9782_v42  ;;  %v8679_v42 = vld [vmem:[%s12768_s5 + $0x38] sm:$0xff]  ;;  %v2917_v5 = vpop.permute.xlu2 %2916 }
 0x3d7   : > { %5773 = vmatpush.bf16.msrb.mxu3 %v8679_v42  ;;  %v3292_v63 = vsel %vm12840_vm2, %v9984_v49, %v2917_v5 }
 0x3d8   : > { %v3333_v42 = vsel %vm3307_vm14, %v3292_v63, %v3057_v16 }
 0x3d9   : > { %v10626_v7 = vpop.f32.mrf.mxu2  ;;  %v3386_v44 = vsel %vm3348_vm3, %v3333_v42, %v3098_v52  ;;  %v10677_v52 = vpop.f32.mrf.mxu3 }
 0x3da   : > { %12878 = vst [vmem:[#allocation9_spill] sm:$0xff] %v10626_v7 }
 0x3db   : > { %v10630_v53 = vpop.f32.mrf.mxu1  ;;  %5774 = vmatpush.bf16.msrb.mxu3 %v8678_v11 }
 0x3dd   : > { %v3061_v11 = vpop.permute.xlu0 %3060 }
 0x3de   : > { %3835 = vmatmul.bf16.gmra.mxu1 %v3380_v41  ;;  %v2919_v57 = vpop.permute.xlu2 %2918 }
 0x3df   : > { %v3294_v49 = vsel %vm12885_vm12, %v10037_v22, %v2919_v57 }
 0x3e0   : > { %v3335_v16 = vsel %vm3307_vm14, %v3294_v49, %v3059_v27 }
 0x3e1   : > { %v10634_v62 = vpop.f32.mrf.mxu2 }
 0x3e2   : > { %12880 = vst [vmem:[#allocation10_spill] sm:$0xff] %v10634_v62  ;;  %v8689_v62 = vld [vmem:[%s12768_s5 + $0x88] sm:$0xff] }
 0x3e3   : > { %v10636_v47 = vpop.f32.mrf.mxu1  ;;  %5977 = vmatpush.bf16.msra.mxu2 %v8689_v62 }
 0x3e6   : > { %8431 = vmatmul.msk.bf16.gmra.mxu2 %vm12881_vm10, %v9812_v15  ;;  %v8684_v15 = vld [vmem:[%s12768_s5 + $0x60] sm:$0xff] }
 0x3e7   : > { %5875 = vmatpush.bf16.msra.mxu1 %v8684_v15  ;;  %v3100_v15 = vpop.permute.xlu1 %3099 }
 0x3e9   : > { %v10643_v51 = vpop.f32.mrf.mxu2 }
 0x3eb   : > { %v10647_v61 = vpop.f32.mrf.mxu1 }
 0x3ee   : > { %3840 = vmatmul.bf16.gmra.mxu1 %v3383_v37 }
 0x3ef   : > { %v3102_v28 = vpop.permute.xlu1 %3101 }
 0x3f1   : > { %v10651_v6 = vpop.f32.mrf.mxu2 }
 0x3f2   : > { %12883 = vst [vmem:[#allocation11_spill] sm:$0xff] %v10651_v6 }
 0x3f3   : > { %v10653_v50 = vpop.f32.mrf.mxu1 }
 0x3f6   : > { %8432 = vmatmul.msk.bf16.gmra.mxu2 %vm12884_vm5, %v9848_v23 }
 0x3f9   : > { %v3985_v39 = vpop.f32.mrf.mxu2 }
 0x3fa   : > { %v3389_v39 = vsel %vm3348_vm3, %v3335_v16, %v3100_v15  ;;  %v8677_v16 = vld [vmem:[%s12768_s5 + $0x28] sm:$0xff] }
 0x3fb   : > { %v10662_v41 = vpop.f32.mrf.mxu1  ;;  %5775 = vmatpush.bf16.msrb.mxu3 %v8677_v16 }
 0x3fe   : > { %3845 = vmatmul.bf16.gmra.mxu1 %v3386_v44  ;;  %v2921_v44 = vpop.permute.xlu2 %2920 }
 0x3ff   : > { %v3296_v22 = vsel %vm12886_vm13, %v12853_v1, %v2921_v44  ;;  %v8683_v1 = vld [vmem:[%s12768_s5 + $0x58] sm:$0xff] }
 0x400   : > { %v3337_v27 = vsel %vm3307_vm14, %v3296_v22, %v3061_v11  ;;  %5876 = vmatpush.bf16.msra.mxu1 %v8683_v1  ;;  %v3104_v22 = vpop.permute.xlu1 %3103 }
 0x401   : > { %v3987_v23 = vpop.f32.mrf.mxu2  ;;  %v3392_v15 = vsel %vm3348_vm3, %v3337_v27, %v3102_v28  ;;  %v10702_v28 = vld [vmem:[%s12767_s4] ss:$0 sm:$0xff] }
 0x403   : > { %v10669_v4 = vpop.f32.mrf.mxu1 }
 0x406   : > { %v2923_v44 = vpop.permute.xlu2 %2922 }
 0x407   : > { %v3298_v27 = vsel %vm12887_vm6, %v12855_v36, %v2923_v44 }
 0x409   : > { %v3990_v37 = vpop.f32.mrf.mxu2 }
 0x40a   : > { %v10681_v37 = vpop.f32.mrf.mxu3 }
 0x40b   : > { %v10673_v5 = vpop.f32.mrf.mxu1 }
 0x40e   : > { %3850 = vmatmul.bf16.gmra.mxu1 %v3389_v39 }
 0x411   : > { %v3992_v63 = vpop.f32.mrf.mxu2 }
 0x412   : > { %v10692_v39 = vpop.f32.mrf.mxu3 }
 0x413   : > { %v10679_v42 = vpop.f32.mrf.mxu1 }
 0x419   : > { %v4004_v23 = vpop.f32.mrf.mxu2 }
 0x41a   : > { %v3063_v23 = vpop.permute.xlu0 %3062 }
 0x41b   : > { %v10685_v57 = vpop.f32.mrf.mxu1  ;;  %v3339_v16 = vsel %vm3307_vm14, %v3298_v27, %v3063_v23  ;;  %v3797_v23 = vadd.f32 %v10702_v28, %v10630_v53  ;;  %v3106_v53 = vpop.permute.xlu1 %3105 }
 0x41c   : > { %v3395_v7 = vsel %vm3348_vm3, %v3339_v16, %v3104_v22 }
 0x41e   : > { %3855 = vmatmul.bf16.gmra.mxu1 %v3392_v15 }
 0x421   : > { %v4006_v49 = vpop.f32.mrf.mxu2 }
 0x422   : > { %v10706_v49 = vpop.f32.mrf.mxu3 }
 0x423   : > { %v10694_v63 = vpop.f32.mrf.mxu1 }
 0x429   : > { %v4009_v11 = vpop.f32.mrf.mxu2 }
 0x42a   : > { %v10716_v44 = vpop.f32.mrf.mxu3 }
 0x42b   : > { %v3821_v15 = vpop.f32.mrf.mxu1 }
 0x42c   : > { %v3822_v6 = vadd.f32 %v10702_v28, %v3821_v15  ;;  %v3065_v15 = vpop.permute.xlu0 %3064 }
 0x42e   : > { %v3931_v1 = vadd.f32 %v10441_v29, %v3822_v6  ;;  %3860 = vmatmul.bf16.gmra.mxu1 %v3395_v7  ;;  %v8688_v29 = vld [vmem:[%s12768_s5 + $0x80] sm:$0xff]  ;;  %v2925_v7 = vpop.permute.xlu2 %2924  ;;  %v3906_v6 = vadd.f32 %v10272_v10, %v3797_v23 }
 0x42f   : > { %5978 = vmatpush.bf16.msra.mxu2 %v8688_v29  ;;  %v3300_v30 = vsel %vm12888_vm9, %v12857_v12, %v2925_v7 }
 0x430   : > { %v4040_v11 = vadd.f32 %v10374_v8, %v3931_v1 }
 0x431   : > { %v4011_v55 = vpop.f32.mrf.mxu2 }
 0x432   : > { %v4158_v27 = vmul.f32 0.2, %v4040_v11  ;;  %vm4118_vm7 = vcmp.gt.f32.partialorder %v4040_v11, 0.0 }
 0x433   : > { %v3823_v36 = vpop.f32.mrf.mxu1 }
 0x434   : > { %v3824_v22 = vadd.f32 %v10702_v28, %v3823_v36  ;;  %v4198_v55 = vsel %vm4118_vm7, %v4040_v11, %v4158_v27  ;;  %v3799_v11 = vadd.f32 %v10702_v28, %v10636_v47  ;;  %vm12891_vm7 = vmmov %vm12840_vm2 }
 0x435   : > { %v4399_v40 = vpack.c.bf16 %v4198_v55, %v4198_v55 }
 0x436   : > { %v3933_v8 = vadd.f32 %v10458_v45, %v3824_v22  ;;  %v3341_v45 = vsel %vm3307_vm14, %v3300_v30, %v3065_v15  ;;  %v10734_v22 = vpop.f32.mrf.mxu3  ;;  %v3908_v55 = vadd.f32 %v10291_v13, %v3799_v11 }
 0x437   : > { %v3398_v23 = vsel %vm3348_vm3, %v3341_v45, %v3106_v53  ;;  %v4479_v12 = vunpack.c.l.b16 %v4399_v40  ;;  %v2927_v40 = vpop.permute.xlu2 %2926 }
 0x438   : > { %v4042_v62 = vadd.f32 %v10390_v33, %v3933_v8 }
 0x439   : > { %v4014_v16 = vpop.f32.mrf.mxu2 }
 0x43a   : > { %vm4119_vm8 = vcmp.gt.f32.partialorder %v4042_v62, 0.0  ;;  %v4159_v1 = vmul.f32 0.2, %v4042_v62  ;;  %v4015_v36 = vadd.f32 %v4014_v16, %v3906_v6  ;;  %v3802_v16 = vadd.f32 %v10702_v28, %v10647_v61 }
 0x43b   : > { %v3826_v46 = vpop.f32.mrf.mxu1  ;;  %v3302_v61 = vsel %vm12840_vm2, %v12861_v48, %v2927_v40 }
 0x43c   : > { %v4199_v27 = vsel %vm4119_vm8, %v4042_v62, %v4159_v1  ;;  %v3827_v33 = vadd.f32 %v10702_v28, %v3826_v46  ;;  %v4148_v29 = vmul.f32 0.2, %v4015_v36  ;;  %vm4108_vm10 = vcmp.gt.f32.partialorder %v4015_v36, 0.0  ;;  %v8676_v46 = vld [vmem:[%s12768_s5 + $0x20] sm:$0xff]  ;;  %vm12893_vm8 = vmmov %vm12840_vm2 }
 0x43d   : > { %v4400_v10 = vpack.c.bf16 %v4199_v27, %v4199_v27  ;;  %5776 = vmatpush.bf16.msrb.mxu3 %v8676_v46  ;;  %v3108_v46 = vpop.permute.xlu1 %3107 }
 0x43e   : > { %v3936_v8 = vadd.f32 %v10469_v31, %v3827_v33  ;;  %3865 = vmatmul.bf16.gmra.mxu1 %v3398_v23  ;;  %v4188_v6 = vsel %vm4108_vm10, %v4015_v36, %v4148_v29  ;;  %v10745_v33 = vpop.f32.mrf.mxu3  ;;  %v3067_v36 = vpop.permute.xlu0 %3066 }
 0x43f   : > { %v4480_v7 = vunpack.c.l.b16 %v4400_v10  ;;  %v4389_v45 = vpack.c.bf16 %v4188_v6, %v4188_v6 }
 0x440   : > { %v4045_v30 = vadd.f32 %v10677_v52, %v3936_v8 }
 0x441   : > { %v4512_v47 = vpack.c.b16 %v4480_v7, %v4479_v12  ;;  %v4016_v62 = vpop.f32.mrf.mxu2  ;;  %v4469_v6 = vunpack.c.l.b16 %v4389_v45 }
 0x442   : > { %v4017_v15 = vadd.f32 %v4016_v62, %v3908_v55  ;;  %v4160_v1 = vmul.f32 0.2, %v4045_v30  ;;  %vm4120_vm5 = vcmp.gt.f32.partialorder %v4045_v30, 0.0  ;;  %v3911_v55 = vadd.f32 %v10313_v59, %v3802_v16 }
 0x443   : > { %v3828_v31 = vpop.f32.mrf.mxu1  ;;  %v4575_v53 = vshrl.u32 %v4512_v47, 16  ;;  %v4578_v27 = vshll.u32 %v4512_v47, 16  ;;  %v3343_v47 = vsel %vm3307_vm14, %v3302_v61, %v3067_v36 }
 0x444   : > { %vm4109_vm11 = vcmp.gt.f32.partialorder %v4017_v15, 0.0  ;;  %v4149_v52 = vmul.f32 0.2, %v4017_v15  ;;  %v3829_v13 = vadd.f32 %v10702_v28, %v3828_v31  ;;  %v4200_v12 = vsel %vm4120_vm5, %v4045_v30, %v4160_v1 }
 0x445   : > { %v4577_v11 = vrot.slane %v4575_v53, 7  ;;  %v3401_v45 = vsel %vm3348_vm3, %v3343_v47, %v3108_v46 }
 0x446   : > { %v4189_v10 = vsel %vm4109_vm11, %v4017_v15, %v4149_v52  ;;  %v3938_v23 = vadd.f32 %v10477_v34, %v3829_v13  ;;  %v3804_v52 = vadd.f32 %v10702_v28, %v10653_v50  ;;  %vm12894_vm11 = vmmov %vm12840_vm2 }
 0x447   : > { %v4390_v29 = vpack.c.bf16 %v4189_v10, %v4189_v10  ;;  %v4580_v8 = vor.u32 %v4578_v27, %v4577_v11  ;;  %v4732_v62 = vsel %vm9371_vm15, %v4577_v11, 0 }
 0x448   : > { %v4047_v7 = vadd.f32 %v10681_v37, %v3938_v23  ;;  %v4401_v37 = vpack.c.bf16 %v4200_v12, %v4200_v12  ;;  %v5055_v40 = vrot.slane %v4732_v62, 1  ;;  %v4837_v11 = vshll.u32 %v4732_v62, 16 }
 0x449   : > { %v4470_v15 = vunpack.c.l.b16 %v4390_v29  ;;  %v4019_v31 = vpop.f32.mrf.mxu2  ;;  %v10757_v34 = vsel %vm9371_vm15, 0, %v4580_v8  ;;  %v3913_v62 = vadd.f32 %v10329_v18, %v3804_v52  ;;  %v3807_v52 = vadd.f32 %v10702_v28, %v10662_v41  ;;  %v8675_v41 = vld [vmem:[%s12768_s5 + $0x18] sm:$0xff] }
 0x44a   : > { %12889 = vst [vmem:[#allocation12_spill] sm:$0xff] %v10757_v34  ;;  %vm4121_vm12 = vcmp.gt.f32.partialorder %v4047_v7, 0.0  ;;  %v4161_v48 = vmul.f32 0.2, %v4047_v7  ;;  %v4020_v30 = vadd.f32 %v4019_v31, %v3911_v55  ;;  %5223 = vrot.lane.b32.xlu0 %v10757_v34, %s8799_s29  ;;  %v5054_v59 = vrot.slane %v10757_v34, 1  ;;  %v10774_v55 = vpop.f32.mrf.mxu3  ;;  %5777 = vmatpush.bf16.msrb.mxu3 %v8675_v41 }
 0x44b   : > { %v4507_v16 = vpack.c.b16 %v4470_v15, %v4469_v6  ;;  %v10762_v53 = vpop.f32.mrf.mxu1  ;;  %v4832_v1 = vshll.u32 %v10757_v34, 16  ;;  %v4830_v61 = vshrl.u32 %v10757_v34, 16  ;;  %v4481_v8 = vunpack.c.l.b16 %v4401_v37 }
 0x44c   : > { %v4201_v13 = vsel %vm4121_vm12, %v4047_v7, %v4161_v48  ;;  %v4150_v10 = vmul.f32 0.2, %v4020_v30  ;;  %v10769_v23 = vsel %vm973_vm0, %v5054_v59, %v5055_v40  ;;  %vm4110_vm13 = vcmp.gt.f32.partialorder %v4020_v30, 0.0  ;;  %v8682_v59 = vld [vmem:[%s12768_s5 + $0x50] sm:$0xff]  ;;  %vm12896_vm12 = vmmov %vm12891_vm7 }
 0x44d   : > { %v4540_v27 = vshrl.u32 %v4507_v16, 16  ;;  %v4402_v36 = vpack.c.bf16 %v4201_v13, %v4201_v13  ;;  %5188 = vrot.lane.b32.xlu2 %v10769_v23, %s8800_s12  ;;  %v4834_v29 = vrot.slane %v4832_v1, 1  ;;  %v4543_v12 = vshll.u32 %v4507_v16, 16  ;;  %5877 = vmatpush.bf16.msra.mxu1 %v8682_v59 }
 0x44e   : > { %3870 = vmatmul.bf16.gmra.mxu1 %v3401_v45  ;;  %v4839_v46 = vrot.slane %v4837_v11, 1  ;;  %v4190_v31 = vsel %vm4110_vm13, %v4020_v30, %v4150_v10 }
 0x44f   : > { %v4542_v50 = vrot.slane %v4540_v27, 7  ;;  %v4482_v7 = vunpack.c.l.b16 %v4402_v36  ;;  %v4835_v47 = vor.u32 %v4834_v29, %v4830_v61  ;;  %v4391_v13 = vpack.c.bf16 %v4190_v31, %v4190_v31 }
 0x451   : > { %v4545_v6 = vor.u32 %v4543_v12, %v4542_v50  ;;  %v4513_v15 = vpack.c.b16 %v4482_v7, %v4481_v8  ;;  %v4021_v48 = vpop.f32.mrf.mxu2  ;;  %v4727_v37 = vsel %vm9371_vm15, %v4542_v50, 0  ;;  %v10783_v16 = vsel %vm664_vm1, %v4835_v47, %v4839_v46 }
 0x452   : > { %v4022_v40 = vadd.f32 %v4021_v48, %v3913_v62  ;;  %12890 = vst [vmem:[#allocation13_spill] sm:$0xff] %v10783_v16  ;;  %5271 = vrot.lane.b32.xlu1 %v10783_v16, %s8798_s19  ;;  %v5040_v27 = vrot.slane %v4727_v37, 1  ;;  %v10806_v7 = vpop.f32.mrf.mxu3  ;;  %v2929_v62 = vpop.permute.xlu2 %2928  ;;  %v4471_v47 = vunpack.c.l.b16 %v4391_v13  ;;  %v3916_v46 = vadd.f32 %v10346_v14, %v3807_v52 }
 0x453   : > { %v10787_v18 = vsel %vm9371_vm15, 0, %v4545_v6  ;;  %v10791_v30 = vpop.f32.mrf.mxu1  ;;  %v4582_v1 = vshrl.u32 %v4513_v15, 16  ;;  %v4585_v10 = vshll.u32 %v4513_v15, 16  ;;  %v3069_v15 = vpop.permute.xlu0 %3068  ;;  %v3304_v14 = vsel %vm12893_vm8, %v10284_v56, %v2929_v62  ;;  %vm12897_vm8 = vmmov %vm12891_vm7 }
 0x454   : > { %vm4111_vm6 = vcmp.gt.f32.partialorder %v4022_v40, 0.0  ;;  %v4151_v45 = vmul.f32 0.2, %v4022_v40  ;;  %v5039_v11 = vrot.slane %v10787_v18, 1  ;;  %v4772_v29 = vshll.u32 %v10787_v18, 16  ;;  %v3110_v13 = vpop.permute.xlu1 %3109 }
 0x455   : > { %v10796_v36 = vrot.slane %v4582_v1, 7  ;;  %v4777_v1 = vshll.u32 %v4727_v37, 16  ;;  %v3809_v37 = vadd.f32 %v10702_v28, %v10669_v4 }
 0x456   : > { %v4191_v61 = vsel %vm4111_vm6, %v4022_v40, %v4151_v45  ;;  %v10800_v50 = vsel %vm973_vm0, %v5039_v11, %v5040_v27  ;;  %v4774_v6 = vrot.slane %v4772_v29, 1  ;;  %v4770_v40 = vshrl.u32 %v10787_v18, 16 }
 0x457   : > { %v4392_v8 = vpack.c.bf16 %v4191_v61, %v4191_v61  ;;  %v4587_v12 = vor.u32 %v4585_v10, %v10796_v36  ;;  %8518 = vmatmul.msk.bf16.vlgmr.msra.gmra.mxu2 %vm12891_vm7, %v10800_v50  ;;  %5178 = vrot.lane.b32.xlu2 %v10800_v50, %s8800_s12  ;;  %v3345_v10 = vsel %vm3307_vm14, %v3304_v14, %v3069_v15 }
 0x458   : > { %v4775_v27 = vor.u32 %v4774_v6, %v4770_v40  ;;  %v3404_v29 = vsel %vm3348_vm3, %v3345_v10, %v3110_v13 }
 0x459   : > { %v4472_v31 = vunpack.c.l.b16 %v4392_v8  ;;  %v4024_v48 = vpop.f32.mrf.mxu2  ;;  %v10815_v59 = vsel %vm9371_vm15, 0, %v4587_v12  ;;  %v4779_v8 = vrot.slane %v4777_v1, 1  ;;  %v3812_v1 = vadd.f32 %v10702_v28, %v10673_v5 }
 0x45a   : > { %12892 = vst [vmem:[#allocation14_spill] sm:$0xff] %v10815_v59  ;;  %v4025_v45 = vadd.f32 %v4024_v48, %v3916_v46  ;;  %5225 = vrot.lane.b32.xlu0 %v10815_v59, %s8799_s29  ;;  %5136 = vrot.lane.b32.xlu1 %v10757_v34, %s8798_s19  ;;  %v10840_v48 = vpop.f32.mrf.mxu3 }
 0x45b   : > { %v4508_v52 = vpack.c.b16 %v4472_v31, %v4471_v47  ;;  %v10824_v11 = vpop.f32.mrf.mxu1  ;;  %v10831_v56 = vsel %vm664_vm1, %v4775_v27, %v4779_v8  ;;  %v3918_v47 = vadd.f32 %v10366_v3, %v3809_v37  ;;  %v3921_v8 = vadd.f32 %v10382_v43, %v3812_v1 }
 0x45c   : > { %v4152_v12 = vmul.f32 0.2, %v4025_v45  ;;  %vm4112_vm9 = vcmp.gt.f32.partialorder %v4025_v45, 0.0  ;;  %v3814_v43 = vadd.f32 %v10702_v28, %v10679_v42  ;;  %v8674_v42 = vld [vmem:[%s12768_s5 + $0x10] sm:$0xff] }
 0x45d   : > { %v4547_v61 = vshrl.u32 %v4508_v52, 16  ;;  %v4550_v41 = vshll.u32 %v4508_v52, 16  ;;  %5778 = vmatpush.bf16.msrb.mxu3 %v8674_v42 }
 0x45e   : > { %3875 = vmatmul.bf16.gmra.mxu1 %v3404_v29  ;;  %v4192_v4 = vsel %vm4112_vm9, %v4025_v45, %v4152_v12  ;;  %vm12899_vm9 = vmmov %vm12891_vm7 }
 0x45f   : > { %v4549_v62 = vrot.slane %v4547_v61, 7  ;;  %4965 = vrot.lane.b32.xlu2 %v10831_v56, %s8800_s12  ;;  %v4393_v45 = vpack.c.bf16 %v4192_v4, %v4192_v4 }
 0x461   : > { %v4026_v46 = vpop.f32.mrf.mxu2  ;;  %v4552_v6 = vor.u32 %v4550_v41, %v4549_v62  ;;  %v4728_v31 = vsel %vm9371_vm15, %v4549_v62, 0  ;;  %v4473_v5 = vunpack.c.l.b16 %v4393_v45 }
 0x462   : > { %v4027_v15 = vadd.f32 %v4026_v46, %v3918_v47  ;;  %5213 = vrot.lane.b32.xlu0 %v10787_v18, %s8799_s29  ;;  %5126 = vrot.lane.b32.xlu1 %v10787_v18, %s8798_s19  ;;  %v5043_v52 = vrot.slane %v4728_v31, 1  ;;  %v4789_v47 = vshll.u32 %v4728_v31, 16 }
 0x463   : > { %v10844_v40 = vpop.f32.mrf.mxu1  ;;  %v10848_v3 = vsel %vm9371_vm15, 0, %v4552_v6  ;;  %v10861_v6 = vpop.f32.mrf.mxu3 }
 0x464   : > { %vm4113_vm10 = vcmp.gt.f32.partialorder %v4027_v15, 0.0  ;;  %v4153_v13 = vmul.f32 0.2, %v4027_v15  ;;  %v5042_v14 = vrot.slane %v10848_v3, 1  ;;  %v4784_v27 = vshll.u32 %v10848_v3, 16 }
 0x465   : > { %v4782_v62 = vshrl.u32 %v10848_v3, 16  ;;  %v4791_v45 = vrot.slane %v4789_v47, 1 }
 0x466   : > { %v4193_v10 = vsel %vm4113_vm10, %v4027_v15, %v4153_v13  ;;  %v5044_v61 = vsel %vm973_vm0, %v5042_v14, %v5043_v52  ;;  %v4786_v29 = vrot.slane %v4784_v27, 1  ;;  %v3923_v27 = vadd.f32 %v10404_v21, %v3814_v43 }
 0x467   : > { %v4394_v37 = vpack.c.bf16 %v4193_v10, %v4193_v10  ;;  %8519 = vmatmul.msk.bf16.gmra.mxu2 %vm12894_vm11, %v5044_v61  ;;  %5180 = vrot.lane.b32.xlu2 %v5044_v61, %s8800_s12 }
 0x468   : > { %v4787_v13 = vor.u32 %v4786_v29, %v4782_v62 }
 0x469   : > { %v4474_v12 = vunpack.c.l.b16 %v4394_v37  ;;  %v4029_v41 = vpop.f32.mrf.mxu2 }
 0x46a   : > { %v4030_v46 = vadd.f32 %v4029_v41, %v3921_v8  ;;  %5091 = vrot.lane.b32.xlu0 %v10800_v50, %s8799_s29  ;;  %5261 = vrot.lane.b32.xlu1 %v10831_v56, %s8798_s19  ;;  %v10870_v52 = vsel %vm664_vm1, %v4787_v13, %v4791_v45  ;;  %v3817_v41 = vadd.f32 %v10702_v28, %v10685_v57 }
 0x46b   : > { %v4509_v4 = vpack.c.b16 %v4474_v12, %v4473_v5  ;;  %v10865_v15 = vpop.f32.mrf.mxu1  ;;  %v10892_v47 = vpop.f32.mrf.mxu3 }
 0x46c   : > { %v4154_v14 = vmul.f32 0.2, %v4030_v46  ;;  %vm4114_vm5 = vcmp.gt.f32.partialorder %v4030_v46, 0.0  ;;  %v3926_v57 = vadd.f32 %v10419_v26, %v3817_v41  ;;  %v3819_v26 = vadd.f32 %v10702_v28, %v10694_v63 }
 0x46d   : > { %v4554_v1 = vshrl.u32 %v4509_v4, 16  ;;  %v4557_v31 = vshll.u32 %v4509_v4, 16 }
 0x46e   : > { %v4194_v29 = vsel %vm4114_vm5, %v4030_v46, %v4154_v14  ;;  %vm12900_vm5 = vmmov %vm12891_vm7 }
 0x46f   : > { %v4556_v50 = vrot.slane %v4554_v1, 7  ;;  %4967 = vrot.lane.b32.xlu2 %v10870_v52, %s8800_s12  ;;  %v4395_v46 = vpack.c.bf16 %v4194_v29, %v4194_v29 }
 0x471   : > { %v4031_v10 = vpop.f32.mrf.mxu2  ;;  %v4559_v37 = vor.u32 %v4557_v31, %v4556_v50  ;;  %v4729_v5 = vsel %vm9371_vm15, %v4556_v50, 0  ;;  %v8681_v50 = vld [vmem:[%s12768_s5 + $0x48] sm:$0xff] }
 0x472   : > { %v4032_v8 = vadd.f32 %v4031_v10, %v3923_v27  ;;  %5215 = vrot.lane.b32.xlu0 %v10848_v3, %s8799_s29  ;;  %5128 = vrot.lane.b32.xlu1 %v10848_v3, %s8798_s19  ;;  %v5046_v13 = vrot.slane %v4729_v5, 1  ;;  %v4475_v27 = vunpack.c.l.b16 %v4395_v46  ;;  %v4801_v29 = vshll.u32 %v4729_v5, 16 }
 0x473   : > { %v10884_v12 = vpop.f32.mrf.mxu1  ;;  %v10888_v21 = vsel %vm9371_vm15, 0, %v4559_v37  ;;  %5878 = vmatpush.bf16.msra.mxu1 %v8681_v50  ;;  %v10911_v41 = vpop.f32.mrf.mxu3  ;;  %v3928_v50 = vadd.f32 %v10431_v9, %v3819_v26 }
 0x474   : > { %12895 = vst [vmem:[#allocation15_spill] sm:$0xff] %v10888_v21  ;;  %vm4115_vm2 = vcmp.gt.f32.partialorder %v4032_v8, 0.0  ;;  %v4155_v62 = vmul.f32 0.2, %v4032_v8  ;;  %v5045_v4 = vrot.slane %v10888_v21, 1  ;;  %v4796_v43 = vshll.u32 %v10888_v21, 16 }
 0x475   : > { %v4794_v42 = vshrl.u32 %v10888_v21, 16 }
 0x476   : > { %v4195_v1 = vsel %vm4115_vm2, %v4032_v8, %v4155_v62  ;;  %v5047_v14 = vsel %vm973_vm0, %v5045_v4, %v5046_v13  ;;  %v4798_v31 = vrot.slane %v4796_v43, 1  ;;  %v4803_v43 = vrot.slane %v4801_v29, 1 }
 0x477   : > { %v4396_v45 = vpack.c.bf16 %v4195_v1, %v4195_v1  ;;  %8520 = vmatmul.msk.bf16.gmra.mxu2 %vm12896_vm12, %v5047_v14  ;;  %5182 = vrot.lane.b32.xlu2 %v5047_v14, %s8800_s12 }
 0x478   : > { %v4799_v13 = vor.u32 %v4798_v31, %v4794_v42 }
 0x479   : > { %v4476_v10 = vunpack.c.l.b16 %v4396_v45  ;;  %v4034_v37 = vpop.f32.mrf.mxu2 }
 0x47a   : > { %v4035_v8 = vadd.f32 %v4034_v37, %v3926_v57  ;;  %5093 = vrot.lane.b32.xlu0 %v5044_v61, %s8799_s29  ;;  %5263 = vrot.lane.b32.xlu1 %v10870_v52, %s8798_s19  ;;  %v10914_v45 = vsel %vm664_vm1, %v4799_v13, %v4803_v43 }
 0x47b   : > { %v4510_v62 = vpack.c.b16 %v4476_v10, %v4475_v27  ;;  %v10907_v4 = vpop.f32.mrf.mxu1  ;;  %v2931_v10 = vpop.permute.xlu2 %2930 }
 0x47c   : > { %v4156_v1 = vmul.f32 0.2, %v4035_v8  ;;  %vm4116_vm13 = vcmp.gt.f32.partialorder %v4035_v8, 0.0  ;;  %v10933_v43 = vpop.f32.mrf.mxu3 }
 0x47d   : > { %v4561_v46 = vshrl.u32 %v4510_v62, 16  ;;  %v4564_v5 = vshll.u32 %v4510_v62, 16 }
 0x47e   : > { %v4196_v27 = vsel %vm4116_vm13, %v4035_v8, %v4156_v1  ;;  %vm12901_vm13 = vmmov %vm12900_vm5 }
 0x47f   : > { %v4563_v61 = vrot.slane %v4561_v46, 7  ;;  %4969 = vrot.lane.b32.xlu2 %v10914_v45, %s8800_s12  ;;  %v4397_v8 = vpack.c.bf16 %v4196_v27, %v4196_v27 }
 0x481   : > { %v4036_v31 = vpop.f32.mrf.mxu2  ;;  %v4566_v57 = vor.u32 %v4564_v5, %v4563_v61  ;;  %v4730_v37 = vsel %vm9371_vm15, %v4563_v61, 0 }
 0x482   : > { %v4037_v63 = vadd.f32 %v4036_v31, %v3928_v50  ;;  %5217 = vrot.lane.b32.xlu0 %v10888_v21, %s8799_s29  ;;  %5130 = vrot.lane.b32.xlu1 %v10888_v21, %s8798_s19  ;;  %v5049_v13 = vrot.slane %v4730_v37, 1  ;;  %v8673_v50 = vld [vmem:[%s12768_s5 + $0x8] sm:$0xff]  ;;  %v3834_v31 = vadd.f32 %v10702_v28, %v10791_v30 }
 0x483   : > { %v10925_v42 = vpop.f32.mrf.mxu1  ;;  %v10929_v29 = vsel %vm9371_vm15, 0, %v4566_v57  ;;  %v4477_v57 = vunpack.c.l.b16 %v4397_v8  ;;  %5779 = vmatpush.bf16.msrb.mxu3 %v8673_v50  ;;  %v3306_v8 = vsel %vm12897_vm8, %v9380_v24, %v2931_v10  ;;  %vm12906_vm8 = vmmov %vm12900_vm5 }
 0x484   : > { %vm4117_vm6 = vcmp.gt.f32.partialorder %v4037_v63, 0.0  ;;  %v4157_v9 = vmul.f32 0.2, %v4037_v63  ;;  %v5048_v62 = vrot.slane %v10929_v29, 1  ;;  %v4808_v26 = vshll.u32 %v10929_v29, 16  ;;  %v10959_v21 = vpop.f32.mrf.mxu3 }
 0x486   : > { %v4197_v46 = vsel %vm4117_vm6, %v4037_v63, %v4157_v9  ;;  %v10936_v5 = vsel %vm973_vm0, %v5048_v62, %v5049_v13  ;;  %v4810_v61 = vrot.slane %v4808_v26, 1  ;;  %v4806_v63 = vshrl.u32 %v10929_v29, 16 }
 0x487   : > { %v4398_v1 = vpack.c.bf16 %v4197_v46, %v4197_v46  ;;  %8521 = vmatmul.msk.bf16.gmra.mxu2 %vm12891_vm7, %v10936_v5  ;;  %5184 = vrot.lane.b32.xlu2 %v10936_v5, %s8800_s12  ;;  %v4813_v9 = vshll.u32 %v4730_v37, 16  ;;  %v3832_v62 = vadd.f32 %v10702_v28, %v10762_v53  ;;  %v3943_v46 = vadd.f32 %v10508_v35, %v3834_v31  ;;  %v3071_v37 = vpop.permute.xlu0 %3070 }
 0x488   : > { %v4811_v26 = vor.u32 %v4810_v61, %v4806_v63  ;;  %v3347_v61 = vsel %vm3307_vm14, %v3306_v8, %v3071_v37  ;;  %v3112_v63 = vpop.permute.xlu1 %3111 }
 0x489   : > { %v4478_v27 = vunpack.c.l.b16 %v4398_v1  ;;  %v4962_v1 = vpop.permute.xlu2 %4961  ;;  %v4815_v34 = vrot.slane %v4813_v9, 1  ;;  %v3941_v53 = vadd.f32 %v10494_v60, %v3832_v62  ;;  %v4052_v35 = vadd.f32 %v10706_v49, %v3943_v46  ;;  %v8672_v46 = vld [vmem:[%s12768_s5] sm:$0xff] }
 0x48a   : > { %5095 = vrot.lane.b32.xlu0 %v5047_v14, %s8799_s29  ;;  %5265 = vrot.lane.b32.xlu1 %v10914_v45, %s8798_s19  ;;  %v3407_v10 = vsel %vm3348_vm3, %v3347_v61, %v3112_v63  ;;  %v3839_v61 = vadd.f32 %v10702_v28, %v10844_v40 }
 0x48b   : > { %v4511_v13 = vpack.c.b16 %v4478_v27, %v4477_v57  ;;  %v10953_v30 = vpop.f32.mrf.mxu1  ;;  %v10962_v57 = vsel %vm664_vm1, %v4811_v26, %v4815_v34  ;;  %3880 = vmatmul.bf16.gmra.mxu1 %v3407_v10  ;;  %v4050_v34 = vadd.f32 %v10692_v39, %v3941_v53  ;;  %v4163_v62 = vmul.f32 0.2, %v4052_v35  ;;  %5780 = vmatpush.bf16.msrb.mxu3 %v8672_v46 }
 0x48c   : > { %vm4123_vm10 = vcmp.gt.f32.partialorder %v4052_v35, 0.0  ;;  %v11000_v10 = vpop.f32.mrf.mxu3 }
 0x48d   : > { %v4568_v50 = vshrl.u32 %v4511_v13, 16  ;;  %v4571_v14 = vshll.u32 %v4511_v13, 16  ;;  %v5302_v13 = vsel %vm12899_vm9, %v9380_v24, %v4962_v1  ;;  %v4162_v8 = vmul.f32 0.2, %v4050_v34 }
 0x48e   : > { %vm4122_vm11 = vcmp.gt.f32.partialorder %v4050_v34, 0.0 }
 0x48f   : > { %v4570_v27 = vrot.slane %v4568_v50, 7  ;;  %4971 = vrot.lane.b32.xlu2 %v10962_v57, %s8800_s12  ;;  %v5088_v53 = vpop.permute.xlu0 %5087 }
 0x490   : > { %v5125_v1 = vpop.permute.xlu1 %5124 }
 0x491   : > { %v4573_v31 = vor.u32 %v4571_v14, %v4570_v27  ;;  %v10971_v60 = vsel %vm9371_vm15, %v4570_v27, 0  ;;  %v10991_v37 = vpop.permute.xlu2 %5176  ;;  %v5338_v14 = vsel %vm3307_vm14, %v5302_v13, %v5088_v53  ;;  %v4203_v27 = vsel %vm4123_vm10, %v4052_v35, %v4163_v62 }
 0x492   : > { %5219 = vrot.lane.b32.xlu0 %v10929_v29, %s8799_s29  ;;  %5132 = vrot.lane.b32.xlu1 %v10929_v29, %s8798_s19  ;;  %v5052_v39 = vrot.slane %v10971_v60, 1  ;;  %v5374_v63 = vsel %vm3348_vm3, %v5338_v14, %v5125_v1  ;;  %v4404_v35 = vpack.c.bf16 %v4203_v27, %v4203_v27  ;;  %v3948_v62 = vadd.f32 %v10535_v32, %v3839_v61  ;;  %v8680_v32 = vld [vmem:[%s12768_s5 + $0x40] sm:$0xff] }
 0x493   : > { %v10978_v49 = vpop.f32.mrf.mxu1  ;;  %v10982_v9 = vsel %vm9371_vm15, 0, %v4573_v31  ;;  %v4202_v31 = vsel %vm4122_vm11, %v4050_v34, %v4162_v8  ;;  %5781 = vmatmul.bf16.vlgmr.msrb.gmra.mxu3 %v5374_v63  ;;  %v5057_v61 = vrot.slane %v10815_v59, 1  ;;  %5879 = vmatpush.bf16.msra.mxu1 %v8680_v32  ;;  %v3842_v32 = vadd.f32 %v10702_v28, %v10865_v15  ;;  %vm12908_vm11 = vmmov %vm12900_vm5 }
 0x494   : > { %12898 = vst [vmem:[#allocation16_spill] sm:$0xff] %v10982_v9  ;;  %v5051_v26 = vrot.slane %v10982_v9, 1  ;;  %v4403_v13 = vpack.c.bf16 %v4202_v31, %v4202_v31  ;;  %v4820_v34 = vshll.u32 %v10982_v9, 16  ;;  %v4484_v46 = vunpack.c.l.b16 %v4404_v35 }
 0x495   : > { %v4825_v31 = vshll.u32 %v10971_v60, 16  ;;  %v4842_v15 = vshrl.u32 %v10815_v59, 16 }
 0x496   : > { %v5053_v50 = vsel %vm973_vm0, %v5051_v26, %v5052_v39  ;;  %v3837_v26 = vadd.f32 %v10702_v28, %v10824_v11  ;;  %v4057_v11 = vadd.f32 %v10734_v22, %v3948_v62  ;;  %v4483_v53 = vunpack.c.l.b16 %v4403_v13 }
 0x497   : > { %8522 = vmatmul.msk.bf16.gmra.mxu2 %vm12900_vm5, %v5053_v50  ;;  %5186 = vrot.lane.b32.xlu2 %v5053_v50, %s8800_s12  ;;  %v4822_v22 = vrot.slane %v4820_v34, 1  ;;  %v4827_v60 = vrot.slane %v4825_v31, 1 }
 0x498   : > { %v3946_v39 = vadd.f32 %v10520_v54, %v3837_v26  ;;  %v4733_v54 = vsel %vm9371_vm15, %v10796_v36, 0  ;;  %v4514_v1 = vpack.c.b16 %v4484_v46, %v4483_v53  ;;  %v4165_v63 = vmul.f32 0.2, %v4057_v11 }
 0x499   : > { %v11014_v8 = vpop.permute.xlu2 %4963  ;;  %vm4125_vm2 = vcmp.gt.f32.partialorder %v4057_v11, 0.0  ;;  %v5058_v26 = vrot.slane %v4733_v54, 1  ;;  %v4844_v36 = vshll.u32 %v10815_v59, 16  ;;  %v3844_v46 = vadd.f32 %v10702_v28, %v10884_v12 }
 0x49a   : > { %5097 = vrot.lane.b32.xlu0 %v10936_v5, %s8799_s29  ;;  %5267 = vrot.lane.b32.xlu1 %v10962_v57, %s8798_s19  ;;  %v11018_v5 = vpop.f32.mrf.mxu3  ;;  %v4055_v14 = vadd.f32 %v10716_v44, %v3946_v39  ;;  %v4818_v44 = vshrl.u32 %v10982_v9, 16  ;;  %v4589_v39 = vshrl.u32 %v4514_v1, 16  ;;  %v4205_v34 = vsel %vm4125_vm2, %v4057_v11, %v4165_v63 }
 0x49b   : > { %v11008_v40 = vpop.f32.mrf.mxu1  ;;  %v11038_v13 = vsel %vm973_vm0, %v5057_v61, %v5058_v26  ;;  %v4846_v11 = vrot.slane %v4844_v36, 1  ;;  %v4406_v63 = vpack.c.bf16 %v4205_v34, %v4205_v34  ;;  %v3953_v31 = vadd.f32 %v10562_v2, %v3844_v46 }
 0x49c   : > { %v4164_v35 = vmul.f32 0.2, %v4055_v14  ;;  %v4823_v62 = vor.u32 %v4822_v22, %v4818_v44  ;;  %vm4124_vm12 = vcmp.gt.f32.partialorder %v4055_v14, 0.0  ;;  %v4849_v26 = vshll.u32 %v4733_v54, 16 }
 0x49d   : > { %v4486_v36 = vunpack.c.l.b16 %v4406_v63  ;;  %v4062_v34 = vadd.f32 %v10774_v55, %v3953_v31  ;;  %v3847_v63 = vadd.f32 %v10702_v28, %v10907_v4  ;;  %v11095_v31 = vpop.permute.xlu0 %5089 }
 0x49e   : > { %v4204_v53 = vsel %vm4124_vm12, %v4055_v14, %v4164_v35  ;;  %v11051_v61 = vsel %vm664_vm1, %v4823_v62, %v4827_v60  ;;  %v4591_v14 = vrot.slane %v4589_v39, 7  ;;  %v4592_v62 = vshll.u32 %v4514_v1, 16 }
 0x49f   : > { %4975 = vrot.lane.b32.xlu2 %v10783_v16, %s8800_s12  ;;  %12903 = vst [vmem:[#allocation18_spill] sm:$0xff] %v11051_v61  ;;  %v4405_v35 = vpack.c.bf16 %v4204_v53, %v4204_v53  ;;  %v3951_v60 = vadd.f32 %v10550_v0, %v3842_v32  ;;  %vm4127_vm6 = vcmp.gt.f32.partialorder %v4062_v34, 0.0 }
 0x4a0   : > { %v4594_v16 = vor.u32 %v4592_v62, %v4591_v14 }
 0x4a1   : > { %v4060_v39 = vadd.f32 %v10745_v33, %v3951_v60  ;;  %v4167_v33 = vmul.f32 0.2, %v4062_v34 }
 0x4a2   : > { %5221 = vrot.lane.b32.xlu0 %v10982_v9, %s8799_s29  ;;  %5134 = vrot.lane.b32.xlu1 %v10982_v9, %s8798_s19  ;;  %v11054_v12 = vpop.f32.mrf.mxu3  ;;  %v4485_v9 = vunpack.c.l.b16 %v4405_v35  ;;  %v11080_v1 = vsel %vm9371_vm15, 0, %v4594_v16  ;;  %v4734_v16 = vsel %vm9371_vm15, %v4591_v14, 0 }
 0x4a3   : > { %v11031_v27 = vpop.f32.mrf.mxu1  ;;  %12905 = vst [vmem:[#allocation20_spill] sm:$0xff] %v11080_v1  ;;  %v4166_v53 = vmul.f32 0.2, %v4060_v39  ;;  %v4856_v32 = vshll.u32 %v11080_v1, 16  ;;  %vm4126_vm7 = vcmp.gt.f32.partialorder %v4060_v39, 0.0  ;;  %v5060_v14 = vrot.slane %v11080_v1, 1 }
 0x4a4   : > { %v4515_v0 = vpack.c.b16 %v4486_v36, %v4485_v9  ;;  %v3849_v9 = vadd.f32 %v10702_v28, %v10925_v42  ;;  %v4861_v36 = vshll.u32 %v4734_v16, 16 }
 0x4a5   : > { %v4858_v42 = vrot.slane %v4856_v32, 1 }
 0x4a6   : > { %v3958_v4 = vadd.f32 %v10584_v19, %v3849_v9  ;;  %v4863_v19 = vrot.slane %v4861_v36, 1  ;;  %v3854_v36 = vadd.f32 %v10702_v28, %v10978_v49 }
 0x4a7   : > { %8523 = vmatmul.msk.bf16.gmra.mxu2 %vm12901_vm13, %v10769_v23  ;;  %5190 = vrot.lane.b32.xlu2 %v11038_v13, %s8800_s12  ;;  %v11048_v22 = vpop.permute.xlu2 %5188  ;;  %vm12910_vm13 = vmmov %vm12900_vm5 }
 0x4a8   : > { %12902 = vst [vmem:[#allocation17_spill] sm:$0xff] %v11048_v22  ;;  %v4851_v22 = vrot.slane %v4849_v26, 1 }
 0x4aa   : > { %5099 = vrot.lane.b32.xlu0 %v5053_v50, %s8799_s29  ;;  %5269 = vrot.lane.b32.xlu1 %v11051_v61, %s8798_s19  ;;  %v4847_v50 = vor.u32 %v4846_v11, %v4842_v15  ;;  %v11082_v46 = vpop.f32.mrf.mxu3  ;;  %v4206_v11 = vsel %vm4126_vm7, %v4060_v39, %v4166_v53  ;;  %v5061_v39 = vrot.slane %v4734_v16, 1  ;;  %v3956_v53 = vadd.f32 %v10574_v17, %v3847_v63  ;;  %vm12914_vm7 = vmmov %vm12900_vm5 }
 0x4ab   : > { %v11058_v44 = vpop.f32.mrf.mxu1 }
 0x4ac   : > { %v11070_v54 = vsel %vm664_vm1, %v4847_v50, %v4851_v22  ;;  %v4596_v22 = vshrl.u32 %v4515_v0, 16  ;;  %v4854_v50 = vshrl.u32 %v11080_v1, 16 }
 0x4ad   : > { %12904 = vst [vmem:[#allocation19_spill] sm:$0xff] %v11070_v54 }
 0x4ae   : > { %v4598_v62 = vrot.slane %v4596_v22, 7  ;;  %v4859_v32 = vor.u32 %v4858_v42, %v4854_v50  ;;  %v4067_v22 = vadd.f32 %v10840_v48, %v3958_v4 }
 0x4af   : > { %4973 = vrot.lane.b32.xlu2 %v11051_v61, %s8800_s12  ;;  %v4065_v61 = vadd.f32 %v10806_v7, %v3956_v53 }
 0x4b0   : > { %v4169_v7 = vmul.f32 0.2, %v4067_v22  ;;  %vm4129_vm9 = vcmp.gt.f32.partialorder %v4067_v22, 0.0 }
 0x4b1   : > { %v11067_v2 = vpop.permute.xlu2 %5178  ;;  %vm4128_vm10 = vcmp.gt.f32.partialorder %v4065_v61, 0.0 }
 0x4b2   : > { %5101 = vrot.lane.b32.xlu0 %v10769_v23, %s8799_s29  ;;  %5273 = vrot.lane.b32.xlu1 %v11070_v54, %s8798_s19  ;;  %v4207_v23 = vsel %vm4127_vm6, %v4062_v34, %v4167_v33  ;;  %v11106_v60 = vpop.f32.mrf.mxu3  ;;  %v4407_v34 = vpack.c.bf16 %v4206_v11, %v4206_v11  ;;  %v4599_v33 = vshll.u32 %v4515_v0, 16  ;;  %v11121_v0 = vsel %vm664_vm1, %v4859_v32, %v4863_v19  ;;  %vm12911_vm6 = vmmov %vm12900_vm5 }
 0x4b3   : > { %v11076_v55 = vpop.f32.mrf.mxu1  ;;  %v4408_v26 = vpack.c.bf16 %v4207_v23, %v4207_v23  ;;  %12907 = vst [vmem:[#allocation21_spill] sm:$0xff] %v11121_v0  ;;  %v4209_v50 = vsel %vm4129_vm9, %v4067_v22, %v4169_v7 }
 0x4b4   : > { %v4487_v9 = vunpack.c.l.b16 %v4407_v34  ;;  %v4410_v49 = vpack.c.bf16 %v4209_v50, %v4209_v50 }
 0x4b5   : > { %v4488_v23 = vunpack.c.l.b16 %v4408_v26 }
 0x4b7   : > { %8524 = vmatmul.msk.bf16.gmra.mxu2 %vm12906_vm8, %v11038_v13  ;;  %4977 = vrot.lane.b32.xlu2 %v11070_v54, %s8800_s12  ;;  %v11112_v54 = vsel %vm973_vm0, %v5060_v14, %v5061_v39  ;;  %v4516_v17 = vpack.c.b16 %v4488_v23, %v4487_v9  ;;  %v4168_v14 = vmul.f32 0.2, %v4065_v61  ;;  %v3852_v39 = vadd.f32 %v10702_v28, %v10953_v30 }
 0x4b9   : > { %v11097_v15 = vpop.permute.xlu2 %4965  ;;  %v4603_v4 = vshrl.u32 %v4516_v17, 16  ;;  %v4208_v34 = vsel %vm4128_vm10, %v4065_v61, %v4168_v14  ;;  %v3963_v61 = vadd.f32 %v10598_v25, %v3854_v36  ;;  %v4606_v50 = vshll.u32 %v4516_v17, 16  ;;  %vm12915_vm10 = vmmov %vm12900_vm5 }
 0x4ba   : > { %5227 = vrot.lane.b32.xlu0 %v11080_v1, %s8799_s29  ;;  %5138 = vrot.lane.b32.xlu1 %v10815_v59, %s8798_s19  ;;  %v4601_v59 = vor.u32 %v4599_v33, %v4598_v62  ;;  %v4094_v63 = vpop.f32.mrf.mxu3  ;;  %v4409_v7 = vpack.c.bf16 %v4208_v34, %v4208_v34 }
 0x4bb   : > { %v11103_v35 = vpop.f32.mrf.mxu1  ;;  %v4605_v22 = vrot.slane %v4603_v4, 7  ;;  %v4072_v36 = vadd.f32 %v10892_v47, %v3963_v61 }
 0x4bc   : > { %v11131_v16 = vsel %vm9371_vm15, 0, %v4601_v59  ;;  %v11133_v42 = vpop.permute.xlu0 %5223  ;;  %v4735_v59 = vsel %vm9371_vm15, %v4598_v62, 0  ;;  %v4489_v17 = vunpack.c.l.b16 %v4409_v7 }
 0x4bd   : > { %v5063_v23 = vrot.slane %v11131_v16, 1  ;;  %v4866_v9 = vshrl.u32 %v11131_v16, 16  ;;  %v4873_v63 = vshll.u32 %v4735_v59, 16  ;;  %vm4131_vm2 = vcmp.gt.f32.partialorder %v4072_v36, 0.0 }
 0x4bf   : > { %5192 = vrot.lane.b32.xlu2 %v11112_v54, %s8800_s12 }
 0x4c1   : > { %v11118_v11 = vpop.permute.xlu2 %5180 }
 0x4c2   : > { %5103 = vrot.lane.b32.xlu0 %v11038_v13, %s8799_s29  ;;  %5275 = vrot.lane.b32.xlu1 %v11121_v0, %s8798_s19  ;;  %v4868_v13 = vshll.u32 %v11131_v16, 16  ;;  %v4096_v19 = vpop.f32.mrf.mxu3 }
 0x4c3   : > { %v11127_v48 = vpop.f32.mrf.mxu1  ;;  %v4490_v19 = vunpack.c.l.b16 %v4410_v49 }
 0x4c4   : > { %v11135_v26 = vpop.permute.xlu1 %5271  ;;  %v4870_v53 = vrot.slane %v4868_v13, 1  ;;  %v5064_v13 = vrot.slane %v4735_v59, 1  ;;  %v4875_v59 = vrot.slane %v4873_v63, 1  ;;  %v11199_v63 = vld [vmem:[%s12767_s4] ss:$0 sm:$0xff] }
 0x4c5   : > { %v4517_v47 = vpack.c.b16 %v4490_v19, %v4489_v17  ;;  %v3859_v7 = vadd.f32 %v11199_v63, %v11031_v27 }
 0x4c6   : > { %v4871_v4 = vor.u32 %v4870_v53, %v4866_v9  ;;  %v11165_v25 = vsel %vm973_vm0, %v5063_v23, %v5064_v13 }
 0x4c7   : > { %8525 = vmatmul.msk.bf16.gmra.mxu2 %vm12908_vm11, %v11112_v54  ;;  %4979 = vrot.lane.b32.xlu2 %v11121_v0, %s8800_s12  ;;  %v3961_v0 = vadd.f32 %v10588_v58, %v3852_v39  ;;  %vm12916_vm11 = vmmov %vm12900_vm5 }
 0x4c8   : > { %v11180_v39 = vsel %vm664_vm1, %v4871_v4, %v4875_v59 }
 0x4c9   : > { %v11148_v33 = vpop.permute.xlu2 %4967  ;;  %v4070_v58 = vadd.f32 %v10861_v6, %v3961_v0  ;;  %12909 = vst [vmem:[#allocation22_spill] sm:$0xff] %v11180_v39 }
 0x4ca   : > { %5229 = vrot.lane.b32.xlu0 %v11131_v16, %s8799_s29  ;;  %5140 = vrot.lane.b32.xlu1 %v11080_v1, %s8798_s19 }
 0x4cb   : > { %v3871_v32 = vpop.f32.mrf.mxu1  ;;  %v4170_v23 = vmul.f32 0.2, %v4070_v58  ;;  %vm4130_vm12 = vcmp.gt.f32.partialorder %v4070_v58, 0.0 }
 0x4cc   : > { %v3872_v62 = vadd.f32 %v10702_v28, %v3871_v32  ;;  %v11157_v30 = vpop.permute.xlu0 %5225  ;;  %v11160_v14 = vpop.permute.xlu1 %5136  ;;  %v4608_v28 = vor.u32 %v4606_v50, %v4605_v22  ;;  %v3857_v50 = vadd.f32 %v11199_v63, %v11008_v40  ;;  %v12912_v40 = vld [vmem:[#allocation6_spill] sm:$0xff] }
 0x4cd   : > { %v4210_v13 = vsel %vm4130_vm12, %v4070_v58, %v4170_v23  ;;  %v3968_v58 = vadd.f32 %v12912_v40, %v3859_v7 }
 0x4ce   : > { %v3981_v1 = vadd.f32 %v10643_v51, %v3872_v62  ;;  %v5304_v51 = vsel %vm12900_vm5, %v9380_v24, %v11014_v8  ;;  %v11190_v6 = vsel %vm9371_vm15, 0, %v4608_v28  ;;  %v4171_v8 = vmul.f32 0.2, %v4072_v36 }
 0x4cf   : > { %5194 = vrot.lane.b32.xlu2 %v11165_v25, %s8800_s12  ;;  %v5340_v53 = vsel %vm3307_vm14, %v5304_v51, %v11095_v31  ;;  %v4880_v61 = vshll.u32 %v11190_v6, 16  ;;  %v4610_v62 = vshrl.u32 %v4517_v47, 16  ;;  %v4736_v31 = vsel %vm9371_vm15, %v4605_v22, 0 }
 0x4d0   : > { %v11169_v32 = vadd.f32 %v11082_v46, %v3981_v1  ;;  %v4099_v46 = vpop.f32.mrf.mxu3  ;;  %v4211_v9 = vsel %vm4131_vm2, %v4072_v36, %v4171_v8  ;;  %v5066_v59 = vrot.slane %v11190_v6, 1  ;;  %v5429_v22 = vsel %vm12911_vm6, %v9417_v20, %v10991_v37  ;;  %vm12920_vm6 = vmmov %vm12900_vm5 }
 0x4d1   : > { %v11177_v34 = vpop.permute.xlu2 %5182  ;;  %v4882_v19 = vrot.slane %v4880_v61, 1  ;;  %v4412_v27 = vpack.c.bf16 %v4211_v9, %v4211_v9  ;;  %v4612_v17 = vrot.slane %v4610_v62, 7  ;;  %v4878_v46 = vshrl.u32 %v11190_v6, 16 }
 0x4d2   : > { %5105 = vrot.lane.b32.xlu0 %v11112_v54, %s8799_s29  ;;  %5277 = vrot.lane.b32.xlu1 %v11180_v39, %s8798_s19  ;;  %v4885_v8 = vshll.u32 %v4736_v31, 16  ;;  %v5067_v61 = vrot.slane %v4736_v31, 1  ;;  %v4613_v9 = vshll.u32 %v4517_v47, 16  ;;  %v4077_v40 = vadd.f32 %v10933_v43, %v3968_v58 }
 0x4d3   : > { %v11186_v1 = vpop.f32.mrf.mxu1  ;;  %v4883_v24 = vor.u32 %v4882_v19, %v4878_v46 }
 0x4d4   : > { %v5214_v0 = vpop.permute.xlu0 %5213  ;;  %v5127_v49 = vpop.permute.xlu1 %5126  ;;  %v11227_v37 = vsel %vm973_vm0, %v5066_v59, %v5067_v61  ;;  %v4615_v7 = vor.u32 %v4613_v9, %v4612_v17  ;;  %vm4133_vm8 = vcmp.gt.f32.partialorder %v4077_v40, 0.0 }
 0x4d5   : > { %v5377_v54 = vsel %vm3348_vm3, %v5340_v53, %v5127_v49  ;;  %v4411_v49 = vpack.c.bf16 %v4210_v13, %v4210_v13  ;;  %v5482_v23 = vsel %vm3307_vm14, %v5429_v22, %v5214_v0  ;;  %v4887_v0 = vrot.slane %v4885_v8, 1 }
 0x4d6   : > { %5786 = vmatmul.bf16.gmra.mxu3 %v5377_v54  ;;  %v11244_v59 = vsel %vm9371_vm15, 0, %v4615_v7  ;;  %v4173_v22 = vmul.f32 0.2, %v4077_v40 }
 0x4d7   : > { %8526 = vmatmul.msk.bf16.gmra.mxu2 %vm12910_vm13, %v11165_v25  ;;  %4981 = vrot.lane.b32.xlu2 %v11180_v39, %s8800_s12  ;;  %v4492_v39 = vunpack.c.l.b16 %v4412_v27  ;;  %v4491_v13 = vunpack.c.l.b16 %v4411_v49  ;;  %v4892_v8 = vshll.u32 %v11244_v59, 16  ;;  %v5069_v9 = vrot.slane %v11244_v59, 1  ;;  %vm12919_vm13 = vmmov %vm12900_vm5 }
 0x4d8   : > { %v4101_v53 = vpop.f32.mrf.mxu3  ;;  %v4213_v49 = vsel %vm4133_vm8, %v4077_v40, %v4173_v22  ;;  %v4890_v7 = vshrl.u32 %v11244_v59, 16  ;;  %v12918_v22 = vld [vmem:[#allocation7_spill] sm:$0xff] }
 0x4d9   : > { %v11211_v4 = vpop.permute.xlu2 %4969  ;;  %v4518_v19 = vpack.c.b16 %v4492_v39, %v4491_v13  ;;  %v4894_v61 = vrot.slane %v4892_v8, 1 }
 0x4da   : > { %5231 = vrot.lane.b32.xlu0 %v11190_v6, %s8799_s29  ;;  %5142 = vrot.lane.b32.xlu1 %v11131_v16, %s8798_s19  ;;  %v5980_v28 = vpop.f32.mrf.mxu2 }
 0x4db   : > { %v3876_v36 = vpop.f32.mrf.mxu1  ;;  %v12913_v28 = vld [vmem:[#allocation5_spill] sm:$0xff]  ;;  %v4617_v53 = vshrl.u32 %v4518_v19, 16 }
 0x4dc   : > { %v5092_v51 = vpop.permute.xlu0 %5091  ;;  %v5262_v54 = vpop.permute.xlu1 %5261  ;;  %v3966_v36 = vadd.f32 %v12913_v28, %v3857_v50  ;;  %v11236_v50 = vsel %vm664_vm1, %v4883_v24, %v4887_v0 }
 0x4dd   : > { %v5518_v62 = vsel %vm3348_vm3, %v5482_v23, %v5262_v54  ;;  %v3864_v23 = vadd.f32 %v11199_v63, %v11076_v55  ;;  %v4414_v55 = vpack.c.bf16 %v4213_v49, %v4213_v49  ;;  %v4619_v28 = vrot.slane %v4617_v53, 7 }
 0x4de   : > { %5880 = vmatmul.bf16.vlgmr.msra.gmra.mxu1 %v5518_v62  ;;  %v4075_v47 = vadd.f32 %v10911_v41, %v3966_v36  ;;  %v5306_v41 = vsel %vm12914_vm7, %v10787_v18, %v11097_v15  ;;  %v4737_v18 = vsel %vm9371_vm15, %v4612_v17, 0  ;;  %v5432_v17 = vsel %vm12916_vm11, %v10831_v56, %v11067_v2  ;;  %v12917_v36 = vld [vmem:[#allocation8_spill] sm:$0xff]  ;;  %vm12924_vm7 = vmmov %vm12900_vm5 }
 0x4df   : > { %5196 = vrot.lane.b32.xlu2 %v11227_v37, %s8800_s12  ;;  %v5342_v58 = vsel %vm3307_vm14, %v5306_v41, %v5092_v51  ;;  %v3862_v51 = vadd.f32 %v11199_v63, %v11058_v44  ;;  %v3973_v62 = vadd.f32 %v12917_v36, %v3864_v23  ;;  %v4897_v40 = vshll.u32 %v4737_v18, 16  ;;  %vm12926_vm11 = vmmov %vm12900_vm5 }
 0x4e0   : > { %v4172_v39 = vmul.f32 0.2, %v4075_v47  ;;  %vm4132_vm9 = vcmp.gt.f32.partialorder %v4075_v47, 0.0 }
 0x4e1   : > { %v11233_v31 = vpop.permute.xlu2 %5184  ;;  %v3971_v41 = vadd.f32 %v12918_v22, %v3862_v51 }
 0x4e2   : > { %5107 = vrot.lane.b32.xlu0 %v11165_v25, %s8799_s29  ;;  %5279 = vrot.lane.b32.xlu1 %v11236_v50, %s8798_s19  ;;  %v5982_v43 = vpop.f32.mrf.mxu2  ;;  %v4212_v15 = vsel %vm4132_vm9, %v4075_v47, %v4172_v39  ;;  %v4494_v39 = vunpack.c.l.b16 %v4414_v55 }
 0x4e3   : > { %v3878_v27 = vpop.f32.mrf.mxu1  ;;  %v4413_v0 = vpack.c.bf16 %v4212_v15, %v4212_v15  ;;  %v5070_v43 = vrot.slane %v4737_v18, 1 }
 0x4e4   : > { %v5216_v24 = vpop.permute.xlu0 %5215  ;;  %v5129_v25 = vpop.permute.xlu1 %5128  ;;  %v4620_v27 = vshll.u32 %v4518_v19, 16  ;;  %v4080_v19 = vadd.f32 %v10959_v21, %v3971_v41  ;;  %v5308_v21 = vsel %vm12900_vm5, %v10848_v3, %v11148_v33  ;;  %v4738_v3 = vsel %vm9371_vm15, %v4619_v28, 0 }
 0x4e5   : > { %v5380_v46 = vsel %vm3348_vm3, %v5342_v58, %v5129_v25  ;;  %v5484_v13 = vsel %vm3307_vm14, %v5432_v17, %v5216_v24  ;;  %v4895_v25 = vor.u32 %v4894_v61, %v4890_v7  ;;  %v11278_v56 = vsel %vm973_vm0, %v5069_v9, %v5070_v43 }
 0x4e6   : > { %5791 = vmatmul.bf16.gmra.mxu3 %v5380_v46  ;;  %v4622_v2 = vor.u32 %v4620_v27, %v4619_v28  ;;  %v4082_v46 = vadd.f32 %v11000_v10, %v3973_v62  ;;  %v4899_v24 = vrot.slane %v4897_v40, 1  ;;  %v4493_v8 = vunpack.c.l.b16 %v4413_v0 }
 0x4e7   : > { %8527 = vmatmul.msk.bf16.gmra.mxu2 %vm12915_vm10, %v11227_v37  ;;  %4983 = vrot.lane.b32.xlu2 %v11236_v50, %s8800_s12  ;;  %v4174_v55 = vmul.f32 0.2, %v4080_v19  ;;  %vm4134_vm12 = vcmp.gt.f32.partialorder %v4080_v19, 0.0  ;;  %v3869_v62 = vadd.f32 %v11199_v63, %v11127_v48  ;;  %v5435_v28 = vsel %vm12920_vm6, %v10870_v52, %v11118_v11  ;;  %vm12925_vm10 = vmmov %vm12900_vm5 }
 0x4e8   : > { %v11287_v49 = vsel %vm664_vm1, %v4895_v25, %v4899_v24  ;;  %v4519_v23 = vpack.c.b16 %v4494_v39, %v4493_v8  ;;  %v11295_v10 = vsel %vm9371_vm15, 0, %v4622_v2  ;;  %v4175_v18 = vmul.f32 0.2, %v4082_v46 }
 0x4e9   : > { %v11262_v54 = vpop.permute.xlu2 %4971  ;;  %vm4135_vm2 = vcmp.gt.f32.partialorder %v4082_v46, 0.0  ;;  %v4904_v9 = vshll.u32 %v11295_v10, 16  ;;  %v4214_v33 = vsel %vm4134_vm12, %v4080_v19, %v4174_v55  ;;  %v5072_v48 = vrot.slane %v11295_v10, 1 }
 0x4ea   : > { %5233 = vrot.lane.b32.xlu0 %v11244_v59, %s8799_s29  ;;  %5144 = vrot.lane.b32.xlu1 %v11190_v6, %s8798_s19  ;;  %v4624_v17 = vshrl.u32 %v4519_v23, 16  ;;  %v4215_v36 = vsel %vm4135_vm2, %v4082_v46, %v4175_v18  ;;  %v4902_v27 = vshrl.u32 %v11295_v10, 16  ;;  %v4909_v22 = vshll.u32 %v4738_v3, 16  ;;  %v12922_v46 = vld [vmem:[#allocation9_spill] sm:$0xff]  ;;  %vm12927_vm2 = vmmov %vm12900_vm5 }
 0x4eb   : > { %v4906_v7 = vrot.slane %v4904_v9, 1  ;;  %v4416_v40 = vpack.c.bf16 %v4215_v36, %v4215_v36  ;;  %v4415_v41 = vpack.c.bf16 %v4214_v33, %v4214_v33  ;;  %v5073_v39 = vrot.slane %v4738_v3, 1  ;;  %v12923_v9 = vld [vmem:[#allocation15_spill] sm:$0xff]  ;;  %vm12929_vm12 = vmmov %vm12927_vm2 }
 0x4ec   : > { %v5094_v44 = vpop.permute.xlu0 %5093  ;;  %v5264_v47 = vpop.permute.xlu1 %5263  ;;  %v4627_v2 = vshll.u32 %v4519_v23, 16  ;;  %vm12931_vm6 = vmmov %vm12927_vm2 }
 0x4ed   : > { %v5521_v58 = vsel %vm3348_vm3, %v5484_v13, %v5264_v47  ;;  %v5344_v51 = vsel %vm3307_vm14, %v5308_v21, %v5094_v44  ;;  %v3867_v44 = vadd.f32 %v11199_v63, %v11103_v35  ;;  %v4626_v13 = vrot.slane %v4624_v17, 7  ;;  %v12921_v47 = vld [vmem:[#allocation10_spill] sm:$0xff] }
 0x4ee   : > { %5885 = vmatmul.bf16.gmra.mxu1 %v5521_v58  ;;  %v3978_v43 = vadd.f32 %v12921_v47, %v3869_v62  ;;  %v4907_v19 = vor.u32 %v4906_v7, %v4902_v27  ;;  %v4496_v18 = vunpack.c.l.b16 %v4416_v40  ;;  %v5074_v52 = vsel %vm973_vm0, %v5072_v48, %v5073_v39 }
 0x4ef   : > { %5198 = vrot.lane.b32.xlu2 %v11278_v56, %s8800_s12  ;;  %v3976_v24 = vadd.f32 %v12922_v46, %v3867_v44  ;;  %v4629_v11 = vor.u32 %v4627_v2, %v4626_v13  ;;  %v5310_v17 = vsel %vm12924_vm7, %v12923_v9, %v11211_v4  ;;  %v4739_v4 = vsel %vm9371_vm15, %v4626_v13, 0 }
 0x4f0   : > { %v4087_v21 = vadd.f32 %v11054_v12, %v3978_v43  ;;  %v5438_v27 = vsel %vm12926_vm11, %v10914_v45, %v11177_v34  ;;  %v4921_v13 = vshll.u32 %v4739_v4, 16  ;;  %v5076_v2 = vrot.slane %v4739_v4, 1  ;;  %vm12938_vm11 = vmmov %vm12927_vm2 }
 0x4f1   : > { %v11284_v53 = vpop.permute.xlu2 %5186  ;;  %v5312_v9 = vsel %vm12900_vm5, %v10929_v29, %v11262_v54  ;;  %v12928_v29 = vld [vmem:[#allocation11_spill] sm:$0xff]  ;;  %vm4138_vm7 = vcmp.gt.f32.partialorder %v11169_v32, 0.0  ;;  %vm12941_vm5 = vmmov %vm12927_vm2 }
 0x4f2   : > { %5109 = vrot.lane.b32.xlu0 %v11227_v37, %s8799_s29  ;;  %5281 = vrot.lane.b32.xlu1 %v11287_v49, %s8798_s19  ;;  %v4177_v12 = vmul.f32 0.2, %v4087_v21  ;;  %vm4137_vm8 = vcmp.gt.f32.partialorder %v4087_v21, 0.0 }
 0x4f4   : > { %v5218_v15 = vpop.permute.xlu0 %5217  ;;  %v5131_v61 = vpop.permute.xlu1 %5130  ;;  %v4217_v40 = vsel %vm4137_vm8, %v4087_v21, %v4177_v12  ;;  %vm12934_vm8 = vmmov %vm12927_vm2 }
 0x4f5   : > { %v5383_v37 = vsel %vm3348_vm3, %v5344_v51, %v5131_v61  ;;  %v5486_v58 = vsel %vm3307_vm14, %v5435_v28, %v5218_v15  ;;  %v4911_v51 = vrot.slane %v4909_v22, 1  ;;  %v4495_v61 = vunpack.c.l.b16 %v4415_v41 }
 0x4f6   : > { %5796 = vmatmul.bf16.gmra.mxu3 %v5383_v37  ;;  %v4085_v15 = vadd.f32 %v11018_v5, %v3976_v24  ;;  %v11341_v37 = vsel %vm9371_vm15, 0, %v4629_v11  ;;  %v4418_v47 = vpack.c.bf16 %v4217_v40, %v4217_v40  ;;  %v11366_v24 = vpop.f32.mrf.mxu2 }
 0x4f7   : > { %8528 = vmatmul.msk.bf16.gmra.mxu2 %vm12919_vm13, %v11278_v56  ;;  %4985 = vrot.lane.b32.xlu2 %v11287_v49, %s8800_s12  ;;  %v11333_v23 = vsel %vm664_vm1, %v4907_v19, %v4911_v51  ;;  %v4520_v55 = vpack.c.b16 %v4496_v18, %v4495_v61  ;;  %v4916_v44 = vshll.u32 %v11341_v37, 16  ;;  %v5075_v43 = vrot.slane %v11341_v37, 1 }
 0x4f8   : > { %v4176_v3 = vmul.f32 0.2, %v4085_v15  ;;  %vm4136_vm9 = vcmp.gt.f32.partialorder %v4085_v15, 0.0  ;;  %v4914_v41 = vshrl.u32 %v11341_v37, 16  ;;  %v4498_v11 = vunpack.c.l.b16 %v4418_v47 }
 0x4f9   : > { %v11315_v0 = vpop.permute.xlu2 %4975  ;;  %v4631_v7 = vshrl.u32 %v4520_v55, 16  ;;  %v4918_v28 = vrot.slane %v4916_v44, 1  ;;  %v4634_v46 = vshll.u32 %v4520_v55, 16  ;;  %v11370_v45 = vsel %vm973_vm0, %v5075_v43, %v5076_v2 }
 0x4fa   : > { %5235 = vrot.lane.b32.xlu0 %v11295_v10, %s8799_s29  ;;  %5146 = vrot.lane.b32.xlu1 %v11244_v59, %s8798_s19  ;;  %v4216_v48 = vsel %vm4136_vm9, %v4085_v15, %v4176_v3  ;;  %v4923_v51 = vrot.slane %v4921_v13, 1  ;;  %vm12935_vm9 = vmmov %vm12927_vm2 }
 0x4fb   : > { %v4919_v19 = vor.u32 %v4918_v28, %v4914_v41 }
 0x4fc   : > { %v5096_v35 = vpop.permute.xlu0 %5095  ;;  %v5266_v25 = vpop.permute.xlu1 %5265 }
 0x4fd   : > { %v5524_v8 = vsel %vm3348_vm3, %v5486_v58, %v5266_v25  ;;  %v5346_v36 = vsel %vm3307_vm14, %v5310_v17, %v5096_v35  ;;  %v4633_v35 = vrot.slane %v4631_v7, 7  ;;  %v4417_v58 = vpack.c.bf16 %v4216_v48, %v4216_v48 }
 0x4fe   : > { %5890 = vmatmul.bf16.gmra.mxu1 %v5524_v8  ;;  %v11375_v15 = vsel %vm664_vm1, %v4919_v19, %v4923_v51  ;;  %v11392_v7 = vpop.f32.mrf.mxu2  ;;  %v5441_v48 = vsel %vm12929_vm12, %v10962_v57, %v11233_v31  ;;  %v12932_v19 = vld [vmem:[#allocation4_spill] sm:$0xff]  ;;  %vm12943_vm12 = vmmov %vm12927_vm2 }
 0x4ff   : > { %5200 = vrot.lane.b32.xlu2 %v5074_v52, %s8800_s12  ;;  %v4636_v34 = vor.u32 %v4634_v46, %v4633_v35  ;;  %v4497_v61 = vunpack.c.l.b16 %v4417_v58  ;;  %v4740_v54 = vsel %vm9371_vm15, %v4633_v35, 0  ;;  %v12930_v46 = vld [vmem:[#allocation16_spill] sm:$0xff] }
 0x500   : > { %v4933_v43 = vshll.u32 %v4740_v54, 16 }
 0x501   : > { %v11347_v62 = vpop.permute.xlu2 %5190  ;;  %v4521_v55 = vpack.c.b16 %v4498_v11, %v4497_v61  ;;  %v11382_v12 = vsel %vm9371_vm15, 0, %v4636_v34 }
 0x502   : > { %5111 = vrot.lane.b32.xlu0 %v11278_v56, %s8799_s29  ;;  %5283 = vrot.lane.b32.xlu1 %v11333_v23, %s8798_s19  ;;  %v4928_v3 = vshll.u32 %v11382_v12, 16  ;;  %v4926_v47 = vshrl.u32 %v11382_v12, 16  ;;  %v4935_v57 = vrot.slane %v4933_v43, 1  ;;  %v5078_v51 = vrot.slane %v11382_v12, 1 }
 0x503   : > { %v4638_v44 = vshrl.u32 %v4521_v55, 16 }
 0x504   : > { %v5220_v5 = vpop.permute.xlu0 %5219  ;;  %v5133_v56 = vpop.permute.xlu1 %5132  ;;  %v4930_v40 = vrot.slane %v4928_v3, 1 }
 0x505   : > { %v5386_v33 = vsel %vm3348_vm3, %v5346_v36, %v5133_v56  ;;  %v5488_v25 = vsel %vm3307_vm14, %v5438_v27, %v5220_v5  ;;  %v3874_v5 = vadd.f32 %v11199_v63, %v11186_v1  ;;  %v4640_v4 = vrot.slane %v4638_v44, 7  ;;  %v12933_v44 = vld [vmem:[#allocation18_spill] sm:$0xff] }
 0x506   : > { %5801 = vmatmul.bf16.gmra.mxu3 %v5386_v33  ;;  %v4641_v27 = vshll.u32 %v4521_v55, 16  ;;  %v11416_v2 = vpop.f32.mrf.mxu2 }
 0x507   : > { %8529 = vmatmul.msk.bf16.gmra.mxu2 %vm12925_vm10, %v5074_v52  ;;  %4987 = vrot.lane.b32.xlu2 %v11333_v23, %s8800_s12  ;;  %v3983_v1 = vadd.f32 %v12928_v29, %v3874_v5  ;;  %v5444_v29 = vsel %vm12934_vm8, %v12933_v44, %v11284_v53  ;;  %vm12937_vm10 = vmmov %vm12927_vm2 }
 0x508   : > { %v3881_v18 = vpop.f32.mrf.mxu1  ;;  %vm12950_vm8 = vmmov %vm12927_vm2 }
 0x509   : > { %v4974_v21 = vpop.permute.xlu2 %4973  ;;  %v4178_v18 = vmul.f32 0.2, %v11169_v32 }
 0x50a   : > { %5237 = vrot.lane.b32.xlu0 %v11341_v37, %s8799_s29  ;;  %5148 = vrot.lane.b32.xlu1 %v11295_v10, %s8798_s19 }
 0x50c   : > { %v5098_v22 = vpop.permute.xlu0 %5097  ;;  %v5268_v39 = vpop.permute.xlu1 %5267 }
 0x50d   : > { %v5527_v8 = vsel %vm3348_vm3, %v5488_v25, %v5268_v39  ;;  %v5348_v36 = vsel %vm3307_vm14, %v5312_v9, %v5098_v22  ;;  %v4092_v22 = vadd.f32 %v11106_v60, %v3983_v1  ;;  %v4931_v25 = vor.u32 %v4930_v40, %v4926_v47 }
 0x50e   : > { %5895 = vmatmul.bf16.gmra.mxu1 %v5527_v8  ;;  %v4643_v39 = vor.u32 %v4641_v27, %v4640_v4  ;;  %v5314_v60 = vsel %vm12931_vm6, %v12930_v46, %v4974_v21  ;;  %v4741_v1 = vsel %vm9371_vm15, %v4640_v4, 0  ;;  %v11455_v53 = vpop.f32.mrf.mxu2  ;;  %vm12947_vm6 = vmmov %vm12927_vm2 }
 0x50f   : > { %5202 = vrot.lane.b32.xlu2 %v11370_v45, %s8800_s12  ;;  %v4179_v31 = vmul.f32 0.2, %v4092_v22  ;;  %vm4139_vm13 = vcmp.gt.f32.partialorder %v4092_v22, 0.0  ;;  %v11421_v8 = vsel %vm664_vm1, %v4931_v25, %v4935_v57  ;;  %v4945_v47 = vshll.u32 %v4741_v1, 16  ;;  %v12936_v25 = vld [vmem:[#allocation12_spill] sm:$0xff] }
 0x510   : > { %v3883_v33 = vpop.f32.mrf.mxu1  ;;  %v11434_v21 = vsel %vm9371_vm15, 0, %v4643_v39  ;;  %v5316_v39 = vsel %vm12937_vm10, %v12936_v25, %v11315_v0  ;;  %vm12952_vm10 = vmmov %vm12927_vm2 }
 0x511   : > { %v11399_v63 = vpop.permute.xlu2 %4977  ;;  %v4219_v55 = vsel %vm4139_vm13, %v4092_v22, %v4179_v31  ;;  %vm12945_vm13 = vmmov %vm12927_vm2 }
 0x512   : > { %5113 = vrot.lane.b32.xlu0 %v5074_v52, %s8799_s29  ;;  %5285 = vrot.lane.b32.xlu1 %v11375_v15, %s8798_s19  ;;  %v4420_v33 = vpack.c.bf16 %v4219_v55, %v4219_v55 }
 0x514   : > { %v5222_v17 = vpop.permute.xlu0 %5221  ;;  %v5135_v56 = vpop.permute.xlu1 %5134  ;;  %v4500_v40 = vunpack.c.l.b16 %v4420_v33 }
 0x515   : > { %v5389_v52 = vsel %vm3348_vm3, %v5348_v36, %v5135_v56  ;;  %v5490_v35 = vsel %vm3307_vm14, %v5441_v48, %v5222_v17  ;;  %v5079_v17 = vrot.slane %v4740_v54, 1  ;;  %v4940_v56 = vshll.u32 %v11434_v21, 16 }
 0x516   : > { %5806 = vmatmul.bf16.gmra.mxu3 %v5389_v52  ;;  %v5782_v13 = vpop.f32.mrf.mxu3  ;;  %v4218_v52 = vsel %vm4138_vm7, %v11169_v32, %v4178_v18  ;;  %v5492_v54 = vsel %vm3307_vm14, %v5444_v29, %v11133_v42  ;;  %v8697_v42 = vld [vmem:[%s12770_s7 + $0x38] sm:$0xff]  ;;  %v11479_v18 = vpop.f32.mrf.mxu2  ;;  %vm12948_vm7 = vmmov %vm12927_vm2 }
 0x517   : > { %6839 = vrot.lane.b32.xlu2 %v9417_v20, %s8800_s12  ;;  %8530 = vmatmul.msk.bf16.gmra.mxu2 %vm12927_vm2, %v11370_v45  ;;  %v5080_v3 = vsel %vm973_vm0, %v5078_v51, %v5079_v17  ;;  %v4942_v32 = vrot.slane %v4940_v56, 1 }
 0x518   : > { %7581 = vmatpush.bf16.msrb.mxu0 %v8697_v42 }
 0x519   : > { %v11426_v11 = vpop.permute.xlu2 %5192 }
 0x51a   : > { %5239 = vrot.lane.b32.xlu0 %v11382_v12, %s8799_s29  ;;  %5150 = vrot.lane.b32.xlu1 %v11341_v37, %s8798_s19 }
 0x51c   : > { %v5100_v28 = vpop.permute.xlu0 %5099  ;;  %v5270_v41 = vpop.permute.xlu1 %5269 }
 0x51d   : > { %v5530_v58 = vsel %vm3348_vm3, %v5490_v35, %v5270_v41  ;;  %v5350_v34 = vsel %vm3307_vm14, %v5314_v60, %v5100_v28  ;;  %v4938_v28 = vshrl.u32 %v11434_v21, 16  ;;  %v4947_v41 = vrot.slane %v4945_v47, 1 }
 0x51e   : > { %5900 = vmatmul.bf16.gmra.mxu1 %v5530_v58  ;;  %v5784_v5 = vpop.f32.mrf.mxu3  ;;  %v5392_v36 = vsel %vm3348_vm3, %v5350_v34, %v11160_v14  ;;  %v4419_v14 = vpack.c.bf16 %v4218_v52, %v4218_v52  ;;  %v5082_v60 = vrot.slane %v4741_v1, 1  ;;  %v11500_v1 = vpop.f32.mrf.mxu2 }
 0x51f   : > { %4989 = vrot.lane.b32.xlu2 %v11375_v15, %s8800_s12  ;;  %v4943_v22 = vor.u32 %v4942_v32, %v4938_v28  ;;  %v12940_v5 = vld [vmem:[#allocation13_spill] sm:$0xff] }
 0x520   : > { %v4499_v27 = vunpack.c.l.b16 %v4419_v14 }
 0x521   : > { %v11458_v43 = vpop.permute.xlu2 %4979  ;;  %v11468_v13 = vsel %vm664_vm1, %v4943_v22, %v4947_v41 }
 0x522   : > { %6951 = vrot.lane.b32.xlu0 %v12932_v19, %s8799_s29  ;;  %5287 = vrot.lane.b32.xlu1 %v11421_v8, %s8798_s19  ;;  %v4522_v35 = vpack.c.b16 %v4500_v40, %v4499_v27 }
 0x524   : > { %v5102_v61 = vpop.permute.xlu0 %5101  ;;  %v5274_v9 = vpop.permute.xlu1 %5273  ;;  %v4645_v58 = vshrl.u32 %v4522_v35, 16  ;;  %v4648_v0 = vshll.u32 %v4522_v35, 16 }
 0x525   : > { %v5352_v31 = vsel %vm3307_vm14, %v5316_v39, %v5102_v61  ;;  %v12939_v61 = vld [vmem:[#allocation17_spill] sm:$0xff]  ;;  %v12946_v39 = vld [vmem:[#allocation20_spill] sm:$0xff] }
 0x526   : > { %5811 = vmatmul.bf16.gmra.mxu3 %v5392_v36  ;;  %v4647_v17 = vrot.slane %v4645_v58, 7  ;;  %v5447_v36 = vsel %vm12941_vm5, %v12940_v5, %v12939_v61  ;;  %v11524_v22 = vpop.f32.mrf.mxu2  ;;  %vm12955_vm5 = vmmov %vm12927_vm2 }
 0x527   : > { %5204 = vrot.lane.b32.xlu2 %v5080_v3, %s8800_s12  ;;  %8531 = vmatmul.msk.bf16.gmra.mxu2 %vm12935_vm9, %v5080_v3  ;;  %v5494_v33 = vsel %vm3307_vm14, %v5447_v36, %v11157_v30  ;;  %vm12951_vm9 = vmmov %vm12927_vm2 }
 0x528   : > { %v4650_v52 = vor.u32 %v4648_v0, %v4647_v17  ;;  %v5536_v29 = vsel %vm3348_vm3, %v5494_v33, %v5274_v9  ;;  %v11510_v32 = vsel %vm9371_vm15, %v4647_v17, 0 }
 0x529   : > { %v11482_v51 = vpop.permute.xlu2 %5194 }
 0x52a   : > { %5115 = vrot.lane.b32.xlu0 %v11370_v45, %s8799_s29  ;;  %5152 = vrot.lane.b32.xlu1 %v11382_v12, %s8798_s19  ;;  %v5533_v45 = vsel %vm3348_vm3, %v5492_v54, %v11135_v26  ;;  %v5081_v26 = vrot.slane %v11434_v21, 1  ;;  %v12942_v54 = vld [vmem:[#allocation14_spill] sm:$0xff] }
 0x52b   : > { %v5318_v9 = vsel %vm12927_vm2, %v12942_v54, %v11399_v63  ;;  %v12944_v63 = vld [vmem:[#allocation19_spill] sm:$0xff] }
 0x52c   : > { %v5228_v48 = vpop.permute.xlu0 %5227  ;;  %v5139_v4 = vpop.permute.xlu1 %5138  ;;  %v11485_v55 = vsel %vm973_vm0, %v5081_v26, %v5082_v60  ;;  %v5450_v35 = vsel %vm12945_vm13, %v12944_v63, %v11347_v62  ;;  %vm12956_vm13 = vmmov %vm12955_vm5 }
 0x52d   : > { %v5395_v34 = vsel %vm3348_vm3, %v5352_v31, %v5139_v4  ;;  %v5085_v4 = vrot.slane %v11510_v32, 1  ;;  %v5496_v26 = vsel %vm3307_vm14, %v5450_v35, %v5228_v48  ;;  %v8696_v48 = vld [vmem:[%s12770_s7 + $0x30] sm:$0xff]  ;;  %v12953_v35 = vld [vmem:[#allocation22_spill] sm:$0xff] }
 0x52e   : > { %5905 = vmatmul.bf16.gmra.mxu1 %v5533_v45  ;;  %v11536_v31 = vpop.f32.mrf.mxu2  ;;  %7582 = vmatpush.bf16.msrb.mxu0 %v8696_v48 }
 0x52f   : > { %4991 = vrot.lane.b32.xlu2 %v11421_v8, %s8800_s12 }
 0x531   : > { %v4982_v14 = vpop.permute.xlu2 %4981 }
 0x532   : > { %5241 = vrot.lane.b32.xlu0 %v11434_v21, %s8799_s29  ;;  %5289 = vrot.lane.b32.xlu1 %v11468_v13, %s8798_s19 }
 0x534   : > { %v5104_v57 = vpop.permute.xlu0 %5103  ;;  %v5276_v46 = vpop.permute.xlu1 %5275 }
 0x535   : > { %v5354_v28 = vsel %vm3307_vm14, %v5318_v9, %v5104_v57  ;;  %v5539_v25 = vsel %vm3348_vm3, %v5496_v26, %v5276_v46  ;;  %v5320_v57 = vsel %vm12947_vm6, %v12946_v39, %v11458_v43  ;;  %v12949_v43 = vld [vmem:[#allocation21_spill] sm:$0xff]  ;;  %v5322_v9 = vsel %vm12951_vm9, %v11131_v16, %v4982_v14  ;;  %vm12957_vm6 = vmmov %vm12955_vm5 }
 0x536   : > { %5816 = vmatmul.bf16.gmra.mxu3 %v5395_v34  ;;  %v5453_v61 = vsel %vm12950_vm8, %v12949_v43, %v11426_v11  ;;  %vm12958_vm9 = vmmov %vm12955_vm5 }
 0x537   : > { %5206 = vrot.lane.b32.xlu2 %v11485_v55, %s8800_s12  ;;  %8532 = vmatmul.msk.bf16.gmra.mxu2 %vm12938_vm11, %v11485_v55  ;;  %vm12954_vm11 = vmmov %vm12927_vm2 }
 0x538   : > { %v5456_v26 = vsel %vm12954_vm11, %v12953_v35, %v11482_v51 }
 0x539   : > { %v11526_v42 = vpop.permute.xlu2 %5196 }
 0x53a   : > { %5117 = vrot.lane.b32.xlu0 %v5080_v3, %s8799_s29  ;;  %5154 = vrot.lane.b32.xlu1 %v11434_v21, %s8798_s19  ;;  %v11504_v3 = vsel %vm9371_vm15, 0, %v4650_v52 }
 0x53b   : > { %v5084_v30 = vrot.slane %v11504_v3, 1 }
 0x53c   : > { %v5230_v56 = vpop.permute.xlu0 %5229  ;;  %v5141_v44 = vpop.permute.xlu1 %5140 }
 0x53d   : > { %v5398_v27 = vsel %vm3348_vm3, %v5354_v28, %v5141_v44  ;;  %v11520_v45 = vsel %vm973_vm0, %v5084_v30, %v5085_v4  ;;  %v5498_v52 = vsel %vm3307_vm14, %v5453_v61, %v5230_v56  ;;  %v11549_v44 = vpop.f32.mrf.mxu2  ;;  %v11561_v56 = vld [vmem:[%s12769_s6] ss:$0 sm:$0xff] }
 0x53e   : > { %5910 = vmatmul.bf16.gmra.mxu1 %v5536_v29 }
 0x541   : > { %v4984_v34 = vpop.permute.xlu2 %4983 }
 0x542   : > { %5243 = vrot.lane.b32.xlu0 %v11504_v3, %s8799_s29  ;;  %v5324_v51 = vsel %vm12955_vm5, %v11190_v6, %v4984_v34 }
 0x544   : > { %v5106_v40 = vpop.permute.xlu0 %5105  ;;  %v5278_v47 = vpop.permute.xlu1 %5277 }
 0x545   : > { %v5356_v17 = vsel %vm3307_vm14, %v5320_v57, %v5106_v40  ;;  %v5542_v29 = vsel %vm3348_vm3, %v5498_v52, %v5278_v47  ;;  %v11563_v47 = vpop.f32.mrf.mxu2 }
 0x546   : > { %5821 = vmatmul.bf16.gmra.mxu3 %v5398_v27 }
 0x547   : > { %8533 = vmatmul.msk.bf16.gmra.mxu2 %vm12943_vm12, %v11520_v45 }
 0x549   : > { %v11552_v30 = vpop.permute.xlu2 %5198 }
 0x54c   : > { %v5232_v41 = vpop.permute.xlu0 %5231  ;;  %v5143_v58 = vpop.permute.xlu1 %5142 }
 0x54d   : > { %v5401_v62 = vsel %vm3348_vm3, %v5356_v17, %v5143_v58  ;;  %v5500_v39 = vsel %vm3307_vm14, %v5456_v26, %v5232_v41 }
 0x54e   : > { %5915 = vmatmul.bf16.gmra.mxu1 %v5539_v25 }
 0x551   : > { %v4986_v63 = vpop.permute.xlu2 %4985 }
 0x554   : > { %v5108_v60 = vpop.permute.xlu0 %5107  ;;  %v5280_v0 = vpop.permute.xlu1 %5279 }
 0x555   : > { %v5358_v11 = vsel %vm3307_vm14, %v5322_v9, %v5108_v60  ;;  %v5545_v17 = vsel %vm3348_vm3, %v5500_v39, %v5280_v0  ;;  %v8695_v0 = vld [vmem:[%s12770_s7 + $0x28] sm:$0xff] }
 0x556   : > { %5826 = vmatmul.bf16.gmra.mxu3 %v5401_v62  ;;  %7583 = vmatpush.bf16.msrb.mxu0 %v8695_v0 }
 0x557   : > { %8534 = vmatmul.msk.bf16.gmra.mxu2 %vm12948_vm7, %v12932_v19 }
 0x559   : > { %v5787_v46 = vpop.f32.mrf.mxu3  ;;  %v11576_v43 = vpop.permute.xlu2 %5200 }
 0x55a   : > { %v5788_v14 = vadd.f32 %v11561_v56, %v5787_v46 }
 0x55b   : > { %v5881_v5 = vpop.f32.mrf.mxu1 }
 0x55c   : > { %v5234_v36 = vpop.permute.xlu0 %5233  ;;  %v5145_v33 = vpop.permute.xlu1 %5144 }
 0x55d   : > { %v5404_v27 = vsel %vm3348_vm3, %v5358_v11, %v5145_v33 }
 0x55e   : > { %5920 = vmatmul.bf16.gmra.mxu1 %v5542_v29 }
 0x561   : > { %v5789_v54 = vpop.f32.mrf.mxu3 }
 0x562   : > { %v5790_v46 = vadd.f32 %v11561_v56, %v5789_v54 }
 0x563   : > { %v5883_v40 = vpop.f32.mrf.mxu1 }
 0x564   : > { %v5110_v28 = vpop.permute.xlu0 %5109  ;;  %v5282_v4 = vpop.permute.xlu1 %5281 }
 0x565   : > { %v5360_v41 = vsel %vm3307_vm14, %v5324_v51, %v5110_v28 }
 0x566   : > { %5831 = vmatmul.bf16.gmra.mxu3 %v5404_v27  ;;  %v5459_v27 = vsel %vm12956_vm13, %v11236_v50, %v11526_v42  ;;  %v4952_v42 = vshll.u32 %v11504_v3, 16 }
 0x567   : > { %8535 = vmatmul.msk.bf16.gmra.mxu2 %vm12952_vm10, %v12932_v19  ;;  %vm12960_vm10 = vmmov %vm12955_vm5  ;;  %v8706_v19 = vld [vmem:[%s12770_s7 + $0x80] sm:$0xff] }
 0x569   : > { %v5792_v16 = vpop.f32.mrf.mxu3 }
 0x56a   : > { %v5793_v28 = vadd.f32 %v11561_v56, %v5792_v16 }
 0x56b   : > { %v5886_v58 = vpop.f32.mrf.mxu1 }
 0x56c   : > { %v11571_v25 = vpop.permute.xlu0 %5235  ;;  %v5887_v57 = vadd.f32 %v5886_v58, %v5788_v14  ;;  %v5147_v60 = vpop.permute.xlu1 %5146  ;;  %v5502_v58 = vsel %vm3307_vm14, %v5459_v27, %v5234_v36  ;;  %v4957_v27 = vshll.u32 %v11510_v32, 16 }
 0x56e   : > { %v5986_v62 = vadd.f32 %v11366_v24, %v5887_v57  ;;  %5925 = vmatmul.bf16.gmra.mxu1 %v5545_v17  ;;  %v5407_v24 = vsel %vm3348_vm3, %v5360_v41, %v5147_v60 }
 0x570   : > { %v6108_v61 = vmul.f32 0.2, %v5986_v62  ;;  %vm6072_vm2 = vcmp.gt.f32.partialorder %v5986_v62, 0.0 }
 0x571   : > { %v5794_v48 = vpop.f32.mrf.mxu3 }
 0x572   : > { %v6144_v9 = vsel %vm6072_vm2, %v5986_v62, %v6108_v61  ;;  %v5548_v62 = vsel %vm3348_vm3, %v5502_v58, %v5282_v4  ;;  %v5795_v51 = vadd.f32 %v11561_v56, %v5794_v48  ;;  %vm12961_vm2 = vmmov %vm12957_vm6 }
 0x573   : > { %v5888_v5 = vpop.f32.mrf.mxu1  ;;  %v6325_v34 = vpack.c.bf16 %v6144_v9, %v6144_v9 }
 0x574   : > { %v5112_v52 = vpop.permute.xlu0 %5111  ;;  %v5889_v33 = vadd.f32 %v5888_v5, %v5790_v46  ;;  %v11582_v29 = vpop.permute.xlu1 %5283  ;;  %v5326_v5 = vsel %vm12957_vm6, %v11244_v59, %v4986_v63 }
 0x575   : > { %v6397_v60 = vunpack.c.l.b16 %v6325_v34  ;;  %v4954_v34 = vrot.slane %v4952_v42, 1 }
 0x576   : > { %v5988_v54 = vadd.f32 %v11392_v7, %v5889_v33  ;;  %5836 = vmatmul.bf16.gmra.mxu3 %v5407_v24  ;;  %v11596_v7 = vpop.permute.xlu2 %4987 }
 0x578   : > { %vm6073_vm12 = vcmp.gt.f32.partialorder %v5988_v54, 0.0  ;;  %v6109_v6 = vmul.f32 0.2, %v5988_v54 }
 0x579   : > { %v5797_v40 = vpop.f32.mrf.mxu3 }
 0x57a   : > { %v6145_v11 = vsel %vm6073_vm12, %v5988_v54, %v6109_v6  ;;  %v5798_v32 = vadd.f32 %v11561_v56, %v5797_v40  ;;  %vm12962_vm12 = vmmov %vm12961_vm2 }
 0x57b   : > { %v6326_v14 = vpack.c.bf16 %v6145_v11, %v6145_v11  ;;  %v5891_v35 = vpop.f32.mrf.mxu1 }
 0x57c   : > { %v11593_v26 = vpop.permute.xlu0 %5237  ;;  %v5892_v39 = vadd.f32 %v5891_v35, %v5793_v28  ;;  %v5149_v57 = vpop.permute.xlu1 %5148 }
 0x57d   : > { %v6398_v17 = vunpack.c.l.b16 %v6326_v14 }
 0x57e   : > { %v5991_v16 = vadd.f32 %v11416_v2, %v5892_v39  ;;  %5930 = vmatmul.bf16.gmra.mxu1 %v5548_v62  ;;  %v5362_v2 = vsel %vm3307_vm14, %v5326_v5, %v5112_v52  ;;  %v11614_v28 = vpop.permute.xlu2 %5202  ;;  %v4950_v52 = vshrl.u32 %v11504_v3, 16  ;;  %v5462_v62 = vsel %vm12958_vm9, %v11287_v49, %v11552_v30 }
 0x57f   : > { %v6432_v46 = vpack.c.b16 %v6398_v17, %v6397_v60  ;;  %v5410_v54 = vsel %vm3348_vm3, %v5362_v2, %v5149_v57 }
 0x580   : > { %v6110_v36 = vmul.f32 0.2, %v5991_v16  ;;  %vm6074_vm7 = vcmp.gt.f32.partialorder %v5991_v16, 0.0  ;;  %v4955_v17 = vor.u32 %v4954_v34, %v4950_v52 }
 0x581   : > { %v11600_v61 = vpop.f32.mrf.mxu3  ;;  %v6457_v50 = vshrl.u32 %v6432_v46, 16  ;;  %v6460_v24 = vshll.u32 %v6432_v46, 16 }
 0x582   : > { %v6146_v59 = vsel %vm6074_vm7, %v5991_v16, %v6110_v36  ;;  %vm12964_vm7 = vmmov %vm12961_vm2 }
 0x583   : > { %v5893_v41 = vpop.f32.mrf.mxu1  ;;  %v6459_v4 = vrot.slane %v6457_v50, 7  ;;  %v6327_v39 = vpack.c.bf16 %v6146_v59, %v6146_v59  ;;  %v5504_v50 = vsel %vm3307_vm14, %v5462_v62, %v11571_v25 }
 0x584   : > { %v11606_v33 = vpop.permute.xlu0 %5113  ;;  %v5894_v0 = vadd.f32 %v5893_v41, %v5795_v51  ;;  %v11609_v9 = vpop.permute.xlu1 %5285  ;;  %v5551_v40 = vsel %vm3348_vm3, %v5504_v50, %v11582_v29 }
 0x585   : > { %v6462_v6 = vor.u32 %v6460_v24, %v6459_v4  ;;  %v6630_v48 = vsel %vm9371_vm15, %v6459_v4, 0  ;;  %v4959_v4 = vrot.slane %v4957_v27, 1  ;;  %v6399_v24 = vunpack.c.l.b16 %v6327_v39 }
 0x586   : > { %v5993_v63 = vadd.f32 %v11455_v53, %v5894_v0  ;;  %5841 = vmatmul.bf16.gmra.mxu3 %v5410_v54  ;;  %v6907_v58 = vrot.slane %v6630_v48, 1  ;;  %v6667_v60 = vshll.u32 %v6630_v48, 16  ;;  %v11652_v59 = vpop.permute.xlu2 %6839  ;;  %v5328_v27 = vsel %vm12960_vm10, %v11295_v10, %v11596_v7  ;;  %v8694_v10 = vld [vmem:[%s12770_s7 + $0x20] sm:$0xff]  ;;  %vm12966_vm10 = vmmov %vm12961_vm2 }
 0x587   : > { %v11619_v11 = vsel %vm9371_vm15, 0, %v6462_v6  ;;  %v11650_v34 = vsel %vm664_vm1, %v4955_v17, %v4959_v4  ;;  %7584 = vmatpush.bf16.msrb.mxu0 %v8694_v10 }
 0x588   : > { %vm6075_vm8 = vcmp.gt.f32.partialorder %v5993_v63, 0.0  ;;  %v6111_v14 = vmul.f32 0.2, %v5993_v63  ;;  %6984 = vrot.lane.b32.xlu1 %v11619_v11, %s8798_s19  ;;  %v6906_v35 = vrot.slane %v11619_v11, 1  ;;  %v6662_v53 = vshll.u32 %v11619_v11, 16 }
 0x589   : > { %v11626_v57 = vpop.f32.mrf.mxu3  ;;  %v6660_v5 = vshrl.u32 %v11619_v11, 16  ;;  %v6669_v25 = vrot.slane %v6667_v60, 1 }
 0x58a   : > { %v6147_v16 = vsel %vm6075_vm8, %v5993_v63, %v6111_v14  ;;  %v11634_v46 = vsel %vm973_vm0, %v6906_v35, %v6907_v58  ;;  %v6664_v41 = vrot.slane %v6662_v53, 1  ;;  %v5364_v53 = vsel %vm3307_vm14, %v5328_v27, %v11606_v33  ;;  %vm12965_vm8 = vmmov %vm12961_vm2 }
 0x58b   : > { %v6328_v42 = vpack.c.bf16 %v6147_v16, %v6147_v16  ;;  %6953 = vrot.lane.b32.xlu0 %v11634_v46, %s8799_s29  ;;  %v5896_v51 = vpop.f32.mrf.mxu1  ;;  %v5803_v4 = vadd.f32 %v11561_v56, %v11626_v57 }
 0x58c   : > { %v11640_v36 = vpop.permute.xlu0 %5239  ;;  %v5897_v49 = vadd.f32 %v5896_v51, %v5798_v32  ;;  %v5151_v30 = vpop.permute.xlu1 %5150  ;;  %v6665_v0 = vor.u32 %v6664_v41, %v6660_v5 }
 0x58d   : > { %v6400_v2 = vunpack.c.l.b16 %v6328_v42 }
 0x58e   : > { %v5996_v54 = vadd.f32 %v11479_v18, %v5897_v49  ;;  %5935 = vmatmul.bf16.gmra.mxu1 %v5551_v40  ;;  %v11647_v48 = vsel %vm664_vm1, %v6665_v0, %v6669_v25  ;;  %v5800_v18 = vadd.f32 %v11561_v56, %v11600_v61  ;;  %v5413_v61 = vsel %vm3348_vm3, %v5364_v53, %v5151_v30  ;;  %v4990_v40 = vpop.permute.xlu2 %4989 }
 0x58f   : > { %v6433_v6 = vpack.c.b16 %v6400_v2, %v6399_v24  ;;  %12959 = vst [vmem:[#allocation6_spill] sm:$0xff] %v11647_v48  ;;  %6841 = vrot.lane.b32.xlu2 %v11647_v48, %s8800_s12  ;;  %v5465_v30 = vsel %vm12961_vm2, %v11333_v23, %v11576_v43 }
 0x590   : > { %5291 = vrot.lane.b32.xlu1 %v11650_v34, %s8798_s19  ;;  %v6112_v52 = vmul.f32 0.2, %v5996_v54  ;;  %vm6076_vm11 = vcmp.gt.f32.partialorder %v5996_v54, 0.0  ;;  %v5506_v0 = vsel %vm3307_vm14, %v5465_v30, %v11593_v26 }
 0x591   : > { %v5804_v29 = vpop.f32.mrf.mxu3  ;;  %v6464_v63 = vshrl.u32 %v6433_v6, 16  ;;  %v6467_v39 = vshll.u32 %v6433_v6, 16  ;;  %v5554_v57 = vsel %vm3348_vm3, %v5506_v0, %v11609_v9  ;;  %v5330_v9 = vsel %vm12962_vm12, %v11341_v37, %v4990_v40 }
 0x593   : > { %5119 = vrot.lane.b32.xlu0 %v11485_v55, %s8799_s29  ;;  %v5898_v14 = vpop.f32.mrf.mxu1  ;;  %v6466_v58 = vrot.slane %v6464_v63, 7  ;;  %v6148_v55 = vsel %vm6076_vm11, %v5996_v54, %v6112_v52 }
 0x594   : > { %v11665_v35 = vpop.permute.xlu0 %6951  ;;  %v5899_v60 = vadd.f32 %v5898_v14, %v5800_v18  ;;  %v11676_v32 = vpop.permute.xlu1 %5287  ;;  %v6329_v51 = vpack.c.bf16 %v6148_v55, %v6148_v55  ;;  %v12963_v55 = vld [vmem:[#allocation2_spill] sm:$0xff] }
 0x595   : > { %v6469_v17 = vor.u32 %v6467_v39, %v6466_v58  ;;  %v6631_v62 = vsel %vm9371_vm15, %v6466_v58, 0 }
 0x596   : > { %v5998_v7 = vadd.f32 %v11500_v1, %v5899_v60  ;;  %5846 = vmatmul.bf16.gmra.mxu3 %v5413_v61  ;;  %v6910_v42 = vrot.slane %v6631_v62, 1  ;;  %v11687_v1 = vpop.f32.mrf.mxu2  ;;  %v6679_v49 = vshll.u32 %v6631_v62, 16  ;;  %v6401_v18 = vunpack.c.l.b16 %v6329_v51 }
 0x597   : > { %v11680_v33 = vsel %vm9371_vm15, 0, %v6469_v17  ;;  %4993 = vrot.lane.b32.xlu2 %v11468_v13, %s8800_s12  ;;  %v5805_v17 = vadd.f32 %v11561_v56, %v5804_v29 }
 0x598   : > { %vm6077_vm5 = vcmp.gt.f32.partialorder %v5998_v7, 0.0  ;;  %v6113_v16 = vmul.f32 0.2, %v5998_v7  ;;  %6986 = vrot.lane.b32.xlu1 %v11680_v33, %s8798_s19  ;;  %v6909_v50 = vrot.slane %v11680_v33, 1  ;;  %v6674_v41 = vshll.u32 %v11680_v33, 16 }
 0x599   : > { %v5807_v5 = vpop.f32.mrf.mxu3  ;;  %v6672_v63 = vshrl.u32 %v11680_v33, 16  ;;  %v6681_v14 = vrot.slane %v6679_v49, 1 }
 0x59a   : > { %v6149_v24 = vsel %vm6077_vm5, %v5998_v7, %v6113_v16  ;;  %v11696_v2 = vsel %vm973_vm0, %v6909_v50, %v6910_v42  ;;  %v6676_v23 = vrot.slane %v6674_v41, 1  ;;  %v11721_v42 = vpop.permute.xlu2 %5204 }
 0x59b   : > { %v6330_v25 = vpack.c.bf16 %v6149_v24, %v6149_v24  ;;  %6955 = vrot.lane.b32.xlu0 %v11696_v2, %s8799_s29  ;;  %v5901_v54 = vpop.f32.mrf.mxu1 }
 0x59c   : > { %v5116_v6 = vpop.permute.xlu0 %5115  ;;  %v5902_v43 = vadd.f32 %v5901_v54, %v5803_v4  ;;  %v6677_v27 = vor.u32 %v6676_v23, %v6672_v63  ;;  %v5153_v53 = vpop.permute.xlu1 %5152  ;;  %v5468_v23 = vsel %vm12964_vm7, %v11375_v15, %v11614_v28 }
 0x59d   : > { %v6402_v52 = vunpack.c.l.b16 %v6330_v25  ;;  %v5366_v62 = vsel %vm3307_vm14, %v5330_v9, %v5116_v6 }
 0x59e   : > { %v6001_v58 = vadd.f32 %v11524_v22, %v5902_v43  ;;  %5940 = vmatmul.bf16.gmra.mxu1 %v5554_v57  ;;  %v11707_v39 = vsel %vm664_vm1, %v6677_v27, %v6681_v14  ;;  %v11717_v10 = vpop.f32.mrf.mxu2  ;;  %v5416_v41 = vsel %vm3348_vm3, %v5366_v62, %v5153_v53  ;;  %v5808_v43 = vadd.f32 %v11561_v56, %v5807_v5 }
 0x59f   : > { %v6434_v26 = vpack.c.b16 %v6402_v52, %v6401_v18  ;;  %6843 = vrot.lane.b32.xlu2 %v11707_v39, %s8800_s12  ;;  %v5508_v27 = vsel %vm3307_vm14, %v5468_v23, %v11640_v36 }
 0x5a0   : > { %5156 = vrot.lane.b32.xlu1 %v11504_v3, %s8798_s19  ;;  %v6114_v22 = vmul.f32 0.2, %v6001_v58  ;;  %vm6078_vm13 = vcmp.gt.f32.partialorder %v6001_v58, 0.0  ;;  %v5557_v28 = vsel %vm3348_vm3, %v5508_v27, %v11676_v32 }
 0x5a1   : > { %v5809_v60 = vpop.f32.mrf.mxu3  ;;  %v6471_v61 = vshrl.u32 %v6434_v26, 16  ;;  %v6474_v50 = vshll.u32 %v6434_v26, 16 }
 0x5a2   : > { %v6150_v30 = vsel %vm6078_vm13, %v6001_v58, %v6114_v22  ;;  %v4992_v62 = vpop.permute.xlu2 %4991 }
 0x5a3   : > { %5245 = vrot.lane.b32.xlu0 %v12963_v55, %s8799_s29  ;;  %v5903_v7 = vpop.f32.mrf.mxu1  ;;  %v6473_v16 = vrot.slane %v6471_v61, 7  ;;  %v6331_v54 = vpack.c.bf16 %v6150_v30, %v6150_v30  ;;  %v5332_v32 = vsel %vm12965_vm8, %v11382_v12, %v4992_v62 }
 0x5a4   : > { %v5904_v51 = vadd.f32 %v5903_v7, %v5805_v17  ;;  %v11723_v37 = vpop.permute.xlu0 %5241  ;;  %v11743_v18 = vpop.permute.xlu1 %5289 }
 0x5a5   : > { %v6476_v29 = vor.u32 %v6474_v50, %v6473_v16  ;;  %v6632_v49 = vsel %vm9371_vm15, %v6473_v16, 0  ;;  %v6403_v9 = vunpack.c.l.b16 %v6331_v54 }
 0x5a6   : > { %v6003_v40 = vadd.f32 %v11536_v31, %v5904_v51  ;;  %5851 = vmatmul.bf16.gmra.mxu3 %v5416_v41  ;;  %v6913_v25 = vrot.slane %v6632_v49, 1  ;;  %v6691_v63 = vshll.u32 %v6632_v49, 16  ;;  %v11755_v5 = vpop.f32.mrf.mxu2 }
 0x5a7   : > { %v11731_v4 = vsel %vm9371_vm15, 0, %v6476_v29  ;;  %5208 = vrot.lane.b32.xlu2 %v11520_v45, %s8800_s12  ;;  %v5810_v29 = vadd.f32 %v11561_v56, %v5809_v60 }
 0x5a8   : > { %vm6079_vm6 = vcmp.gt.f32.partialorder %v6003_v40, 0.0  ;;  %v6115_v24 = vmul.f32 0.2, %v6003_v40  ;;  %6988 = vrot.lane.b32.xlu1 %v11731_v4, %s8798_s19  ;;  %v6912_v0 = vrot.slane %v11731_v4, 1  ;;  %v6686_v31 = vshll.u32 %v11731_v4, 16 }
 0x5a9   : > { %v5812_v6 = vpop.f32.mrf.mxu3  ;;  %v6684_v26 = vshrl.u32 %v11731_v4, 16  ;;  %v6693_v22 = vrot.slane %v6691_v63, 1 }
 0x5aa   : > { %v6151_v57 = vsel %vm6079_vm6, %v6003_v40, %v6115_v24  ;;  %v11746_v52 = vsel %vm973_vm0, %v6912_v0, %v6913_v25  ;;  %v6688_v53 = vrot.slane %v6686_v31, 1  ;;  %v8693_v0 = vld [vmem:[%s12770_s7 + $0x18] sm:$0xff] }
 0x5ab   : > { %v6332_v14 = vpack.c.bf16 %v6151_v57, %v6151_v57  ;;  %6957 = vrot.lane.b32.xlu0 %v11746_v52, %s8799_s29  ;;  %v5906_v58 = vpop.f32.mrf.mxu1  ;;  %7585 = vmatpush.bf16.msrb.mxu0 %v8693_v0  ;;  %v5471_v57 = vsel %vm12966_vm10, %v11421_v8, %v11721_v42  ;;  %v5813_v42 = vadd.f32 %v11561_v56, %v5812_v6 }
 0x5ac   : > { %v5907_v15 = vadd.f32 %v5906_v58, %v5808_v43  ;;  %v6689_v17 = vor.u32 %v6688_v53, %v6684_v26  ;;  %v5118_v16 = vpop.permute.xlu0 %5117  ;;  %v5155_v25 = vpop.permute.xlu1 %5154 }
 0x5ad   : > { %v6404_v61 = vunpack.c.l.b16 %v6332_v14  ;;  %v5368_v49 = vsel %vm3307_vm14, %v5332_v32, %v5118_v16 }
 0x5ae   : > { %v6006_v36 = vadd.f32 %v11549_v44, %v5907_v15  ;;  %5945 = vmatmul.bf16.gmra.mxu1 %v5557_v28  ;;  %v11759_v50 = vsel %vm664_vm1, %v6689_v17, %v6693_v22  ;;  %v5419_v31 = vsel %vm3348_vm3, %v5368_v49, %v5155_v25  ;;  %v11776_v43 = vpop.f32.mrf.mxu2 }
 0x5af   : > { %v6435_v7 = vpack.c.b16 %v6404_v61, %v6403_v9  ;;  %6845 = vrot.lane.b32.xlu2 %v11759_v50, %s8800_s12 }
 0x5b0   : > { %5293 = vrot.lane.b32.xlu1 %v9417_v20, %s8798_s19  ;;  %v6116_v44 = vmul.f32 0.2, %v6006_v36  ;;  %vm6080_vm9 = vcmp.gt.f32.partialorder %v6006_v36, 0.0 }
 0x5b1   : > { %v5814_v51 = vpop.f32.mrf.mxu3  ;;  %v6478_v41 = vshrl.u32 %v6435_v7, 16  ;;  %v6481_v24 = vshll.u32 %v6435_v7, 16 }
 0x5b2   : > { %v6152_v60 = vsel %vm6080_vm9, %v6006_v36, %v6116_v44  ;;  %vm12967_vm9 = vmmov %vm12966_vm10 }
 0x5b3   : > { %v5908_v30 = vpop.f32.mrf.mxu1  ;;  %v6480_v40 = vrot.slane %v6478_v41, 7  ;;  %v6333_v53 = vpack.c.bf16 %v6152_v60, %v6152_v60 }
 0x5b4   : > { %v5909_v54 = vadd.f32 %v5908_v30, %v5810_v29 }
 0x5b5   : > { %v6483_v12 = vor.u32 %v6481_v24, %v6480_v40  ;;  %v6633_v63 = vsel %vm9371_vm15, %v6480_v40, 0  ;;  %v6405_v16 = vunpack.c.l.b16 %v6333_v53 }
 0x5b6   : > { %v6008_v23 = vadd.f32 %v11563_v47, %v5909_v54  ;;  %5856 = vmatmul.bf16.gmra.mxu3 %v5419_v31  ;;  %v6916_v26 = vrot.slane %v6633_v63, 1  ;;  %v5510_v47 = vsel %vm3307_vm14, %v5471_v57, %v11723_v37  ;;  %v6703_v8 = vshll.u32 %v6633_v63, 16  ;;  %v11806_v30 = vpop.f32.mrf.mxu2 }
 0x5b7   : > { %v11783_v27 = vsel %vm9371_vm15, 0, %v6483_v12  ;;  %v5560_v7 = vsel %vm3348_vm3, %v5510_v47, %v11743_v18  ;;  %v5815_v18 = vadd.f32 %v11561_v56, %v5814_v51 }
 0x5b8   : > { %vm6081_vm11 = vcmp.gt.f32.partialorder %v6008_v23, 0.0  ;;  %v6117_v14 = vmul.f32 0.2, %v6008_v23  ;;  %6990 = vrot.lane.b32.xlu1 %v11783_v27, %s8798_s19  ;;  %v6915_v58 = vrot.slane %v11783_v27, 1  ;;  %v6698_v28 = vshll.u32 %v11783_v27, 16 }
 0x5b9   : > { %v5817_v15 = vpop.f32.mrf.mxu3  ;;  %v6696_v62 = vshrl.u32 %v11783_v27, 16  ;;  %v6705_v6 = vrot.slane %v6703_v8, 1 }
 0x5ba   : > { %v6153_v9 = vsel %vm6081_vm11, %v6008_v23, %v6117_v14  ;;  %v11793_v61 = vsel %vm973_vm0, %v6915_v58, %v6916_v26  ;;  %v6700_v36 = vrot.slane %v6698_v28, 1  ;;  %v5818_v8 = vadd.f32 %v11561_v56, %v5817_v15  ;;  %vm12968_vm11 = vmmov %vm12967_vm9 }
 0x5bb   : > { %v6334_v17 = vpack.c.bf16 %v6153_v9, %v6153_v9  ;;  %v5911_v22 = vpop.f32.mrf.mxu1  ;;  %6959 = vrot.lane.b32.xlu0 %v11793_v61, %s8799_s29 }
 0x5bc   : > { %v5912_v37 = vadd.f32 %v5911_v22, %v5813_v42  ;;  %v6701_v41 = vor.u32 %v6700_v36, %v6696_v62 }
 0x5bd   : > { %v6406_v32 = vunpack.c.l.b16 %v6334_v17 }
 0x5be   : > { %v6011_v29 = vadd.f32 %v11687_v1, %v5912_v37  ;;  %5950 = vmatmul.bf16.gmra.mxu1 %v5560_v7  ;;  %v11802_v49 = vsel %vm664_vm1, %v6701_v41, %v6705_v6  ;;  %v11824_v9 = vpop.f32.mrf.mxu2 }
 0x5bf   : > { %v6436_v44 = vpack.c.b16 %v6406_v32, %v6405_v16  ;;  %6847 = vrot.lane.b32.xlu2 %v11802_v49, %s8800_s12 }
 0x5c0   : > { %v6118_v0 = vmul.f32 0.2, %v6011_v29  ;;  %vm6082_vm5 = vcmp.gt.f32.partialorder %v6011_v29, 0.0 }
 0x5c1   : > { %v5819_v40 = vpop.f32.mrf.mxu3  ;;  %v6485_v24 = vshrl.u32 %v6436_v44, 16  ;;  %v6488_v31 = vshll.u32 %v6436_v44, 16 }
 0x5c2   : > { %v6154_v60 = vsel %vm6082_vm5, %v6011_v29, %v6118_v0 }
 0x5c3   : > { %v5913_v25 = vpop.f32.mrf.mxu1  ;;  %v6487_v54 = vrot.slane %v6485_v24, 7  ;;  %v6335_v26 = vpack.c.bf16 %v6154_v60, %v6154_v60 }
 0x5c4   : > { %v5914_v1 = vadd.f32 %v5913_v25, %v5815_v18  ;;  %v5820_v18 = vadd.f32 %v11561_v56, %v5819_v40 }
 0x5c5   : > { %v6490_v12 = vor.u32 %v6488_v31, %v6487_v54  ;;  %v6634_v63 = vsel %vm9371_vm15, %v6487_v54, 0  ;;  %v6407_v7 = vunpack.c.l.b16 %v6335_v26 }
 0x5c6   : > { %v6013_v23 = vadd.f32 %v11717_v10, %v5914_v1  ;;  %v6919_v58 = vrot.slane %v6634_v63, 1  ;;  %v6715_v28 = vshll.u32 %v6634_v63, 16 }
 0x5c7   : > { %v11814_v57 = vsel %vm9371_vm15, 0, %v6490_v12  ;;  %v11839_v12 = vpop.f32.mrf.mxu2 }
 0x5c8   : > { %vm6083_vm2 = vcmp.gt.f32.partialorder %v6013_v23, 0.0  ;;  %v6119_v14 = vmul.f32 0.2, %v6013_v23  ;;  %6992 = vrot.lane.b32.xlu1 %v11814_v57, %s8798_s19  ;;  %v6918_v51 = vrot.slane %v11814_v57, 1  ;;  %v6710_v53 = vshll.u32 %v11814_v57, 16 }
 0x5c9   : > { %v5822_v47 = vpop.f32.mrf.mxu3  ;;  %v6708_v62 = vshrl.u32 %v11814_v57, 16  ;;  %v6717_v41 = vrot.slane %v6715_v28, 1 }
 0x5ca   : > { %v6155_v10 = vsel %vm6083_vm2, %v6013_v23, %v6119_v14  ;;  %v11822_v42 = vsel %vm973_vm0, %v6918_v51, %v6919_v58  ;;  %v6712_v36 = vrot.slane %v6710_v53, 1 }
 0x5cb   : > { %v6336_v17 = vpack.c.bf16 %v6155_v10, %v6155_v10  ;;  %6961 = vrot.lane.b32.xlu0 %v11822_v42, %s8799_s29  ;;  %v5916_v22 = vpop.f32.mrf.mxu1 }
 0x5cc   : > { %v5917_v37 = vadd.f32 %v5916_v22, %v5818_v8  ;;  %v6713_v32 = vor.u32 %v6712_v36, %v6708_v62 }
 0x5cd   : > { %v6408_v16 = vunpack.c.l.b16 %v6336_v17  ;;  %v5823_v17 = vadd.f32 %v11561_v56, %v5822_v47 }
 0x5ce   : > { %v6016_v15 = vadd.f32 %v11755_v5, %v5917_v37  ;;  %v11831_v29 = vsel %vm664_vm1, %v6713_v32, %v6717_v41  ;;  %v8692_v5 = vld [vmem:[%s12770_s7 + $0x10] sm:$0xff] }
 0x5cf   : > { %v6437_v6 = vpack.c.b16 %v6408_v16, %v6407_v7  ;;  %6849 = vrot.lane.b32.xlu2 %v11831_v29, %s8800_s12  ;;  %7586 = vmatpush.bf16.msrb.mxu0 %v8692_v5  ;;  %v11860_v47 = vpop.f32.mrf.mxu2 }
 0x5d0   : > { %v6120_v0 = vmul.f32 0.2, %v6016_v15  ;;  %vm6084_vm12 = vcmp.gt.f32.partialorder %v6016_v15, 0.0 }
 0x5d1   : > { %v6492_v44 = vshrl.u32 %v6437_v6, 16  ;;  %v5824_v24 = vpop.f32.mrf.mxu3  ;;  %v6495_v54 = vshll.u32 %v6437_v6, 16 }
 0x5d2   : > { %v6156_v23 = vsel %vm6084_vm12, %v6016_v15, %v6120_v0  ;;  %v5825_v5 = vadd.f32 %v11561_v56, %v5824_v24  ;;  %vm12969_vm12 = vmmov %vm12967_vm9 }
 0x5d3   : > { %v6494_v25 = vrot.slane %v6492_v44, 7  ;;  %v5918_v31 = vpop.f32.mrf.mxu1  ;;  %v6337_v53 = vpack.c.bf16 %v6156_v23, %v6156_v23  ;;  %v8690_v23 = vld [vmem:[%s12770_s7] sm:$0xff] }
 0x5d4   : > { %v5919_v1 = vadd.f32 %v5918_v31, %v5820_v18  ;;  %v8691_v31 = vld [vmem:[%s12770_s7 + $0x8] sm:$0xff] }
 0x5d5   : > { %v6497_v63 = vor.u32 %v6495_v54, %v6494_v25  ;;  %v6635_v60 = vsel %vm9371_vm15, %v6494_v25, 0  ;;  %v6409_v32 = vunpack.c.l.b16 %v6337_v53  ;;  %7587 = vmatpush.bf16.msrb.mxu0 %v8691_v31 }
 0x5d6   : > { %v6018_v40 = vadd.f32 %v11776_v43, %v5919_v1  ;;  %v6922_v26 = vrot.slane %v6635_v60, 1  ;;  %v6727_v10 = vshll.u32 %v6635_v60, 16 }
 0x5d7   : > { %v11846_v14 = vsel %vm9371_vm15, 0, %v6497_v63 }
 0x5d8   : > { %vm6085_vm13 = vcmp.gt.f32.partialorder %v6018_v40, 0.0  ;;  %v6121_v51 = vmul.f32 0.2, %v6018_v40  ;;  %6994 = vrot.lane.b32.xlu1 %v11846_v14, %s8798_s19  ;;  %v6921_v58 = vrot.slane %v11846_v14, 1  ;;  %v6722_v8 = vshll.u32 %v11846_v14, 16 }
 0x5d9   : > { %v5827_v28 = vpop.f32.mrf.mxu3  ;;  %v6720_v37 = vshrl.u32 %v11846_v14, 16  ;;  %v6729_v6 = vrot.slane %v6727_v10, 1  ;;  %7588 = vmatpush.bf16.msrb.mxu0 %v8690_v23 }
 0x5da   : > { %v6157_v43 = vsel %vm6085_vm13, %v6018_v40, %v6121_v51  ;;  %v11854_v22 = vsel %vm973_vm0, %v6921_v58, %v6922_v26  ;;  %v6724_v7 = vrot.slane %v6722_v8, 1  ;;  %vm12970_vm13 = vmmov %vm12967_vm9 }
 0x5db   : > { %v6338_v62 = vpack.c.bf16 %v6157_v43, %v6157_v43  ;;  %6963 = vrot.lane.b32.xlu0 %v11854_v22, %s8799_s29  ;;  %v5921_v36 = vpop.f32.mrf.mxu1  ;;  %v11884_v43 = vpop.f32.mrf.mxu2 }
 0x5dc   : > { %v5922_v16 = vadd.f32 %v5921_v36, %v5823_v17  ;;  %v6725_v15 = vor.u32 %v6724_v7, %v6720_v37  ;;  %v5828_v7 = vadd.f32 %v11561_v56, %v5827_v28 }
 0x5dd   : > { %v6410_v41 = vunpack.c.l.b16 %v6338_v62 }
 0x5de   : > { %v6021_v44 = vadd.f32 %v11806_v30, %v5922_v16  ;;  %v11863_v0 = vsel %vm664_vm1, %v6725_v15, %v6729_v6 }
 0x5df   : > { %v6438_v18 = vpack.c.b16 %v6410_v41, %v6409_v32  ;;  %6851 = vrot.lane.b32.xlu2 %v11863_v0, %s8800_s12 }
 0x5e0   : > { %v6122_v1 = vmul.f32 0.2, %v6021_v44  ;;  %vm6086_vm6 = vcmp.gt.f32.partialorder %v6021_v44, 0.0 }
 0x5e1   : > { %v6499_v25 = vshrl.u32 %v6438_v18, 16  ;;  %v5829_v54 = vpop.f32.mrf.mxu3  ;;  %v6502_v30 = vshll.u32 %v6438_v18, 16 }
 0x5e2   : > { %v6158_v26 = vsel %vm6086_vm6, %v6021_v44, %v6122_v1 }
 0x5e3   : > { %v6501_v63 = vrot.slane %v6499_v25, 7  ;;  %v5923_v60 = vpop.f32.mrf.mxu1  ;;  %v6339_v62 = vpack.c.bf16 %v6158_v26, %v6158_v26 }
 0x5e4   : > { %v5924_v40 = vadd.f32 %v5923_v60, %v5825_v5 }
 0x5e5   : > { %v6504_v51 = vor.u32 %v6502_v30, %v6501_v63  ;;  %v6636_v58 = vsel %vm9371_vm15, %v6501_v63, 0  ;;  %v6411_v25 = vunpack.c.l.b16 %v6339_v62  ;;  %v5207_v62 = vpop.permute.xlu2 %5206 }
 0x5e6   : > { %v6023_v53 = vadd.f32 %v11824_v9, %v5924_v40  ;;  %v6925_v17 = vrot.slane %v6636_v58, 1  ;;  %v6739_v9 = vshll.u32 %v6636_v58, 16  ;;  %v5830_v40 = vadd.f32 %v11561_v56, %v5829_v54  ;;  %v11901_v58 = vpop.f32.mrf.mxu2 }
 0x5e7   : > { %v11879_v24 = vsel %vm9371_vm15, 0, %v6504_v51  ;;  %v7146_v54 = vsel %vm12967_vm9, %v12963_v55, %v11652_v59 }
 0x5e8   : > { %vm6087_vm7 = vcmp.gt.f32.partialorder %v6023_v53, 0.0  ;;  %v6123_v8 = vmul.f32 0.2, %v6023_v53  ;;  %6996 = vrot.lane.b32.xlu1 %v11879_v24, %s8798_s19  ;;  %v6924_v10 = vrot.slane %v11879_v24, 1  ;;  %v6734_v37 = vshll.u32 %v11879_v24, 16 }
 0x5e9   : > { %v5832_v36 = vpop.f32.mrf.mxu3  ;;  %v6732_v6 = vshrl.u32 %v11879_v24, 16  ;;  %v6741_v1 = vrot.slane %v6739_v9, 1  ;;  %v7178_v59 = vsel %vm3307_vm14, %v7146_v54, %v11665_v35 }
 0x5ea   : > { %v6159_v16 = vsel %vm6087_vm7, %v6023_v53, %v6123_v8  ;;  %v11889_v32 = vsel %vm973_vm0, %v6924_v10, %v6925_v17  ;;  %v6736_v44 = vrot.slane %v6734_v37, 1 }
 0x5eb   : > { %v6340_v41 = vpack.c.bf16 %v6159_v16, %v6159_v16  ;;  %6965 = vrot.lane.b32.xlu0 %v11889_v32, %s8799_s29  ;;  %v5926_v15 = vpop.f32.mrf.mxu1 }
 0x5ec   : > { %v5927_v18 = vadd.f32 %v5926_v15, %v5828_v7  ;;  %v6737_v5 = vor.u32 %v6736_v44, %v6732_v6  ;;  %v5244_v7 = vpop.permute.xlu0 %5243 }
 0x5ed   : > { %v6412_v31 = vunpack.c.l.b16 %v6340_v41 }
 0x5ee   : > { %v6026_v63 = vadd.f32 %v11839_v12, %v5927_v18  ;;  %v11896_v30 = vsel %vm664_vm1, %v6737_v5, %v6741_v1  ;;  %v6035_v35 = vpop.f32.mrf.mxu2 }
 0x5ef   : > { %v6439_v28 = vpack.c.b16 %v6412_v31, %v6411_v25  ;;  %6853 = vrot.lane.b32.xlu2 %v11896_v30, %s8800_s12  ;;  %v5833_v31 = vadd.f32 %v11561_v56, %v5832_v36 }
 0x5f0   : > { %v6124_v51 = vmul.f32 0.2, %v6026_v63  ;;  %vm6088_vm8 = vcmp.gt.f32.partialorder %v6026_v63, 0.0 }
 0x5f1   : > { %v6506_v60 = vshrl.u32 %v6439_v28, 16  ;;  %v5834_v23 = vpop.f32.mrf.mxu3  ;;  %v6509_v53 = vshll.u32 %v6439_v28, 16 }
 0x5f2   : > { %v6160_v37 = vsel %vm6088_vm8, %v6026_v63, %v6124_v51  ;;  %vm12971_vm8 = vmmov %vm12967_vm9 }
 0x5f3   : > { %v6508_v26 = vrot.slane %v6506_v60, 7  ;;  %v5928_v8 = vpop.f32.mrf.mxu1  ;;  %v6341_v44 = vpack.c.bf16 %v6160_v37, %v6160_v37  ;;  %vm12972_vm9 = vmmov %vm12971_vm8 }
 0x5f4   : > { %v5929_v10 = vadd.f32 %v5928_v8, %v5830_v40 }
 0x5f5   : > { %v6511_v12 = vor.u32 %v6509_v53, %v6508_v26  ;;  %v6637_v17 = vsel %vm9371_vm15, %v6508_v26, 0  ;;  %v6413_v8 = vunpack.c.l.b16 %v6341_v44 }
 0x5f6   : > { %v6028_v9 = vadd.f32 %v11860_v47, %v5929_v10  ;;  %v6928_v6 = vrot.slane %v6637_v17, 1  ;;  %v6751_v25 = vshll.u32 %v6637_v17, 16  ;;  %v6842_v17 = vpop.permute.xlu2 %6841 }
 0x5f7   : > { %v11911_v16 = vsel %vm9371_vm15, 0, %v6511_v12 }
 0x5f8   : > { %vm6089_vm10 = vcmp.gt.f32.partialorder %v6028_v9, 0.0  ;;  %v6125_v41 = vmul.f32 0.2, %v6028_v9  ;;  %6998 = vrot.lane.b32.xlu1 %v11911_v16, %s8798_s19  ;;  %v6927_v15 = vrot.slane %v11911_v16, 1  ;;  %v6746_v47 = vshll.u32 %v11911_v16, 16 }
 0x5f9   : > { %v5837_v18 = vpop.f32.mrf.mxu3  ;;  %v6744_v51 = vshrl.u32 %v11911_v16, 16  ;;  %v6753_v12 = vrot.slane %v6751_v25, 1 }
 0x5fa   : > { %v6161_v5 = vsel %vm6089_vm10, %v6028_v9, %v6125_v41  ;;  %v6985_v1 = vpop.permute.xlu1 %6984  ;;  %v11921_v63 = vsel %vm973_vm0, %v6927_v15, %v6928_v6  ;;  %v6748_v26 = vrot.slane %v6746_v47, 1  ;;  %v5474_v15 = vsel %vm12968_vm11, %v11468_v13, %v5207_v62  ;;  %v8707_v62 = vld [vmem:[%s12770_s7 + $0x88] sm:$0xff] }
 0x5fb   : > { %v6342_v28 = vpack.c.bf16 %v6161_v5, %v6161_v5  ;;  %v7210_v60 = vsel %vm3348_vm3, %v7178_v59, %v6985_v1  ;;  %6967 = vrot.lane.b32.xlu0 %v11921_v63, %s8799_s29  ;;  %v5931_v40 = vpop.f32.mrf.mxu1  ;;  %v5512_v44 = vsel %vm3307_vm14, %v5474_v15, %v5244_v7  ;;  %v5835_v47 = vadd.f32 %v11561_v56, %v5834_v23 }
 0x5fc   : > { %v5932_v53 = vadd.f32 %v5931_v40, %v5833_v31  ;;  %7589 = vmatmul.bf16.vlgmr.msrb.gmra.mxu0 %v7210_v60  ;;  %v6749_v10 = vor.u32 %v6748_v26, %v6744_v51  ;;  %v6037_v51 = vpop.f32.mrf.mxu2  ;;  %7765 = vmatpush.bf16.msra.mxu3 %v8707_v62 }
 0x5fd   : > { %v6414_v36 = vunpack.c.l.b16 %v6342_v28  ;;  %v6954_v54 = vpop.permute.xlu0 %6953 }
 0x5fe   : > { %v6031_v37 = vadd.f32 %v11884_v43, %v5932_v53  ;;  %v11929_v41 = vsel %vm664_vm1, %v6749_v10, %v6753_v12  ;;  %v4994_v53 = vpop.permute.xlu2 %4993  ;;  %v7148_v12 = vsel %vm12969_vm12, %v11619_v11, %v6842_v17 }
 0x5ff   : > { %v6440_v9 = vpack.c.b16 %v6414_v36, %v6413_v8  ;;  %6855 = vrot.lane.b32.xlu2 %v11929_v41, %s8800_s12 }
 0x600   : > { %v6126_v25 = vmul.f32 0.2, %v6031_v37  ;;  %vm6090_vm5 = vcmp.gt.f32.partialorder %v6031_v37, 0.0  ;;  %7766 = vmatpush.bf16.msra.mxu3 %v8706_v19 }
 0x601   : > { %v6513_v6 = vshrl.u32 %v6440_v9, 16  ;;  %v6516_v43 = vshll.u32 %v6440_v9, 16  ;;  %v5839_v5 = vpop.f32.mrf.mxu3 }
 0x602   : > { %v5292_v59 = vpop.permute.xlu1 %5291  ;;  %v6162_v23 = vsel %vm6090_vm5, %v6031_v37, %v6126_v25  ;;  %vm12973_vm5 = vmmov %vm12971_vm8 }
 0x603   : > { %v6515_v31 = vrot.slane %v6513_v6, 7  ;;  %v5933_v1 = vpop.f32.mrf.mxu1  ;;  %v5563_v28 = vsel %vm3348_vm3, %v5512_v44, %v5292_v59  ;;  %v6343_v37 = vpack.c.bf16 %v6162_v23, %v6162_v23  ;;  %v5838_v6 = vadd.f32 %v11561_v56, %v5837_v18 }
 0x604   : > { %v5934_v60 = vadd.f32 %v5933_v1, %v5835_v47  ;;  %5955 = vmatmul.bf16.gmra.mxu1 %v5563_v28  ;;  %v7180_v44 = vsel %vm3307_vm14, %v7148_v12, %v6954_v54  ;;  %v11973_v12 = vld [vmem:[%s12769_s6] ss:$0 sm:$0xff] }
 0x605   : > { %v6518_v40 = vor.u32 %v6516_v43, %v6515_v31  ;;  %v6638_v13 = vsel %vm9371_vm15, %v6515_v31, 0  ;;  %v6415_v56 = vunpack.c.l.b16 %v6343_v37 }
 0x606   : > { %v6033_v7 = vadd.f32 %v11901_v58, %v5934_v60  ;;  %v6931_v10 = vrot.slane %v6638_v13, 1  ;;  %v5120_v58 = vpop.permute.xlu0 %5119  ;;  %v6763_v15 = vshll.u32 %v6638_v13, 16 }
 0x607   : > { %v11946_v26 = vsel %vm9371_vm15, 0, %v6518_v40 }
 0x608   : > { %vm6091_vm2 = vcmp.gt.f32.partialorder %v6033_v7, 0.0  ;;  %v6127_v8 = vmul.f32 0.2, %v6033_v7  ;;  %7000 = vrot.lane.b32.xlu1 %v11946_v26, %s8798_s19  ;;  %v6930_v36 = vrot.slane %v11946_v26, 1  ;;  %v6758_v9 = vshll.u32 %v11946_v26, 16 }
 0x609   : > { %v6756_v17 = vshrl.u32 %v11946_v26, 16  ;;  %v5842_v54 = vpop.f32.mrf.mxu3  ;;  %v6765_v40 = vrot.slane %v6763_v15, 1 }
 0x60a   : > { %v6163_v47 = vsel %vm6091_vm2, %v6033_v7, %v6127_v8  ;;  %v6987_v25 = vpop.permute.xlu1 %6986  ;;  %v11957_v59 = vsel %vm973_vm0, %v6930_v36, %v6931_v10  ;;  %v6760_v1 = vrot.slane %v6758_v9, 1  ;;  %v6040_v7 = vpop.f32.mrf.mxu2  ;;  %v5334_v8 = vsel %vm12970_vm13, %v11434_v21, %v4994_v53  ;;  %vm12974_vm13 = vmmov %vm12973_vm5 }
 0x60b   : > { %v6344_v31 = vpack.c.bf16 %v6163_v47, %v6163_v47  ;;  %6969 = vrot.lane.b32.xlu0 %v11957_v59, %s8799_s29  ;;  %v5936_v43 = vpop.f32.mrf.mxu1  ;;  %v7213_v11 = vsel %vm3348_vm3, %v7180_v44, %v6987_v25  ;;  %v6844_v10 = vpop.permute.xlu2 %6843  ;;  %v5370_v37 = vsel %vm3307_vm14, %v5334_v8, %v5120_v58 }
 0x60c   : > { %v5937_v28 = vadd.f32 %v5936_v43, %v5838_v6  ;;  %7594 = vmatmul.bf16.gmra.mxu0 %v7213_v11  ;;  %v6761_v60 = vor.u32 %v6760_v1, %v6756_v17 }
 0x60d   : > { %v6416_v18 = vunpack.c.l.b16 %v6344_v31 }
 0x60e   : > { %v6036_v13 = vadd.f32 %v6035_v35, %v5937_v28  ;;  %v11964_v23 = vsel %vm664_vm1, %v6761_v60, %v6765_v40  ;;  %v5840_v35 = vadd.f32 %v11973_v12, %v5839_v5  ;;  %v6956_v47 = vpop.permute.xlu0 %6955 }
 0x60f   : > { %v6441_v62 = vpack.c.b16 %v6416_v18, %v6415_v56  ;;  %6857 = vrot.lane.b32.xlu2 %v11964_v23, %s8800_s12  ;;  %v7150_v18 = vsel %vm12971_vm8, %v11680_v33, %v6844_v10  ;;  %vm12975_vm8 = vmmov %vm12973_vm5 }
 0x610   : > { %v6128_v9 = vmul.f32 0.2, %v6036_v13  ;;  %vm6092_vm6 = vcmp.gt.f32.partialorder %v6036_v13, 0.0 }
 0x611   : > { %v6520_v36 = vshrl.u32 %v6441_v62, 16  ;;  %v6523_v44 = vshll.u32 %v6441_v62, 16  ;;  %v5844_v5 = vpop.f32.mrf.mxu3  ;;  %v7182_v62 = vsel %vm3307_vm14, %v7150_v18, %v6956_v47 }
 0x612   : > { %v5157_v15 = vpop.permute.xlu1 %5156  ;;  %v6164_v11 = vsel %vm6092_vm6, %v6036_v13, %v6128_v9  ;;  %v5843_v13 = vadd.f32 %v11973_v12, %v5842_v54  ;;  %v6042_v54 = vpop.f32.mrf.mxu2 }
 0x613   : > { %v6522_v6 = vrot.slane %v6520_v36, 7  ;;  %v5938_v25 = vpop.f32.mrf.mxu1  ;;  %v5422_v21 = vsel %vm3348_vm3, %v5370_v37, %v5157_v15  ;;  %v6345_v60 = vpack.c.bf16 %v6164_v11, %v6164_v11 }
 0x614   : > { %v5939_v53 = vadd.f32 %v5938_v25, %v5840_v35  ;;  %5861 = vmatmul.bf16.gmra.mxu3 %v5422_v21 }
 0x615   : > { %v6525_v31 = vor.u32 %v6523_v44, %v6522_v6  ;;  %v6639_v43 = vsel %vm9371_vm15, %v6522_v6, 0  ;;  %v5209_v44 = vpop.permute.xlu2 %5208  ;;  %v6417_v47 = vunpack.c.l.b16 %v6345_v60 }
 0x616   : > { %v6038_v17 = vadd.f32 %v6037_v51, %v5939_v53  ;;  %v6934_v56 = vrot.slane %v6639_v43, 1  ;;  %v6775_v51 = vshll.u32 %v6639_v43, 16  ;;  %v5246_v53 = vpop.permute.xlu0 %5245 }
 0x617   : > { %v11982_v58 = vsel %vm9371_vm15, 0, %v6525_v31 }
 0x618   : > { %vm6093_vm7 = vcmp.gt.f32.partialorder %v6038_v17, 0.0  ;;  %v6129_v1 = vmul.f32 0.2, %v6038_v17  ;;  %7002 = vrot.lane.b32.xlu1 %v11982_v58, %s8798_s19  ;;  %v6933_v28 = vrot.slane %v11982_v58, 1  ;;  %v6770_v40 = vshll.u32 %v11982_v58, 16 }
 0x619   : > { %v6768_v15 = vshrl.u32 %v11982_v58, 16  ;;  %v6777_v43 = vrot.slane %v6775_v51, 1  ;;  %v5847_v18 = vpop.f32.mrf.mxu3 }
 0x61a   : > { %v6165_v8 = vsel %vm6093_vm7, %v6038_v17, %v6129_v1  ;;  %v6989_v36 = vpop.permute.xlu1 %6988  ;;  %v11993_v35 = vsel %vm973_vm0, %v6933_v28, %v6934_v56  ;;  %v6772_v6 = vrot.slane %v6770_v40, 1  ;;  %v5477_v28 = vsel %vm12972_vm9, %v11650_v34, %v5209_v44  ;;  %vm12976_vm9 = vmmov %vm12973_vm5 }
 0x61b   : > { %v6346_v37 = vpack.c.bf16 %v6165_v8, %v6165_v8  ;;  %6971 = vrot.lane.b32.xlu0 %v11993_v35, %s8799_s29  ;;  %v5941_v9 = vpop.f32.mrf.mxu1  ;;  %v7216_v10 = vsel %vm3348_vm3, %v7182_v62, %v6989_v36  ;;  %v5845_v40 = vadd.f32 %v11973_v12, %v5844_v5  ;;  %v5514_v60 = vsel %vm3307_vm14, %v5477_v28, %v5246_v53  ;;  %v8705_v5 = vld [vmem:[%s12770_s7 + $0x78] sm:$0xff] }
 0x61c   : > { %v5942_v25 = vadd.f32 %v5941_v9, %v5843_v13  ;;  %7599 = vmatmul.bf16.gmra.mxu0 %v7216_v10  ;;  %v6773_v31 = vor.u32 %v6772_v6, %v6768_v15 }
 0x61d   : > { %v6418_v21 = vunpack.c.l.b16 %v6346_v37  ;;  %v6846_v15 = vpop.permute.xlu2 %6845  ;;  %7670 = vmatpush.bf16.msra.mxu0 %v8705_v5 }
 0x61e   : > { %v6041_v11 = vadd.f32 %v6040_v7, %v5942_v25  ;;  %v12000_v1 = vsel %vm664_vm1, %v6773_v31, %v6777_v43  ;;  %v6045_v25 = vpop.f32.mrf.mxu2 }
 0x61f   : > { %v6442_v17 = vpack.c.b16 %v6418_v21, %v6417_v47  ;;  %6859 = vrot.lane.b32.xlu2 %v12000_v1, %s8800_s12  ;;  %v6958_v47 = vpop.permute.xlu0 %6957 }
 0x620   : > { %v6130_v13 = vmul.f32 0.2, %v6041_v11  ;;  %vm6094_vm10 = vcmp.gt.f32.partialorder %v6041_v11, 0.0 }
 0x621   : > { %v6527_v56 = vshrl.u32 %v6442_v17, 16  ;;  %v6530_v7 = vshll.u32 %v6442_v17, 16  ;;  %v7152_v17 = vsel %vm12973_vm5, %v11731_v4, %v6846_v15 }
 0x622   : > { %v5294_v62 = vpop.permute.xlu1 %5293  ;;  %v6166_v6 = vsel %vm6094_vm10, %v6041_v11, %v6130_v13  ;;  %vm12978_vm10 = vmmov %vm12973_vm5 }
 0x623   : > { %v6529_v51 = vrot.slane %v6527_v56, 7  ;;  %v5943_v8 = vpop.f32.mrf.mxu1  ;;  %v5566_v36 = vsel %vm3348_vm3, %v5514_v60, %v5294_v62  ;;  %v6347_v11 = vpack.c.bf16 %v6166_v6, %v6166_v6  ;;  %v5848_v56 = vadd.f32 %v11973_v12, %v5847_v18 }
 0x624   : > { %v5944_v37 = vadd.f32 %v5943_v8, %v5845_v40  ;;  %5960 = vmatmul.bf16.gmra.mxu1 %v5566_v36  ;;  %v7184_v40 = vsel %vm3307_vm14, %v7152_v17, %v6958_v47 }
 0x625   : > { %v6532_v9 = vor.u32 %v6530_v7, %v6529_v51  ;;  %v6640_v10 = vsel %vm9371_vm15, %v6529_v51, 0  ;;  %v5849_v51 = vpop.f32.mrf.mxu3  ;;  %v6419_v18 = vunpack.c.l.b16 %v6347_v11 }
 0x626   : > { %v6043_v44 = vadd.f32 %v6042_v54, %v5944_v37  ;;  %v6937_v43 = vrot.slane %v6640_v10, 1  ;;  %v6787_v28 = vshll.u32 %v6640_v10, 16  ;;  %v5850_v17 = vadd.f32 %v11973_v12, %v5849_v51 }
 0x627   : > { %v12016_v21 = vsel %vm9371_vm15, 0, %v6532_v9 }
 0x628   : > { %vm6095_vm11 = vcmp.gt.f32.partialorder %v6043_v44, 0.0  ;;  %v6131_v53 = vmul.f32 0.2, %v6043_v44  ;;  %7004 = vrot.lane.b32.xlu1 %v12016_v21, %s8798_s19  ;;  %v6936_v31 = vrot.slane %v12016_v21, 1  ;;  %v6782_v54 = vshll.u32 %v12016_v21, 16 }
 0x629   : > { %v6780_v37 = vshrl.u32 %v12016_v21, 16  ;;  %v6789_v6 = vrot.slane %v6787_v28, 1 }
 0x62a   : > { %v6167_v60 = vsel %vm6095_vm11, %v6043_v44, %v6131_v53  ;;  %v6991_v13 = vpop.permute.xlu1 %6990  ;;  %v12027_v62 = vsel %vm973_vm0, %v6936_v31, %v6937_v43  ;;  %v6784_v9 = vrot.slane %v6782_v54, 1  ;;  %v6047_v31 = vpop.f32.mrf.mxu2  ;;  %vm12979_vm11 = vmmov %vm12973_vm5 }
 0x62b   : > { %v6348_v7 = vpack.c.bf16 %v6167_v60, %v6167_v60  ;;  %6973 = vrot.lane.b32.xlu0 %v12027_v62, %s8799_s29  ;;  %v5946_v8 = vpop.f32.mrf.mxu1  ;;  %v7219_v36 = vsel %vm3348_vm3, %v7184_v40, %v6991_v13 }
 0x62c   : > { %v5947_v10 = vadd.f32 %v5946_v8, %v5848_v56  ;;  %7604 = vmatmul.bf16.gmra.mxu0 %v7219_v36  ;;  %v6785_v15 = vor.u32 %v6784_v9, %v6780_v37 }
 0x62d   : > { %v6420_v5 = vunpack.c.l.b16 %v6348_v7  ;;  %v5852_v13 = vpop.f32.mrf.mxu3  ;;  %v6848_v7 = vpop.permute.xlu2 %6847 }
 0x62e   : > { %v6046_v44 = vadd.f32 %v6045_v25, %v5947_v10  ;;  %v12034_v53 = vsel %vm664_vm1, %v6785_v15, %v6789_v6  ;;  %v6960_v37 = vpop.permute.xlu0 %6959 }
 0x62f   : > { %v6443_v47 = vpack.c.b16 %v6420_v5, %v6419_v18  ;;  %6861 = vrot.lane.b32.xlu2 %v12034_v53, %s8800_s12  ;;  %v7154_v5 = vsel %vm12974_vm13, %v11783_v27, %v6848_v7  ;;  %vm12981_vm13 = vmmov %vm12973_vm5 }
 0x630   : > { %v6132_v40 = vmul.f32 0.2, %v6046_v44  ;;  %vm6096_vm2 = vcmp.gt.f32.partialorder %v6046_v44, 0.0 }
 0x631   : > { %v6534_v43 = vshrl.u32 %v6443_v47, 16  ;;  %v6537_v56 = vshll.u32 %v6443_v47, 16  ;;  %v5853_v47 = vadd.f32 %v11973_v12, %v5852_v13 }
 0x632   : > { %v6168_v8 = vsel %vm6096_vm2, %v6046_v44, %v6132_v40 }
 0x633   : > { %v6536_v54 = vrot.slane %v6534_v43, 7  ;;  %v5948_v11 = vpop.f32.mrf.mxu1  ;;  %v6349_v15 = vpack.c.bf16 %v6168_v8, %v6168_v8 }
 0x634   : > { %v5949_v60 = vadd.f32 %v5948_v11, %v5850_v17 }
 0x635   : > { %v6539_v28 = vor.u32 %v6537_v56, %v6536_v54  ;;  %v6641_v25 = vsel %vm9371_vm15, %v6536_v54, 0  ;;  %v6050_v54 = vpop.f32.mrf.mxu2  ;;  %v6421_v13 = vunpack.c.l.b16 %v6349_v15 }
 0x636   : > { %v6048_v36 = vadd.f32 %v6047_v31, %v5949_v60  ;;  %v6940_v18 = vrot.slane %v6641_v25, 1  ;;  %v6799_v44 = vshll.u32 %v6641_v25, 16  ;;  %v7186_v31 = vsel %vm3307_vm14, %v7154_v5, %v6960_v37 }
 0x637   : > { %v12043_v9 = vsel %vm9371_vm15, 0, %v6539_v28 }
 0x638   : > { %vm6097_vm12 = vcmp.gt.f32.partialorder %v6048_v36, 0.0  ;;  %v6133_v51 = vmul.f32 0.2, %v6048_v36  ;;  %7006 = vrot.lane.b32.xlu1 %v12043_v9, %s8798_s19  ;;  %v6939_v10 = vrot.slane %v12043_v9, 1  ;;  %v6794_v6 = vshll.u32 %v12043_v9, 16 }
 0x639   : > { %v6792_v28 = vshrl.u32 %v12043_v9, 16  ;;  %v6801_v37 = vrot.slane %v6799_v44, 1 }
 0x63a   : > { %v6169_v43 = vsel %vm6097_vm12, %v6048_v36, %v6133_v51  ;;  %v6993_v17 = vpop.permute.xlu1 %6992  ;;  %v12054_v40 = vsel %vm973_vm0, %v6939_v10, %v6940_v18  ;;  %v6796_v25 = vrot.slane %v6794_v6, 1  ;;  %v5854_v10 = vpop.f32.mrf.mxu3 }
 0x63b   : > { %v6350_v56 = vpack.c.bf16 %v6169_v43, %v6169_v43  ;;  %6975 = vrot.lane.b32.xlu0 %v12054_v40, %s8799_s29  ;;  %v5951_v11 = vpop.f32.mrf.mxu1  ;;  %v7222_v60 = vsel %vm3348_vm3, %v7186_v31, %v6993_v17  ;;  %v8704_v43 = vld [vmem:[%s12770_s7 + $0x70] sm:$0xff]  ;;  %v5855_v15 = vadd.f32 %v11973_v12, %v5854_v10 }
 0x63c   : > { %v5952_v7 = vadd.f32 %v5951_v11, %v5853_v47  ;;  %7609 = vmatmul.bf16.gmra.mxu0 %v7222_v60  ;;  %v6797_v36 = vor.u32 %v6796_v25, %v6792_v28  ;;  %v6850_v28 = vpop.permute.xlu2 %6849 }
 0x63d   : > { %v6422_v8 = vunpack.c.l.b16 %v6350_v56  ;;  %7671 = vmatpush.bf16.msra.mxu0 %v8704_v43  ;;  %v6052_v56 = vpop.f32.mrf.mxu2 }
 0x63e   : > { %v6051_v51 = vadd.f32 %v6050_v54, %v5952_v7  ;;  %v12061_v5 = vsel %vm664_vm1, %v6797_v36, %v6801_v37 }
 0x63f   : > { %v6444_v18 = vpack.c.b16 %v6422_v8, %v6421_v13  ;;  %6863 = vrot.lane.b32.xlu2 %v12061_v5, %s8800_s12  ;;  %v6962_v13 = vpop.permute.xlu0 %6961 }
 0x640   : > { %v6134_v47 = vmul.f32 0.2, %v6051_v51  ;;  %vm6098_vm6 = vcmp.gt.f32.partialorder %v6051_v51, 0.0 }
 0x641   : > { %v6541_v6 = vshrl.u32 %v6444_v18, 16  ;;  %v6544_v44 = vshll.u32 %v6444_v18, 16  ;;  %v7156_v18 = vsel %vm12975_vm8, %v11814_v57, %v6850_v28 }
 0x642   : > { %v6170_v25 = vsel %vm6098_vm6, %v6051_v51, %v6134_v47  ;;  %vm12983_vm6 = vmmov %vm12973_vm5 }
 0x643   : > { %v6543_v31 = vrot.slane %v6541_v6, 7  ;;  %v5953_v17 = vpop.f32.mrf.mxu1  ;;  %v6351_v43 = vpack.c.bf16 %v6170_v25, %v6170_v25 }
 0x644   : > { %v5954_v54 = vadd.f32 %v5953_v17, %v5855_v15  ;;  %v7188_v15 = vsel %vm3307_vm14, %v7156_v18, %v6962_v13 }
 0x645   : > { %v6546_v11 = vor.u32 %v6544_v44, %v6543_v31  ;;  %v6642_v60 = vsel %vm9371_vm15, %v6543_v31, 0  ;;  %v6423_v28 = vunpack.c.l.b16 %v6351_v43 }
 0x646   : > { %v6053_v7 = vadd.f32 %v6052_v56, %v5954_v54  ;;  %v6943_v10 = vrot.slane %v6642_v60, 1  ;;  %v6811_v6 = vshll.u32 %v6642_v60, 16 }
 0x647   : > { %v12073_v8 = vsel %vm9371_vm15, 0, %v6546_v11 }
 0x648   : > { %vm6099_vm7 = vcmp.gt.f32.partialorder %v6053_v7, 0.0  ;;  %v6135_v36 = vmul.f32 0.2, %v6053_v7  ;;  %7008 = vrot.lane.b32.xlu1 %v12073_v8, %s8798_s19  ;;  %v6942_v37 = vrot.slane %v12073_v8, 1  ;;  %v6806_v51 = vshll.u32 %v12073_v8, 16 }
 0x649   : > { %v6804_v56 = vshrl.u32 %v12073_v8, 16  ;;  %v6813_v48 = vrot.slane %v6811_v6, 1 }
 0x64a   : > { %v6171_v47 = vsel %vm6099_vm7, %v6053_v7, %v6135_v36  ;;  %v6995_v31 = vpop.permute.xlu1 %6994  ;;  %v12083_v44 = vsel %vm973_vm0, %v6942_v37, %v6943_v10  ;;  %v6808_v11 = vrot.slane %v6806_v51, 1  ;;  %v6852_v51 = vpop.permute.xlu2 %6851 }
 0x64b   : > { %v6352_v17 = vpack.c.bf16 %v6171_v47, %v6171_v47  ;;  %6977 = vrot.lane.b32.xlu0 %v12083_v44, %s8799_s29  ;;  %v7225_v54 = vsel %vm3348_vm3, %v7188_v15, %v6995_v31 }
 0x64c   : > { %7614 = vmatmul.bf16.gmra.mxu0 %v7225_v54  ;;  %v6809_v60 = vor.u32 %v6808_v11, %v6804_v56  ;;  %v7158_v54 = vsel %vm12976_vm9, %v11846_v14, %v6852_v51  ;;  %vm12984_vm9 = vmmov %vm12973_vm5 }
 0x64d   : > { %v6424_v25 = vunpack.c.l.b16 %v6352_v17  ;;  %v6964_v47 = vpop.permute.xlu0 %6963 }
 0x64e   : > { %v12090_v7 = vsel %vm664_vm1, %v6809_v60, %v6813_v48  ;;  %v7190_v56 = vsel %vm3307_vm14, %v7158_v54, %v6964_v47 }
 0x64f   : > { %v6445_v13 = vpack.c.b16 %v6424_v25, %v6423_v28  ;;  %6865 = vrot.lane.b32.xlu2 %v12090_v7, %s8800_s12 }
 0x651   : > { %v6548_v36 = vshrl.u32 %v6445_v13, 16  ;;  %v6551_v10 = vshll.u32 %v6445_v13, 16 }
 0x653   : > { %v6550_v37 = vrot.slane %v6548_v36, 7 }
 0x655   : > { %v6553_v18 = vor.u32 %v6551_v10, %v6550_v37  ;;  %v6643_v15 = vsel %vm9371_vm15, %v6550_v37, 0 }
 0x656   : > { %v6946_v6 = vrot.slane %v6643_v15, 1  ;;  %v6823_v17 = vshll.u32 %v6643_v15, 16 }
 0x657   : > { %v12098_v43 = vsel %vm9371_vm15, 0, %v6553_v18  ;;  %v6854_v18 = vpop.permute.xlu2 %6853 }
 0x658   : > { %7010 = vrot.lane.b32.xlu1 %v12098_v43, %s8798_s19  ;;  %v6945_v48 = vrot.slane %v12098_v43, 1  ;;  %v6818_v31 = vshll.u32 %v12098_v43, 16  ;;  %v6816_v25 = vshrl.u32 %v12098_v43, 16  ;;  %v6825_v37 = vrot.slane %v6823_v17, 1 }
 0x659   : > { %v7160_v51 = vsel %vm12978_vm10, %v11879_v24, %v6854_v18  ;;  %vm12985_vm10 = vmmov %vm12973_vm5 }
 0x65a   : > { %v6997_v11 = vpop.permute.xlu1 %6996  ;;  %v12108_v28 = vsel %vm973_vm0, %v6945_v48, %v6946_v6  ;;  %v6820_v60 = vrot.slane %v6818_v31, 1  ;;  %v8703_v31 = vld [vmem:[%s12770_s7 + $0x68] sm:$0xff] }
 0x65b   : > { %6979 = vrot.lane.b32.xlu0 %v12108_v28, %s8799_s29  ;;  %v7228_v13 = vsel %vm3348_vm3, %v7190_v56, %v6997_v11  ;;  %7672 = vmatpush.bf16.msra.mxu0 %v8703_v31 }
 0x65c   : > { %7619 = vmatmul.bf16.gmra.mxu0 %v7228_v13  ;;  %v6821_v36 = vor.u32 %v6820_v60, %v6816_v25  ;;  %v5857_v60 = vpop.f32.mrf.mxu3 }
 0x65d   : > { %v6966_v15 = vpop.permute.xlu0 %6965 }
 0x65e   : > { %v12115_v10 = vsel %vm664_vm1, %v6821_v36, %v6825_v37  ;;  %v7192_v47 = vsel %vm3307_vm14, %v7160_v51, %v6966_v15  ;;  %v5858_v36 = vadd.f32 %v11973_v12, %v5857_v60 }
 0x65f   : > { %12977 = vst [vmem:[#allocation5_spill] sm:$0xff] %v12115_v10  ;;  %6867 = vrot.lane.b32.xlu2 %v12115_v10, %s8800_s12  ;;  %v6856_v17 = vpop.permute.xlu2 %6855 }
 0x663   : > { %5121 = vrot.lane.b32.xlu0 %v11520_v45, %s8799_s29  ;;  %v6055_v45 = vpop.f32.mrf.mxu2 }
 0x667   : > { %4995 = vrot.lane.b32.xlu2 %v11650_v34, %s8800_s12  ;;  %v7162_v34 = vsel %vm12979_vm11, %v11911_v16, %v6856_v17  ;;  %vm12986_vm11 = vmmov %vm12973_vm5 }
 0x66a   : > { %v6999_v48 = vpop.permute.xlu1 %6998 }
 0x66b   : > { %v7231_v6 = vsel %vm3348_vm3, %v7192_v47, %v6999_v48  ;;  %v6057_v56 = vpop.f32.mrf.mxu2  ;;  %v5859_v47 = vpop.f32.mrf.mxu3 }
 0x66c   : > { %7624 = vmatmul.bf16.gmra.mxu0 %v7231_v6  ;;  %v6858_v48 = vpop.permute.xlu2 %6857  ;;  %v5860_v17 = vadd.f32 %v11973_v12, %v5859_v47 }
 0x66d   : > { %v6968_v54 = vpop.permute.xlu0 %6967 }
 0x66e   : > { %v7194_v11 = vsel %vm3307_vm14, %v7162_v34, %v6968_v54  ;;  %v7164_v34 = vsel %vm12973_vm5, %v11946_v26, %v6858_v48 }
 0x673   : > { %v12135_v18 = vpop.f32.mrf.mxu2 }
 0x679   : > { %v12137_v6 = vpop.f32.mrf.mxu0  ;;  %v6860_v10 = vpop.permute.xlu2 %6859 }
 0x67a   : > { %v7001_v25 = vpop.permute.xlu1 %7000  ;;  %12980 = vst [vmem:[#allocation8_spill] sm:$0xff] %v12137_v6 }
 0x67b   : > { %v7234_v13 = vsel %vm3348_vm3, %v7194_v11, %v7001_v25 }
 0x67c   : > { %7629 = vmatmul.bf16.gmra.mxu0 %v7234_v13 }
 0x67d   : > { %v6970_v31 = vpop.permute.xlu0 %6969 }
 0x67e   : > { %v7196_v25 = vsel %vm3307_vm14, %v7164_v34, %v6970_v31 }
 0x681   : > { %v5956_v37 = vpop.f32.mrf.mxu1  ;;  %v12149_v20 = vpop.f32.mrf.mxu0 }
 0x682   : > { %v5957_v15 = vadd.f32 %v5956_v37, %v5858_v36  ;;  %v12147_v37 = vpop.f32.mrf.mxu2 }
 0x684   : > { %v6056_v51 = vadd.f32 %v6055_v45, %v5957_v15  ;;  %v8702_v45 = vld [vmem:[%s12770_s7 + $0x60] sm:$0xff] }
 0x685   : > { %7673 = vmatpush.bf16.msra.mxu0 %v8702_v45 }
 0x686   : > { %v6136_v54 = vmul.f32 0.2, %v6056_v51  ;;  %vm6100_vm2 = vcmp.gt.f32.partialorder %v6056_v51, 0.0 }
 0x688   : > { %v6172_v15 = vsel %vm6100_vm2, %v6056_v51, %v6136_v54  ;;  %v7166_v54 = vsel %vm12981_vm13, %v11982_v58, %v6860_v10 }
 0x689   : > { %v5958_v11 = vpop.f32.mrf.mxu1  ;;  %v6353_v6 = vpack.c.bf16 %v6172_v15, %v6172_v15  ;;  %v12156_v45 = vpop.f32.mrf.mxu0 }
 0x68a   : > { %v5959_v60 = vadd.f32 %v5958_v11, %v5860_v17  ;;  %v7003_v13 = vpop.permute.xlu1 %7002 }
 0x68b   : > { %v7237_v36 = vsel %vm3348_vm3, %v7196_v25, %v7003_v13  ;;  %v6425_v34 = vunpack.c.l.b16 %v6353_v6  ;;  %v6065_v25 = vpop.f32.mrf.mxu2 }
 0x68c   : > { %v6058_v47 = vadd.f32 %v6057_v56, %v5959_v60  ;;  %7634 = vmatmul.bf16.gmra.mxu0 %v7237_v36 }
 0x68d   : > { %v6972_v56 = vpop.permute.xlu0 %6971 }
 0x68e   : > { %vm6101_vm12 = vcmp.gt.f32.partialorder %v6058_v47, 0.0  ;;  %v6137_v48 = vmul.f32 0.2, %v6058_v47  ;;  %v7198_v6 = vsel %vm3307_vm14, %v7166_v54, %v6972_v56 }
 0x690   : > { %v6173_v31 = vsel %vm6101_vm12, %v6058_v47, %v6137_v48 }
 0x691   : > { %v6354_v17 = vpack.c.bf16 %v6173_v31, %v6173_v31 }
 0x693   : > { %v6426_v11 = vunpack.c.l.b16 %v6354_v17 }
 0x695   : > { %v6446_v13 = vpack.c.b16 %v6426_v11, %v6425_v34  ;;  %v6067_v34 = vpop.f32.mrf.mxu2 }
 0x696   : > { %v12184_v34 = vpop.f32.mrf.mxu0 }
 0x697   : > { %v6555_v51 = vshrl.u32 %v6446_v13, 16  ;;  %v6558_v36 = vshll.u32 %v6446_v13, 16  ;;  %v5862_v47 = vpop.f32.mrf.mxu3  ;;  %12982 = vst [vmem:[#allocation7_spill] sm:$0xff] %v12184_v34 }
 0x699   : > { %v6557_v60 = vrot.slane %v6555_v51, 7  ;;  %v5863_v51 = vadd.f32 %v11973_v12, %v5862_v47 }
 0x69a   : > { %v7005_v15 = vpop.permute.xlu1 %7004 }
 0x69b   : > { %v7240_v48 = vsel %vm3348_vm3, %v7198_v6, %v7005_v15  ;;  %v6560_v31 = vor.u32 %v6558_v36, %v6557_v60  ;;  %v6644_v17 = vsel %vm9371_vm15, %v6557_v60, 0 }
 0x69c   : > { %7639 = vmatmul.bf16.gmra.mxu0 %v7240_v48  ;;  %v6949_v11 = vrot.slane %v6644_v17, 1  ;;  %v6835_v13 = vshll.u32 %v6644_v17, 16 }
 0x69d   : > { %v12164_v19 = vsel %vm9371_vm15, 0, %v6560_v31  ;;  %v8701_v31 = vld [vmem:[%s12770_s7 + $0x58] sm:$0xff] }
 0x69e   : > { %7012 = vrot.lane.b32.xlu1 %v12164_v19, %s8798_s19  ;;  %v6948_v10 = vrot.slane %v12164_v19, 1  ;;  %v6830_v25 = vshll.u32 %v12164_v19, 16  ;;  %v6828_v54 = vshrl.u32 %v12164_v19, 16  ;;  %v6837_v48 = vrot.slane %v6835_v13, 1  ;;  %7674 = vmatpush.bf16.msra.mxu0 %v8701_v31 }
 0x6a0   : > { %v12172_v56 = vsel %vm973_vm0, %v6948_v10, %v6949_v11  ;;  %v6832_v60 = vrot.slane %v6830_v25, 1  ;;  %v5864_v10 = vpop.f32.mrf.mxu3  ;;  %v6862_v11 = vpop.permute.xlu2 %6861 }
 0x6a1   : > { %6981 = vrot.lane.b32.xlu0 %v12172_v56, %s8799_s29  ;;  %v5961_v36 = vpop.f32.mrf.mxu1  ;;  %v6974_v25 = vpop.permute.xlu0 %6973  ;;  %v5865_v13 = vadd.f32 %v11973_v12, %v5864_v10 }
 0x6a2   : > { %v5962_v6 = vadd.f32 %v5961_v36, %v5863_v51  ;;  %v6833_v15 = vor.u32 %v6832_v60, %v6828_v54  ;;  %v12200_v10 = vpop.f32.mrf.mxu0 }
 0x6a4   : > { %v6061_v17 = vadd.f32 %v12135_v18, %v5962_v6  ;;  %v12182_v47 = vsel %vm664_vm1, %v6833_v15, %v6837_v48  ;;  %v7168_v18 = vsel %vm12983_vm6, %v12016_v21, %v6862_v11 }
 0x6a5   : > { %6869 = vrot.lane.b32.xlu2 %v12182_v47, %s8800_s12  ;;  %v7200_v60 = vsel %vm3307_vm14, %v7168_v18, %v6974_v25 }
 0x6a6   : > { %5158 = vrot.lane.b32.xlu1 %v12963_v55, %s8798_s19  ;;  %v6138_v51 = vmul.f32 0.2, %v6061_v17  ;;  %vm6102_vm7 = vcmp.gt.f32.partialorder %v6061_v17, 0.0 }
 0x6a8   : > { %v6174_v48 = vsel %vm6102_vm7, %v6061_v17, %v6138_v51 }
 0x6a9   : > { %7065 = vrot.lane.b32.xlu0 %v11680_v33, %s8799_s29  ;;  %v5963_v54 = vpop.f32.mrf.mxu1  ;;  %v6355_v11 = vpack.c.bf16 %v6174_v48, %v6174_v48 }
 0x6aa   : > { %v5964_v36 = vadd.f32 %v5963_v54, %v5865_v13  ;;  %v7007_v6 = vpop.permute.xlu1 %7006  ;;  %v12208_v54 = vpop.f32.mrf.mxu0 }
 0x6ab   : > { %v7243_v15 = vsel %vm3348_vm3, %v7200_v60, %v7007_v6  ;;  %v6427_v25 = vunpack.c.l.b16 %v6355_v11 }
 0x6ac   : > { %v6063_v31 = vadd.f32 %v12147_v37, %v5964_v36  ;;  %7644 = vmatmul.bf16.gmra.mxu0 %v7243_v15  ;;  %v6864_v37 = vpop.permute.xlu2 %6863 }
 0x6ad   : > { %7032 = vrot.lane.b32.xlu2 %v11634_v46, %s8800_s12  ;;  %v6976_v17 = vpop.permute.xlu0 %6975  ;;  %v7170_v46 = vsel %vm12984_vm9, %v12043_v9, %v6864_v37 }
 0x6ae   : > { %vm6103_vm8 = vcmp.gt.f32.partialorder %v6063_v31, 0.0  ;;  %v6139_v12 = vmul.f32 0.2, %v6063_v31 }
 0x6b0   : > { %v6175_v33 = vsel %vm6103_vm8, %v6063_v31, %v6139_v12 }
 0x6b1   : > { %v6356_v34 = vpack.c.bf16 %v6175_v33, %v6175_v33  ;;  %7067 = vrot.lane.b32.xlu0 %v11731_v4, %s8799_s29 }
 0x6b2   : > { %v12230_v31 = vpop.f32.mrf.mxu0 }
 0x6b3   : > { %v6428_v13 = vunpack.c.l.b16 %v6356_v34  ;;  %v7202_v34 = vsel %vm3307_vm14, %v7170_v46, %v6976_v17 }
 0x6b4   : > { %v6866_v12 = vpop.permute.xlu2 %6865 }
 0x6b5   : > { %v6447_v18 = vpack.c.b16 %v6428_v13, %v6427_v25  ;;  %7034 = vrot.lane.b32.xlu2 %v11696_v2, %s8800_s12  ;;  %v7172_v33 = vsel %vm12985_vm10, %v12073_v8, %v6866_v12 }
 0x6b7   : > { %v6562_v51 = vshrl.u32 %v6447_v18, 16  ;;  %v6565_v4 = vshll.u32 %v6447_v18, 16 }
 0x6b9   : > { %7069 = vrot.lane.b32.xlu0 %v11783_v27, %s8799_s29  ;;  %v12212_v60 = vrot.slane %v6562_v51, 7  ;;  %v8700_v27 = vld [vmem:[%s12770_s7 + $0x50] sm:$0xff] }
 0x6ba   : > { %v7009_v36 = vpop.permute.xlu1 %7008  ;;  %7675 = vmatpush.bf16.msra.mxu0 %v8700_v27  ;;  %v12242_v18 = vpop.f32.mrf.mxu0 }
 0x6bb   : > { %v7246_v6 = vsel %vm3348_vm3, %v7202_v34, %v7009_v36  ;;  %v6567_v15 = vor.u32 %v6565_v4, %v12212_v60 }
 0x6bc   : > { %7649 = vmatmul.bf16.gmra.mxu0 %v7246_v6  ;;  %v6868_v17 = vpop.permute.xlu2 %6867 }
 0x6bd   : > { %7036 = vrot.lane.b32.xlu2 %v11746_v52, %s8800_s12  ;;  %v12221_v48 = vsel %vm9371_vm15, 0, %v6567_v15  ;;  %v6978_v11 = vpop.permute.xlu0 %6977 }
 0x6be   : > { %7014 = vrot.lane.b32.xlu1 %v12221_v48, %s8798_s19  ;;  %v7019_v38 = vshll.u32 %v12221_v48, 16 }
 0x6c1   : > { %7071 = vrot.lane.b32.xlu0 %v11814_v57, %s8799_s29  ;;  %v7204_v57 = vsel %vm3307_vm14, %v7172_v33, %v6978_v11 }
 0x6c4   : > { %v4996_v6 = vpop.permute.xlu2 %4995 }
 0x6c5   : > { %7038 = vrot.lane.b32.xlu2 %v11793_v61, %s8800_s12 }
 0x6c6   : > { %7109 = vrot.lane.b32.xlu1 %v11707_v39, %s8798_s19 }
 0x6c9   : > { %7073 = vrot.lane.b32.xlu0 %v11846_v14, %s8799_s29  ;;  %v12254_v14 = vpop.f32.mrf.mxu0 }
 0x6ca   : > { %v7011_v25 = vpop.permute.xlu1 %7010 }
 0x6cb   : > { %v7249_v13 = vsel %vm3348_vm3, %v7204_v57, %v7011_v25  ;;  %v7029_v57 = vrot.slane %v12221_v48, 1 }
 0x6cc   : > { %7654 = vmatmul.bf16.gmra.mxu0 %v7249_v13 }
 0x6cd   : > { %7040 = vrot.lane.b32.xlu2 %v11822_v42, %s8800_s12  ;;  %v6980_v51 = vpop.permute.xlu0 %6979 }
 0x6ce   : > { %7111 = vrot.lane.b32.xlu1 %v11759_v50, %s8798_s19 }
 0x6d1   : > { %7075 = vrot.lane.b32.xlu0 %v11879_v24, %s8799_s29  ;;  %v12262_v37 = vpop.f32.mrf.mxu0  ;;  %v8699_v24 = vld [vmem:[%s12770_s7 + $0x48] sm:$0xff] }
 0x6d2   : > { %7676 = vmatpush.bf16.msra.mxu0 %v8699_v24  ;;  %v12987_v24 = vld [vmem:[#allocation5_spill] sm:$0xff] }
 0x6d5   : > { %7042 = vrot.lane.b32.xlu2 %v11854_v22, %s8800_s12  ;;  %v5122_v15 = vpop.permute.xlu0 %5121 }
 0x6d6   : > { %7113 = vrot.lane.b32.xlu1 %v11802_v49, %s8798_s19 }
 0x6d9   : > { %7077 = vrot.lane.b32.xlu0 %v11911_v16, %s8799_s29  ;;  %v12275_v16 = vpop.f32.mrf.mxu0 }
 0x6dd   : > { %7044 = vrot.lane.b32.xlu2 %v11889_v32, %s8800_s12 }
 0x6de   : > { %7115 = vrot.lane.b32.xlu1 %v11831_v29, %s8798_s19 }
 0x6e1   : > { %7079 = vrot.lane.b32.xlu0 %v11946_v26, %s8799_s29  ;;  %v12283_v26 = vpop.f32.mrf.mxu0 }
 0x6e5   : > { %7046 = vrot.lane.b32.xlu2 %v11921_v63, %s8800_s12 }
 0x6e6   : > { %7117 = vrot.lane.b32.xlu1 %v11863_v0, %s8798_s19 }
 0x6e9   : > { %7081 = vrot.lane.b32.xlu0 %v11982_v58, %s8799_s29  ;;  %v12295_v58 = vpop.f32.mrf.mxu0 }
 0x6ed   : > { %7048 = vrot.lane.b32.xlu2 %v11957_v59, %s8800_s12 }
 0x6ee   : > { %7119 = vrot.lane.b32.xlu1 %v11896_v30, %s8798_s19 }
 0x6f1   : > { %7083 = vrot.lane.b32.xlu0 %v12016_v21, %s8799_s29  ;;  %v8698_v21 = vld [vmem:[%s12770_s7 + $0x40] sm:$0xff] }
 0x6f2   : > { %7677 = vmatpush.bf16.msra.mxu0 %v8698_v21 }
 0x6f5   : > { %7050 = vrot.lane.b32.xlu2 %v11993_v35, %s8800_s12 }
 0x6f6   : > { %7121 = vrot.lane.b32.xlu1 %v11929_v41, %s8798_s19 }
 0x6f9   : > { %7085 = vrot.lane.b32.xlu0 %v12043_v9, %s8799_s29  ;;  %v12306_v9 = vpop.f32.mrf.mxu0 }
 0x6fd   : > { %7052 = vrot.lane.b32.xlu2 %v12027_v62, %s8800_s12 }
 0x6fe   : > { %7123 = vrot.lane.b32.xlu1 %v11964_v23, %s8798_s19 }
 0x701   : > { %7087 = vrot.lane.b32.xlu0 %v12073_v8, %s8799_s29  ;;  %v7174_v8 = vsel %vm12986_vm11, %v12098_v43, %v6868_v17  ;;  %v12320_v36 = vpop.f32.mrf.mxu0 }
 0x702   : > { %v7206_v46 = vsel %vm3307_vm14, %v7174_v8, %v6980_v51  ;;  %v7021_v51 = vrot.slane %v7019_v38, 1  ;;  %v12989_v8 = vld [vmem:[#allocation4_spill] sm:$0xff] }
 0x705   : > { %7054 = vrot.lane.b32.xlu2 %v12054_v40, %s8800_s12 }
 0x706   : > { %7125 = vrot.lane.b32.xlu1 %v12000_v1, %s8798_s19 }
 0x709   : > { %7089 = vrot.lane.b32.xlu0 %v12098_v43, %s8799_s29  ;;  %v5336_v43 = vsel %vm12973_vm5, %v11504_v3, %v4996_v6  ;;  %v12332_v33 = vpop.f32.mrf.mxu0  ;;  %v6645_v3 = vsel %vm9371_vm15, %v12212_v60, 0  ;;  %vm12988_vm15 = vmmov %vm12973_vm5  ;;  %v6870_v60 = vpop.permute.xlu2 %6869 }
 0x70a   : > { %v5372_v27 = vsel %vm3307_vm14, %v5336_v43, %v5122_v15  ;;  %v7030_v25 = vrot.slane %v6645_v3, 1 }
 0x70c   : > { %v12345_v13 = vsel %vm973_vm0, %v7029_v57, %v7030_v25  ;;  %vm12990_vm0 = vmmov %vm12973_vm5  ;;  %v12992_v57 = vld [vmem:[#allocation3_spill] sm:$0xff]  ;;  %v12993_v25 = vld [vmem:[#allocation6_spill] sm:$0xff] }
 0x70d   : > { %7056 = vrot.lane.b32.xlu2 %v12083_v44, %s8800_s12  ;;  %vm12991_vm2 = vmmov %vm12990_vm0 }
 0x70e   : > { %7127 = vrot.lane.b32.xlu1 %v12034_v53, %s8798_s19  ;;  %vm12994_vm12 = vmmov %vm12990_vm0 }
 0x70f   : > { %vm12996_vm13 = vmmov %vm12990_vm0 }
 0x710   : > { %v7013_v4 = vpop.permute.xlu1 %7012  ;;  %vm12997_vm6 = vmmov %vm12990_vm0 }
 0x711   : > { %7091 = vrot.lane.b32.xlu0 %v12164_v19, %s8799_s29  ;;  %v7252_v34 = vsel %vm3348_vm3, %v7206_v46, %v7013_v4  ;;  %v12351_v21 = vpop.f32.mrf.mxu0  ;;  %v7176_v46 = vsel %vm12990_vm0, %v12164_v19, %v6870_v60  ;;  %v7017_v4 = vshrl.u32 %v12221_v48, 16  ;;  %vm12998_vm7 = vmmov %vm12990_vm0 }
 0x712   : > { %7659 = vmatmul.bf16.gmra.mxu0 %v7252_v34  ;;  %v7024_v34 = vshll.u32 %v6645_v3, 16  ;;  %vm12999_vm8 = vmmov %vm12990_vm0 }
 0x713   : > { %v6982_v17 = vpop.permute.xlu0 %6981  ;;  %v7022_v43 = vor.u32 %v7021_v51, %v7017_v4  ;;  %vm13000_vm9 = vmmov %vm12990_vm0 }
 0x714   : > { %vm13001_vm10 = vmmov %vm12990_vm0 }
 0x715   : > { %7058 = vrot.lane.b32.xlu2 %v12108_v28, %s8800_s12  ;;  %vm13002_vm11 = vmmov %vm12990_vm0 }
 0x716   : > { %7129 = vrot.lane.b32.xlu1 %v12061_v5, %s8798_s19  ;;  %vm13003_vm5 = vmmov %vm12990_vm0 }
 0x718   : > { %v5159_v12 = vpop.permute.xlu1 %5158 }
 0x719   : > { %7093 = vrot.lane.b32.xlu0 %v12221_v48, %s8799_s29  ;;  %v5425_v11 = vsel %vm3348_vm3, %v5372_v27, %v5159_v12  ;;  %v12366_v15 = vpop.f32.mrf.mxu0  ;;  %v7026_v27 = vrot.slane %v7024_v34, 1  ;;  %v7033_v48 = vpop.permute.xlu2 %7032 }
 0x71a   : > { %5866 = vmatmul.bf16.gmra.mxu3 %v5425_v11  ;;  %v7259_v38 = vsel %vm12994_vm12, %v12993_v25, %v7033_v48  ;;  %vm13006_vm12 = vmmov %vm12990_vm0 }
 0x71b   : > { %v12370_v12 = vsel %vm664_vm1, %v7022_v43, %v7026_v27  ;;  %v7066_v11 = vpop.permute.xlu0 %7065  ;;  %vm12995_vm1 = vmmov %vm12990_vm0 }
 0x71c   : > { %v7306_v60 = vsel %vm3307_vm14, %v7259_v38, %v7066_v11 }
 0x71d   : > { %7060 = vrot.lane.b32.xlu2 %v12172_v56, %s8800_s12 }
 0x71e   : > { %7131 = vrot.lane.b32.xlu1 %v12090_v7, %s8798_s19 }
 0x721   : > { %7095 = vrot.lane.b32.xlu0 %v12963_v55, %s8799_s29  ;;  %v12376_v19 = vpop.f32.mrf.mxu0 }
 0x725   : > { %7062 = vrot.lane.b32.xlu2 %v12345_v13, %s8800_s12 }
 0x726   : > { %7133 = vrot.lane.b32.xlu1 %v12987_v24, %s8798_s19 }
 0x729   : > { %5247 = vrot.lane.b32.xlu0 %v12963_v55, %s8799_s29  ;;  %v7208_v55 = vsel %vm3307_vm14, %v7176_v46, %v6982_v17  ;;  %v12384_v51 = vpop.f32.mrf.mxu0  ;;  %v7068_v46 = vpop.permute.xlu0 %7067 }
 0x72a   : > { %8608 = vmatmul.msk.bf16.vlgmr.msra.gmra.mxu3 %vm12988_vm15, %v11696_v2  ;;  %vm13004_vm15 = vmmov %vm12990_vm0 }
 0x72d   : > { %5210 = vrot.lane.b32.xlu2 %v12989_v8, %s8800_s12  ;;  %s8626_s12 = sshll.u32 %s13030_s13, 8 }
 0x72e   : > { %7135 = vrot.lane.b32.xlu1 %v12182_v47, %s8798_s19  ;;  %s12473_s28 = scalar_lea.vmem %s12772_s9, %s8626_s12  ;;  %s12574_s17 = scalar_lea.vmem %s12773_s10, %s8626_s12 }
 0x730   : > { %v7015_v6 = vpop.permute.xlu1 %7014 }
 0x731   : > { %v7255_v2 = vsel %vm3348_vm3, %v7208_v55, %v7015_v6  ;;  %v12392_v55 = vpop.f32.mrf.mxu0 }
 0x732   : > { %7664 = vmatmul.bf16.gmra.mxu0 %v7255_v2 }
 0x736   : > { %7137 = vrot.lane.b32.xlu1 %v12370_v12, %s8798_s19 }
 0x738   : > { %v7110_v3 = vpop.permute.xlu1 %7109 }
 0x739   : > { %v7338_v17 = vsel %vm3348_vm3, %v7306_v60, %v7110_v3  ;;  %v12396_v43 = vpop.f32.mrf.mxu0 }
 0x73a   : > { %8609 = vmatmul.msk.bf16.gmra.mxu3 %vm12991_vm2, %v11746_v52  ;;  %v7035_v52 = vpop.permute.xlu2 %7034  ;;  %vm13005_vm2 = vmmov %vm12990_vm0 }
 0x73b   : > { %v7262_v34 = vsel %vm12996_vm13, %v11707_v39, %v7035_v52  ;;  %vm13008_vm13 = vmmov %vm12990_vm0 }
 0x73c   : > { %v7308_v6 = vsel %vm3307_vm14, %v7262_v34, %v7068_v46 }
 0x73e   : > { %7139 = vrot.lane.b32.xlu1 %v12992_v57, %s8798_s19 }
 0x740   : > { %v7112_v4 = vpop.permute.xlu1 %7111 }
 0x741   : > { %v7341_v2 = vsel %vm3348_vm3, %v7308_v6, %v7112_v4  ;;  %v12404_v25 = vpop.f32.mrf.mxu0 }
 0x742   : > { %7678 = vmatmul.bf16.vlgmr.msra.gmra.mxu0 %v7338_v17  ;;  %v7037_v27 = vpop.permute.xlu2 %7036 }
 0x743   : > { %v7265_v11 = vsel %vm12998_vm7, %v11759_v50, %v7037_v27  ;;  %vm13011_vm7 = vmmov %vm12990_vm0 }
 0x746   : > { %5295 = vrot.lane.b32.xlu1 %v12992_v57, %s8798_s19 }
 0x748   : > { %v7114_v48 = vpop.permute.xlu1 %7113 }
 0x749   : > { %v12408_v60 = vpop.f32.mrf.mxu0 }
 0x74a   : > { %8610 = vmatmul.msk.bf16.gmra.mxu3 %vm12995_vm1, %v11793_v61  ;;  %v7070_v61 = vpop.permute.xlu0 %7069  ;;  %v7039_v38 = vpop.permute.xlu2 %7038  ;;  %vm13007_vm1 = vmmov %vm12990_vm0 }
 0x74b   : > { %v7310_v39 = vsel %vm3307_vm14, %v7265_v11, %v7070_v61  ;;  %v7268_v52 = vsel %vm13000_vm9, %v11802_v49, %v7039_v38  ;;  %vm13014_vm9 = vmmov %vm12990_vm0 }
 0x74c   : > { %v7344_v3 = vsel %vm3348_vm3, %v7310_v39, %v7114_v48 }
 0x750   : > { %v7116_v17 = vpop.permute.xlu1 %7115 }
 0x751   : > { %v12414_v4 = vpop.f32.mrf.mxu0 }
 0x752   : > { %7683 = vmatmul.bf16.gmra.mxu0 %v7341_v2  ;;  %v7041_v34 = vpop.permute.xlu2 %7040 }
 0x753   : > { %v7271_v2 = vsel %vm13002_vm11, %v11831_v29, %v7041_v34  ;;  %vm13016_vm11 = vmmov %vm12990_vm0 }
 0x758   : > { %v7118_v6 = vpop.permute.xlu1 %7117 }
 0x759   : > { %v12421_v61 = vpop.f32.mrf.mxu0 }
 0x75a   : > { %8611 = vmatmul.msk.bf16.gmra.mxu3 %vm12997_vm6, %v11822_v42  ;;  %v7072_v42 = vpop.permute.xlu0 %7071  ;;  %v7043_v11 = vpop.permute.xlu2 %7042  ;;  %vm13010_vm6 = vmmov %vm12990_vm0 }
 0x75b   : > { %v7312_v50 = vsel %vm3307_vm14, %v7268_v52, %v7072_v42 }
 0x75c   : > { %v7347_v46 = vsel %vm3348_vm3, %v7312_v50, %v7116_v17 }
 0x760   : > { %v7120_v39 = vpop.permute.xlu1 %7119 }
 0x761   : > { %v12426_v48 = vpop.f32.mrf.mxu0 }
 0x762   : > { %7688 = vmatmul.bf16.gmra.mxu0 %v7344_v3  ;;  %v7274_v3 = vsel %vm13004_vm15, %v11863_v0, %v7043_v11  ;;  %v7045_v17 = vpop.permute.xlu2 %7044  ;;  %vm13018_vm15 = vmmov %vm12990_vm0 }
 0x763   : > { %v7277_v34 = vsel %vm13005_vm2, %v11896_v30, %v7045_v17  ;;  %vm13019_vm2 = vmmov %vm12990_vm0 }
 0x769   : > { %v12432_v42 = vpop.f32.mrf.mxu0 }
 0x76a   : > { %8612 = vmatmul.msk.bf16.gmra.mxu3 %vm12999_vm8, %v11854_v22  ;;  %v7074_v22 = vpop.permute.xlu0 %7073  ;;  %vm13012_vm8 = vmmov %vm12990_vm0 }
 0x76b   : > { %v7314_v27 = vsel %vm3307_vm14, %v7271_v2, %v7074_v22 }
 0x76c   : > { %v7350_v49 = vsel %vm3348_vm3, %v7314_v27, %v7118_v6 }
 0x772   : > { %7693 = vmatmul.bf16.gmra.mxu0 %v7347_v46  ;;  %v7122_v46 = vpop.permute.xlu1 %7121 }
 0x77a   : > { %8613 = vmatmul.msk.bf16.gmra.mxu3 %vm13001_vm10, %v11889_v32  ;;  %v7076_v32 = vpop.permute.xlu0 %7075  ;;  %v7124_v11 = vpop.permute.xlu1 %7123  ;;  %vm13015_vm10 = vmmov %vm12990_vm0 }
 0x77b   : > { %v7316_v29 = vsel %vm3307_vm14, %v7274_v3, %v7076_v32 }
 0x77c   : > { %v7353_v38 = vsel %vm3348_vm3, %v7316_v29, %v7120_v39 }
 0x782   : > { %7698 = vmatmul.bf16.gmra.mxu0 %v7350_v49 }
 0x78a   : > { %8614 = vmatmul.msk.bf16.gmra.mxu3 %vm13003_vm5, %v11921_v63  ;;  %v7078_v63 = vpop.permute.xlu0 %7077  ;;  %vm13017_vm5 = vmmov %vm12990_vm0 }
 0x78b   : > { %v7318_v0 = vsel %vm3307_vm14, %v7277_v34, %v7078_v63  ;;  %v7126_v34 = vpop.permute.xlu1 %7125 }
 0x78c   : > { %v7356_v22 = vsel %vm3348_vm3, %v7318_v0, %v7122_v46 }
 0x78f   : > { %v12436_v52 = vpop.f32.mrf.mxu0 }
 0x792   : > { %7703 = vmatmul.bf16.gmra.mxu0 %v7353_v38  ;;  %v7080_v27 = vpop.permute.xlu0 %7079 }
 0x797   : > { %v12442_v2 = vpop.f32.mrf.mxu0 }
 0x79a   : > { %8615 = vmatmul.msk.bf16.gmra.mxu3 %vm12990_vm0, %v11957_v59  ;;  %v7047_v59 = vpop.permute.xlu2 %7046  ;;  %v7082_v17 = vpop.permute.xlu0 %7081 }
 0x79b   : > { %v7280_v32 = vsel %vm13007_vm1, %v11929_v41, %v7047_v59  ;;  %vm13021_vm1 = vmmov %vm12990_vm0 }
 0x79c   : > { %v7320_v30 = vsel %vm3307_vm14, %v7280_v32, %v7080_v27 }
 0x79d   : > { %v5867_v50 = vpop.f32.mrf.mxu3  ;;  %v7359_v3 = vsel %vm3348_vm3, %v7320_v30, %v7124_v11 }
 0x79e   : > { %v13009_v50 = vld [vmem:[#allocation8_spill] sm:$0xff] }
 0x7a2   : > { %7708 = vmatmul.bf16.gmra.mxu0 %v7356_v22  ;;  %v7049_v41 = vpop.permute.xlu2 %7048 }
 0x7a3   : > { %v7283_v0 = vsel %vm13010_vm6, %v11964_v23, %v7049_v41  ;;  %vm8040_vm6 = vcmask 7168  }
 0x7a5   : > { %v5869_v6 = vpop.f32.mrf.mxu3 }
 0x7a6   : > { %v7322_v6 = vsel %vm3307_vm14, %v7283_v0, %v7082_v17 }
 0x7a7   : > { %v7362_v27 = vsel %vm3348_vm3, %v7322_v6, %v7126_v34 }
 0x7aa   : > { %8616 = vmatmul.msk.bf16.gmra.mxu3 %vm13006_vm12, %v11993_v35  ;;  %v12457_v35 = vld [vmem:[%s12771_s8] ss:$0 sm:$0xff]  ;;  %v7051_v41 = vpop.permute.xlu2 %7050  ;;  %vm13020_vm12 = vmmov %vm12990_vm0 }
 0x7ab   : > { %v7591_v46 = vadd.f32 %v12457_v35, %v13009_v50  ;;  %v7593_v23 = vadd.f32 %v12457_v35, %v12149_v20  ;;  %v7084_v50 = vpop.permute.xlu0 %7083  ;;  %v7596_v34 = vadd.f32 %v12457_v35, %v12156_v45  ;;  %v7128_v20 = vpop.permute.xlu1 %7127  ;;  %v7286_v0 = vsel %vm13012_vm8, %v12000_v1, %v7051_v41  ;;  %v13013_v45 = vld [vmem:[#allocation7_spill] sm:$0xff]  ;;  %vm13024_vm8 = vmmov %vm12990_vm0 }
 0x7ad   : > { %v7768_v49 = vpop.f32.mrf.mxu3 }
 0x7af   : > { %v12448_v39 = vpop.f32.mrf.mxu0 }
 0x7b2   : > { %7713 = vmatmul.bf16.gmra.mxu0 %v7359_v3 }
 0x7b5   : > { %v7770_v29 = vpop.f32.mrf.mxu3 }
 0x7b7   : > { %v12452_v38 = vpop.f32.mrf.mxu0 }
 0x7ba   : > { %8617 = vmatmul.msk.bf16.gmra.mxu3 %vm13008_vm13, %v12027_v62  ;;  %vm13022_vm13 = vmmov %vm12990_vm0 }
 0x7bd   : > { %v7773_v63 = vpop.f32.mrf.mxu3 }
 0x7bf   : > { %v7679_v22 = vpop.f32.mrf.mxu0 }
 0x7c0   : > { %v7680_v59 = vadd.f32 %v7679_v22, %v7591_v46  ;;  %v7324_v22 = vsel %vm3307_vm14, %v7286_v0, %v7084_v50  ;;  %v7130_v50 = vpop.permute.xlu1 %7129 }
 0x7c1   : > { %v7365_v6 = vsel %vm3348_vm3, %v7324_v22, %v7128_v20 }
 0x7c2   : > { %v7769_v11 = vadd.f32 %v7768_v49, %v7680_v59  ;;  %7718 = vmatmul.bf16.gmra.mxu0 %v7362_v27 }
 0x7c4   : > { %v7848_v62 = vmax.f32 %v7769_v11, 0.0 }
 0x7c5   : > { %v7775_v32 = vpop.f32.mrf.mxu3 }
 0x7c6   : > { %7880 = vst.msk [vmem:[%s12473_s28] sm:$0xff] %vm1394_vm4, %v7848_v62  ;;  %7944 = vrot.lane.b32.xlu2 %v7848_v62, %s8801_s30  ;;  %v7598_v62 = vadd.f32 %v12457_v35, %v13013_v45 }
 0x7c7   : > { %v7681_v49 = vpop.f32.mrf.mxu0 }
 0x7c8   : > { %v7682_v30 = vadd.f32 %v7681_v49, %v7593_v23 }
 0x7ca   : > { %v7771_v3 = vadd.f32 %v7770_v29, %v7682_v30  ;;  %8618 = vmatmul.msk.bf16.gmra.mxu3 %vm13011_vm7, %v12054_v40  ;;  %v7053_v30 = vpop.permute.xlu2 %7052  ;;  %vm13023_vm7 = vmmov %vm12990_vm0 }
 0x7cc   : > { %v7849_v17 = vmax.f32 %v7771_v3, 0.0 }
 0x7cd   : > { %v7778_v46 = vpop.f32.mrf.mxu3 }
 0x7ce   : > { %7881 = vst.msk [vmem:[%s12473_s28 + $0x8] sm:$0xff] %vm1394_vm4, %v7849_v17  ;;  %7946 = vrot.lane.b32.xlu0 %v7849_v17, %s8801_s30  ;;  %v7601_v17 = vadd.f32 %v12457_v35, %v12200_v10  ;;  %v7603_v10 = vadd.f32 %v12457_v35, %v12208_v54 }
 0x7cf   : > { %v7684_v29 = vpop.f32.mrf.mxu0 }
 0x7d0   : > { %v7685_v40 = vadd.f32 %v7684_v29, %v7596_v34  ;;  %v7289_v34 = vsel %vm13015_vm10, %v12034_v53, %v7053_v30 }
 0x7d2   : > { %v7774_v59 = vadd.f32 %v7773_v63, %v7685_v40  ;;  %7723 = vmatmul.bf16.gmra.mxu0 %v7365_v6  ;;  %v7086_v63 = vpop.permute.xlu0 %7085  ;;  %v7055_v6 = vpop.permute.xlu2 %7054 }
 0x7d3   : > { %v7326_v20 = vsel %vm3307_vm14, %v7289_v34, %v7086_v63  ;;  %v7292_v54 = vsel %vm13017_vm5, %v12061_v5, %v7055_v6 }
 0x7d4   : > { %v7850_v27 = vmax.f32 %v7774_v59, 0.0  ;;  %v7368_v0 = vsel %vm3348_vm3, %v7326_v20, %v7130_v50  ;;  %v7608_v50 = vadd.f32 %v12457_v35, %v12242_v18 }
 0x7d5   : > { %v7780_v11 = vpop.f32.mrf.mxu3 }
 0x7d6   : > { %7882 = vst.msk [vmem:[%s12473_s28 + $0x10] sm:$0xff] %vm1394_vm4, %v7850_v27  ;;  %7948 = vrot.lane.b32.xlu1 %v7850_v27, %s8801_s30 }
 0x7d7   : > { %v7686_v23 = vpop.f32.mrf.mxu0 }
 0x7d8   : > { %v7687_v1 = vadd.f32 %v7686_v23, %v7598_v62  ;;  %v7606_v23 = vadd.f32 %v12457_v35, %v12230_v31 }
 0x7da   : > { %v7776_v49 = vadd.f32 %v7775_v32, %v7687_v1  ;;  %8619 = vmatmul.msk.bf16.gmra.mxu3 %vm13014_vm9, %v12083_v44  ;;  %v7132_v1 = vpop.permute.xlu1 %7131 }
 0x7dc   : > { %v7851_v3 = vmax.f32 %v7776_v49, 0.0 }
 0x7dd   : > { %v7783_v41 = vpop.f32.mrf.mxu3 }
 0x7de   : > { %7883 = vst.msk [vmem:[%s12473_s28 + $0x18] sm:$0xff] %vm1394_vm4, %v7851_v3  ;;  %7950 = vrot.lane.b32.xlu2 %v7851_v3, %s8801_s30 }
 0x7df   : > { %v7689_v32 = vpop.f32.mrf.mxu0 }
 0x7e0   : > { %v7690_v44 = vadd.f32 %v7689_v32, %v7601_v17 }
 0x7e2   : > { %v7779_v29 = vadd.f32 %v7778_v46, %v7690_v44  ;;  %7728 = vmatmul.bf16.gmra.mxu0 %v7368_v0  ;;  %v7088_v46 = vpop.permute.xlu0 %7087 }
 0x7e3   : > { %v7328_v30 = vsel %vm3307_vm14, %v7292_v54, %v7088_v46  ;;  %v7613_v46 = vadd.f32 %v12457_v35, %v12262_v37 }
 0x7e4   : > { %v7852_v22 = vmax.f32 %v7779_v29, 0.0  ;;  %v7371_v3 = vsel %vm3348_vm3, %v7328_v30, %v7132_v1  ;;  %v7611_v29 = vadd.f32 %v12457_v35, %v12254_v14 }
 0x7e5   : > { %v7785_v40 = vpop.f32.mrf.mxu3 }
 0x7e6   : > { %7884 = vst.msk [vmem:[%s12473_s28 + $0x20] sm:$0xff] %vm1394_vm4, %v7852_v22  ;;  %7952 = vrot.lane.b32.xlu0 %v7852_v22, %s8801_s30  ;;  %v7134_v22 = vpop.permute.xlu1 %7133 }
 0x7e7   : > { %v7691_v53 = vpop.f32.mrf.mxu0 }
 0x7e8   : > { %v7692_v59 = vadd.f32 %v7691_v53, %v7603_v10 }
 0x7ea   : > { %v7781_v27 = vadd.f32 %v7780_v11, %v7692_v59  ;;  %8620 = vmatmul.msk.bf16.gmra.mxu3 %vm13016_vm11, %v12108_v28  ;;  %v7057_v11 = vpop.permute.xlu2 %7056  ;;  %v7090_v34 = vpop.permute.xlu0 %7089 }
 0x7eb   : > { %v7295_v18 = vsel %vm12990_vm0, %v12090_v7, %v7057_v11  ;;  %v7616_v11 = vadd.f32 %v12457_v35, %v12275_v16 }
 0x7ec   : > { %v7853_v45 = vmax.f32 %v7781_v27, 0.0 }
 0x7ed   : > { %v7788_v62 = vpop.f32.mrf.mxu3 }
 0x7ee   : > { %7885 = vst.msk [vmem:[%s12473_s28 + $0x28] sm:$0xff] %vm1394_vm4, %v7853_v45  ;;  %7954 = vrot.lane.b32.xlu1 %v7853_v45, %s8801_s30 }
 0x7ef   : > { %v7694_v49 = vpop.f32.mrf.mxu0 }
 0x7f0   : > { %v7695_v28 = vadd.f32 %v7694_v49, %v7606_v23 }
 0x7f2   : > { %v7784_v63 = vadd.f32 %v7783_v41, %v7695_v28  ;;  %7733 = vmatmul.bf16.gmra.mxu0 %v7371_v3  ;;  %v7059_v20 = vpop.permute.xlu2 %7058  ;;  %v7092_v53 = vpop.permute.xlu0 %7091 }
 0x7f3   : > { %v7136_v28 = vpop.permute.xlu1 %7135  ;;  %v7298_v37 = vsel %vm13020_vm12, %v12987_v24, %v7059_v20 }
 0x7f4   : > { %v7854_v17 = vmax.f32 %v7784_v63, 0.0  ;;  %v7332_v63 = vsel %vm3307_vm14, %v7298_v37, %v7092_v53 }
 0x7f5   : > { %v7790_v31 = vpop.f32.mrf.mxu3 }
 0x7f6   : > { %7886 = vst.msk [vmem:[%s12473_s28 + $0x30] sm:$0xff] %vm1394_vm4, %v7854_v17  ;;  %7956 = vrot.lane.b32.xlu2 %v7854_v17, %s8801_s30  ;;  %v7377_v17 = vsel %vm3348_vm3, %v7332_v63, %v7136_v28  ;;  %v7628_v63 = vadd.f32 %v12457_v35, %v12332_v33 }
 0x7f7   : > { %v7696_v5 = vpop.f32.mrf.mxu0 }
 0x7f8   : > { %v7697_v32 = vadd.f32 %v7696_v5, %v7608_v50  ;;  %v7618_v5 = vadd.f32 %v12457_v35, %v12283_v26  ;;  %v7621_v26 = vadd.f32 %v12457_v35, %v12295_v58 }
 0x7fa   : > { %v7786_v44 = vadd.f32 %v7785_v40, %v7697_v32  ;;  %8621 = vmatmul.msk.bf16.gmra.mxu3 %vm13018_vm15, %v12172_v56  ;;  %v7330_v40 = vsel %vm3307_vm14, %v7295_v18, %v7090_v34  ;;  %v7061_v27 = vpop.permute.xlu2 %7060  ;;  %v7094_v54 = vpop.permute.xlu0 %7093 }
 0x7fb   : > { %v7374_v56 = vsel %vm3348_vm3, %v7330_v40, %v7134_v22  ;;  %v7138_v22 = vpop.permute.xlu1 %7137 }
 0x7fc   : > { %v7855_v41 = vmax.f32 %v7786_v44, 0.0 }
 0x7fd   : > { %v7793_v0 = vpop.f32.mrf.mxu3 }
 0x7fe   : > { %7887 = vst.msk [vmem:[%s12473_s28 + $0x38] sm:$0xff] %vm1394_vm4, %v7855_v41  ;;  %7958 = vrot.lane.b32.xlu0 %v7855_v41, %s8801_s30 }
 0x7ff   : > { %v7699_v10 = vpop.f32.mrf.mxu0 }
 0x800   : > { %v7700_v6 = vadd.f32 %v7699_v10, %v7611_v29 }
 0x802   : > { %v7789_v59 = vadd.f32 %v7788_v62, %v7700_v6  ;;  %7738 = vmatmul.bf16.gmra.mxu0 %v7374_v56  ;;  %v7063_v30 = vpop.permute.xlu2 %7062  ;;  %v7096_v34 = vpop.permute.xlu0 %7095 }
 0x804   : > { %v7856_v14 = vmax.f32 %v7789_v59, 0.0 }
 0x805   : > { %v7795_v45 = vpop.f32.mrf.mxu3 }
 0x806   : > { %7888 = vst.msk [vmem:[%s12473_s28 + $0x40] sm:$0xff] %vm1394_vm4, %v7856_v14  ;;  %7960 = vrot.lane.b32.xlu1 %v7856_v14, %s8801_s30 }
 0x807   : > { %v7701_v7 = vpop.f32.mrf.mxu0 }
 0x808   : > { %v7702_v23 = vadd.f32 %v7701_v7, %v7613_v46 }
 0x80a   : > { %v7791_v1 = vadd.f32 %v7790_v31, %v7702_v23  ;;  %8622 = vmatmul.msk.bf16.gmra.mxu3 %vm13019_vm2, %v12345_v13  ;;  %v5211_v24 = vpop.permute.xlu2 %5210 }
 0x80c   : > { %v7857_v62 = vmax.f32 %v7791_v1, 0.0  ;;  %v7626_v1 = vadd.f32 %v12457_v35, %v12320_v36 }
 0x80d   : > { %v7798_v49 = vpop.f32.mrf.mxu3 }
 0x80e   : > { %7889 = vst.msk [vmem:[%s12473_s28 + $0x48] sm:$0xff] %vm1394_vm4, %v7857_v62  ;;  %7962 = vrot.lane.b32.xlu2 %v7857_v62, %s8801_s30 }
 0x80f   : > { %v7704_v3 = vpop.f32.mrf.mxu0 }
 0x810   : > { %v7705_v13 = vadd.f32 %v7704_v3, %v7616_v11 }
 0x812   : > { %v7794_v31 = vadd.f32 %v7793_v0, %v7705_v13  ;;  %7743 = vmatmul.bf16.gmra.mxu0 %v7377_v17  ;;  %v5480_v0 = vsel %vm13022_vm13, %v12992_v57, %v5211_v24  ;;  %v7301_v57 = vsel %vm13023_vm7, %v12182_v47, %v7061_v27  ;;  %v7623_v47 = vadd.f32 %v12457_v35, %v12306_v9 }
 0x813   : > { %v7334_v10 = vsel %vm3307_vm14, %v7301_v57, %v7094_v54  ;;  %v7140_v54 = vpop.permute.xlu1 %7139  ;;  %v7304_v9 = vsel %vm13024_vm8, %v12370_v12, %v7063_v30  ;;  %v7636_v57 = vadd.f32 %v12457_v35, %v12376_v19 }
 0x814   : > { %v7858_v50 = vmax.f32 %v7794_v31, 0.0  ;;  %v7380_v56 = vsel %vm3348_vm3, %v7334_v10, %v7138_v22 }
 0x815   : > { %v7800_v16 = vpop.f32.mrf.mxu3 }
 0x816   : > { %7890 = vst.msk [vmem:[%s12473_s28 + $0x50] sm:$0xff] %vm1394_vm4, %v7858_v50  ;;  %7964 = vrot.lane.b32.xlu0 %v7858_v50, %s8801_s30 }
 0x817   : > { %v7706_v32 = vpop.f32.mrf.mxu0 }
 0x818   : > { %v7707_v20 = vadd.f32 %v7706_v32, %v7618_v5 }
 0x81a   : > { %v7796_v44 = vadd.f32 %v7795_v45, %v7707_v20  ;;  %8623 = vmatmul.msk.bf16.gmra.mxu3 %vm13021_vm1, %v12989_v8  ;;  %v5248_v8 = vpop.permute.xlu0 %5247 }
 0x81b   : > { %v12579_v58 = vsel %vm3307_vm14, %v5480_v0, %v5248_v8  ;;  %v12611_v33 = vpop.permute.xlu1 %5295 }
 0x81c   : > { %v7859_v41 = vmax.f32 %v7796_v44, 0.0 }
 0x81d   : > { %v7803_v29 = vpop.f32.mrf.mxu3 }
 0x81e   : > { %7891 = vst.msk [vmem:[%s12473_s28 + $0x58] sm:$0xff] %vm1394_vm4, %v7859_v41  ;;  %7966 = vrot.lane.b32.xlu1 %v7859_v41, %s8801_s30  ;;  %v7633_v41 = vadd.f32 %v12457_v35, %v12366_v15 }
 0x81f   : > { %v7709_v18 = vpop.f32.mrf.mxu0 }
 0x820   : > { %v7710_v40 = vadd.f32 %v7709_v18, %v7621_v26  ;;  %v7945_v6 = vpop.permute.xlu2 %7944 }
 0x821   : > { %8041 = vst.msk [vmem:[%s12574_s17] sm:$0xff] %vm8040_vm6, %v7945_v6 }
 0x822   : > { %v7799_v53 = vadd.f32 %v7798_v49, %v7710_v40  ;;  %7748 = vmatmul.bf16.gmra.mxu0 %v7380_v56  ;;  %v7336_v49 = vsel %vm3307_vm14, %v7304_v9, %v7096_v34  ;;  %v7638_v56 = vadd.f32 %v12457_v35, %v12384_v51  ;;  %v7643_v9 = vadd.f32 %v12457_v35, %v12396_v43 }
 0x823   : > { %v7383_v28 = vsel %vm3348_vm3, %v7336_v49, %v7140_v54 }
 0x824   : > { %v7860_v59 = vmax.f32 %v7799_v53, 0.0 }
 0x825   : > { %v7805_v14 = vpop.f32.mrf.mxu3 }
 0x826   : > { %7892 = vst.msk [vmem:[%s12473_s28 + $0x60] sm:$0xff] %vm1394_vm4, %v7860_v59  ;;  %7968 = vrot.lane.b32.xlu2 %v7860_v59, %s8801_s30 }
 0x827   : > { %v7711_v27 = vpop.f32.mrf.mxu0 }
 0x828   : > { %v7712_v45 = vadd.f32 %v7711_v27, %v7623_v47 }
 0x82a   : > { %v7801_v46 = vadd.f32 %v7800_v16, %v7712_v45  ;;  %v7631_v16 = vadd.f32 %v12457_v35, %v12351_v21  ;;  %v7641_v45 = vadd.f32 %v12457_v35, %v12392_v55 }
 0x82c   : > { %v7861_v7 = vmax.f32 %v7801_v46, 0.0 }
 0x82d   : > { %v7808_v23 = vpop.f32.mrf.mxu3 }
 0x82e   : > { %7893 = vst.msk [vmem:[%s12473_s28 + $0x68] sm:$0xff] %vm1394_vm4, %v7861_v7  ;;  %7970 = vrot.lane.b32.xlu0 %v7861_v7, %s8801_s30 }
 0x82f   : > { %v7714_v62 = vpop.f32.mrf.mxu0 }
 0x830   : > { %v7715_v11 = vadd.f32 %v7714_v62, %v7626_v1 }
 0x832   : > { %v7804_v37 = vadd.f32 %v7803_v29, %v7715_v11  ;;  %7753 = vmatmul.bf16.gmra.mxu0 %v7383_v28 }
 0x834   : > { %v7862_v3 = vmax.f32 %v7804_v37, 0.0 }
 0x835   : > { %v7810_v36 = vpop.f32.mrf.mxu3 }
 0x836   : > { %7894 = vst.msk [vmem:[%s12473_s28 + $0x70] sm:$0xff] %vm1394_vm4, %v7862_v3  ;;  %7972 = vrot.lane.b32.xlu1 %v7862_v3, %s8801_s30  ;;  %v7646_v3 = vadd.f32 %v12457_v35, %v12404_v25 }
 0x837   : > { %v7716_v12 = vpop.f32.mrf.mxu0 }
 0x838   : > { %v7717_v30 = vadd.f32 %v7716_v12, %v7628_v63  ;;  %v7951_v13 = vpop.permute.xlu2 %7950 }
 0x839   : > { %8044 = vst.msk [vmem:[%s12574_s17 + $0x18] sm:$0xff] %vm8040_vm6, %v7951_v13 }
 0x83a   : > { %v7806_v17 = vadd.f32 %v7805_v14, %v7717_v30 }
 0x83c   : > { %v7863_v31 = vmax.f32 %v7806_v17, 0.0  ;;  %v7648_v17 = vadd.f32 %v12457_v35, %v12408_v60 }
 0x83d   : > { %v7813_v50 = vpop.f32.mrf.mxu3 }
 0x83e   : > { %7895 = vst.msk [vmem:[%s12473_s28 + $0x78] sm:$0xff] %vm1394_vm4, %v7863_v31  ;;  %7974 = vrot.lane.b32.xlu2 %v7863_v31, %s8801_s30 }
 0x83f   : > { %v7719_v5 = vpop.f32.mrf.mxu0 }
 0x840   : > { %v7720_v34 = vadd.f32 %v7719_v5, %v7631_v16  ;;  %v7947_v24 = vpop.permute.xlu0 %7946 }
 0x841   : > { %8042 = vst.msk [vmem:[%s12574_s17 + $0x8] sm:$0xff] %vm8040_vm6, %v7947_v24 }
 0x842   : > { %v7809_v32 = vadd.f32 %v7808_v23, %v7720_v34  ;;  %v7651_v34 = vadd.f32 %v12457_v35, %v12414_v4  ;;  %v5569_v4 = vsel %vm3348_vm3, %v12579_v58, %v12611_v33 }
 0x843   : > { %5965 = vmatmul.bf16.gmra.mxu1 %v5569_v4 }
 0x844   : > { %v7864_v20 = vmax.f32 %v7809_v32, 0.0 }
 0x845   : > { %v7815_v44 = vpop.f32.mrf.mxu3 }
 0x846   : > { %7896 = vst.msk [vmem:[%s12473_s28 + $0x80] sm:$0xff] %vm1394_vm4, %v7864_v20  ;;  %7976 = vrot.lane.b32.xlu0 %v7864_v20, %s8801_s30 }
 0x847   : > { %v7721_v21 = vpop.f32.mrf.mxu0 }
 0x848   : > { %v7722_v0 = vadd.f32 %v7721_v21, %v7633_v41  ;;  %v7949_v29 = vpop.permute.xlu1 %7948  ;;  %v7653_v21 = vadd.f32 %v12457_v35, %v12421_v61  ;;  %v7656_v61 = vadd.f32 %v12457_v35, %v12426_v48 }
 0x849   : > { %8043 = vst.msk [vmem:[%s12574_s17 + $0x10] sm:$0xff] %vm8040_vm6, %v7949_v29 }
 0x84a   : > { %v7811_v26 = vadd.f32 %v7810_v36, %v7722_v0 }
 0x84c   : > { %v7865_v22 = vmax.f32 %v7811_v26, 0.0 }
 0x84d   : > { %v7818_v8 = vpop.f32.mrf.mxu3 }
 0x84e   : > { %7897 = vst.msk [vmem:[%s12473_s28 + $0x88] sm:$0xff] %vm1394_vm4, %v7865_v22  ;;  %7978 = vrot.lane.b32.xlu1 %v7865_v22, %s8801_s30 }
 0x84f   : > { %v7724_v15 = vpop.f32.mrf.mxu0 }
 0x850   : > { %v7725_v18 = vadd.f32 %v7724_v15, %v7636_v57  ;;  %v7957_v10 = vpop.permute.xlu2 %7956 }
 0x851   : > { %8047 = vst.msk [vmem:[%s12574_s17 + $0x30] sm:$0xff] %vm8040_vm6, %v7957_v10 }
 0x852   : > { %v7814_v40 = vadd.f32 %v7813_v50, %v7725_v18 }
 0x854   : > { %v7866_v6 = vmax.f32 %v7814_v40, 0.0 }
 0x855   : > { %v7820_v19 = vpop.f32.mrf.mxu3 }
 0x856   : > { %7898 = vst.msk [vmem:[%s12473_s28 + $0x90] sm:$0xff] %vm1394_vm4, %v7866_v6  ;;  %7980 = vrot.lane.b32.xlu2 %v7866_v6, %s8801_s30  ;;  %v7658_v6 = vadd.f32 %v12457_v35, %v12432_v42 }
 0x857   : > { %v7726_v53 = vpop.f32.mrf.mxu0 }
 0x858   : > { %v7727_v59 = vadd.f32 %v7726_v53, %v7638_v56  ;;  %v7953_v14 = vpop.permute.xlu0 %7952 }
 0x859   : > { %8045 = vst.msk [vmem:[%s12574_s17 + $0x20] sm:$0xff] %vm8040_vm6, %v7953_v14 }
 0x85a   : > { %v7816_v47 = vadd.f32 %v7815_v44, %v7727_v59 }
 0x85c   : > { %v7867_v27 = vmax.f32 %v7816_v47, 0.0  ;;  %v7661_v47 = vadd.f32 %v12457_v35, %v12436_v52 }
 0x85d   : > { %v7823_v23 = vpop.f32.mrf.mxu3 }
 0x85e   : > { %7899 = vst.msk [vmem:[%s12473_s28 + $0x98] sm:$0xff] %vm1394_vm4, %v7867_v27  ;;  %7982 = vrot.lane.b32.xlu0 %v7867_v27, %s8801_s30 }
 0x85f   : > { %v7729_v51 = vpop.f32.mrf.mxu0 }
 0x860   : > { %v7730_v46 = vadd.f32 %v7729_v51, %v7641_v45  ;;  %v7955_v7 = vpop.permute.xlu1 %7954 }
 0x861   : > { %8046 = vst.msk [vmem:[%s12574_s17 + $0x28] sm:$0xff] %vm8040_vm6, %v7955_v7  ;;  %v7663_v7 = vadd.f32 %v12457_v35, %v12442_v2 }
 0x862   : > { %v7819_v1 = vadd.f32 %v7818_v8, %v7730_v46 }
 0x864   : > { %v7868_v54 = vmax.f32 %v7819_v1, 0.0 }
 0x865   : > { %v7825_v28 = vpop.f32.mrf.mxu3 }
 0x866   : > { %7900 = vst.msk [vmem:[%s12473_s28 + $0xa0] sm:$0xff] %vm1394_vm4, %v7868_v54  ;;  %7984 = vrot.lane.b32.xlu1 %v7868_v54, %s8801_s30 }
 0x867   : > { %v7731_v55 = vpop.f32.mrf.mxu0 }
 0x868   : > { %v7732_v62 = vadd.f32 %v7731_v55, %v7643_v9  ;;  %v7963_v49 = vpop.permute.xlu2 %7962 }
 0x869   : > { %8050 = vst.msk [vmem:[%s12574_s17 + $0x48] sm:$0xff] %vm8040_vm6, %v7963_v49 }
 0x86a   : > { %v7821_v11 = vadd.f32 %v7820_v19, %v7732_v62  ;;  %v7666_v62 = vadd.f32 %v12457_v35, %v12448_v39 }
 0x86c   : > { %v7869_v37 = vmax.f32 %v7821_v11, 0.0 }
 0x86d   : > { %v7828_v13 = vpop.f32.mrf.mxu3 }
 0x86e   : > { %7901 = vst.msk [vmem:[%s12473_s28 + $0xa8] sm:$0xff] %vm1394_vm4, %v7869_v37  ;;  %7986 = vrot.lane.b32.xlu2 %v7869_v37, %s8801_s30 }
 0x86f   : > { %v7734_v43 = vpop.f32.mrf.mxu0 }
 0x870   : > { %v7735_v36 = vadd.f32 %v7734_v43, %v7646_v3  ;;  %v7959_v63 = vpop.permute.xlu0 %7958  ;;  %v7668_v43 = vadd.f32 %v12457_v35, %v12452_v38 }
 0x871   : > { %8048 = vst.msk [vmem:[%s12574_s17 + $0x38] sm:$0xff] %vm8040_vm6, %v7959_v63 }
 0x872   : > { %v7824_v12 = vadd.f32 %v7823_v23, %v7735_v36 }
 0x874   : > { %v7870_v30 = vmax.f32 %v7824_v12, 0.0 }
 0x875   : > { %v7830_v60 = vpop.f32.mrf.mxu3 }
 0x876   : > { %7902 = vst.msk [vmem:[%s12473_s28 + $0xb0] sm:$0xff] %vm1394_vm4, %v7870_v30  ;;  %7988 = vrot.lane.b32.xlu0 %v7870_v30, %s8801_s30 }
 0x877   : > { %v7736_v25 = vpop.f32.mrf.mxu0 }
 0x878   : > { %v7737_v31 = vadd.f32 %v7736_v25, %v7648_v17  ;;  %v7961_v50 = vpop.permute.xlu1 %7960 }
 0x879   : > { %8049 = vst.msk [vmem:[%s12574_s17 + $0x40] sm:$0xff] %vm8040_vm6, %v7961_v50 }
 0x87a   : > { %v7826_v16 = vadd.f32 %v7825_v28, %v7737_v31 }
 0x87c   : > { %v7871_v5 = vmax.f32 %v7826_v16, 0.0 }
 0x87d   : > { %v7833_v22 = vpop.f32.mrf.mxu3 }
 0x87e   : > { %7903 = vst.msk [vmem:[%s12473_s28 + $0xb8] sm:$0xff] %vm1394_vm4, %v7871_v5  ;;  %7990 = vrot.lane.b32.xlu1 %v7871_v5, %s8801_s30 }
 0x87f   : > { %v7739_v24 = vpop.f32.mrf.mxu0 }
 0x880   : > { %v7740_v32 = vadd.f32 %v7739_v24, %v7651_v34  ;;  %v7969_v20 = vpop.permute.xlu2 %7968 }
 0x881   : > { %8053 = vst.msk [vmem:[%s12574_s17 + $0x60] sm:$0xff] %vm8040_vm6, %v7969_v20 }
 0x882   : > { %v7829_v44 = vadd.f32 %v7828_v13, %v7740_v32 }
 0x884   : > { %v7872_v41 = vmax.f32 %v7829_v44, 0.0 }
 0x885   : > { %v7835_v10 = vpop.f32.mrf.mxu3 }
 0x886   : > { %7904 = vst.msk [vmem:[%s12473_s28 + $0xc0] sm:$0xff] %vm1394_vm4, %v7872_v41  ;;  %7992 = vrot.lane.b32.xlu2 %v7872_v41, %s8801_s30 }
 0x887   : > { %v7741_v0 = vpop.f32.mrf.mxu0 }
 0x888   : > { %v7742_v29 = vadd.f32 %v7741_v0, %v7653_v21  ;;  %v7965_v26 = vpop.permute.xlu0 %7964 }
 0x889   : > { %8051 = vst.msk [vmem:[%s12574_s17 + $0x50] sm:$0xff] %vm8040_vm6, %v7965_v26 }
 0x88a   : > { %v7831_v8 = vadd.f32 %v7830_v60, %v7742_v29 }
 0x88c   : > { %v7873_v57 = vmax.f32 %v7831_v8, 0.0 }
 0x88d   : > { %v7838_v14 = vpop.f32.mrf.mxu3 }
 0x88e   : > { %7905 = vst.msk [vmem:[%s12473_s28 + $0xc8] sm:$0xff] %vm1394_vm4, %v7873_v57  ;;  %7994 = vrot.lane.b32.xlu0 %v7873_v57, %s8801_s30 }
 0x88f   : > { %v7744_v15 = vpop.f32.mrf.mxu0 }
 0x890   : > { %v7745_v58 = vadd.f32 %v7744_v15, %v7656_v61  ;;  %v7967_v33 = vpop.permute.xlu1 %7966 }
 0x891   : > { %8052 = vst.msk [vmem:[%s12574_s17 + $0x58] sm:$0xff] %vm8040_vm6, %v7967_v33 }
 0x892   : > { %v7834_v18 = vadd.f32 %v7833_v22, %v7745_v58 }
 0x894   : > { %v7874_v40 = vmax.f32 %v7834_v18, 0.0 }
 0x895   : > { %v7840_v52 = vpop.f32.mrf.mxu3 }
 0x896   : > { %7906 = vst.msk [vmem:[%s12473_s28 + $0xd0] sm:$0xff] %vm1394_vm4, %v7874_v40  ;;  %7996 = vrot.lane.b32.xlu1 %v7874_v40, %s8801_s30 }
 0x897   : > { %v7746_v48 = vpop.f32.mrf.mxu0 }
 0x898   : > { %v7747_v56 = vadd.f32 %v7746_v48, %v7658_v6  ;;  %v7975_v19 = vpop.permute.xlu2 %7974 }
 0x899   : > { %8056 = vst.msk [vmem:[%s12574_s17 + $0x78] sm:$0xff] %vm8040_vm6, %v7975_v19 }
 0x89a   : > { %v7836_v53 = vadd.f32 %v7835_v10, %v7747_v56 }
 0x89c   : > { %v7875_v59 = vmax.f32 %v7836_v53, 0.0 }
 0x89d   : > { %v7843_v2 = vpop.f32.mrf.mxu3 }
 0x89e   : > { %7907 = vst.msk [vmem:[%s12473_s28 + $0xd8] sm:$0xff] %vm1394_vm4, %v7875_v59  ;;  %7998 = vrot.lane.b32.xlu2 %v7875_v59, %s8801_s30 }
 0x89f   : > { %v7749_v42 = vpop.f32.mrf.mxu0 }
 0x8a0   : > { %v7750_v27 = vadd.f32 %v7749_v42, %v7661_v47  ;;  %v7971_v45 = vpop.permute.xlu0 %7970 }
 0x8a1   : > { %8054 = vst.msk [vmem:[%s12574_s17 + $0x68] sm:$0xff] %vm8040_vm6, %v7971_v45 }
 0x8a2   : > { %v7839_v51 = vadd.f32 %v7838_v14, %v7750_v27 }
 0x8a4   : > { %v7876_v46 = vmax.f32 %v7839_v51, 0.0 }
 0x8a5   : > { %v7845_v12 = vpop.f32.mrf.mxu3 }
 0x8a6   : > { %7908 = vst.msk [vmem:[%s12473_s28 + $0xe0] sm:$0xff] %vm1394_vm4, %v7876_v46  ;;  %8000 = vrot.lane.b32.xlu0 %v7876_v46, %s8801_s30 }
 0x8a7   : > { %v7751_v23 = vpop.f32.mrf.mxu0 }
 0x8a8   : > { %v7752_v1 = vadd.f32 %v7751_v23, %v7663_v7  ;;  %v7973_v54 = vpop.permute.xlu1 %7972 }
 0x8a9   : > { %8055 = vst.msk [vmem:[%s12574_s17 + $0x70] sm:$0xff] %vm8040_vm6, %v7973_v54 }
 0x8aa   : > { %v7841_v9 = vadd.f32 %v7840_v52, %v7752_v1 }
 0x8ac   : > { %v7877_v55 = vmax.f32 %v7841_v9, 0.0 }
 0x8ae   : > { %7909 = vst.msk [vmem:[%s12473_s28 + $0xe8] sm:$0xff] %vm1394_vm4, %v7877_v55  ;;  %8002 = vrot.lane.b32.xlu1 %v7877_v55, %s8801_s30 }
 0x8af   : > { %v7754_v49 = vpop.f32.mrf.mxu0 }
 0x8b0   : > { %v7755_v11 = vadd.f32 %v7754_v49, %v7666_v62  ;;  %v7981_v28 = vpop.permute.xlu2 %7980 }
 0x8b1   : > { %8059 = vst.msk [vmem:[%s12574_s17 + $0x90] sm:$0xff] %vm8040_vm6, %v7981_v28 }
 0x8b2   : > { %v7844_v37 = vadd.f32 %v7843_v2, %v7755_v11 }
 0x8b4   : > { %v7878_v3 = vmax.f32 %v7844_v37, 0.0 }
 0x8b6   : > { %7910 = vst.msk [vmem:[%s12473_s28 + $0xf0] sm:$0xff] %vm1394_vm4, %v7878_v3  ;;  %8004 = vrot.lane.b32.xlu2 %v7878_v3, %s8801_s30 }
 0x8b7   : > { %v7756_v39 = vpop.f32.mrf.mxu0 }
 0x8b8   : > { %v7757_v36 = vadd.f32 %v7756_v39, %v7668_v43  ;;  %v7977_v63 = vpop.permute.xlu0 %7976 }
 0x8b9   : > { %8057 = vst.msk [vmem:[%s12574_s17 + $0x80] sm:$0xff] %vm8040_vm6, %v7977_v63 }
 0x8ba   : > { %v7846_v30 = vadd.f32 %v7845_v12, %v7757_v36 }
 0x8bc   : > { %v7879_v13 = vmax.f32 %v7846_v30, 0.0 }
 0x8be   : > { %7911 = vst.msk [vmem:[%s12473_s28 + $0xf8] sm:$0xff] %vm1394_vm4, %v7879_v13  ;;  %8006 = vrot.lane.b32.xlu0 %v7879_v13, %s8801_s30 }
 0x8c0   : > { %v7979_v38 = vpop.permute.xlu1 %7978  ;;  %v5966_v60 = vpop.f32.mrf.mxu1 }
 0x8c1   : > { %8058 = vst.msk [vmem:[%s12574_s17 + $0x88] sm:$0xff] %vm8040_vm6, %v7979_v38 }
 0x8c8   : > { %v7987_v35 = vpop.permute.xlu2 %7986  ;;  %v5968_v32 = vpop.f32.mrf.mxu1 }
 0x8c9   : > { %8062 = vst.msk [vmem:[%s12574_s17 + $0xa8] sm:$0xff] %vm8040_vm6, %v7987_v35 }
 0x8d0   : > { %v7983_v17 = vpop.permute.xlu0 %7982 }
 0x8d1   : > { %8060 = vst.msk [vmem:[%s12574_s17 + $0x98] sm:$0xff] %vm8040_vm6, %v7983_v17 }
 0x8d8   : > { %v7985_v25 = vpop.permute.xlu1 %7984 }
 0x8d9   : > { %8061 = vst.msk [vmem:[%s12574_s17 + $0xa0] sm:$0xff] %vm8040_vm6, %v7985_v25 }
 0x8e0   : > { %v7993_v31 = vpop.permute.xlu2 %7992 }
 0x8e1   : > { %8065 = vst.msk [vmem:[%s12574_s17 + $0xc0] sm:$0xff] %vm8040_vm6, %v7993_v31 }
 0x8e8   : > { %v7989_v50 = vpop.permute.xlu0 %7988 }
 0x8e9   : > { %8063 = vst.msk [vmem:[%s12574_s17 + $0xb0] sm:$0xff] %vm8040_vm6, %v7989_v50 }
 0x8f0   : > { %v7991_v16 = vpop.permute.xlu1 %7990 }
 0x8f1   : > { %8064 = vst.msk [vmem:[%s12574_s17 + $0xb8] sm:$0xff] %vm8040_vm6, %v7991_v16 }
 0x8f8   : > { %v7999_v5 = vpop.permute.xlu2 %7998 }
 0x8f9   : > { %8068 = vst.msk [vmem:[%s12574_s17 + $0xd8] sm:$0xff] %vm8040_vm6, %v7999_v5 }
 0x900   : > { %v7995_v34 = vpop.permute.xlu0 %7994 }
 0x901   : > { %8066 = vst.msk [vmem:[%s12574_s17 + $0xc8] sm:$0xff] %vm8040_vm6, %v7995_v34 }
 0x908   : > { %v7997_v24 = vpop.permute.xlu1 %7996 }
 0x909   : > { %8067 = vst.msk [vmem:[%s12574_s17 + $0xd0] sm:$0xff] %vm8040_vm6, %v7997_v24 }
 0x910   : > { %v8005_v20 = vpop.permute.xlu2 %8004 }
 0x911   : > { %8071 = vst.msk [vmem:[%s12574_s17 + $0xf0] sm:$0xff] %vm8040_vm6, %v8005_v20 }
 0x918   : > { %v8001_v44 = vpop.permute.xlu0 %8000 }
 0x919   : > { %8069 = vst.msk [vmem:[%s12574_s17 + $0xe0] sm:$0xff] %vm8040_vm6, %v8001_v44 }
 0x920   : > { %v8003_v41 = vpop.permute.xlu1 %8002 }
 0x921   : > { %8070 = vst.msk [vmem:[%s12574_s17 + $0xe8] sm:$0xff] %vm8040_vm6, %v8003_v41 }
 0x930   : > { %v8007_v21 = vpop.permute.xlu0 %8006 }
 0x931   : > { %8072 = vst.msk [vmem:[%s12574_s17 + $0xf8] sm:$0xff] %vm8040_vm6, %v8007_v21 }
 0x932 PF: > { %s21_s15 = sadd.s32 1, %s8786_s15   ;;  %s13025_s13 = smov %s8782_s14 }
 0x933   : > { %p18_p5 = scmp.ge.s32.totalorder %s21_s15, 4   ;;  %s13026_s14 = smov %s13028_s16 }
 0x935   :  { %20 = sbr.rel (!%p18_p5) target bundleno = 2 (0x2), region = 99 }

</bundles_post_ra>
